<compile_context>
chip_gen: v7x
topology: tpu7x:2x2x1
jax: 0.10.0
libtpu: 0.0.40
codegen_flags: <defaults>
</compile_context>

<pallas_src>
import numpy as np

import jax
import jax.numpy as jnp
from jax.experimental import pallas as pl
from jax.experimental.pallas import tpu as pltpu

# ---- config (stand-in for cfg.GAN.*) -----------------------------------------
DF_DIM = 4          # cfg.GAN.DF_DIM (small demo size)
CODE_DIM = 8        # ef_dim / code_dim
B_CONDITION = True  # cfg.GAN.B_CONDITION
BN_EPS = 1e-5
LRELU_SLOPE = 0.2
IMG_SIZE = 32       # NET32: 32 -> 16 -> 8 -> 4

_WEIGHT_KEYS = ("m0", "m1", "b1", "m2", "b2", "m3", "b3",
                "wc", "mjx", "bj", "wlu", "blu")


# ==============================================================================
# Pallas kernel: whole D_THETA3_NET32 forward, one sample per grid step.
# ==============================================================================
def _fused_forward_kernel(v0_ref, c_ref, m0_ref, m1_ref, b1_ref, m2_ref,
                          b2_ref, m3_ref, b3_ref, wc_ref, mjx_ref, bj_ref,
                          wlu_ref, blu_ref, out_ref):
    def lrelu(y):
        return jnp.maximum(y, LRELU_SLOPE * y)

    def mm(a, w_ref):   # bf16 x bf16 GEMM with f32 accumulation on the MXU
        return jnp.dot(a.astype(jnp.bfloat16), w_ref[...],
                       preferred_element_type=jnp.float32)

    # encode_image_by_4times: conv(3->ndf,4,2,1)+lrelu ; conv(ndf->2ndf)+BN+lrelu
    h = lrelu(mm(v0_ref[...], m0_ref))                        # (1, ndf*16*16)
    h = lrelu(mm(h, m1_ref) + b1_ref[...])                    # (1, 2ndf*8*8)
    # img_code_s8: downBlock(2ndf -> 4ndf)
    h = lrelu(mm(h, m2_ref) + b2_ref[...])                    # (1, 4ndf*4*4)
    # img_code_s8_1: Block3x3_leakRelu(4ndf -> 2ndf)  -> x_code (flat c,y,x)
    x_code = lrelu(mm(h, m3_ref) + b3_ref[...])               # (1, 2ndf*4*4)
    # jointConv on cat(c_code, x_code): c_code half pre-folded to (efg, 2ndf*16)
    hc = lrelu(mm(c_ref[...], wc_ref) + mm(x_code, mjx_ref) + bj_ref[...])
    # logits / uncond_logits: 4x4 stride-4 conv on a 4x4 map == flat weighted
    # sum over (c, y, x); both emitted as one (1, 2) block, then sigmoid.
    lc = jnp.sum(hc * wlu_ref[0:1, :], axis=-1, keepdims=True)        # (1, 1)
    lu = jnp.sum(x_code * wlu_ref[1:2, :], axis=-1, keepdims=True)    # (1, 1)
    col = jax.lax.broadcasted_iota(jnp.int32, (1, 2), 1)
    out_ref[...] = jax.nn.sigmoid(jnp.where(col == 0, lc, lu) + blu_ref[...])


def d_theta3_net32_forward(prep, x_nchw, c_code):
    n = x_nchw.shape[0]
    v0 = x_nchw.reshape(n, 1, -1).astype(jnp.bfloat16)        # (N, 1, 3*H*W)
    cc = c_code.reshape(n, 1, -1).astype(jnp.float32)         # (N, 1, efg)
    weights = [prep[k] for k in _WEIGHT_KEYS]

    def row_spec(width):   # per-sample row block; leading batch dim squeezed
        return pl.BlockSpec((None, 1, width), lambda i: (i, 0, 0))

    out = pl.pallas_call(
        _fused_forward_kernel,
        out_shape=jax.ShapeDtypeStruct((n, 1, 2), jnp.float32),
        grid=(n,),
        in_specs=[row_spec(v0.shape[2]), row_spec(cc.shape[2])]
                + [pl.BlockSpec(w.shape, lambda i: (0, 0)) for w in weights],
        out_specs=row_spec(2),
        compiler_params=pltpu.CompilerParams(
            dimension_semantics=("parallel",),          # v7x: 2 TCs share batch
            vmem_limit_bytes=32 * 1024 * 1024),
    )(v0, cc, *weights)
    out = out.reshape(n, 2)
    return [out[:, 0], out[:, 1]]


# ==============================================================================
# init-time weight re-layout: conv -> dense matrix, BN folded (eval mode)
# ==============================================================================
def _conv_to_matrix(w_oihw, in_hw, stride, pad):
    """Dense matrix M with flat_out[(co,oy,ox)] = flat_in[(ci,y,x)] @ M.
    Pure weight re-layout of a small conv (zero-padding encoded in M)."""
    w = np.asarray(w_oihw, np.float32)
    cout, cin, kh, kw = w.shape
    h, wd = in_hw
    ho = (h + 2 * pad - kh) // stride + 1
    wo = (wd + 2 * pad - kw) // stride + 1
    m = np.zeros((cin, h, wd, cout, ho, wo), np.float32)
    for ki in range(kh):
        for kj in range(kw):
            wt = w[:, :, ki, kj].T                       # (cin, cout)
            for oy in range(ho):
                y = stride * oy + ki - pad
                if y < 0 or y >= h:
                    continue
                for ox in range(wo):
                    x = stride * ox + kj - pad
                    if x < 0 or x >= wd:
                        continue
                    m[:, y, x, :, oy, ox] += wt
    return m.reshape(cin * h * wd, cout * ho * wo)


def _conv_w(key, cout, cin, k):
    return 0.05 * jax.random.normal(key, (cout, cin, k, k), jnp.float32)


def _bn_fold(key, c):
    k1, k2, k3, k4 = jax.random.split(key, 4)
    gamma = 1.0 + 0.1 * jax.random.normal(k1, (c,), jnp.float32)
    beta = 0.1 * jax.random.normal(k2, (c,), jnp.float32)
    mean = 0.1 * jax.random.normal(k3, (c,), jnp.float32)
    var = 1.0 + 0.1 * jax.random.uniform(k4, (c,), jnp.float32)
    scale = gamma / jnp.sqrt(var + BN_EPS)
    bias = beta - mean * scale
    return scale, bias


def init_params(key):
    ndf, efg = DF_DIM, CODE_DIM
    ks = jax.random.split(key, 13)
    p = {}
    p["s4_0"] = dict(w=_conv_w(ks[0], ndf, 3, 4))                       # no BN
    s, b = _bn_fold(ks[2], ndf * 2)
    p["s4_1"] = dict(w=_conv_w(ks[1], ndf * 2, ndf, 4), scale=s, bias=b)
    s, b = _bn_fold(ks[4], ndf * 4)
    p["s8"] = dict(w=_conv_w(ks[3], ndf * 4, ndf * 2, 4), scale=s, bias=b)
    s, b = _bn_fold(ks[6], ndf * 2)
    p["s8_1"] = dict(w=_conv_w(ks[5], ndf * 2, ndf * 4, 3), scale=s, bias=b)
    s, b = _bn_fold(ks[8], ndf * 2)
    p["joint"] = dict(w=_conv_w(ks[7], ndf * 2, ndf * 2 + efg, 3), scale=s, bias=b)
    p["logits"] = dict(w=_conv_w(ks[9], 1, ndf * 2, 4),
                       bias=0.05 * jax.random.normal(ks[10], (1,), jnp.float32))
    p["uncond_logits"] = dict(w=_conv_w(ks[11], 1, ndf * 2, 4),
                              bias=0.05 * jax.random.normal(ks[12], (1,),
                                                            jnp.float32))
    return p


def prepare_params(params):
    """One-time weight re-layout (numpy): conv -> dense operator, BN folded."""
    ndf, efg = DF_DIM, CODE_DIM

    def folded_w(q):
        w = np.asarray(q["w"], np.float32)
        if "scale" in q:
            w = w * np.asarray(q["scale"], np.float32)[:, None, None, None]
        return w

    def bias_flat(q, hw):                     # per-channel bias over spatial
        return np.repeat(np.asarray(q["bias"], np.float32), hw)[None, :]

    m0 = _conv_to_matrix(folded_w(params["s4_0"]), (32, 32), 2, 1)   # (3072,1024)
    m1 = _conv_to_matrix(folded_w(params["s4_1"]), (16, 16), 2, 1)   # (1024, 512)
    b1 = bias_flat(params["s4_1"], 8 * 8)
    m2 = _conv_to_matrix(folded_w(params["s8"]), (8, 8), 2, 1)       # (512, 256)
    b2 = bias_flat(params["s8"], 4 * 4)
    m3 = _conv_to_matrix(folded_w(params["s8_1"]), (4, 4), 1, 1)     # (256, 128)
    b3 = bias_flat(params["s8_1"], 4 * 4)

    mj = _conv_to_matrix(folded_w(params["joint"]), (4, 4), 1, 1)
    # concat order is (c_code, x_code): first efg*16 rows are the c_code half.
    wc = mj[:efg * 16].reshape(efg, 16, -1).sum(axis=1)              # (efg, 128)
    mjx = mj[efg * 16:]                                              # (128, 128)
    bj = bias_flat(params["joint"], 4 * 4)

    wl = np.asarray(params["logits"]["w"], np.float32).reshape(1, -1)
    wu = np.asarray(params["uncond_logits"]["w"], np.float32).reshape(1, -1)
    wlu = np.concatenate([wl, wu], axis=0)                           # (2, 128)
    blu = np.concatenate([np.asarray(params["logits"]["bias"], np.float32),
                          np.asarray(params["uncond_logits"]["bias"],
                                     np.float32)])[None, :]          # (1, 2)

    def bf16(a):
        return jnp.asarray(a, jnp.bfloat16)

    def f32(a):
        return jnp.asarray(a, jnp.float32)

    return dict(m0=bf16(m0), m1=bf16(m1), b1=f32(b1), m2=bf16(m2), b2=f32(b2),
                m3=bf16(m3), b3=f32(b3), wc=bf16(wc), mjx=bf16(mjx), bj=f32(bj),
                wlu=f32(wlu), blu=f32(blu))


# ==============================================================================
# pure-JAX reference (test harness only, not part of the kernel path)
# ==============================================================================
def _reference_forward(params, x, c_code):
    def conv(h, q, stride, pad):
        w = q["w"]
        if "scale" in q:
            w = w * q["scale"][:, None, None, None]
        y = jax.lax.conv_general_dilated(
            h, w, (stride, stride), ((pad, pad), (pad, pad)),
            dimension_numbers=("NCHW", "OIHW", "NCHW"))
        if "bias" in q:
            y = y + q["bias"][None, :, None, None]
        return y

    def lrelu(y):
        return jnp.maximum(y, LRELU_SLOPE * y)

    h = lrelu(conv(x, params["s4_0"], 2, 1))
    h = lrelu(conv(h, params["s4_1"], 2, 1))
    h = lrelu(conv(h, params["s8"], 2, 1))
    x_code = lrelu(conv(h, params["s8_1"], 1, 1))
    n, efg = c_code.shape
    cmap = jnp.broadcast_to(c_code[:, :, None, None], (n, efg, 4, 4))
    hc = lrelu(conv(jnp.concatenate([cmap, x_code], axis=1), params["joint"], 1, 1))
    lc = conv(hc, params["logits"], 4, 0)
    lu = conv(x_code, params["uncond_logits"], 4, 0)
    return jax.nn.sigmoid(lc).reshape(-1), jax.nn.sigmoid(lu).reshape(-1)


# ==============================================================================
if __name__ == "__main__":
    root = jax.random.PRNGKey(0)
    kp, kx, kc = jax.random.split(root, 3)
    params = init_params(kp)
    prep = prepare_params(params)

    # NET32 takes 32x32 inputs: 32 -> 16 -> 8 -> 4 (then 4x4/s4 logits)
    x = jax.random.normal(kx, (2, 3, IMG_SIZE, IMG_SIZE), jnp.float32)  # NCHW
    c_code = jax.random.normal(kc, (2, CODE_DIM), jnp.float32)

    fwd = jax.jit(d_theta3_net32_forward)
    out_c, out_u = fwd(prep, x, c_code)
    jax.block_until_ready(out_c)
    jax.block_until_ready(out_u)

    assert out_c.shape == (2,) and out_u.shape == (2,)
    assert bool(jnp.all(jnp.isfinite(out_c)) and jnp.all(jnp.isfinite(out_u)))
    assert bool(jnp.all((out_c >= 0) & (out_c <= 1)))
    assert bool(jnp.all((out_u >= 0) & (out_u <= 1)))

    # correctness vs pure-JAX reference (bf16 weights/activations -> loose atol)
    ref_c, ref_u = _reference_forward(params, x, c_code)
    np.testing.assert_allclose(np.asarray(out_c), np.asarray(ref_c),
                               atol=3e-2, rtol=0)
    np.testing.assert_allclose(np.asarray(out_u), np.asarray(ref_u),
                               atol=3e-2, rtol=0)
    print("KERNEL_OK")
</pallas_src>

<mosaic_0001>
module attributes {stable_mosaic.version = 11 : i64} {
  func.func @_fused_forward_kernel(%arg0: i32, %arg1: memref<1x1x3072xbf16, #tpu.memory_space<vmem>>, %arg2: memref<1x1x8xf32, #tpu.memory_space<vmem>>, %arg3: memref<3072x1024xbf16, #tpu.memory_space<vmem>>, %arg4: memref<1024x512xbf16, #tpu.memory_space<vmem>>, %arg5: memref<1x512xf32, #tpu.memory_space<vmem>>, %arg6: memref<512x256xbf16, #tpu.memory_space<vmem>>, %arg7: memref<1x256xf32, #tpu.memory_space<vmem>>, %arg8: memref<256x128xbf16, #tpu.memory_space<vmem>>, %arg9: memref<1x128xf32, #tpu.memory_space<vmem>>, %arg10: memref<8x128xbf16, #tpu.memory_space<vmem>>, %arg11: memref<128x128xbf16, #tpu.memory_space<vmem>>, %arg12: memref<1x128xf32, #tpu.memory_space<vmem>>, %arg13: memref<2x128xf32, #tpu.memory_space<vmem>>, %arg14: memref<1x2xf32, #tpu.memory_space<vmem>>, %arg15: memref<1x1x2xf32, #tpu.memory_space<vmem>>) attributes {dimension_semantics = [#tpu.dimension_semantics<parallel>], iteration_bounds = array<i64: 2>, scalar_prefetch = 0 : i64, scratch_operands = 0 : i64, tpu.core_type = #tpu.core_type<tc>, window_params = [{transform_indices = @transform_0, window_bounds = array<i64: 1, 1, 3072>}, {transform_indices = @transform_1, window_bounds = array<i64: 1, 1, 8>}, {pipeline_mode = #tpu.pipeline_mode<synchronous>, transform_indices = @transform_2, window_bounds = array<i64: 3072, 1024>}, {pipeline_mode = #tpu.pipeline_mode<synchronous>, transform_indices = @transform_3, window_bounds = array<i64: 1024, 512>}, {pipeline_mode = #tpu.pipeline_mode<synchronous>, transform_indices = @transform_4, window_bounds = array<i64: 1, 512>}, {pipeline_mode = #tpu.pipeline_mode<synchronous>, transform_indices = @transform_5, window_bounds = array<i64: 512, 256>}, {pipeline_mode = #tpu.pipeline_mode<synchronous>, transform_indices = @transform_6, window_bounds = array<i64: 1, 256>}, {pipeline_mode = #tpu.pipeline_mode<synchronous>, transform_indices = @transform_7, window_bounds = array<i64: 256, 128>}, {pipeline_mode = #tpu.pipeline_mode<synchronous>, transform_indices = @transform_8, window_bounds = array<i64: 1, 128>}, {pipeline_mode = #tpu.pipeline_mode<synchronous>, transform_indices = @transform_9, window_bounds = array<i64: 8, 128>}, {pipeline_mode = #tpu.pipeline_mode<synchronous>, transform_indices = @transform_10, window_bounds = array<i64: 128, 128>}, {pipeline_mode = #tpu.pipeline_mode<synchronous>, transform_indices = @transform_11, window_bounds = array<i64: 1, 128>}, {pipeline_mode = #tpu.pipeline_mode<synchronous>, transform_indices = @transform_12, window_bounds = array<i64: 2, 128>}, {pipeline_mode = #tpu.pipeline_mode<synchronous>, transform_indices = @transform_13, window_bounds = array<i64: 1, 2>}, {transform_indices = @transform_14, window_bounds = array<i64: 1, 1, 2>}]} {
    %c0 = arith.constant 0 : index
    %c0_0 = arith.constant 0 : index
    %c0_1 = arith.constant 0 : index
    %0 = vector.load %arg1[%c0, %c0_0, %c0_1] : memref<1x1x3072xbf16, #tpu.memory_space<vmem>>, vector<1x1x3072xbf16>
    %1 = vector.shape_cast %0 : vector<1x1x3072xbf16> to vector<1x3072xbf16>
    %c0_2 = arith.constant 0 : index
    %c0_3 = arith.constant 0 : index
    %2 = vector.load %arg3[%c0_2, %c0_3] : memref<3072x1024xbf16, #tpu.memory_space<vmem>>, vector<3072x1024xbf16>
    %cst = arith.constant dense<0.000000e+00> : vector<1x1024xf32>
    %3 = tpu.matmul %1, %2, %cst {dimension_numbers = #tpu.dot_dimension_numbers<[1], [0], [0], [1], [0, 0, 1, 1], [], []>} : vector<1x3072xbf16>, vector<3072x1024xbf16>, vector<1x1024xf32> -> vector<1x1024xf32>
    %cst_4 = arith.constant 2.000000e-01 : f32
    %4 = vector.broadcast %cst_4 : f32 to vector<1x1024xf32>
    %5 = arith.mulf %4, %3 : vector<1x1024xf32>
    %6 = arith.maximumf %3, %5 : vector<1x1024xf32>
    %7 = arith.truncf %6 : vector<1x1024xf32> to vector<1x1024xbf16>
    %c0_5 = arith.constant 0 : index
    %c0_6 = arith.constant 0 : index
    %8 = vector.load %arg4[%c0_5, %c0_6] : memref<1024x512xbf16, #tpu.memory_space<vmem>>, vector<1024x512xbf16>
    %cst_7 = arith.constant dense<0.000000e+00> : vector<1x512xf32>
    %9 = tpu.matmul %7, %8, %cst_7 {dimension_numbers = #tpu.dot_dimension_numbers<[1], [0], [0], [1], [0, 0, 1, 1], [], []>} : vector<1x1024xbf16>, vector<1024x512xbf16>, vector<1x512xf32> -> vector<1x512xf32>
    %c0_8 = arith.constant 0 : index
    %c0_9 = arith.constant 0 : index
    %10 = vector.load %arg5[%c0_8, %c0_9] : memref<1x512xf32, #tpu.memory_space<vmem>>, vector<1x512xf32>
    %11 = arith.addf %9, %10 : vector<1x512xf32>
    %cst_10 = arith.constant 2.000000e-01 : f32
    %12 = vector.broadcast %cst_10 : f32 to vector<1x512xf32>
    %13 = arith.mulf %12, %11 : vector<1x512xf32>
    %14 = arith.maximumf %11, %13 : vector<1x512xf32>
    %15 = arith.truncf %14 : vector<1x512xf32> to vector<1x512xbf16>
    %c0_11 = arith.constant 0 : index
    %c0_12 = arith.constant 0 : index
    %16 = vector.load %arg6[%c0_11, %c0_12] : memref<512x256xbf16, #tpu.memory_space<vmem>>, vector<512x256xbf16>
    %cst_13 = arith.constant dense<0.000000e+00> : vector<1x256xf32>
    %17 = tpu.matmul %15, %16, %cst_13 {dimension_numbers = #tpu.dot_dimension_numbers<[1], [0], [0], [1], [0, 0, 1, 1], [], []>} : vector<1x512xbf16>, vector<512x256xbf16>, vector<1x256xf32> -> vector<1x256xf32>
    %c0_14 = arith.constant 0 : index
    %c0_15 = arith.constant 0 : index
    %18 = vector.load %arg7[%c0_14, %c0_15] : memref<1x256xf32, #tpu.memory_space<vmem>>, vector<1x256xf32>
    %19 = arith.addf %17, %18 : vector<1x256xf32>
    %cst_16 = arith.constant 2.000000e-01 : f32
    %20 = vector.broadcast %cst_16 : f32 to vector<1x256xf32>
    %21 = arith.mulf %20, %19 : vector<1x256xf32>
    %22 = arith.maximumf %19, %21 : vector<1x256xf32>
    %23 = arith.truncf %22 : vector<1x256xf32> to vector<1x256xbf16>
    %c0_17 = arith.constant 0 : index
    %c0_18 = arith.constant 0 : index
    %24 = vector.load %arg8[%c0_17, %c0_18] : memref<256x128xbf16, #tpu.memory_space<vmem>>, vector<256x128xbf16>
    %cst_19 = arith.constant dense<0.000000e+00> : vector<1x128xf32>
    %25 = tpu.matmul %23, %24, %cst_19 {dimension_numbers = #tpu.dot_dimension_numbers<[1], [0], [0], [1], [0, 0, 1, 1], [], []>} : vector<1x256xbf16>, vector<256x128xbf16>, vector<1x128xf32> -> vector<1x128xf32>
    %c0_20 = arith.constant 0 : index
    %c0_21 = arith.constant 0 : index
    %26 = vector.load %arg9[%c0_20, %c0_21] : memref<1x128xf32, #tpu.memory_space<vmem>>, vector<1x128xf32>
    %27 = arith.addf %25, %26 : vector<1x128xf32>
    %cst_22 = arith.constant 2.000000e-01 : f32
    %28 = vector.broadcast %cst_22 : f32 to vector<1x128xf32>
    %29 = arith.mulf %28, %27 : vector<1x128xf32>
    %30 = arith.maximumf %27, %29 : vector<1x128xf32>
    %c0_23 = arith.constant 0 : index
    %c0_24 = arith.constant 0 : index
    %c0_25 = arith.constant 0 : index
    %31 = vector.load %arg2[%c0_23, %c0_24, %c0_25] : memref<1x1x8xf32, #tpu.memory_space<vmem>>, vector<1x1x8xf32>
    %32 = vector.shape_cast %31 : vector<1x1x8xf32> to vector<1x8xf32>
    %33 = arith.truncf %32 : vector<1x8xf32> to vector<1x8xbf16>
    %c0_26 = arith.constant 0 : index
    %c0_27 = arith.constant 0 : index
    %34 = vector.load %arg10[%c0_26, %c0_27] : memref<8x128xbf16, #tpu.memory_space<vmem>>, vector<8x128xbf16>
    %cst_28 = arith.constant dense<0.000000e+00> : vector<1x128xf32>
    %35 = tpu.matmul %33, %34, %cst_28 {dimension_numbers = #tpu.dot_dimension_numbers<[1], [0], [0], [1], [0, 0, 1, 1], [], []>} : vector<1x8xbf16>, vector<8x128xbf16>, vector<1x128xf32> -> vector<1x128xf32>
    %36 = arith.truncf %30 : vector<1x128xf32> to vector<1x128xbf16>
    %c0_29 = arith.constant 0 : index
    %c0_30 = arith.constant 0 : index
    %37 = vector.load %arg11[%c0_29, %c0_30] : memref<128x128xbf16, #tpu.memory_space<vmem>>, vector<128x128xbf16>
    %cst_31 = arith.constant dense<0.000000e+00> : vector<1x128xf32>
    %38 = tpu.matmul %36, %37, %cst_31 {dimension_numbers = #tpu.dot_dimension_numbers<[1], [0], [0], [1], [0, 0, 1, 1], [], []>} : vector<1x128xbf16>, vector<128x128xbf16>, vector<1x128xf32> -> vector<1x128xf32>
    %39 = arith.addf %35, %38 : vector<1x128xf32>
    %c0_32 = arith.constant 0 : index
    %c0_33 = arith.constant 0 : index
    %40 = vector.load %arg12[%c0_32, %c0_33] : memref<1x128xf32, #tpu.memory_space<vmem>>, vector<1x128xf32>
    %41 = arith.addf %39, %40 : vector<1x128xf32>
    %cst_34 = arith.constant 2.000000e-01 : f32
    %42 = vector.broadcast %cst_34 : f32 to vector<1x128xf32>
    %43 = arith.mulf %42, %41 : vector<1x128xf32>
    %44 = arith.maximumf %41, %43 : vector<1x128xf32>
    %c0_35 = arith.constant 0 : index
    %c0_36 = arith.constant 0 : index
    %45 = vector.load %arg13[%c0_35, %c0_36] : memref<2x128xf32, #tpu.memory_space<vmem>>, vector<1x128xf32>
    %46 = arith.mulf %44, %45 : vector<1x128xf32>
    %cst_37 = arith.constant dense<0.000000e+00> : vector<1xf32>
    %47 = vector.multi_reduction <add>, %46, %cst_37 [1] : vector<1x128xf32> to vector<1xf32>
    %48 = vector.shape_cast %47 : vector<1xf32> to vector<1x1xf32>
    %c1 = arith.constant 1 : index
    %c0_38 = arith.constant 0 : index
    %49 = vector.load %arg13[%c1, %c0_38] : memref<2x128xf32, #tpu.memory_space<vmem>>, vector<1x128xf32>
    %50 = arith.mulf %30, %49 : vector<1x128xf32>
    %cst_39 = arith.constant dense<0.000000e+00> : vector<1xf32>
    %51 = vector.multi_reduction <add>, %50, %cst_39 [1] : vector<1x128xf32> to vector<1xf32>
    %52 = vector.shape_cast %51 : vector<1xf32> to vector<1x1xf32>
    %53 = tpu.iota {dimensions = array<i32: 1>} : vector<1x2xi32>
    %c0_i32 = arith.constant 0 : i32
    %54 = vector.broadcast %c0_i32 : i32 to vector<1x2xi32>
    %55 = arith.cmpi eq, %53, %54 : vector<1x2xi32>
    %56 = vector.shape_cast %48 : vector<1x1xf32> to vector<1x1xf32>
    %57 = vector.broadcast %56 : vector<1x1xf32> to vector<1x2xf32>
    %58 = vector.shape_cast %52 : vector<1x1xf32> to vector<1x1xf32>
    %59 = vector.broadcast %58 : vector<1x1xf32> to vector<1x2xf32>
    %60 = arith.select %55, %57, %59 : vector<1x2xi1>, vector<1x2xf32>
    %c0_40 = arith.constant 0 : index
    %c0_41 = arith.constant 0 : index
    %61 = vector.load %arg14[%c0_40, %c0_41] : memref<1x2xf32, #tpu.memory_space<vmem>>, vector<1x2xf32>
    %62 = arith.addf %60, %61 : vector<1x2xf32>
    %63 = arith.negf %62 : vector<1x2xf32>
    %64 = math.exp %63 : vector<1x2xf32>
    %cst_42 = arith.constant 1.000000e+00 : f32
    %65 = vector.broadcast %cst_42 : f32 to vector<1x2xf32>
    %66 = arith.addf %65, %64 : vector<1x2xf32>
    %67 = arith.divf %65, %66 : vector<1x2xf32>
    %c0_43 = arith.constant 0 : index
    %c0_44 = arith.constant 0 : index
    %c0_45 = arith.constant 0 : index
    %68 = vector.load %arg15[%c0_43, %c0_44, %c0_45] : memref<1x1x2xf32, #tpu.memory_space<vmem>>, vector<1x1x2xf32>
    %69 = vector.shape_cast %68 : vector<1x1x2xf32> to vector<1x2xf32>
    %70 = vector.shape_cast %67 : vector<1x2xf32> to vector<1x1x2xf32>
    tpu.vector_store %arg15[%c0_43, %c0_44, %c0_45], %70 {strides = array<i32>} : memref<1x1x2xf32, #tpu.memory_space<vmem>>, vector<1x1x2xf32>,
    return
  }
  func.func @transform_0(%arg0: i32) -> (i32, i32, i32) {
    %c0_i32 = arith.constant 0 : i32
    %c0_i32_0 = arith.constant 0 : i32
    %c0_i32_1 = arith.constant 0 : i32
    return %arg0, %c0_i32, %c0_i32_0 : i32, i32, i32
  }
  func.func @transform_1(%arg0: i32) -> (i32, i32, i32) {
    %c0_i32 = arith.constant 0 : i32
    %c0_i32_0 = arith.constant 0 : i32
    %c0_i32_1 = arith.constant 0 : i32
    return %arg0, %c0_i32, %c0_i32_0 : i32, i32, i32
  }
  func.func @transform_2(%arg0: i32) -> (i32, i32) {
    %c0_i32 = arith.constant 0 : i32
    %c0_i32_0 = arith.constant 0 : i32
    %c0_i32_1 = arith.constant 0 : i32
    return %c0_i32, %c0_i32_0 : i32, i32
  }
  func.func @transform_3(%arg0: i32) -> (i32, i32) {
    %c0_i32 = arith.constant 0 : i32
    %c0_i32_0 = arith.constant 0 : i32
    %c0_i32_1 = arith.constant 0 : i32
    return %c0_i32, %c0_i32_0 : i32, i32
  }
  func.func @transform_4(%arg0: i32) -> (i32, i32) {
    %c0_i32 = arith.constant 0 : i32
    %c0_i32_0 = arith.constant 0 : i32
    %c0_i32_1 = arith.constant 0 : i32
    return %c0_i32, %c0_i32_0 : i32, i32
  }
  func.func @transform_5(%arg0: i32) -> (i32, i32) {
    %c0_i32 = arith.constant 0 : i32
    %c0_i32_0 = arith.constant 0 : i32
    %c0_i32_1 = arith.constant 0 : i32
    return %c0_i32, %c0_i32_0 : i32, i32
  }
  func.func @transform_6(%arg0: i32) -> (i32, i32) {
    %c0_i32 = arith.constant 0 : i32
    %c0_i32_0 = arith.constant 0 : i32
    %c0_i32_1 = arith.constant 0 : i32
    return %c0_i32, %c0_i32_0 : i32, i32
  }
  func.func @transform_7(%arg0: i32) -> (i32, i32) {
    %c0_i32 = arith.constant 0 : i32
    %c0_i32_0 = arith.constant 0 : i32
    %c0_i32_1 = arith.constant 0 : i32
    return %c0_i32, %c0_i32_0 : i32, i32
  }
  func.func @transform_8(%arg0: i32) -> (i32, i32) {
    %c0_i32 = arith.constant 0 : i32
    %c0_i32_0 = arith.constant 0 : i32
    %c0_i32_1 = arith.constant 0 : i32
    return %c0_i32, %c0_i32_0 : i32, i32
  }
  func.func @transform_9(%arg0: i32) -> (i32, i32) {
    %c0_i32 = arith.constant 0 : i32
    %c0_i32_0 = arith.constant 0 : i32
    %c0_i32_1 = arith.constant 0 : i32
    return %c0_i32, %c0_i32_0 : i32, i32
  }
  func.func @transform_10(%arg0: i32) -> (i32, i32) {
    %c0_i32 = arith.constant 0 : i32
    %c0_i32_0 = arith.constant 0 : i32
    %c0_i32_1 = arith.constant 0 : i32
    return %c0_i32, %c0_i32_0 : i32, i32
  }
  func.func @transform_11(%arg0: i32) -> (i32, i32) {
    %c0_i32 = arith.constant 0 : i32
    %c0_i32_0 = arith.constant 0 : i32
    %c0_i32_1 = arith.constant 0 : i32
    return %c0_i32, %c0_i32_0 : i32, i32
  }
  func.func @transform_12(%arg0: i32) -> (i32, i32) {
    %c0_i32 = arith.constant 0 : i32
    %c0_i32_0 = arith.constant 0 : i32
    %c0_i32_1 = arith.constant 0 : i32
    return %c0_i32, %c0_i32_0 : i32, i32
  }
  func.func @transform_13(%arg0: i32) -> (i32, i32) {
    %c0_i32 = arith.constant 0 : i32
    %c0_i32_0 = arith.constant 0 : i32
    %c0_i32_1 = arith.constant 0 : i32
    return %c0_i32, %c0_i32_0 : i32, i32
  }
  func.func @transform_14(%arg0: i32) -> (i32, i32, i32) {
    %c0_i32 = arith.constant 0 : i32
    %c0_i32_0 = arith.constant 0 : i32
    %c0_i32_1 = arith.constant 0 : i32
    return %arg0, %c0_i32, %c0_i32_0 : i32, i32, i32
  }
}

</mosaic_0001>

<bundles_post_ra>
// kernel: d_theta3_net32_forward.1
= control target key start
LH: loop header
LB: loop body
LE: loop exit
PB: predicated region body
PF: predicated region fallthrough
CT: control target
= control target key end

     0   :  { %s19064_s0 = inlined_call_operand.vmem [shape: bf16[2,1,3072], index: 0, kind: input, shape index: {}]   ;;  %s19065_s1 = inlined_call_operand.hbm [shape: f32[2,1,8], index: 1, kind: input, shape index: {}]   ;;  %s19066_s2 = inlined_call_operand.hbm [shape: bf16[3072,1024], index: 2, kind: input, shape index: {}]   ;;  %s19067_s3 = inlined_call_operand.hbm [shape: bf16[1024,512], index: 3, kind: input, shape index: {}]   ;;  %s19068_s4 = inlined_call_operand.hbm [shape: f32[1,512], index: 4, kind: input, shape index: {}]   ;;  %s19069_s5 = inlined_call_operand.hbm [shape: bf16[512,256], index: 5, kind: input, shape index: {}]   ;;  %s19070_s6 = inlined_call_operand.hbm [shape: f32[1,256], index: 6, kind: input, shape index: {}]   ;;  %s19071_s7 = inlined_call_operand.hbm [shape: bf16[256,128], index: 7, kind: input, shape index: {}]   ;;  %s19072_s8 = inlined_call_operand.hbm [shape: f32[1,128], index: 8, kind: input, shape index: {}]   ;;  %s19073_s9 = inlined_call_operand.hbm [shape: bf16[8,128], index: 9, kind: input, shape index: {}]   ;;  %s19074_s10 = inlined_call_operand.hbm [shape: bf16[128,128], index: 10, kind: input, shape index: {}]   ;;  %s19075_s11 = inlined_call_operand.hbm [shape: f32[1,128], index: 11, kind: input, shape index: {}]   ;;  %s19076_s12 = inlined_call_operand.hbm [shape: f32[2,128], index: 12, kind: input, shape index: {}]   ;;  %s19077_s13 = inlined_call_operand.hbm [shape: f32[1,2], index: 13, kind: input, shape index: {}]   ;;  %s19078_s14 = inlined_call_operand.vmem [shape: f32[2,1,2], index: 14, kind: output, shape index: {}]  }
   0x1   :  { %19087 = sst [smem:[#allocation32_spill]] %s19064_s0 }
   0x2   :  { %19088 = sst [smem:[#allocation33_spill]] %s19065_s1 }
   0x3   :  { %19089 = sst [smem:[#allocation34_spill]] %s19078_s14 }
   0x4   :  { %19 = vsyncpa [#allocation3], 0 }
   0x5   :  { %21 = vsyncpa [#allocation3 + $0x1], 0 }
   0x6   :  { %22 = vsyncpa [#allocation5], 0 }
   0x7   :  { %23 = vsyncpa [#allocation8], 0 }
   0x8   :  { %24 = vsyncpa [#allocation11], 0 }
   0x9   :  { %25 = vsyncpa [#allocation14], 0 }
   0xa   :  { %26 = vsyncpa [#allocation17], 0 }
   0xb   :  { %27 = vsyncpa [#allocation20], 0  ;;  %s18351_s29 = smov 0   ;;  %s18353_s30 = smov 0  }
   0xc   :  { %s18355_s15 = smov 0   ;;  %s18357_s16 = smov 0  }
   0xd LB: > { %19090 = sst [smem:[#allocation29_spill]] %s18238_s29  ;;  %s18252_s17 = smov [#allocation4]   ;;  %s18250_s16 = sphi %s18357_s16, %s19124_s16   ;;  %s18246_s15 = sphi %s18355_s15, %s19123_s15   ;;  %s18242_s30 = sphi %s18353_s30, %s19122_s30   ;;  %s18238_s29 = sphi %s18351_s29, %s19121_s29  }
   0xe   : > { %s380_s18 = sshll.u32 %s18252_s17, 4  ;;  %s18372_s19 = sadd.s32 4294967295, %s18250_s16   ;;  %s18377_s18 = int_to_ptr.vmem [resolvable:$true] %s380_s18 }
   0xf   : > { %19091 = sst [smem:[#allocation30_spill]] %s18372_s19  ;;  %p14962_p0 = scmp.ge.s32.totalorder %s18250_s16, 1 }
  0x10   : > { %p19083_p1 = scmp.eq.s32.totalorder %s18372_s19, 0  ;;  %p368_p2 = scmp.lt.s32.totalorder %s18250_s16, 3 }
  0x11   : > { %s18253_s21 = smov [#allocation7]   ;;  %s18254_s24 = smov [#allocation10]  }
  0x12   : > { %p18379_p3 = pnand %p14962_p0, %p368_p2  ;;  %s407_s22 = sshll.u32 %s18253_s21, 4  ;;  %s18391_s22 = int_to_ptr.vmem [resolvable:$true] %s407_s22 }
  0x13   : > { %s431_s25 = sshll.u32 %s18254_s24, 4  ;;  %s17826_s28 = scalar_lea.hbm %s19066_s2, 196608  ;;  %s18393_s25 = int_to_ptr.vmem [resolvable:$true] %s431_s25 }
  0x14   : > { %s19092_s20 = scalar_select %p18379_p3, 1, 0 }
  0x15   : > { %p17194_p4 = pneg %p18379_p3  ;;  %p17827_p6 = scmp.ne.s32.totalorder %s19066_s2, %s17826_s28 }
  0x16   : > { %19093 = sst [smem:[#allocation31_spill]] %s19092_s20  ;;  %p17833_p10 = scmp.lt.u32.totalorder %s17826_s28, %s19066_s2 }
  0x17   : > { %p18387_p5 = pnand %p17194_p4, %p19083_p1 }
  0x19   : > { %p18403_p7 = pneg %p18387_p5 }
  0x1b   : > { %p17829_p8 = pnand %p18403_p7, %p17827_p6 }
  0x1d   : > { %p17830_p9 = pneg %p17829_p8 }
  0x1f   : > { %p17835_p11 = pnand %p17833_p10, %p17830_p9 }
  0x21   : > { %17838 = shalt.err (!%p17835_p11)
}
  0x22   : > { %s17839_s14 = scalar_lea.vmem %s18377_s18, 196608  ;;  %p17847_p2 = scmp.lt.s32.totalorder %s18377_s18, %s18377_s18 }
  0x23   : > { %p17840_p12 = scmp.ne.s32.totalorder %s18377_s18, %s17839_s14  ;;  %p17848_p4 = scmp.lt.s32.totalorder %s17839_s14, %s17839_s14 }
  0x25   : > { %p17842_p13 = pnand %p17840_p12, %p18403_p7  ;;  %p17849_p6 = por %p17848_p4, %p17847_p2 }
  0x27   : > { %p17843_p0 = pneg %p17842_p13 }
  0x29   : > { %p17850_p8 = pnand %p17849_p6, %p17843_p0 }
  0x2b   : > { %17853 = shalt.err (!%p17850_p8)
}
  0x2c   : > { %s18255_s26 = smov 512   ;;  %s18256_s0 = smov 32  }
  0x2d   : > { %17197 = dma.hbm_to_vmem [thread:$0]  (!%p18387_p5), %s19066_s2, 196608, %s18377_s18, [#allocation5], %s18255_s26, %s18255_s26, %s18256_s0  }
  0x2e   : > { %s17854_s20 = scalar_lea.hbm %s19068_s4, 64 }
  0x2f   : > { %p17855_p9 = scmp.ne.s32.totalorder %s19068_s4, %s17854_s20  ;;  %p17861_p12 = scmp.lt.u32.totalorder %s17854_s20, %s19068_s4 }
  0x31   : > { %p17857_p10 = pnand %p17855_p9, %p18403_p7 }
  0x33   : > { %p17858_p11 = pneg %p17857_p10 }
  0x35   : > { %p17863_p13 = pnand %p17861_p12, %p17858_p11 }
  0x37   : > { %17866 = shalt.err (!%p17863_p13)
}
  0x38   : > { %s17867_s18 = scalar_lea.vmem %s18391_s22, 64  ;;  %p17875_p6 = scmp.lt.s32.totalorder %s18391_s22, %s18391_s22 }
  0x39   : > { %p17868_p0 = scmp.ne.s32.totalorder %s18391_s22, %s17867_s18  ;;  %p17876_p8 = scmp.lt.s32.totalorder %s17867_s18, %s17867_s18 }
  0x3b   : > { %p17870_p2 = pnand %p17868_p0, %p18403_p7  ;;  %p17877_p9 = por %p17876_p8, %p17875_p6 }
  0x3d   : > { %p17871_p4 = pneg %p17870_p2 }
  0x3f   : > { %p17878_p10 = pnand %p17877_p9, %p17871_p4 }
  0x41   : > { %17881 = shalt.err (!%p17878_p10)
}
  0x42   : > { %17203 = dma.hbm_to_vmem [thread:$0]  (!%p18387_p5), %s19068_s4, 64, %s18391_s22, [#allocation8]  }
  0x43   : > { %s17882_s26 = scalar_lea.hbm %s19070_s6, 32 }
  0x44   : > { %p17883_p11 = scmp.ne.s32.totalorder %s19070_s6, %s17882_s26  ;;  %p17889_p0 = scmp.lt.u32.totalorder %s17882_s26, %s19070_s6 }
  0x46   : > { %p17885_p12 = pnand %p17883_p11, %p18403_p7 }
  0x48   : > { %p17886_p13 = pneg %p17885_p12 }
  0x4a   : > { %p17891_p2 = pnand %p17889_p0, %p17886_p13 }
  0x4c   : > { %17894 = shalt.err (!%p17891_p2)
}
  0x4d   : > { %s17895_s22 = scalar_lea.vmem %s18393_s25, 32  ;;  %p17903_p9 = scmp.lt.s32.totalorder %s18393_s25, %s18393_s25 }
  0x4e   : > { %p17896_p4 = scmp.ne.s32.totalorder %s18393_s25, %s17895_s22  ;;  %p17904_p10 = scmp.lt.s32.totalorder %s17895_s22, %s17895_s22 }
  0x50   : > { %p17898_p6 = pnand %p17896_p4, %p18403_p7  ;;  %p17905_p11 = por %p17904_p10, %p17903_p9 }
  0x52   : > { %p17899_p8 = pneg %p17898_p6 }
  0x54   : > { %p17906_p12 = pnand %p17905_p11, %p17899_p8 }
  0x56   : > { %17909 = shalt.err (!%p17906_p12)
}
  0x57   : > { %17209 = dma.hbm_to_vmem [thread:$0]  (!%p18387_p5), %s19070_s6, 32, %s18393_s25, [#allocation11]  }
  0x58   : > { %s18257_s18 = smov [#allocation13]   ;;  %s17910_s20 = scalar_lea.hbm %s19072_s8, 16 }
  0x59   : > { %s455_s1 = sshll.u32 %s18257_s18, 4  ;;  %p17911_p13 = scmp.ne.s32.totalorder %s19072_s8, %s17910_s20  ;;  %s456_s1 = int_to_ptr.vmem [resolvable:$true] %s455_s1 }
  0x5a   : > { %p17917_p4 = scmp.lt.u32.totalorder %s17910_s20, %s19072_s8 }
  0x5b   : > { %p17913_p0 = pnand %p17911_p13, %p18403_p7 }
  0x5d   : > { %p17914_p2 = pneg %p17913_p0 }
  0x5f   : > { %p17919_p6 = pnand %p17917_p4, %p17914_p2 }
  0x61   : > { %17922 = shalt.err (!%p17919_p6)
}
  0x62   : > { %s17923_s25 = scalar_lea.vmem %s456_s1, 16  ;;  %s17930_s17 = scalar_lea.vmem %s456_s1, 32 }
  0x63   : > { %p17924_p8 = scmp.ne.s32.totalorder %s456_s1, %s17923_s25  ;;  %p17931_p11 = scmp.lt.s32.totalorder %s456_s1, %s456_s1 }
  0x64   : > { %p17932_p12 = scmp.lt.s32.totalorder %s17930_s17, %s17923_s25 }
  0x65   : > { %p17926_p9 = pnand %p17924_p8, %p18403_p7 }
  0x66   : > { %p17933_p1 = por %p17932_p12, %p17931_p11 }
  0x67   : > { %p17927_p10 = pneg %p17926_p9 }
  0x69   : > { %p17934_p3 = pnand %p17933_p1, %p17927_p10 }
  0x6b   : > { %17937 = shalt.err (!%p17934_p3)
}
  0x6c   : > { %17215 = dma.hbm_to_vmem [thread:$0]  (!%p18387_p5), %s19072_s8, 16, %s456_s1, [#allocation14]  }
  0x6d   : > { %s18258_s14 = smov [#allocation16]   ;;  %s18259_s29 = smov [#allocation19]  }
  0x6e   : > { %s476_s18 = sshll.u32 %s18258_s14, 4  ;;  %s501_s19 = sshll.u32 %s18259_s29, 4  ;;  %s477_s18 = int_to_ptr.vmem [resolvable:$true] %s476_s18  ;;  %s18488_s19 = int_to_ptr.vmem [resolvable:$true] %s501_s19 }
  0x6f   : > { %s17938_s0 = scalar_lea.hbm %s19074_s10, 1024 }
  0x70   : > { %p17939_p1 = scmp.ne.s32.totalorder %s19074_s10, %s17938_s0  ;;  %p17945_p0 = scmp.lt.u32.totalorder %s17938_s0, %s19074_s10 }
  0x72   : > { %p17941_p3 = pnand %p17939_p1, %p18403_p7 }
  0x74   : > { %p17942_p13 = pneg %p17941_p3 }
  0x76   : > { %p17947_p2 = pnand %p17945_p0, %p17942_p13 }
  0x78   : > { %17950 = shalt.err (!%p17947_p2)
}
  0x79   : > { %s17951_s17 = scalar_lea.vmem %s477_s18, 1024  ;;  %p17959_p9 = scmp.lt.s32.totalorder %s477_s18, %s477_s18 }
  0x7a   : > { %p17952_p4 = scmp.ne.s32.totalorder %s477_s18, %s17951_s17  ;;  %p17960_p10 = scmp.lt.s32.totalorder %s17951_s17, %s17951_s17 }
  0x7c   : > { %p17954_p6 = pnand %p17952_p4, %p18403_p7  ;;  %p17961_p11 = por %p17960_p10, %p17959_p9 }
  0x7e   : > { %p17955_p8 = pneg %p17954_p6 }
  0x80   : > { %p17962_p12 = pnand %p17961_p11, %p17955_p8 }
  0x82   : > { %17965 = shalt.err (!%p17962_p12)
}
  0x83   : > { %s19085_s22 = smov 64   ;;  %s19086_s24 = smov 4  }
  0x84   : > { %17221 = dma.hbm_to_vmem [thread:$0]  (!%p18387_p5), %s19074_s10, 1024, %s477_s18, [#allocation17], %s19085_s22, %s19085_s22, %s19086_s24  }
  0x85   : > { %s17966_s0 = scalar_lea.hbm %s19076_s12, 32 }
  0x86   : > { %p17967_p1 = scmp.ne.s32.totalorder %s19076_s12, %s17966_s0  ;;  %p17973_p0 = scmp.lt.u32.totalorder %s17966_s0, %s19076_s12 }
  0x88   : > { %p17969_p3 = pnand %p17967_p1, %p18403_p7 }
  0x8a   : > { %p17970_p13 = pneg %p17969_p3 }
  0x8c   : > { %p17975_p2 = pnand %p17973_p0, %p17970_p13 }
  0x8e   : > { %17978 = shalt.err (!%p17975_p2)
}
  0x8f   : > { %s17979_s18 = scalar_lea.vmem %s18488_s19, 32  ;;  %p17987_p9 = scmp.lt.s32.totalorder %s18488_s19, %s18488_s19 }
  0x90   : > { %p17980_p4 = scmp.ne.s32.totalorder %s18488_s19, %s17979_s18  ;;  %p17988_p10 = scmp.lt.s32.totalorder %s17979_s18, %s17979_s18 }
  0x92   : > { %p17982_p6 = pnand %p17980_p4, %p18403_p7  ;;  %p17989_p11 = por %p17988_p10, %p17987_p9 }
  0x94   : > { %p17983_p8 = pneg %p17982_p6 }
  0x96   : > { %p17990_p12 = pnand %p17989_p11, %p17983_p8 }
  0x98   : > { %17993 = shalt.err (!%p17990_p12)
}
  0x99   : > { %17227 = dma.hbm_to_vmem [thread:$0]  (!%p18387_p5), %s19076_s12, 32, %s18488_s19, [#allocation20]  }
  0x9a   : > { %s18262_s29 = smov [#allocation6]   ;;  %s17994_s27 = scalar_lea.hbm %s19067_s3, 32768 }
  0x9b   : > { %s393_s20 = sshll.u32 %s18262_s29, 4  ;;  %p17995_p1 = scmp.ne.s32.totalorder %s19067_s3, %s17994_s27  ;;  %s394_s20 = int_to_ptr.vmem [resolvable:$true] %s393_s20 }
  0x9c   : > { %p18001_p0 = scmp.lt.u32.totalorder %s17994_s27, %s19067_s3 }
  0x9d   : > { %p17997_p3 = pnand %p17995_p1, %p18403_p7 }
  0x9f   : > { %p17998_p13 = pneg %p17997_p3 }
  0xa1   : > { %p18003_p2 = pnand %p18001_p0, %p17998_p13 }
  0xa3   : > { %18006 = shalt.err (!%p18003_p2)
}
  0xa4   : > { %s18007_s19 = scalar_lea.vmem %s394_s20, 32768  ;;  %p18015_p9 = scmp.lt.s32.totalorder %s394_s20, %s394_s20 }
  0xa5   : > { %p18008_p4 = scmp.ne.s32.totalorder %s394_s20, %s18007_s19  ;;  %p18016_p10 = scmp.lt.s32.totalorder %s18007_s19, %s18007_s19 }
  0xa7   : > { %p18010_p6 = pnand %p18008_p4, %p18403_p7  ;;  %p18017_p11 = por %p18016_p10, %p18015_p9 }
  0xa9   : > { %p18011_p8 = pneg %p18010_p6 }
  0xab   : > { %p18018_p12 = pnand %p18017_p11, %p18011_p8 }
  0xad   : > { %18021 = shalt.err (!%p18018_p12)
}
  0xae   : > { %s18263_s17 = smov 256   ;;  %s18264_s14 = smov 16  }
  0xaf   : > { %17200 = dma.hbm_to_vmem [thread:$0]  (!%p18387_p5), %s19067_s3, 32768, %s394_s20, [#allocation5], %s18263_s17, %s18263_s17, %s18264_s14  }
  0xb0   : > { %s18265_s0 = smov [#allocation9]   ;;  %s18022_s1 = scalar_lea.hbm %s19069_s5, 8192 }
  0xb1   : > { %s417_s27 = sshll.u32 %s18265_s0, 4  ;;  %p18023_p1 = scmp.ne.s32.totalorder %s19069_s5, %s18022_s1  ;;  %s418_s27 = int_to_ptr.vmem [resolvable:$true] %s417_s27 }
  0xb2   : > { %p18029_p0 = scmp.lt.u32.totalorder %s18022_s1, %s19069_s5 }
  0xb3   : > { %p18025_p3 = pnand %p18023_p1, %p18403_p7 }
  0xb5   : > { %p18026_p13 = pneg %p18025_p3 }
  0xb7   : > { %p18031_p2 = pnand %p18029_p0, %p18026_p13 }
  0xb9   : > { %18034 = shalt.err (!%p18031_p2)
}
  0xba   : > { %s18035_s20 = scalar_lea.vmem %s418_s27, 8192  ;;  %p18043_p9 = scmp.lt.s32.totalorder %s418_s27, %s418_s27 }
  0xbb   : > { %p18036_p4 = scmp.ne.s32.totalorder %s418_s27, %s18035_s20  ;;  %p18044_p10 = scmp.lt.s32.totalorder %s18035_s20, %s18035_s20 }
  0xbd   : > { %p18038_p6 = pnand %p18036_p4, %p18403_p7  ;;  %p18045_p11 = por %p18044_p10, %p18043_p9 }
  0xbf   : > { %p18039_p8 = pneg %p18038_p6 }
  0xc1   : > { %p18046_p12 = pnand %p18045_p11, %p18039_p8 }
  0xc3   : > { %18049 = shalt.err (!%p18046_p12)
}
  0xc4   : > { %s18266_s17 = smov 128   ;;  %s18267_s14 = smov 8  }
  0xc5   : > { %17206 = dma.hbm_to_vmem [thread:$0]  (!%p18387_p5), %s19069_s5, 8192, %s418_s27, [#allocation8], %s18266_s17, %s18266_s17, %s18267_s14  }
  0xc6   : > { %s18268_s29 = smov [#allocation12]   ;;  %s18269_s0 = smov [#allocation15]  }
  0xc7   : > { %s441_s26 = sshll.u32 %s18268_s29, 4  ;;  %s466_s28 = sshll.u32 %s18269_s0, 4  ;;  %s442_s26 = int_to_ptr.vmem [resolvable:$true] %s441_s26  ;;  %s18570_s28 = int_to_ptr.vmem [resolvable:$true] %s466_s28 }
  0xc8   : > { %s18050_s18 = scalar_lea.hbm %s19071_s7, 2048 }
  0xc9   : > { %p18051_p1 = scmp.ne.s32.totalorder %s19071_s7, %s18050_s18  ;;  %p18057_p0 = scmp.lt.u32.totalorder %s18050_s18, %s19071_s7 }
  0xcb   : > { %p18053_p3 = pnand %p18051_p1, %p18403_p7 }
  0xcd   : > { %p18054_p13 = pneg %p18053_p3 }
  0xcf   : > { %p18059_p2 = pnand %p18057_p0, %p18054_p13 }
  0xd1   : > { %18062 = shalt.err (!%p18059_p2)
}
  0xd2   : > { %s18063_s17 = scalar_lea.vmem %s442_s26, 2048  ;;  %p18071_p9 = scmp.lt.s32.totalorder %s442_s26, %s442_s26 }
  0xd3   : > { %p18064_p4 = scmp.ne.s32.totalorder %s442_s26, %s18063_s17  ;;  %p18072_p10 = scmp.lt.s32.totalorder %s18063_s17, %s18063_s17 }
  0xd5   : > { %p18066_p6 = pnand %p18064_p4, %p18403_p7  ;;  %p18073_p11 = por %p18072_p10, %p18071_p9 }
  0xd7   : > { %p18067_p8 = pneg %p18066_p6 }
  0xd9   : > { %p18074_p12 = pnand %p18073_p11, %p18067_p8 }
  0xdb   : > { %18077 = shalt.err (!%p18074_p12)
}
  0xdc   : > { %s19096_s14 = smov 4   ;;  %s19097_s24 = smov 64  }
  0xdd   : > { %17212 = dma.hbm_to_vmem [thread:$0]  (!%p18387_p5), %s19071_s7, 2048, %s442_s26, [#allocation11], %s19097_s24, %s19097_s24, %s19096_s14  }
  0xde   : > { %s18078_s18 = scalar_lea.hbm %s19073_s9, 64 }
  0xdf   : > { %p18079_p1 = scmp.ne.s32.totalorder %s19073_s9, %s18078_s18  ;;  %p18085_p0 = scmp.lt.u32.totalorder %s18078_s18, %s19073_s9 }
  0xe1   : > { %p18081_p3 = pnand %p18079_p1, %p18403_p7 }
  0xe3   : > { %p18082_p13 = pneg %p18081_p3 }
  0xe5   : > { %p18087_p2 = pnand %p18085_p0, %p18082_p13 }
  0xe7   : > { %18090 = shalt.err (!%p18087_p2)
}
  0xe8   : > { %s18091_s26 = scalar_lea.vmem %s18570_s28, 64  ;;  %p18099_p9 = scmp.lt.s32.totalorder %s18570_s28, %s18570_s28 }
  0xe9   : > { %p18092_p4 = scmp.ne.s32.totalorder %s18570_s28, %s18091_s26  ;;  %p18100_p10 = scmp.lt.s32.totalorder %s18091_s26, %s18091_s26 }
  0xeb   : > { %p18094_p6 = pnand %p18092_p4, %p18403_p7  ;;  %p18101_p11 = por %p18100_p10, %p18099_p9 }
  0xed   : > { %p18095_p8 = pneg %p18094_p6 }
  0xef   : > { %p18102_p12 = pnand %p18101_p11, %p18095_p8 }
  0xf1   : > { %18105 = shalt.err (!%p18102_p12)
}
  0xf2   : > { %17218 = dma.hbm_to_vmem [thread:$0]  (!%p18387_p5), %s19073_s9, 64, %s18570_s28, [#allocation14]  }
  0xf3   : > { %s18270_s24 = smov [#allocation18]   ;;  %s18271_s0 = smov [#allocation21]  }
  0xf4   : > { %s490_s29 = sshll.u32 %s18270_s24, 4  ;;  %s512_s25 = sshll.u32 %s18271_s0, 4  ;;  %s491_s29 = int_to_ptr.vmem [resolvable:$true] %s490_s29  ;;  %s18616_s25 = int_to_ptr.vmem [resolvable:$true] %s512_s25 }
  0xf5   : > { %s18106_s19 = scalar_lea.hbm %s19075_s11, 16 }
  0xf6   : > { %p18107_p1 = scmp.ne.s32.totalorder %s19075_s11, %s18106_s19  ;;  %p18113_p0 = scmp.lt.u32.totalorder %s18106_s19, %s19075_s11 }
  0xf8   : > { %p18109_p3 = pnand %p18107_p1, %p18403_p7 }
  0xfa   : > { %p18110_p13 = pneg %p18109_p3 }
  0xfc   : > { %p18115_p2 = pnand %p18113_p0, %p18110_p13 }
  0xfe   : > { %18118 = shalt.err (!%p18115_p2)
}
  0xff   : > { %s18119_s26 = scalar_lea.vmem %s491_s29, 16  ;;  %s18126_s17 = scalar_lea.vmem %s491_s29, 32 }
 0x100   : > { %p18120_p4 = scmp.ne.s32.totalorder %s491_s29, %s18119_s26  ;;  %p18127_p9 = scmp.lt.s32.totalorder %s491_s29, %s491_s29 }
 0x101   : > { %p18128_p10 = scmp.lt.s32.totalorder %s18126_s17, %s18119_s26 }
 0x102   : > { %p18122_p6 = pnand %p18120_p4, %p18403_p7 }
 0x103   : > { %p18129_p11 = por %p18128_p10, %p18127_p9 }
 0x104   : > { %p18123_p8 = pneg %p18122_p6 }
 0x106   : > { %p18130_p12 = pnand %p18129_p11, %p18123_p8 }
 0x108   : > { %18133 = shalt.err (!%p18130_p12)
}
 0x109   : > { %17224 = dma.hbm_to_vmem [thread:$0]  (!%p18387_p5), %s19075_s11, 16, %s491_s29, [#allocation17]  }
 0x10a   : > { %s18134_s18 = scalar_lea.hbm %s19077_s13, 16 }
 0x10b   : > { %p18135_p1 = scmp.ne.s32.totalorder %s19077_s13, %s18134_s18  ;;  %p18141_p0 = scmp.lt.u32.totalorder %s18134_s18, %s19077_s13 }
 0x10d   : > { %p18137_p3 = pnand %p18135_p1, %p18403_p7 }
 0x10f   : > { %p18138_p13 = pneg %p18137_p3 }
 0x111   : > { %p18143_p2 = pnand %p18141_p0, %p18138_p13 }
 0x113   : > { %18146 = shalt.err (!%p18143_p2)
}
 0x114   : > { %s18147_s29 = scalar_lea.vmem %s18616_s25, 16  ;;  %s18154_s28 = scalar_lea.vmem %s18616_s25, 32 }
 0x115   : > { %p18148_p4 = scmp.ne.s32.totalorder %s18616_s25, %s18147_s29  ;;  %p18155_p9 = scmp.lt.s32.totalorder %s18616_s25, %s18616_s25 }
 0x116   : > { %p18156_p10 = scmp.lt.s32.totalorder %s18154_s28, %s18147_s29 }
 0x117   : > { %p18150_p6 = pnand %p18148_p4, %p18403_p7 }
 0x118   : > { %p18157_p11 = por %p18156_p10, %p18155_p9 }
 0x119   : > { %p18151_p8 = pneg %p18150_p6 }
 0x11b   : > { %p18158_p12 = pnand %p18157_p11, %p18151_p8 }
 0x11d   : > { %18161 = shalt.err (!%p18158_p12)
}
 0x11e   : > { %s19098_s21 = sld [smem:[#allocation29_spill]]  ;;  %s19099_s14 = sld [smem:[#allocation30_spill]] }
 0x11f   : > { %17230 = dma.hbm_to_vmem [thread:$0]  (!%p18387_p5), %s19077_s13, 16, %s18616_s25, [#allocation20]  }
 0x120   : > { %s18661_s24 = sadd.s32 1, %s18250_s16   ;;  %s66_s23 = sadd.s32 1, %s18246_s15 }
 0x121   : > { %s63_s0 = ssub.s32 %s18250_s16, %s18661_s24  ;;  %p73_p7 = scmp.ne.s32.totalorder %s18246_s15, %s18242_s30 }
 0x122   : > { %p64_p1 = scmp.eq.s32.totalorder %s63_s0, 0  ;;  %p74_p3 = scmp.eq.s32.totalorder %s18250_s16, 0 }
 0x123   : > { %p17247_p0 = scmp.lt.s32.totalorder %s18250_s16, 2  ;;  %s530_s19 = sand.u32 1, %s18246_s15  }
 0x124   : > { %p79_p13 = scmp.ne.s32.totalorder %s18242_s30, %s19098_s21  ;;  %p75_p2 = por %p74_p3, %p73_p7 }
 0x125   : > { %s18673_s1 = scalar_select %p64_p1, %s18246_s15, %s66_s23  }
 0x126   : > { %p19100_p4 = scmp.eq.s32.totalorder %s19099_s14, 0  ;;  %s14976_s25 = sshll.u32 %s18250_s16, 4 }
 0x127   : > { %s19102_s27 = sld [smem:[#allocation33_spill]]  ;;  %s533_s28 = scalar_lea.vmem [#allocation2], %s530_s19 }
 0x128   : > { %p18677_p6 = por %p19100_p4, %p79_p13  ;;  %s540_s26 = sshll.u32 %s533_s28, 4  ;;  %s18688_s26 = int_to_ptr.vmem [resolvable:$true] %s540_s26 }
 0x129   : > { %p18690_p5 = pnand %p17247_p0, %p75_p2  ;;  %s531_s16 = scalar_lea.sflag [#allocation3], %s530_s19 }
 0x12b   : > { %p18164_p9 = pneg %p18690_p5 }
 0x12d   : > { %s18686_s29 = scalar_lea.hbm %s19102_s27, %s14976_s25  ;;  %s18167_s0 = scalar_lea.hbm %s19102_s27, 32 }
 0x12e   : > { %s18162_s21 = scalar_lea.hbm %s18686_s29, 16  ;;  %p18168_p12 = scmp.lt.u32.totalorder %s18686_s29, %s19102_s27 }
 0x12f   : > { %p18163_p8 = scmp.ne.s32.totalorder %s18686_s29, %s18162_s21  ;;  %p18169_p7 = scmp.lt.u32.totalorder %s18167_s0, %s18162_s21 }
 0x130   : > { %p18171_p3 = scmp.lt.u32.totalorder %s18162_s21, %s18686_s29 }
 0x131   : > { %p18165_p10 = pnand %p18164_p9, %p18163_p8  ;;  %p18170_p1 = por %p18169_p7, %p18168_p12 }
 0x133   : > { %p18166_p11 = pneg %p18165_p10  ;;  %p18172_p13 = por %p18171_p3, %p18170_p1 }
 0x135   : > { %p18173_p0 = pnand %p18172_p13, %p18166_p11 }
 0x137   : > { %18176 = shalt.err (!%p18173_p0)
}
 0x138   : > { %s18177_s19 = scalar_lea.vmem %s18688_s26, 16  ;;  %s18272_s22 = smov [#allocation2]  }
 0x139   : > { %p18178_p2 = scmp.ne.s32.totalorder %s18688_s26, %s18177_s19  ;;  %s18182_s28 = sshll.u32 %s18272_s22, 4  ;;  %s18183_s28 = int_to_ptr.vmem [resolvable:$false] %s18182_s28 }
 0x13a   : > { %s18184_s14 = scalar_lea.vmem %s18183_s28, 32  ;;  %p18185_p10 = scmp.lt.s32.totalorder %s18688_s26, %s18183_s28 }
 0x13b   : > { %p18180_p4 = pnand %p18178_p2, %p18164_p9  ;;  %p18186_p12 = scmp.lt.s32.totalorder %s18184_s14, %s18177_s19 }
 0x13d   : > { %p18181_p8 = pneg %p18180_p4  ;;  %p18187_p7 = por %p18186_p12, %p18185_p10 }
 0x13f   : > { %p18188_p1 = pnand %p18187_p7, %p18181_p8 }
 0x141   : > { %18191 = shalt.err (!%p18188_p1)
}
 0x142   : > { %17234 = dma.hbm_to_vmem [thread:$0]  (!%p18690_p5), %s18686_s29, 16, %s18688_s26, %s531_s16  }
 0x143   : > { %s19104_s21 = sld [smem:[#allocation31_spill]] }
 0x149   : > { %p19105_p11 = scmp.ne.s32.totalorder %s19104_s21, 0 }
 0x14a   : > { %s551_s23 = sand.u32 (!%p19105_p11), 1, %s18242_s30  }
 0x14b   : > { %549 = sbr.rel (%p19105_p11) target bundleno = 3326 (0xcfe), region = 76  ;;  %s552_s0 = scalar_lea.sflag (!%p19105_p11), [#allocation3], %s551_s23 }
 0x14c   : > { %s18722_s25 = scalar_lea.vmem (!%p19105_p11), [#allocation2], %s551_s23 }
 0x152   : > { %18209 = dma.done.wait (%p18677_p6), %s552_s0, 16  }
 0x153   : > { %18211 = vsyncadd (%p18677_p6), %s552_s0, 4294967280  ;;  %s19106_s20 = sld [smem:[#allocation30_spill]] }
 0x159   : > { %p19107_p9 = scmp.eq.s32.totalorder %s19106_s20, 0 }
 0x15b   : > { %18213 = dma.done.wait (%p19107_p9), [#allocation5], 229376   ;;  %p19108_p3 = pmov %p19107_p9 }
 0x15d   : > { %18215 = vsyncadd (%p19108_p3), [#allocation5], 4294737920  ;;  %p19109_p5 = pmov %p19108_p3 }
 0x15e   : > { %p19110_p13 = pmov %p19108_p3 }
 0x15f   : > { %18217 = dma.done.wait (%p19109_p5), [#allocation8], 8256  }
 0x160   : > { %18219 = vsyncadd (%p19110_p13), [#allocation8], 4294959040  ;;  %p19111_p0 = pmov %p19108_p3 }
 0x162   : > { %18221 = dma.done.wait (%p19111_p0), [#allocation11], 2080   ;;  %p19112_p2 = pmov %p19111_p0 }
 0x163   : > { %p19113_p6 = pmov %p19111_p0 }
 0x164   : > { %18223 = vsyncadd (%p19112_p2), [#allocation11], 4294965216 }
 0x165   : > { %18225 = dma.done.wait (%p19113_p6), [#allocation14], 80   ;;  %p19114_p4 = pmov %p19111_p0 }
 0x166   : > { %p19115_p8 = pmov %p19111_p0 }
 0x167   : > { %18227 = vsyncadd (%p19114_p4), [#allocation14], 4294967216 }
 0x168   : > { %18229 = dma.done.wait (%p19115_p8), [#allocation17], 1040   ;;  %p19116_p10 = pmov %p19111_p0 }
 0x169   : > { %p19117_p12 = pmov %p19111_p0 }
 0x16a   : > { %18231 = vsyncadd (%p19116_p10), [#allocation17], 4294966256 }
 0x16b   : > { %18233 = dma.done.wait (%p19117_p12), [#allocation20], 48   ;;  %p19118_p7 = pmov %p19111_p0 }
 0x16c   : > { %v659_v0 = vld [vmem:[#allocation4] sm:$0xff]  ;;  %v660_v2 = vld [vmem:[#allocation4 + $0x8] sm:$0xff]  ;;  %p648_p1 = scmp.lt.s32.totalorder %s19106_s20, 1  ;;  %v18273_v32 = vmov 1966171168   ;;  %v2202_v34 = vlaneseq  ;;  %s19119_s17 = sld [smem:[#allocation32_spill]] }
 0x16d   : > { %18235 = vsyncadd (%p19118_p7), [#allocation20], 4294967248  ;;  %v663_v1 = vld [vmem:[#allocation4 + $0x20] sm:$0xff]  ;;  %v664_v4 = vld [vmem:[#allocation4 + $0x28] sm:$0xff]  ;;  %v2200_v33 = vunpack.c.l.s4 %v18273_v32  ;;  %vm18275_vm0 = vmmov 0   ;;  %vm14706_vm1 = vcmask 1043456  }
 0x16e   : > { %v14991_v3 = vcombine.high %v659_v0, %v663_v1  ;;  %v14990_v5 = vcombine.low %v659_v0, %v663_v1  ;;  %v667_v6 = vld [vmem:[#allocation4 + $0x40] sm:$0xff]  ;;  %v14993_v8 = vcombine.high %v660_v2, %v664_v4  ;;  %v14992_v9 = vcombine.low %v660_v2, %v664_v4  ;;  %v668_v11 = vld [vmem:[#allocation4 + $0x48] sm:$0xff]  ;;  %s19126_s20 = smov (!%p648_p1, %s19106_s20), 1  ;;  %s19120_s28 = sld [smem:[#allocation34_spill]] }
 0x16f   : > { %v671_v7 = vld [vmem:[#allocation4 + $0x60] sm:$0xff]  ;;  %v672_v12 = vld [vmem:[#allocation4 + $0x68] sm:$0xff]  ;;  %s17143_s18 = smul.u32 24, %s19126_s20  ;;  %v2201_v43 = vunpack.c.0.s8 %v2200_v33  ;;  %v18758_v44 = vshrl.u32 %v2202_v34, 7  ;;  %vm14702_vm2 = vcmask 64512   ;;  %vm14756_vm3 = vcmask 1040384  }
 0x170   : > { %v14999_v10 = vcombine.high %v667_v6, %v671_v7  ;;  %v675_v13 = vld [vmem:[#allocation4 + $0x80] sm:$0xff]  ;;  %10049 = vmatprep.subr.bf16.mxu0 %v14991_v3  ;;  %v15001_v14 = vcombine.high %v668_v11, %v672_v12  ;;  %v676_v16 = vld [vmem:[#allocation4 + $0x88] sm:$0xff]  ;;  %10541 = vmatprep.subr.bf16.mxu1 %v14993_v8  ;;  %v14998_v18 = vcombine.low %v667_v6, %v671_v7  ;;  %vm14777_vm5 = vcmask 8192  }
 0x171   : > { %v679_v15 = vld [vmem:[#allocation4 + $0xa0] sm:$0xff]  ;;  %v680_v17 = vld [vmem:[#allocation4 + $0xa8] sm:$0xff]  ;;  %10050 = vmatpush1.bf16.msra.mxu0 %v14990_v5  ;;  %10542 = vmatpush1.bf16.msra.mxu1 %v14992_v9  ;;  %v15000_v19 = vcombine.low %v668_v11, %v672_v12  ;;  %v18766_v53 = vsub.s32 %v2201_v43, %v18758_v44 }
 0x172   : > { %10051 = vmatprep.subr.bf16.mxu0 %v14999_v10  ;;  %v15007_v20 = vcombine.high %v675_v13, %v679_v15  ;;  %10543 = vmatprep.subr.bf16.mxu1 %v15001_v14  ;;  %v15009_v21 = vcombine.high %v676_v16, %v680_v17  ;;  %v683_v22 = vld [vmem:[#allocation4 + $0xc0] sm:$0xff]  ;;  %v684_v24 = vld [vmem:[#allocation4 + $0xc8] sm:$0xff]  ;;  %v15006_v26 = vcombine.low %v675_v13, %v679_v15  ;;  %s18763_s16 = scalar_lea.vmem %s19119_s17, %s17143_s18 }
 0x173   : > { %v687_v23 = vld [vmem:[#allocation4 + $0xe0] sm:$0xff]  ;;  %v688_v25 = vld [vmem:[#allocation4 + $0xe8] sm:$0xff]  ;;  %v15008_v27 = vcombine.low %v676_v16, %v680_v17 }
 0x174   : > { %v15015_v28 = vcombine.high %v683_v22, %v687_v23  ;;  %v15017_v29 = vcombine.high %v684_v24, %v688_v25  ;;  %v691_v30 = vld [vmem:[#allocation4 + $0x100] sm:$0xff]  ;;  %v692_v35 = vld [vmem:[#allocation4 + $0x108] sm:$0xff]  ;;  %v15014_v37 = vcombine.low %v683_v22, %v687_v23  ;;  %v15016_v38 = vcombine.low %v684_v24, %v688_v25  ;;  %s654_s14 = scalar_lea.vmem %s19120_s28, %s19126_s20 }
 0x175   : > { %10052 = vmatpush1.bf16.msra.mxu0 %v14998_v18  ;;  %10544 = vmatpush1.bf16.msra.mxu1 %v15000_v19  ;;  %v695_v31 = vld [vmem:[#allocation4 + $0x120] sm:$0xff]  ;;  %v696_v36 = vld [vmem:[#allocation4 + $0x128] sm:$0xff] }
 0x176   : > { %10053 = vmatprep.subr.bf16.mxu0 %v15007_v20  ;;  %10545 = vmatprep.subr.bf16.mxu1 %v15009_v21  ;;  %v15023_v39 = vcombine.high %v691_v30, %v695_v31  ;;  %v15025_v40 = vcombine.high %v692_v35, %v696_v36  ;;  %v699_v41 = vld [vmem:[#allocation4 + $0x140] sm:$0xff]  ;;  %v700_v45 = vld [vmem:[#allocation4 + $0x148] sm:$0xff]  ;;  %v15022_v47 = vcombine.low %v691_v30, %v695_v31 }
 0x177   : > { %v703_v42 = vld [vmem:[#allocation4 + $0x160] sm:$0xff]  ;;  %v704_v46 = vld [vmem:[#allocation4 + $0x168] sm:$0xff]  ;;  %v15024_v48 = vcombine.low %v692_v35, %v696_v36 }
 0x178   : > { %v15031_v49 = vcombine.high %v699_v41, %v703_v42  ;;  %v15033_v50 = vcombine.high %v700_v45, %v704_v46  ;;  %v707_v51 = vld [vmem:[#allocation4 + $0x180] sm:$0xff]  ;;  %v708_v54 = vld [vmem:[#allocation4 + $0x188] sm:$0xff]  ;;  %v15030_v56 = vcombine.low %v699_v41, %v703_v42  ;;  %v15032_v57 = vcombine.low %v700_v45, %v704_v46 }
 0x179   : > { %10054 = vmatpush1.bf16.msra.mxu0 %v15006_v26  ;;  %10546 = vmatpush1.bf16.msra.mxu1 %v15008_v27  ;;  %v711_v52 = vld [vmem:[#allocation4 + $0x1a0] sm:$0xff]  ;;  %v712_v55 = vld [vmem:[#allocation4 + $0x1a8] sm:$0xff] }
 0x17a   : > { %10055 = vmatprep.subr.bf16.mxu0 %v15015_v28  ;;  %10547 = vmatprep.subr.bf16.mxu1 %v15017_v29  ;;  %v15039_v58 = vcombine.high %v707_v51, %v711_v52  ;;  %v18769_v59 = vld [vmem:[%s18763_s16] sm:$0xff]  ;;  %v15041_v60 = vcombine.high %v708_v54, %v712_v55  ;;  %v716_v0 = vld [vmem:[#allocation4 + $0x1c8] sm:$0xff]  ;;  %v15038_v2 = vcombine.low %v707_v51, %v711_v52 }
 0x17b   : > { %v715_v61 = vld [vmem:[#allocation4 + $0x1c0] sm:$0xff]  ;;  %v18773_v63 = vrot.slane %v18769_v59, %v18766_v53  ;;  %v720_v1 = vld [vmem:[#allocation4 + $0x1e8] sm:$0xff]  ;;  %v15040_v4 = vcombine.low %v708_v54, %v712_v55 }
 0x17c   : > { %v719_v62 = vld [vmem:[#allocation4 + $0x1e0] sm:$0xff]  ;;  %v15049_v6 = vcombine.high %v716_v0, %v720_v1  ;;  %v724_v10 = vld [vmem:[#allocation4 + $0x208] sm:$0xff]  ;;  %v15048_v13 = vcombine.low %v716_v0, %v720_v1 }
 0x17d   : > { %10056 = vmatpush1.bf16.msra.mxu0 %v15014_v37  ;;  %10548 = vmatpush1.bf16.msra.mxu1 %v15016_v38  ;;  %v2213_v3 = vcombine.high %v18773_v63, %v18773_v63  ;;  %v15047_v5 = vcombine.high %v715_v61, %v719_v62  ;;  %v723_v7 = vld [vmem:[#allocation4 + $0x200] sm:$0xff]  ;;  %v728_v11 = vld [vmem:[#allocation4 + $0x228] sm:$0xff]  ;;  %v15046_v12 = vcombine.low %v715_v61, %v719_v62 }
 0x17e   : > { %10057 = vmatprep.subr.bf16.mxu0 %v15023_v39  ;;  %10549 = vmatprep.subr.bf16.mxu1 %v15025_v40  ;;  %v727_v8 = vld [vmem:[#allocation4 + $0x220] sm:$0xff]  ;;  %v15057_v15 = vcombine.high %v724_v10, %v728_v11  ;;  %v732_v18 = vld [vmem:[#allocation4 + $0x248] sm:$0xff]  ;;  %v15056_v21 = vcombine.low %v724_v10, %v728_v11 }
 0x17f   : > { %v18778_v9 = vrot.slane %v2213_v3, %v18766_v53  ;;  %v15055_v14 = vcombine.high %v723_v7, %v727_v8  ;;  %v731_v16 = vld [vmem:[#allocation4 + $0x240] sm:$0xff]  ;;  %v736_v19 = vld [vmem:[#allocation4 + $0x268] sm:$0xff]  ;;  %v15054_v20 = vcombine.low %v723_v7, %v727_v8 }
 0x180   : > { %v735_v17 = vld [vmem:[#allocation4 + $0x260] sm:$0xff]  ;;  %v15065_v23 = vcombine.high %v732_v18, %v736_v19  ;;  %v740_v26 = vld [vmem:[#allocation4 + $0x288] sm:$0xff]  ;;  %v15064_v29 = vcombine.low %v732_v18, %v736_v19 }
 0x181   : > { %10058 = vmatpush1.bf16.msra.mxu0 %v15022_v47  ;;  %10550 = vmatpush1.bf16.msra.mxu1 %v15024_v48  ;;  %v15063_v22 = vcombine.high %v731_v16, %v735_v17  ;;  %v739_v24 = vld [vmem:[#allocation4 + $0x280] sm:$0xff]  ;;  %v744_v27 = vld [vmem:[#allocation4 + $0x2a8] sm:$0xff]  ;;  %v15062_v28 = vcombine.low %v731_v16, %v735_v17 }
 0x182   : > { %10059 = vmatprep.subr.bf16.mxu0 %v15031_v49  ;;  %10551 = vmatprep.subr.bf16.mxu1 %v15033_v50  ;;  %v743_v25 = vld [vmem:[#allocation4 + $0x2a0] sm:$0xff]  ;;  %v15073_v31 = vcombine.high %v740_v26, %v744_v27  ;;  %v748_v35 = vld [vmem:[#allocation4 + $0x2c8] sm:$0xff]  ;;  %v15072_v38 = vcombine.low %v740_v26, %v744_v27 }
 0x183   : > { %10081 = vmatprep.mubr.bf16.mxu0 %v18778_v9  ;;  %10573 = vmatprep.mubr.bf16.mxu1 %v18778_v9  ;;  %v15071_v30 = vcombine.high %v739_v24, %v743_v25  ;;  %v747_v32 = vld [vmem:[#allocation4 + $0x2c0] sm:$0xff]  ;;  %v752_v36 = vld [vmem:[#allocation4 + $0x2e8] sm:$0xff]  ;;  %v15070_v37 = vcombine.low %v739_v24, %v743_v25  ;;  %v18784_v24 = vrot.slane %v18773_v63, %v18766_v53 }
 0x184   : > { %v751_v33 = vld [vmem:[#allocation4 + $0x2e0] sm:$0xff]  ;;  %v15081_v40 = vcombine.high %v748_v35, %v752_v36  ;;  %v756_v43 = vld [vmem:[#allocation4 + $0x308] sm:$0xff]  ;;  %v15080_v47 = vcombine.low %v748_v35, %v752_v36  ;;  %v18788_v36 = vcombine.high %v18778_v9, %v18778_v9 }
 0x185   : > { %10060 = vmatpush1.bf16.msra.mxu0 %v15030_v56  ;;  %10552 = vmatpush1.bf16.msra.mxu1 %v15032_v57  ;;  %v15079_v39 = vcombine.high %v747_v32, %v751_v33  ;;  %v755_v41 = vld [vmem:[#allocation4 + $0x300] sm:$0xff]  ;;  %v760_v45 = vld [vmem:[#allocation4 + $0x328] sm:$0xff]  ;;  %v15078_v46 = vcombine.low %v747_v32, %v751_v33 }
 0x186   : > { %10061 = vmatprep.subr.bf16.mxu0 %v15039_v58  ;;  %10553 = vmatprep.subr.bf16.mxu1 %v15041_v60  ;;  %v759_v42 = vld [vmem:[#allocation4 + $0x320] sm:$0xff]  ;;  %v15089_v49 = vcombine.high %v756_v43, %v760_v45  ;;  %v764_v52 = vld [vmem:[#allocation4 + $0x348] sm:$0xff]  ;;  %v15088_v56 = vcombine.low %v756_v43, %v760_v45 }
 0x187   : > { %v15087_v48 = vcombine.high %v755_v41, %v759_v42  ;;  %v763_v50 = vld [vmem:[#allocation4 + $0x340] sm:$0xff]  ;;  %v768_v54 = vld [vmem:[#allocation4 + $0x368] sm:$0xff]  ;;  %v15086_v55 = vcombine.low %v755_v41, %v759_v42 }
 0x188   : > { %v767_v51 = vld [vmem:[#allocation4 + $0x360] sm:$0xff]  ;;  %v15097_v58 = vcombine.high %v764_v52, %v768_v54  ;;  %v772_v62 = vld [vmem:[#allocation4 + $0x388] sm:$0xff] }
 0x189   : > { %10062 = vmatpush1.bf16.msra.mxu0 %v15038_v2  ;;  %10554 = vmatpush1.bf16.msra.mxu1 %v15040_v4  ;;  %v15095_v57 = vcombine.high %v763_v50, %v767_v51  ;;  %v771_v60 = vld [vmem:[#allocation4 + $0x380] sm:$0xff]  ;;  %v776_v0 = vld [vmem:[#allocation4 + $0x3a8] sm:$0xff]  ;;  %v15094_v1 = vcombine.low %v763_v50, %v767_v51  ;;  %v15096_v2 = vcombine.low %v764_v52, %v768_v54 }
 0x18a   : > { %10063 = vmatprep.subr.bf16.mxu0 %v15047_v5  ;;  %10555 = vmatprep.subr.bf16.mxu1 %v15049_v6  ;;  %v775_v61 = vld [vmem:[#allocation4 + $0x3a0] sm:$0xff]  ;;  %v15105_v4 = vcombine.high %v772_v62, %v776_v0  ;;  %v780_v7 = vld [vmem:[#allocation4 + $0x3c8] sm:$0xff]  ;;  %v15104_v11 = vcombine.low %v772_v62, %v776_v0 }
 0x18b   : > { %v15103_v3 = vcombine.high %v771_v60, %v775_v61  ;;  %v779_v5 = vld [vmem:[#allocation4 + $0x3c0] sm:$0xff]  ;;  %v784_v8 = vld [vmem:[#allocation4 + $0x3e8] sm:$0xff]  ;;  %v15102_v10 = vcombine.low %v771_v60, %v775_v61 }
 0x18c   : > { %v783_v6 = vld [vmem:[#allocation4 + $0x3e0] sm:$0xff]  ;;  %v788_v16 = vld [vmem:[#allocation4 + $0x408] sm:$0xff]  ;;  %v15112_v19 = vcombine.low %v780_v7, %v784_v8 }
 0x18d   : > { %10064 = vmatpush1.bf16.msra.mxu0 %v15046_v12  ;;  %10556 = vmatpush1.bf16.msra.mxu1 %v15048_v13  ;;  %v15111_v12 = vcombine.high %v779_v5, %v783_v6  ;;  %v15113_v13 = vcombine.high %v780_v7, %v784_v8  ;;  %v792_v17 = vld [vmem:[#allocation4 + $0x428] sm:$0xff]  ;;  %v15110_v18 = vcombine.low %v779_v5, %v783_v6 }
 0x18e   : > { %10065 = vmatprep.subr.bf16.mxu0 %v15055_v14  ;;  %10557 = vmatprep.subr.bf16.mxu1 %v15057_v15  ;;  %v787_v14 = vld [vmem:[#allocation4 + $0x400] sm:$0xff]  ;;  %v796_v25 = vld [vmem:[#allocation4 + $0x448] sm:$0xff] }
 0x18f   : > { %v791_v15 = vld [vmem:[#allocation4 + $0x420] sm:$0xff]  ;;  %v800_v26 = vld [vmem:[#allocation4 + $0x468] sm:$0xff] }
 0x190   : > { %v15118_v27 = vcombine.low %v787_v14, %v791_v15  ;;  %v804_v32 = vld [vmem:[#allocation4 + $0x488] sm:$0xff]  ;;  %v15129_v33 = vcombine.high %v796_v25, %v800_v26 }
 0x191   : > { %10066 = vmatpush1.bf16.msra.mxu0 %v15054_v20  ;;  %10558 = vmatpush1.bf16.msra.mxu1 %v15056_v21  ;;  %v15119_v20 = vcombine.high %v787_v14, %v791_v15  ;;  %v15121_v21 = vcombine.high %v788_v16, %v792_v17  ;;  %v808_v35 = vld [vmem:[#allocation4 + $0x4a8] sm:$0xff] }
 0x192   : > { %10067 = vmatprep.subr.bf16.mxu0 %v15063_v22  ;;  %10559 = vmatprep.subr.bf16.mxu1 %v15065_v23  ;;  %v795_v22 = vld [vmem:[#allocation4 + $0x440] sm:$0xff]  ;;  %v812_v41 = vld [vmem:[#allocation4 + $0x4c8] sm:$0xff]  ;;  %v15137_v42 = vcombine.high %v804_v32, %v808_v35 }
 0x193   : > { %v799_v23 = vld [vmem:[#allocation4 + $0x460] sm:$0xff]  ;;  %v816_v43 = vld [vmem:[#allocation4 + $0x4e8] sm:$0xff] }
 0x194   : > { %v15126_v63 = vcombine.low %v795_v22, %v799_v23  ;;  %v820_v50 = vld [vmem:[#allocation4 + $0x508] sm:$0xff]  ;;  %v15145_v51 = vcombine.high %v812_v41, %v816_v43 }
 0x195   : > { %10068 = vmatpush1.bf16.msra.mxu0 %v15062_v28  ;;  %10560 = vmatpush1.bf16.msra.mxu1 %v15064_v29  ;;  %v15120_v28 = vcombine.low %v788_v16, %v792_v17  ;;  %v15127_v29 = vcombine.high %v795_v22, %v799_v23  ;;  %v824_v52 = vld [vmem:[#allocation4 + $0x528] sm:$0xff] }
 0x196   : > { %10069 = vmatprep.subr.bf16.mxu0 %v15071_v30  ;;  %10561 = vmatprep.subr.bf16.mxu1 %v15073_v31  ;;  %v803_v30 = vld [vmem:[#allocation4 + $0x480] sm:$0xff]  ;;  %v828_v60 = vld [vmem:[#allocation4 + $0x548] sm:$0xff]  ;;  %v15153_v61 = vcombine.high %v820_v50, %v824_v52 }
 0x197   : > { %v807_v31 = vld [vmem:[#allocation4 + $0x4a0] sm:$0xff]  ;;  %v832_v62 = vld [vmem:[#allocation4 + $0x568] sm:$0xff] }
 0x198   : > { %v15134_v45 = vcombine.low %v803_v30, %v807_v31  ;;  %v836_v5 = vld [vmem:[#allocation4 + $0x588] sm:$0xff]  ;;  %v15161_v6 = vcombine.high %v828_v60, %v832_v62 }
 0x199   : > { %10070 = vmatpush1.bf16.msra.mxu0 %v15070_v37  ;;  %10562 = vmatpush1.bf16.msra.mxu1 %v15072_v38  ;;  %v15128_v37 = vcombine.low %v796_v25, %v800_v26  ;;  %v15135_v38 = vcombine.high %v803_v30, %v807_v31  ;;  %v840_v7 = vld [vmem:[#allocation4 + $0x5a8] sm:$0xff]  ;;  %v863_v30 = vld [vmem:[#allocation4 + $0x660] sm:$0xff] }
 0x19a   : > { %10071 = vmatprep.subr.bf16.mxu0 %v15079_v39  ;;  %10563 = vmatprep.subr.bf16.mxu1 %v15081_v40  ;;  %v811_v39 = vld [vmem:[#allocation4 + $0x4c0] sm:$0xff]  ;;  %v844_v14 = vld [vmem:[#allocation4 + $0x5c8] sm:$0xff]  ;;  %v15169_v15 = vcombine.high %v836_v5, %v840_v7 }
 0x19b   : > { %v815_v40 = vld [vmem:[#allocation4 + $0x4e0] sm:$0xff]  ;;  %v848_v16 = vld [vmem:[#allocation4 + $0x5e8] sm:$0xff] }
 0x19c   : > { %v15142_v54 = vcombine.low %v811_v39, %v815_v40  ;;  %v852_v22 = vld [vmem:[#allocation4 + $0x608] sm:$0xff]  ;;  %v15177_v23 = vcombine.high %v844_v14, %v848_v16 }
 0x19d   : > { %10072 = vmatpush1.bf16.msra.mxu0 %v15078_v46  ;;  %10564 = vmatpush1.bf16.msra.mxu1 %v15080_v47  ;;  %v15136_v46 = vcombine.low %v804_v32, %v808_v35  ;;  %v15143_v47 = vcombine.high %v811_v39, %v815_v40  ;;  %v856_v25 = vld [vmem:[#allocation4 + $0x628] sm:$0xff]  ;;  %v871_v39 = vld [vmem:[#allocation4 + $0x6a0] sm:$0xff] }
 0x19e   : > { %10073 = vmatprep.subr.bf16.mxu0 %v15087_v48  ;;  %10565 = vmatprep.subr.bf16.mxu1 %v15089_v49  ;;  %v819_v48 = vld [vmem:[#allocation4 + $0x500] sm:$0xff]  ;;  %v860_v31 = vld [vmem:[#allocation4 + $0x648] sm:$0xff]  ;;  %v15185_v32 = vcombine.high %v852_v22, %v856_v25 }
 0x19f   : > { %v823_v49 = vld [vmem:[#allocation4 + $0x520] sm:$0xff]  ;;  %v868_v40 = vld [vmem:[#allocation4 + $0x688] sm:$0xff] }
 0x1a0   : > { %v15150_v0 = vcombine.low %v819_v48, %v823_v49 }
 0x1a1   : > { %10074 = vmatpush1.bf16.msra.mxu0 %v15086_v55  ;;  %10566 = vmatpush1.bf16.msra.mxu1 %v15088_v56  ;;  %v15144_v55 = vcombine.low %v812_v41, %v816_v43  ;;  %v15151_v56 = vcombine.high %v819_v48, %v823_v49  ;;  %v879_v48 = vld [vmem:[#allocation4 + $0x6e0] sm:$0xff]  ;;  %v876_v49 = vld [vmem:[#allocation4 + $0x6c8] sm:$0xff] }
 0x1a2   : > { %10075 = vmatprep.subr.bf16.mxu0 %v15095_v57  ;;  %10567 = vmatprep.subr.bf16.mxu1 %v15097_v58  ;;  %v827_v57 = vld [vmem:[#allocation4 + $0x540] sm:$0xff] }
 0x1a3   : > { %v831_v58 = vld [vmem:[#allocation4 + $0x560] sm:$0xff] }
 0x1a4   : > { %v15158_v8 = vcombine.low %v827_v57, %v831_v58 }
 0x1a5   : > { %10076 = vmatpush1.bf16.msra.mxu0 %v15094_v1  ;;  %10568 = vmatpush1.bf16.msra.mxu1 %v15096_v2  ;;  %v15152_v1 = vcombine.low %v820_v50, %v824_v52  ;;  %v15159_v2 = vcombine.high %v827_v57, %v831_v58  ;;  %v887_v57 = vld [vmem:[#allocation4 + $0x720] sm:$0xff]  ;;  %v884_v58 = vld [vmem:[#allocation4 + $0x708] sm:$0xff] }
 0x1a6   : > { %10077 = vmatprep.subr.bf16.mxu0 %v15103_v3  ;;  %10569 = vmatprep.subr.bf16.mxu1 %v15105_v4  ;;  %v835_v3 = vld [vmem:[#allocation4 + $0x580] sm:$0xff] }
 0x1a7   : > { %v839_v4 = vld [vmem:[#allocation4 + $0x5a0] sm:$0xff] }
 0x1a8   : > { %v15166_v17 = vcombine.low %v835_v3, %v839_v4 }
 0x1a9   : > { %10078 = vmatpush1.bf16.msra.mxu0 %v15102_v10  ;;  %10570 = vmatpush1.bf16.msra.mxu1 %v15104_v11  ;;  %v15160_v10 = vcombine.low %v828_v60, %v832_v62  ;;  %v15167_v11 = vcombine.high %v835_v3, %v839_v4  ;;  %v895_v3 = vld [vmem:[#allocation4 + $0x760] sm:$0xff]  ;;  %v892_v4 = vld [vmem:[#allocation4 + $0x748] sm:$0xff] }
 0x1aa   : > { %10079 = vmatprep.subr.bf16.mxu0 %v15111_v12  ;;  %10571 = vmatprep.subr.bf16.mxu1 %v15113_v13  ;;  %v843_v12 = vld [vmem:[#allocation4 + $0x5c0] sm:$0xff] }
 0x1ab   : > { %v847_v13 = vld [vmem:[#allocation4 + $0x5e0] sm:$0xff] }
 0x1ac   : > { %v15174_v26 = vcombine.low %v843_v12, %v847_v13 }
 0x1ad   : > { %10080 = vmatpush1.bf16.msra.mxu0 %v15110_v18  ;;  %10572 = vmatpush1.bf16.msra.mxu1 %v15112_v19  ;;  %v15168_v18 = vcombine.low %v836_v5, %v840_v7  ;;  %v15175_v19 = vcombine.high %v843_v12, %v847_v13  ;;  %v903_v12 = vld [vmem:[#allocation4 + $0x7a0] sm:$0xff]  ;;  %v900_v13 = vld [vmem:[#allocation4 + $0x788] sm:$0xff] }
 0x1ae   : > { %10090 = vmatprep.subr.bf16.mxu0 %v15119_v20  ;;  %10582 = vmatprep.subr.bf16.mxu1 %v15121_v21  ;;  %v851_v20 = vld [vmem:[#allocation4 + $0x600] sm:$0xff] }
 0x1af   : > { %v855_v21 = vld [vmem:[#allocation4 + $0x620] sm:$0xff] }
 0x1b0   : > { %10082 = vmatmul.mubr.bf16.vlgmr.msra.gmra.mrb[0].mxu0 %v18784_v24  ;;  %10574 = vmatmul.mubr.bf16.vlgmr.msra.gmra.mrb[0].mxu1 %v18784_v24  ;;  %v15182_v35 = vcombine.low %v851_v20, %v855_v21 }
 0x1b1   : > { %10091 = vmatpush1.bf16.msra.mxu0 %v15118_v27  ;;  %10583 = vmatpush1.bf16.msra.mxu1 %v15120_v28  ;;  %v15176_v27 = vcombine.low %v844_v14, %v848_v16  ;;  %v15183_v28 = vcombine.high %v851_v20, %v855_v21  ;;  %v911_v20 = vld [vmem:[#allocation4 + $0x7e0] sm:$0xff]  ;;  %v908_v21 = vld [vmem:[#allocation4 + $0x7c8] sm:$0xff] }
 0x1b2   : > { %10092 = vmatprep.subr.bf16.mxu0 %v15127_v29  ;;  %10584 = vmatprep.subr.bf16.mxu1 %v15129_v33  ;;  %v859_v29 = vld [vmem:[#allocation4 + $0x640] sm:$0xff]  ;;  %v864_v33 = vld [vmem:[#allocation4 + $0x668] sm:$0xff] }
 0x1b3   : > { %10122 = vmatprep.mubr.bf16.mxu0 %v18788_v36  ;;  %10614 = vmatprep.mubr.bf16.mxu1 %v18788_v36  ;;  %v15193_v41 = vcombine.high %v860_v31, %v864_v33  ;;  %v15190_v43 = vcombine.low %v859_v29, %v863_v30 }
 0x1b5   : > { %10093 = vmatpush1.bf16.msra.mxu0 %v15126_v63  ;;  %10585 = vmatpush1.bf16.msra.mxu1 %v15128_v37  ;;  %v15184_v63 = vcombine.low %v852_v22, %v856_v25  ;;  %v15191_v37 = vcombine.high %v859_v29, %v863_v30  ;;  %v2198_v25 = vcombine.high %v18769_v59, %v18769_v59  ;;  %v915_v29 = vld [vmem:[#allocation4 + $0x800] sm:$0xff] }
 0x1b6   : > { %10094 = vmatprep.subr.bf16.mxu0 %v15135_v38  ;;  %10586 = vmatprep.subr.bf16.mxu1 %v15137_v42  ;;  %v867_v38 = vld [vmem:[#allocation4 + $0x680] sm:$0xff]  ;;  %v872_v42 = vld [vmem:[#allocation4 + $0x6a8] sm:$0xff] }
 0x1b7   : > { %v15201_v50 = vcombine.high %v868_v40, %v872_v42  ;;  %v15198_v52 = vcombine.low %v867_v38, %v871_v39  ;;  %v919_v30 = vld [vmem:[#allocation4 + $0x820] sm:$0xff] }
 0x1b9   : > { %10095 = vmatpush1.bf16.msra.mxu0 %v15134_v45  ;;  %10587 = vmatpush1.bf16.msra.mxu1 %v15136_v46  ;;  %v15192_v45 = vcombine.low %v860_v31, %v864_v33  ;;  %v15199_v46 = vcombine.high %v867_v38, %v871_v39  ;;  %v916_v31 = vld [vmem:[#allocation4 + $0x808] sm:$0xff]  ;;  %v923_v38 = vld [vmem:[#allocation4 + $0x840] sm:$0xff] }
 0x1ba   : > { %10096 = vmatprep.subr.bf16.mxu0 %v15143_v47  ;;  %10588 = vmatprep.subr.bf16.mxu1 %v15145_v51  ;;  %v875_v47 = vld [vmem:[#allocation4 + $0x6c0] sm:$0xff]  ;;  %v880_v51 = vld [vmem:[#allocation4 + $0x6e8] sm:$0xff] }
 0x1bb   : > { %v15209_v60 = vcombine.high %v876_v49, %v880_v51  ;;  %v15206_v62 = vcombine.low %v875_v47, %v879_v48  ;;  %v920_v33 = vld [vmem:[#allocation4 + $0x828] sm:$0xff]  ;;  %v927_v39 = vld [vmem:[#allocation4 + $0x860] sm:$0xff] }
 0x1bd   : > { %10097 = vmatpush1.bf16.msra.mxu0 %v15142_v54  ;;  %10589 = vmatpush1.bf16.msra.mxu1 %v15144_v55  ;;  %v15200_v54 = vcombine.low %v868_v40, %v872_v42  ;;  %v15207_v55 = vcombine.high %v875_v47, %v879_v48  ;;  %v924_v40 = vld [vmem:[#allocation4 + $0x848] sm:$0xff]  ;;  %v15248_v47 = vcombine.low %v916_v31, %v920_v33 }
 0x1be   : > { %10098 = vmatprep.subr.bf16.mxu0 %v15151_v56  ;;  %10590 = vmatprep.subr.bf16.mxu1 %v15153_v61  ;;  %v883_v56 = vld [vmem:[#allocation4 + $0x700] sm:$0xff]  ;;  %v888_v61 = vld [vmem:[#allocation4 + $0x728] sm:$0xff]  ;;  %v15255_v48 = vcombine.high %v923_v38, %v927_v39 }
 0x1bf   : > { %v15217_v5 = vcombine.high %v884_v58, %v888_v61  ;;  %v15214_v7 = vcombine.low %v883_v56, %v887_v57  ;;  %v928_v42 = vld [vmem:[#allocation4 + $0x868] sm:$0xff] }
 0x1c1   : > { %10099 = vmatpush1.bf16.msra.mxu0 %v15150_v0  ;;  %10591 = vmatpush1.bf16.msra.mxu1 %v15152_v1  ;;  %v15208_v0 = vcombine.low %v876_v49, %v880_v51  ;;  %v15215_v1 = vcombine.high %v883_v56, %v887_v57  ;;  %v931_v49 = vld [vmem:[#allocation4 + $0x880] sm:$0xff]  ;;  %v932_v51 = vld [vmem:[#allocation4 + $0x888] sm:$0xff]  ;;  %v15254_v56 = vcombine.low %v923_v38, %v927_v39 }
 0x1c2   : > { %10100 = vmatprep.subr.bf16.mxu0 %v15159_v2  ;;  %10592 = vmatprep.subr.bf16.mxu1 %v15161_v6  ;;  %v891_v2 = vld [vmem:[#allocation4 + $0x740] sm:$0xff]  ;;  %v896_v6 = vld [vmem:[#allocation4 + $0x768] sm:$0xff]  ;;  %v15256_v57 = vcombine.low %v924_v40, %v928_v42 }
 0x1c3   : > { %v15225_v14 = vcombine.high %v892_v4, %v896_v6  ;;  %v15222_v16 = vcombine.low %v891_v2, %v895_v3 }
 0x1c5   : > { %10101 = vmatpush1.bf16.msra.mxu0 %v15158_v8  ;;  %10593 = vmatpush1.bf16.msra.mxu1 %v15160_v10  ;;  %v15216_v8 = vcombine.low %v884_v58, %v888_v61  ;;  %v15223_v10 = vcombine.high %v891_v2, %v895_v3  ;;  %v943_v61 = vld [vmem:[#allocation4 + $0x8e0] sm:$0xff] }
 0x1c6   : > { %10102 = vmatprep.subr.bf16.mxu0 %v15167_v11  ;;  %10594 = vmatprep.subr.bf16.mxu1 %v15169_v15  ;;  %v899_v11 = vld [vmem:[#allocation4 + $0x780] sm:$0xff]  ;;  %v904_v15 = vld [vmem:[#allocation4 + $0x7a8] sm:$0xff] }
 0x1c7   : > { %v15233_v22 = vcombine.high %v900_v13, %v904_v15 }
 0x1c9   : > { %10103 = vmatpush1.bf16.msra.mxu0 %v15166_v17  ;;  %10595 = vmatpush1.bf16.msra.mxu1 %v15168_v18  ;;  %v15224_v17 = vcombine.low %v892_v4, %v896_v6  ;;  %v15231_v18 = vcombine.high %v899_v11, %v903_v12  ;;  %v951_v6 = vld [vmem:[#allocation4 + $0x920] sm:$0xff] }
 0x1ca   : > { %10104 = vmatprep.subr.bf16.mxu0 %v15175_v19  ;;  %10596 = vmatprep.subr.bf16.mxu1 %v15177_v23  ;;  %v907_v19 = vld [vmem:[#allocation4 + $0x7c0] sm:$0xff]  ;;  %v912_v23 = vld [vmem:[#allocation4 + $0x7e8] sm:$0xff] }
 0x1cb   : > { %v15240_v59 = vcombine.low %v908_v21, %v912_v23 }
 0x1cd   : > { %10105 = vmatpush1.bf16.msra.mxu0 %v15174_v26  ;;  %10597 = vmatpush1.bf16.msra.mxu1 %v15176_v27  ;;  %v15230_v26 = vcombine.low %v899_v11, %v903_v12  ;;  %v15232_v27 = vcombine.low %v900_v13, %v904_v15  ;;  %v959_v15 = vld [vmem:[#allocation4 + $0x960] sm:$0xff] }
 0x1ce   : > { %10106 = vmatprep.subr.bf16.mxu0 %v15183_v28  ;;  %10598 = vmatprep.subr.bf16.mxu1 %v15185_v32  ;;  %v15239_v28 = vcombine.high %v907_v19, %v911_v20  ;;  %v15241_v32 = vcombine.high %v908_v21, %v912_v23  ;;  %v967_v23 = vld [vmem:[#allocation4 + $0x9a0] sm:$0xff] }
 0x1d1   : > { %10107 = vmatpush1.bf16.msra.mxu0 %v15182_v35  ;;  %10599 = vmatpush1.bf16.msra.mxu1 %v15184_v63  ;;  %v18797_v35 = vrot.slane %v2198_v25, %v18766_v53  ;;  %v15238_v63 = vcombine.low %v907_v19, %v911_v20  ;;  %v964_v25 = vld [vmem:[#allocation4 + $0x988] sm:$0xff] }
 0x1d2   : > { %10108 = vmatprep.subr.bf16.mxu0 %v15191_v37  ;;  %10600 = vmatprep.subr.bf16.mxu1 %v15193_v41  ;;  %v15247_v37 = vcombine.high %v915_v29, %v919_v30  ;;  %v15249_v41 = vcombine.high %v916_v31, %v920_v33  ;;  %v971_v31 = vld [vmem:[#allocation4 + $0x9c0] sm:$0xff]  ;;  %v972_v33 = vld [vmem:[#allocation4 + $0x9c8] sm:$0xff] }
 0x1d5   : > { %10109 = vmatpush1.bf16.msra.mxu0 %v15190_v43  ;;  %10601 = vmatpush1.bf16.msra.mxu1 %v15192_v45  ;;  %v2214_v43 = vcombine.high %v18797_v35, %v18797_v35  ;;  %v18803_v45 = vcombine.high %v18784_v24, %v18784_v24 }
 0x1d6   : > { %10110 = vmatprep.subr.bf16.mxu0 %v15199_v46  ;;  %10602 = vmatprep.subr.bf16.mxu1 %v15201_v50  ;;  %v15246_v46 = vcombine.low %v915_v29, %v919_v30  ;;  %v935_v50 = vld [vmem:[#allocation4 + $0x8a0] sm:$0xff] }
 0x1d7   : > { %v15263_v58 = vcombine.high %v931_v49, %v935_v50  ;;  %v15262_v2 = vcombine.low %v931_v49, %v935_v50  ;;  %v987_v50 = vld [vmem:[#allocation4 + $0xa40] sm:$0xff] }
 0x1d9   : > { %10111 = vmatpush1.bf16.msra.mxu0 %v15198_v52  ;;  %10603 = vmatpush1.bf16.msra.mxu1 %v15200_v54  ;;  %v15257_v52 = vcombine.high %v924_v40, %v928_v42  ;;  %v936_v54 = vld [vmem:[#allocation4 + $0x8a8] sm:$0xff]  ;;  %v979_v40 = vld [vmem:[#allocation4 + $0xa00] sm:$0xff] }
 0x1da   : > { %10112 = vmatprep.subr.bf16.mxu0 %v15207_v55  ;;  %10604 = vmatprep.subr.bf16.mxu1 %v15209_v60  ;;  %v18806_v55 = vrot.slane %v2214_v43, %v18766_v53  ;;  %v939_v60 = vld [vmem:[#allocation4 + $0x8c0] sm:$0xff]  ;;  %v15264_v3 = vcombine.low %v932_v51, %v936_v54  ;;  %v980_v42 = vld [vmem:[#allocation4 + $0xa08] sm:$0xff] }
 0x1db   : > { %v15271_v4 = vcombine.high %v939_v60, %v943_v61  ;;  %v15270_v11 = vcombine.low %v939_v60, %v943_v61  ;;  %v995_v61 = vld [vmem:[#allocation4 + $0xa80] sm:$0xff] }
 0x1dd   : > { %10113 = vmatpush1.bf16.msra.mxu0 %v15206_v62  ;;  %10605 = vmatpush1.bf16.msra.mxu1 %v15208_v0  ;;  %v940_v62 = vld [vmem:[#allocation4 + $0x8c8] sm:$0xff]  ;;  %v15265_v0 = vcombine.high %v932_v51, %v936_v54  ;;  %v991_v51 = vld [vmem:[#allocation4 + $0xa60] sm:$0xff] }
 0x1de   : > { %10114 = vmatprep.subr.bf16.mxu0 %v15215_v1  ;;  %10606 = vmatprep.subr.bf16.mxu1 %v15217_v5  ;;  %v944_v1 = vld [vmem:[#allocation4 + $0x8e8] sm:$0xff]  ;;  %v947_v5 = vld [vmem:[#allocation4 + $0x900] sm:$0xff]  ;;  %v15319_v60 = vcombine.high %v987_v50, %v991_v51 }
 0x1df   : > { %v15272_v12 = vcombine.low %v940_v62, %v944_v1  ;;  %v15279_v13 = vcombine.high %v947_v5, %v951_v6  ;;  %v15278_v19 = vcombine.low %v947_v5, %v951_v6  ;;  %v1003_v6 = vld [vmem:[#allocation4 + $0xac0] sm:$0xff] }
 0x1e1   : > { %10115 = vmatpush1.bf16.msra.mxu0 %v15214_v7  ;;  %10607 = vmatpush1.bf16.msra.mxu1 %v15216_v8  ;;  %v948_v7 = vld [vmem:[#allocation4 + $0x908] sm:$0xff]  ;;  %v15273_v8 = vcombine.high %v940_v62, %v944_v1  ;;  %v999_v62 = vld [vmem:[#allocation4 + $0xaa0] sm:$0xff] }
 0x1e2   : > { %10116 = vmatprep.subr.bf16.mxu0 %v15223_v10  ;;  %10608 = vmatprep.subr.bf16.mxu1 %v15225_v14  ;;  %v952_v10 = vld [vmem:[#allocation4 + $0x928] sm:$0xff]  ;;  %v955_v14 = vld [vmem:[#allocation4 + $0x940] sm:$0xff]  ;;  %v15327_v5 = vcombine.high %v995_v61, %v999_v62 }
 0x1e3   : > { %v15280_v20 = vcombine.low %v948_v7, %v952_v10  ;;  %v15287_v21 = vcombine.high %v955_v14, %v959_v15 }
 0x1e5   : > { %10117 = vmatpush1.bf16.msra.mxu0 %v15222_v16  ;;  %10609 = vmatpush1.bf16.msra.mxu1 %v15224_v17  ;;  %v956_v16 = vld [vmem:[#allocation4 + $0x948] sm:$0xff]  ;;  %v15281_v17 = vcombine.high %v948_v7, %v952_v10  ;;  %v1007_v7 = vld [vmem:[#allocation4 + $0xae0] sm:$0xff] }
 0x1e6   : > { %10118 = vmatprep.subr.bf16.mxu0 %v15231_v18  ;;  %10610 = vmatprep.subr.bf16.mxu1 %v15233_v22  ;;  %v960_v18 = vld [vmem:[#allocation4 + $0x968] sm:$0xff]  ;;  %v963_v22 = vld [vmem:[#allocation4 + $0x980] sm:$0xff] }
 0x1e7   : > { %v15288_v29 = vcombine.low %v956_v16, %v960_v18  ;;  %v15295_v30 = vcombine.high %v963_v22, %v967_v23 }
 0x1e9   : > { %10119 = vmatpush1.bf16.msra.mxu0 %v15230_v26  ;;  %10611 = vmatpush1.bf16.msra.mxu1 %v15232_v27  ;;  %v15289_v26 = vcombine.high %v956_v16, %v960_v18  ;;  %v968_v27 = vld [vmem:[#allocation4 + $0x9a8] sm:$0xff]  ;;  %v1015_v16 = vld [vmem:[#allocation4 + $0xb20] sm:$0xff] }
 0x1ea   : > { %10120 = vmatprep.subr.bf16.mxu0 %v15239_v28  ;;  %10612 = vmatprep.subr.bf16.mxu1 %v15241_v32  ;;  %v15286_v28 = vcombine.low %v955_v14, %v959_v15  ;;  %v975_v32 = vld [vmem:[#allocation4 + $0x9e0] sm:$0xff]  ;;  %v15296_v38 = vcombine.low %v964_v25, %v968_v27  ;;  %v15335_v14 = vcombine.high %v1003_v6, %v1007_v7 }
 0x1eb   : > { %v15303_v39 = vcombine.high %v971_v31, %v975_v32  ;;  %v1011_v15 = vld [vmem:[#allocation4 + $0xb00] sm:$0xff] }
 0x1ed   : > { %10121 = vmatpush1.bf16.msra.mxu0 %v15238_v63  ;;  %10613 = vmatpush1.bf16.msra.mxu1 %v15240_v59  ;;  %v15297_v63 = vcombine.high %v964_v25, %v968_v27  ;;  %v976_v59 = vld [vmem:[#allocation4 + $0x9e8] sm:$0xff]  ;;  %v1023_v25 = vld [vmem:[#allocation4 + $0xb60] sm:$0xff] }
 0x1ee   : > { %10131 = vmatprep.subr.bf16.mxu0 %v15247_v37  ;;  %10623 = vmatprep.subr.bf16.mxu1 %v15249_v41  ;;  %v15294_v37 = vcombine.low %v963_v22, %v967_v23  ;;  %v983_v41 = vld [vmem:[#allocation4 + $0xa20] sm:$0xff]  ;;  %v15305_v43 = vcombine.high %v972_v33, %v976_v59  ;;  %v15343_v22 = vcombine.high %v1011_v15, %v1015_v16 }
 0x1ef   : > { %v15311_v49 = vcombine.high %v979_v40, %v983_v41  ;;  %v1019_v23 = vld [vmem:[#allocation4 + $0xb40] sm:$0xff] }
 0x1f0   : > { %10123 = vmatmul.mubr.bf16.vlgmr.msra.gmra.mrb[0].mxu0 %v18803_v45  ;;  %10615 = vmatmul.mubr.bf16.vlgmr.msra.gmra.mrb[0].mxu1 %v18803_v45 }
 0x1f1   : > { %10132 = vmatpush1.bf16.msra.mxu0 %v15246_v46  ;;  %10624 = vmatpush1.bf16.msra.mxu1 %v15248_v47  ;;  %v984_v46 = vld [vmem:[#allocation4 + $0xa28] sm:$0xff]  ;;  %v15302_v47 = vcombine.low %v971_v31, %v975_v32  ;;  %v15351_v31 = vcombine.high %v1019_v23, %v1023_v25  ;;  %v1027_v32 = vld [vmem:[#allocation4 + $0xb80] sm:$0xff] }
 0x1f2   : > { %10133 = vmatprep.subr.bf16.mxu0 %v15255_v48  ;;  %10625 = vmatprep.subr.bf16.mxu1 %v15257_v52  ;;  %v15304_v48 = vcombine.low %v972_v33, %v976_v59  ;;  %v988_v52 = vld [vmem:[#allocation4 + $0xa48] sm:$0xff]  ;;  %v15313_v54 = vcombine.high %v980_v42, %v984_v46  ;;  %v1031_v33 = vld [vmem:[#allocation4 + $0xba0] sm:$0xff] }
 0x1f3   : > { %10163 = vmatprep.mubr.bf16.mxu0 %v18806_v55  ;;  %10655 = vmatprep.mubr.bf16.mxu1 %v18806_v55 }
 0x1f5   : > { %10134 = vmatpush1.bf16.msra.mxu0 %v15254_v56  ;;  %10626 = vmatpush1.bf16.msra.mxu1 %v15256_v57  ;;  %v992_v56 = vld [vmem:[#allocation4 + $0xa68] sm:$0xff]  ;;  %v15310_v57 = vcombine.low %v979_v40, %v983_v41  ;;  %v15359_v40 = vcombine.high %v1027_v32, %v1031_v33  ;;  %v1035_v41 = vld [vmem:[#allocation4 + $0xbc0] sm:$0xff] }
 0x1f6   : > { %10135 = vmatprep.subr.bf16.mxu0 %v15263_v58  ;;  %10627 = vmatprep.subr.bf16.mxu1 %v15265_v0  ;;  %v15312_v58 = vcombine.low %v980_v42, %v984_v46  ;;  %v996_v0 = vld [vmem:[#allocation4 + $0xa88] sm:$0xff]  ;;  %v15321_v1 = vcombine.high %v988_v52, %v992_v56  ;;  %v1039_v42 = vld [vmem:[#allocation4 + $0xbe0] sm:$0xff] }
 0x1f9   : > { %10136 = vmatpush1.bf16.msra.mxu0 %v15262_v2  ;;  %10628 = vmatpush1.bf16.msra.mxu1 %v15264_v3  ;;  %v1000_v2 = vld [vmem:[#allocation4 + $0xaa8] sm:$0xff]  ;;  %v15318_v3 = vcombine.low %v987_v50, %v991_v51  ;;  %v15367_v50 = vcombine.high %v1035_v41, %v1039_v42  ;;  %v1043_v51 = vld [vmem:[#allocation4 + $0xc00] sm:$0xff] }
 0x1fa   : > { %10137 = vmatprep.subr.bf16.mxu0 %v15271_v4  ;;  %10629 = vmatprep.subr.bf16.mxu1 %v15273_v8  ;;  %v15320_v4 = vcombine.low %v988_v52, %v992_v56  ;;  %v1004_v8 = vld [vmem:[#allocation4 + $0xac8] sm:$0xff]  ;;  %v15329_v10 = vcombine.high %v996_v0, %v1000_v2  ;;  %v1047_v52 = vld [vmem:[#allocation4 + $0xc20] sm:$0xff] }
 0x1fd   : > { %10138 = vmatpush1.bf16.msra.mxu0 %v15270_v11  ;;  %10630 = vmatpush1.bf16.msra.mxu1 %v15272_v12  ;;  %v1008_v11 = vld [vmem:[#allocation4 + $0xae8] sm:$0xff]  ;;  %v15326_v12 = vcombine.low %v995_v61, %v999_v62  ;;  %v15375_v61 = vcombine.high %v1043_v51, %v1047_v52  ;;  %v1051_v62 = vld [vmem:[#allocation4 + $0xc40] sm:$0xff] }
 0x1fe   : > { %10139 = vmatprep.subr.bf16.mxu0 %v15279_v13  ;;  %10631 = vmatprep.subr.bf16.mxu1 %v15281_v17  ;;  %v15328_v13 = vcombine.low %v996_v0, %v1000_v2  ;;  %v1012_v17 = vld [vmem:[#allocation4 + $0xb08] sm:$0xff]  ;;  %v15337_v18 = vcombine.high %v1004_v8, %v1008_v11  ;;  %v1055_v0 = vld [vmem:[#allocation4 + $0xc60] sm:$0xff] }
 0x1ff   : > { %v1052_v2 = vld [vmem:[#allocation4 + $0xc48] sm:$0xff] }
 0x201   : > { %10140 = vmatpush1.bf16.msra.mxu0 %v15278_v19  ;;  %10632 = vmatpush1.bf16.msra.mxu1 %v15280_v20  ;;  %v1016_v19 = vld [vmem:[#allocation4 + $0xb28] sm:$0xff]  ;;  %v15334_v20 = vcombine.low %v1003_v6, %v1007_v7  ;;  %v15383_v7 = vcombine.high %v1051_v62, %v1055_v0 }
 0x202   : > { %10141 = vmatprep.subr.bf16.mxu0 %v15287_v21  ;;  %10633 = vmatprep.subr.bf16.mxu1 %v15289_v26  ;;  %v15336_v21 = vcombine.low %v1004_v8, %v1008_v11  ;;  %v1020_v26 = vld [vmem:[#allocation4 + $0xb48] sm:$0xff]  ;;  %v15345_v27 = vcombine.high %v1012_v17, %v1016_v19  ;;  %v1059_v8 = vld [vmem:[#allocation4 + $0xc80] sm:$0xff] }
 0x203   : > { %v1060_v11 = vld [vmem:[#allocation4 + $0xc88] sm:$0xff] }
 0x205   : > { %10142 = vmatpush1.bf16.msra.mxu0 %v15286_v28  ;;  %10634 = vmatpush1.bf16.msra.mxu1 %v15288_v29  ;;  %v1024_v28 = vld [vmem:[#allocation4 + $0xb68] sm:$0xff]  ;;  %v15342_v29 = vcombine.low %v1011_v15, %v1015_v16 }
 0x206   : > { %10143 = vmatprep.subr.bf16.mxu0 %v15295_v30  ;;  %10635 = vmatprep.subr.bf16.mxu1 %v15297_v63  ;;  %v15344_v30 = vcombine.low %v1012_v17, %v1016_v19  ;;  %v1028_v63 = vld [vmem:[#allocation4 + $0xb88] sm:$0xff]  ;;  %v15353_v59 = vcombine.high %v1020_v26, %v1024_v28  ;;  %v1067_v17 = vld [vmem:[#allocation4 + $0xcc0] sm:$0xff] }
 0x207   : > { %v1068_v19 = vld [vmem:[#allocation4 + $0xcc8] sm:$0xff] }
 0x209   : > { %10144 = vmatpush1.bf16.msra.mxu0 %v15294_v37  ;;  %10636 = vmatpush1.bf16.msra.mxu1 %v15296_v38  ;;  %v1032_v37 = vld [vmem:[#allocation4 + $0xba8] sm:$0xff]  ;;  %v15350_v38 = vcombine.low %v1019_v23, %v1023_v25 }
 0x20a   : > { %10145 = vmatprep.subr.bf16.mxu0 %v15303_v39  ;;  %10637 = vmatprep.subr.bf16.mxu1 %v15305_v43  ;;  %v15352_v39 = vcombine.low %v1020_v26, %v1024_v28  ;;  %v1036_v43 = vld [vmem:[#allocation4 + $0xbc8] sm:$0xff]  ;;  %v15361_v46 = vcombine.high %v1028_v63, %v1032_v37  ;;  %v1075_v26 = vld [vmem:[#allocation4 + $0xd00] sm:$0xff] }
 0x20b   : > { %v1076_v28 = vld [vmem:[#allocation4 + $0xd08] sm:$0xff] }
 0x20d   : > { %10146 = vmatpush1.bf16.msra.mxu0 %v15302_v47  ;;  %10638 = vmatpush1.bf16.msra.mxu1 %v15304_v48  ;;  %v1040_v47 = vld [vmem:[#allocation4 + $0xbe8] sm:$0xff]  ;;  %v15358_v48 = vcombine.low %v1027_v32, %v1031_v33 }
 0x20e   : > { %10147 = vmatprep.subr.bf16.mxu0 %v15311_v49  ;;  %10639 = vmatprep.subr.bf16.mxu1 %v15313_v54  ;;  %v15360_v49 = vcombine.low %v1028_v63, %v1032_v37  ;;  %v1044_v54 = vld [vmem:[#allocation4 + $0xc08] sm:$0xff]  ;;  %v15369_v56 = vcombine.high %v1036_v43, %v1040_v47  ;;  %v1083_v63 = vld [vmem:[#allocation4 + $0xd40] sm:$0xff] }
 0x20f   : > { %v1084_v37 = vld [vmem:[#allocation4 + $0xd48] sm:$0xff] }
 0x211   : > { %10148 = vmatpush1.bf16.msra.mxu0 %v15310_v57  ;;  %10640 = vmatpush1.bf16.msra.mxu1 %v15312_v58  ;;  %v1048_v57 = vld [vmem:[#allocation4 + $0xc28] sm:$0xff]  ;;  %v15366_v58 = vcombine.low %v1035_v41, %v1039_v42 }
 0x212   : > { %10149 = vmatprep.subr.bf16.mxu0 %v15319_v60  ;;  %10641 = vmatprep.subr.bf16.mxu1 %v15321_v1  ;;  %v15368_v60 = vcombine.low %v1036_v43, %v1040_v47  ;;  %v15377_v1 = vcombine.high %v1044_v54, %v1048_v57  ;;  %v15376_v6 = vcombine.low %v1044_v54, %v1048_v57  ;;  %v1091_v43 = vld [vmem:[#allocation4 + $0xd80] sm:$0xff]  ;;  %v1092_v47 = vld [vmem:[#allocation4 + $0xd88] sm:$0xff] }
 0x213   : > { %v1099_v54 = vld [vmem:[#allocation4 + $0xdc0] sm:$0xff]  ;;  %v1100_v57 = vld [vmem:[#allocation4 + $0xdc8] sm:$0xff] }
 0x215   : > { %10150 = vmatpush1.bf16.msra.mxu0 %v15318_v3  ;;  %10642 = vmatpush1.bf16.msra.mxu1 %v15320_v4  ;;  %v1056_v3 = vld [vmem:[#allocation4 + $0xc68] sm:$0xff]  ;;  %v18814_v4 = vrot.slane %v18797_v35, %v18766_v53  ;;  %v15382_v35 = vcombine.low %v1051_v62, %v1055_v0 }
 0x216   : > { %10151 = vmatprep.subr.bf16.mxu0 %v15327_v5  ;;  %10643 = vmatprep.subr.bf16.mxu1 %v15329_v10  ;;  %v15374_v5 = vcombine.low %v1043_v51, %v1047_v52  ;;  %v1063_v10 = vld [vmem:[#allocation4 + $0xca0] sm:$0xff]  ;;  %v15384_v15 = vcombine.low %v1052_v2, %v1056_v3 }
 0x217   : > { %v15391_v16 = vcombine.high %v1059_v8, %v1063_v10 }
 0x219   : > { %10152 = vmatpush1.bf16.msra.mxu0 %v15326_v12  ;;  %10644 = vmatpush1.bf16.msra.mxu1 %v15328_v13  ;;  %v15385_v12 = vcombine.high %v1052_v2, %v1056_v3  ;;  %v1064_v13 = vld [vmem:[#allocation4 + $0xca8] sm:$0xff]  ;;  %v1111_v2 = vld [vmem:[#allocation4 + $0xe20] sm:$0xff] }
 0x21a   : > { %10153 = vmatprep.subr.bf16.mxu0 %v15335_v14  ;;  %10645 = vmatprep.subr.bf16.mxu1 %v15337_v18  ;;  %v18818_v14 = vcombine.high %v18806_v55, %v18806_v55  ;;  %v1071_v18 = vld [vmem:[#allocation4 + $0xce0] sm:$0xff]  ;;  %v15392_v23 = vcombine.low %v1060_v11, %v1064_v13  ;;  %v1108_v3 = vld [vmem:[#allocation4 + $0xe08] sm:$0xff] }
 0x21b   : > { %v15399_v25 = vcombine.high %v1067_v17, %v1071_v18 }
 0x21d   : > { %10154 = vmatpush1.bf16.msra.mxu0 %v15334_v20  ;;  %10646 = vmatpush1.bf16.msra.mxu1 %v15336_v21  ;;  %v15393_v20 = vcombine.high %v1060_v11, %v1064_v13  ;;  %v1072_v21 = vld [vmem:[#allocation4 + $0xce8] sm:$0xff]  ;;  %v1115_v11 = vld [vmem:[#allocation4 + $0xe40] sm:$0xff] }
 0x21e   : > { %10155 = vmatprep.subr.bf16.mxu0 %v15343_v22  ;;  %10647 = vmatprep.subr.bf16.mxu1 %v15345_v27  ;;  %v15390_v22 = vcombine.low %v1059_v8, %v1063_v10  ;;  %v1079_v27 = vld [vmem:[#allocation4 + $0xd20] sm:$0xff]  ;;  %v15400_v32 = vcombine.low %v1068_v19, %v1072_v21  ;;  %v1116_v13 = vld [vmem:[#allocation4 + $0xe48] sm:$0xff] }
 0x21f   : > { %v15407_v33 = vcombine.high %v1075_v26, %v1079_v27 }
 0x221   : > { %10156 = vmatpush1.bf16.msra.mxu0 %v15342_v29  ;;  %10648 = vmatpush1.bf16.msra.mxu1 %v15344_v30  ;;  %v15401_v29 = vcombine.high %v1068_v19, %v1072_v21  ;;  %v1080_v30 = vld [vmem:[#allocation4 + $0xd28] sm:$0xff]  ;;  %v1123_v19 = vld [vmem:[#allocation4 + $0xe80] sm:$0xff] }
 0x222   : > { %10157 = vmatprep.subr.bf16.mxu0 %v15351_v31  ;;  %10649 = vmatprep.subr.bf16.mxu1 %v15353_v59  ;;  %v15398_v31 = vcombine.low %v1067_v17, %v1071_v18  ;;  %v1087_v59 = vld [vmem:[#allocation4 + $0xd60] sm:$0xff]  ;;  %v15408_v41 = vcombine.low %v1076_v28, %v1080_v30  ;;  %v1124_v21 = vld [vmem:[#allocation4 + $0xe88] sm:$0xff] }
 0x223   : > { %v15415_v42 = vcombine.high %v1083_v63, %v1087_v59 }
 0x225   : > { %10158 = vmatpush1.bf16.msra.mxu0 %v15350_v38  ;;  %10650 = vmatpush1.bf16.msra.mxu1 %v15352_v39  ;;  %v15409_v38 = vcombine.high %v1076_v28, %v1080_v30  ;;  %v1088_v39 = vld [vmem:[#allocation4 + $0xd68] sm:$0xff]  ;;  %v1131_v28 = vld [vmem:[#allocation4 + $0xec0] sm:$0xff] }
 0x226   : > { %10159 = vmatprep.subr.bf16.mxu0 %v15359_v40  ;;  %10651 = vmatprep.subr.bf16.mxu1 %v15361_v46  ;;  %v15406_v40 = vcombine.low %v1075_v26, %v1079_v27  ;;  %v1095_v46 = vld [vmem:[#allocation4 + $0xda0] sm:$0xff]  ;;  %v15416_v51 = vcombine.low %v1084_v37, %v1088_v39  ;;  %v1132_v30 = vld [vmem:[#allocation4 + $0xec8] sm:$0xff] }
 0x227   : > { %v15423_v52 = vcombine.high %v1091_v43, %v1095_v46 }
 0x229   : > { %10160 = vmatpush1.bf16.msra.mxu0 %v15358_v48  ;;  %10652 = vmatpush1.bf16.msra.mxu1 %v15360_v49  ;;  %v15417_v48 = vcombine.high %v1084_v37, %v1088_v39  ;;  %v1096_v49 = vld [vmem:[#allocation4 + $0xda8] sm:$0xff]  ;;  %v1139_v37 = vld [vmem:[#allocation4 + $0xf00] sm:$0xff] }
 0x22a   : > { %10161 = vmatprep.subr.bf16.mxu0 %v15367_v50  ;;  %10653 = vmatprep.subr.bf16.mxu1 %v15369_v56  ;;  %v15414_v50 = vcombine.low %v1083_v63, %v1087_v59  ;;  %v1103_v56 = vld [vmem:[#allocation4 + $0xde0] sm:$0xff]  ;;  %v15424_v62 = vcombine.low %v1092_v47, %v1096_v49  ;;  %v1140_v39 = vld [vmem:[#allocation4 + $0xf08] sm:$0xff] }
 0x22b   : > { %v15431_v0 = vcombine.high %v1099_v54, %v1103_v56 }
 0x22d   : > { %10162 = vmatpush1.bf16.msra.mxu0 %v15366_v58  ;;  %10654 = vmatpush1.bf16.msra.mxu1 %v15368_v60  ;;  %v15425_v58 = vcombine.high %v1092_v47, %v1096_v49  ;;  %v1104_v60 = vld [vmem:[#allocation4 + $0xde8] sm:$0xff]  ;;  %v1147_v47 = vld [vmem:[#allocation4 + $0xf40] sm:$0xff] }
 0x22e   : > { %10172 = vmatprep.subr.bf16.mxu0 %v15375_v61  ;;  %10664 = vmatprep.subr.bf16.mxu1 %v15377_v1  ;;  %v15422_v61 = vcombine.low %v1091_v43, %v1095_v46  ;;  %v1107_v1 = vld [vmem:[#allocation4 + $0xe00] sm:$0xff]  ;;  %v15432_v8 = vcombine.low %v1100_v57, %v1104_v60  ;;  %v1148_v49 = vld [vmem:[#allocation4 + $0xf48] sm:$0xff] }
 0x22f   : > { %v15439_v10 = vcombine.high %v1107_v1, %v1111_v2 }
 0x230   : > { %10164 = vmatmul.mubr.bf16.vlgmr.msra.gmra.mrb[0].mxu0 %v18814_v4  ;;  %10656 = vmatmul.mubr.bf16.vlgmr.msra.gmra.mrb[0].mxu1 %v18814_v4 }
 0x231   : > { %10173 = vmatpush1.bf16.msra.mxu0 %v15374_v5  ;;  %10665 = vmatpush1.bf16.msra.mxu1 %v15376_v6  ;;  %v15433_v5 = vcombine.high %v1100_v57, %v1104_v60  ;;  %v1112_v6 = vld [vmem:[#allocation4 + $0xe28] sm:$0xff]  ;;  %v1155_v57 = vld [vmem:[#allocation4 + $0xf80] sm:$0xff] }
 0x232   : > { %10174 = vmatprep.subr.bf16.mxu0 %v15383_v7  ;;  %10666 = vmatprep.subr.bf16.mxu1 %v15385_v12  ;;  %v15430_v7 = vcombine.low %v1099_v54, %v1103_v56  ;;  %v1119_v12 = vld [vmem:[#allocation4 + $0xe60] sm:$0xff]  ;;  %v15440_v17 = vcombine.low %v1108_v3, %v1112_v6  ;;  %v1156_v60 = vld [vmem:[#allocation4 + $0xf88] sm:$0xff] }
 0x233   : > { %10204 = vmatprep.mubr.bf16.mxu0 %v18818_v14  ;;  %10696 = vmatprep.mubr.bf16.mxu1 %v18818_v14  ;;  %v15447_v18 = vcombine.high %v1115_v11, %v1119_v12 }
 0x235   : > { %10175 = vmatpush1.bf16.msra.mxu0 %v15382_v35  ;;  %10667 = vmatpush1.bf16.msra.mxu1 %v15384_v15  ;;  %v15441_v35 = vcombine.high %v1108_v3, %v1112_v6  ;;  %v1120_v15 = vld [vmem:[#allocation4 + $0xe68] sm:$0xff] }
 0x236   : > { %10176 = vmatprep.subr.bf16.mxu0 %v15391_v16  ;;  %10668 = vmatprep.subr.bf16.mxu1 %v15393_v20  ;;  %v15438_v16 = vcombine.low %v1107_v1, %v1111_v2  ;;  %v1127_v20 = vld [vmem:[#allocation4 + $0xea0] sm:$0xff]  ;;  %v15448_v26 = vcombine.low %v1116_v13, %v1120_v15  ;;  %v1164_v6 = vld [vmem:[#allocation4 + $0xfc8] sm:$0xff] }
 0x237   : > { %v15455_v27 = vcombine.high %v1123_v19, %v1127_v20  ;;  %v1163_v1 = vld [vmem:[#allocation4 + $0xfc0] sm:$0xff] }
 0x239   : > { %10177 = vmatpush1.bf16.msra.mxu0 %v15390_v22  ;;  %10669 = vmatpush1.bf16.msra.mxu1 %v15392_v23  ;;  %v15449_v22 = vcombine.high %v1116_v13, %v1120_v15  ;;  %v1128_v23 = vld [vmem:[#allocation4 + $0xea8] sm:$0xff]  ;;  %v1171_v15 = vld [vmem:[#allocation4 + $0x1000] sm:$0xff] }
 0x23a   : > { %10178 = vmatprep.subr.bf16.mxu0 %v15399_v25  ;;  %10670 = vmatprep.subr.bf16.mxu1 %v15401_v29  ;;  %v15446_v25 = vcombine.low %v1115_v11, %v1119_v12  ;;  %v1135_v29 = vld [vmem:[#allocation4 + $0xee0] sm:$0xff]  ;;  %v15456_v63 = vcombine.low %v1124_v21, %v1128_v23 }
 0x23b   : > { %v15463_v59 = vcombine.high %v1131_v28, %v1135_v29 }
 0x23d   : > { %10179 = vmatpush1.bf16.msra.mxu0 %v15398_v31  ;;  %10671 = vmatpush1.bf16.msra.mxu1 %v15400_v32  ;;  %v15457_v31 = vcombine.high %v1124_v21, %v1128_v23  ;;  %v1136_v32 = vld [vmem:[#allocation4 + $0xee8] sm:$0xff] }
 0x23e   : > { %10180 = vmatprep.subr.bf16.mxu0 %v15407_v33  ;;  %10672 = vmatprep.subr.bf16.mxu1 %v15409_v38  ;;  %v15454_v33 = vcombine.low %v1123_v19, %v1127_v20  ;;  %v1143_v38 = vld [vmem:[#allocation4 + $0xf20] sm:$0xff]  ;;  %v15464_v43 = vcombine.low %v1132_v30, %v1136_v32  ;;  %v1176_v19 = vld [vmem:[#allocation4 + $0x1028] sm:$0xff] }
 0x23f   : > { %v15471_v46 = vcombine.high %v1139_v37, %v1143_v38 }
 0x241   : > { %10181 = vmatpush1.bf16.msra.mxu0 %v15406_v40  ;;  %10673 = vmatpush1.bf16.msra.mxu1 %v15408_v41  ;;  %v15465_v40 = vcombine.high %v1132_v30, %v1136_v32  ;;  %v1144_v41 = vld [vmem:[#allocation4 + $0xf28] sm:$0xff] }
 0x242   : > { %10182 = vmatprep.subr.bf16.mxu0 %v15415_v42  ;;  %10674 = vmatprep.subr.bf16.mxu1 %v15417_v48  ;;  %v15462_v42 = vcombine.low %v1131_v28, %v1135_v29  ;;  %v1151_v48 = vld [vmem:[#allocation4 + $0xf60] sm:$0xff]  ;;  %v15472_v54 = vcombine.low %v1140_v39, %v1144_v41  ;;  %v18835_v28 = vcombine.high %v18814_v4, %v18814_v4  ;;  %v1180_v29 = vld [vmem:[#allocation4 + $0x1048] sm:$0xff] }
 0x243   : > { %v15479_v56 = vcombine.high %v1147_v47, %v1151_v48  ;;  %v1184_v30 = vld [vmem:[#allocation4 + $0x1068] sm:$0xff] }
 0x245   : > { %10183 = vmatpush1.bf16.msra.mxu0 %v15414_v50  ;;  %10675 = vmatpush1.bf16.msra.mxu1 %v15416_v51  ;;  %v15473_v50 = vcombine.high %v1140_v39, %v1144_v41  ;;  %v1152_v51 = vld [vmem:[#allocation4 + $0xf68] sm:$0xff] }
 0x246   : > { %10184 = vmatprep.subr.bf16.mxu0 %v15423_v52  ;;  %10676 = vmatprep.subr.bf16.mxu1 %v15425_v58  ;;  %v15470_v52 = vcombine.low %v1139_v37, %v1143_v38  ;;  %v1159_v58 = vld [vmem:[#allocation4 + $0xfa0] sm:$0xff]  ;;  %v15480_v2 = vcombine.low %v1148_v49, %v1152_v51  ;;  %v1188_v39 = vld [vmem:[#allocation4 + $0x1088] sm:$0xff] }
 0x247   : > { %v15487_v3 = vcombine.high %v1155_v57, %v1159_v58  ;;  %v15486_v11 = vcombine.low %v1155_v57, %v1159_v58  ;;  %v1191_v37 = vld [vmem:[#allocation4 + $0x10a0] sm:$0xff] }
 0x248   : > { %v1203_v57 = vld [vmem:[#allocation4 + $0x1100] sm:$0xff] }
 0x249   : > { %10185 = vmatpush1.bf16.msra.mxu0 %v15422_v61  ;;  %10677 = vmatpush1.bf16.msra.mxu1 %v15424_v62  ;;  %v15481_v61 = vcombine.high %v1148_v49, %v1152_v51  ;;  %v1160_v62 = vld [vmem:[#allocation4 + $0xfa8] sm:$0xff]  ;;  %v1207_v58 = vld [vmem:[#allocation4 + $0x1120] sm:$0xff] }
 0x24a   : > { %10186 = vmatprep.subr.bf16.mxu0 %v15431_v0  ;;  %10678 = vmatprep.subr.bf16.mxu1 %v15433_v5  ;;  %v15478_v0 = vcombine.low %v1147_v47, %v1151_v48  ;;  %v1167_v5 = vld [vmem:[#allocation4 + $0xfe0] sm:$0xff]  ;;  %v15488_v12 = vcombine.low %v1156_v60, %v1160_v62  ;;  %v1196_v49 = vld [vmem:[#allocation4 + $0x10c8] sm:$0xff] }
 0x24b   : > { %v15495_v13 = vcombine.high %v1163_v1, %v1167_v5  ;;  %v15494_v20 = vcombine.low %v1163_v1, %v1167_v5  ;;  %v1195_v47 = vld [vmem:[#allocation4 + $0x10c0] sm:$0xff]  ;;  %v15535_v1 = vcombine.high %v1203_v57, %v1207_v58 }
 0x24c   : > { %v1199_v48 = vld [vmem:[#allocation4 + $0x10e0] sm:$0xff] }
 0x24d   : > { %10187 = vmatpush1.bf16.msra.mxu0 %v15430_v7  ;;  %10679 = vmatpush1.bf16.msra.mxu1 %v15432_v8  ;;  %v1168_v7 = vld [vmem:[#allocation4 + $0xfe8] sm:$0xff]  ;;  %v15489_v8 = vcombine.high %v1156_v60, %v1160_v62  ;;  %v15526_v62 = vcombine.low %v1195_v47, %v1199_v48  ;;  %v1215_v5 = vld [vmem:[#allocation4 + $0x1160] sm:$0xff] }
 0x24e   : > { %10188 = vmatprep.subr.bf16.mxu0 %v15439_v10  ;;  %10680 = vmatprep.subr.bf16.mxu1 %v15441_v35  ;;  %v18825_v10 = vld [vmem:[%s18763_s16 + $0x8] sm:$0xff]  ;;  %v15497_v35 = vcombine.high %v1164_v6, %v1168_v7  ;;  %v15496_v21 = vcombine.low %v1164_v6, %v1168_v7 }
 0x24f   : > { %v1204_v60 = vld [vmem:[#allocation4 + $0x1108] sm:$0xff] }
 0x250   : > { %v1212_v6 = vld [vmem:[#allocation4 + $0x1148] sm:$0xff] }
 0x251   : > { %10189 = vmatpush1.bf16.msra.mxu0 %v15438_v16  ;;  %10681 = vmatpush1.bf16.msra.mxu1 %v15440_v17  ;;  %v1175_v16 = vld [vmem:[#allocation4 + $0x1020] sm:$0xff]  ;;  %v18829_v17 = vrot.slane %v18825_v10, %v18766_v53  ;;  %v1216_v7 = vld [vmem:[#allocation4 + $0x1168] sm:$0xff] }
 0x252   : > { %10190 = vmatprep.subr.bf16.mxu0 %v15447_v18  ;;  %10682 = vmatprep.subr.bf16.mxu1 %v15449_v22  ;;  %v1172_v18 = vld [vmem:[#allocation4 + $0x1008] sm:$0xff]  ;;  %v15503_v22 = vcombine.high %v1171_v15, %v1175_v16 }
 0x253   : > { %v15505_v23 = vcombine.high %v1172_v18, %v1176_v19  ;;  %v15504_v32 = vcombine.low %v1172_v18, %v1176_v19  ;;  %v1224_v18 = vld [vmem:[#allocation4 + $0x11a8] sm:$0xff] }
 0x255   : > { %10191 = vmatpush1.bf16.msra.mxu0 %v15446_v25  ;;  %10683 = vmatpush1.bf16.msra.mxu1 %v15448_v26  ;;  %v1179_v25 = vld [vmem:[#allocation4 + $0x1040] sm:$0xff] }
 0x256   : > { %10192 = vmatprep.subr.bf16.mxu0 %v15455_v27  ;;  %10684 = vmatprep.subr.bf16.mxu1 %v15457_v31  ;;  %v1183_v26 = vld [vmem:[#allocation4 + $0x1060] sm:$0xff]  ;;  %v2262_v27 = vcombine.high %v18829_v17, %v18829_v17  ;;  %v15502_v31 = vcombine.low %v1171_v15, %v1175_v16  ;;  %v1220_v16 = vld [vmem:[#allocation4 + $0x1188] sm:$0xff] }
 0x257   : > { %v15510_v41 = vcombine.low %v1179_v25, %v1183_v26  ;;  %v1223_v15 = vld [vmem:[#allocation4 + $0x11a0] sm:$0xff] }
 0x258   : > { %v18838_v38 = vrot.slane %v2262_v27, %v18766_v53  ;;  %v1232_v27 = vld [vmem:[#allocation4 + $0x11e8] sm:$0xff] }
 0x259   : > { %10193 = vmatpush1.bf16.msra.mxu0 %v15454_v33  ;;  %10685 = vmatpush1.bf16.msra.mxu1 %v15456_v63  ;;  %v15511_v33 = vcombine.high %v1179_v25, %v1183_v26  ;;  %v15513_v63 = vcombine.high %v1180_v29, %v1184_v30  ;;  %v1231_v25 = vld [vmem:[#allocation4 + $0x11e0] sm:$0xff]  ;;  %v1228_v26 = vld [vmem:[#allocation4 + $0x11c8] sm:$0xff] }
 0x25a   : > { %10194 = vmatprep.subr.bf16.mxu0 %v15463_v59  ;;  %10686 = vmatprep.subr.bf16.mxu1 %v15465_v40  ;;  %v1187_v59 = vld [vmem:[#allocation4 + $0x1080] sm:$0xff]  ;;  %v1192_v40 = vld [vmem:[#allocation4 + $0x10a8] sm:$0xff] }
 0x25b   : > { %v15518_v51 = vcombine.low %v1187_v59, %v1191_v37 }
 0x25d   : > { %10195 = vmatpush1.bf16.msra.mxu0 %v15462_v42  ;;  %10687 = vmatpush1.bf16.msra.mxu1 %v15464_v43  ;;  %v15512_v42 = vcombine.low %v1180_v29, %v1184_v30  ;;  %v15519_v43 = vcombine.high %v1187_v59, %v1191_v37  ;;  %v15552_v30 = vcombine.low %v1220_v16, %v1224_v18  ;;  %v1236_v59 = vld [vmem:[#allocation4 + $0x1208] sm:$0xff] }
 0x25e   : > { %10196 = vmatprep.subr.bf16.mxu0 %v15471_v46  ;;  %10688 = vmatprep.subr.bf16.mxu1 %v15473_v50  ;;  %v15521_v46 = vcombine.high %v1188_v39, %v1192_v40  ;;  %v1200_v50 = vld [vmem:[#allocation4 + $0x10e8] sm:$0xff] }
 0x25f   : > { %v1240_v37 = vld [vmem:[#allocation4 + $0x1228] sm:$0xff] }
 0x261   : > { %10197 = vmatpush1.bf16.msra.mxu0 %v15470_v52  ;;  %10689 = vmatpush1.bf16.msra.mxu1 %v15472_v54  ;;  %v15520_v52 = vcombine.low %v1188_v39, %v1192_v40  ;;  %v15527_v54 = vcombine.high %v1195_v47, %v1199_v48  ;;  %v15560_v40 = vcombine.low %v1228_v26, %v1232_v27  ;;  %v1244_v47 = vld [vmem:[#allocation4 + $0x1248] sm:$0xff] }
 0x262   : > { %10198 = vmatprep.subr.bf16.mxu0 %v15479_v56  ;;  %10690 = vmatprep.subr.bf16.mxu1 %v15481_v61  ;;  %v15529_v56 = vcombine.high %v1196_v49, %v1200_v50  ;;  %v1208_v61 = vld [vmem:[#allocation4 + $0x1128] sm:$0xff] }
 0x263   : > { %v1248_v48 = vld [vmem:[#allocation4 + $0x1268] sm:$0xff] }
 0x265   : > { %10199 = vmatpush1.bf16.msra.mxu0 %v15478_v0  ;;  %10691 = vmatpush1.bf16.msra.mxu1 %v15480_v2  ;;  %v15528_v0 = vcombine.low %v1196_v49, %v1200_v50  ;;  %v15537_v2 = vcombine.high %v1204_v60, %v1208_v61  ;;  %v15568_v50 = vcombine.low %v1236_v59, %v1240_v37 }
 0x266   : > { %10200 = vmatprep.subr.bf16.mxu0 %v15487_v3  ;;  %10692 = vmatprep.subr.bf16.mxu1 %v15489_v8  ;;  %v1211_v3 = vld [vmem:[#allocation4 + $0x1140] sm:$0xff]  ;;  %v15534_v8 = vcombine.low %v1203_v57, %v1207_v58  ;;  %v1252_v57 = vld [vmem:[#allocation4 + $0x1288] sm:$0xff] }
 0x267   : > { %v15542_v19 = vcombine.low %v1211_v3, %v1215_v5  ;;  %v1256_v58 = vld [vmem:[#allocation4 + $0x12a8] sm:$0xff] }
 0x269   : > { %10201 = vmatpush1.bf16.msra.mxu0 %v15486_v11  ;;  %10693 = vmatpush1.bf16.msra.mxu1 %v15488_v12  ;;  %v15536_v11 = vcombine.low %v1204_v60, %v1208_v61  ;;  %v15543_v12 = vcombine.high %v1211_v3, %v1215_v5  ;;  %v15576_v61 = vcombine.low %v1244_v47, %v1248_v48  ;;  %v1260_v3 = vld [vmem:[#allocation4 + $0x12c8] sm:$0xff] }
 0x26a   : > { %10202 = vmatprep.subr.bf16.mxu0 %v15495_v13  ;;  %10694 = vmatprep.subr.bf16.mxu1 %v15497_v35  ;;  %v15545_v13 = vcombine.high %v1212_v6, %v1216_v7  ;;  %v1219_v35 = vld [vmem:[#allocation4 + $0x1180] sm:$0xff]  ;;  %v1264_v5 = vld [vmem:[#allocation4 + $0x12e8] sm:$0xff] }
 0x26b   : > { %v15550_v29 = vcombine.low %v1219_v35, %v1223_v15 }
 0x26d   : > { %10203 = vmatpush1.bf16.msra.mxu0 %v15494_v20  ;;  %10695 = vmatpush1.bf16.msra.mxu1 %v15496_v21  ;;  %v15544_v20 = vcombine.low %v1212_v6, %v1216_v7  ;;  %v15551_v21 = vcombine.high %v1219_v35, %v1223_v15  ;;  %v15584_v7 = vcombine.low %v1252_v57, %v1256_v58  ;;  %v1268_v35 = vld [vmem:[#allocation4 + $0x1308] sm:$0xff] }
 0x26e   : > { %10213 = vmatprep.subr.bf16.mxu0 %v15503_v22  ;;  %10705 = vmatprep.subr.bf16.mxu1 %v15505_v23  ;;  %v15553_v22 = vcombine.high %v1220_v16, %v1224_v18  ;;  %v1227_v23 = vld [vmem:[#allocation4 + $0x11c0] sm:$0xff]  ;;  %v1272_v15 = vld [vmem:[#allocation4 + $0x1328] sm:$0xff]  ;;  %v15592_v18 = vcombine.low %v1260_v3, %v1264_v5 }
 0x26f   : > { %v15558_v39 = vcombine.low %v1227_v23, %v1231_v25 }
 0x270   : > { %10205 = vmatmul.mubr.bf16.vlgmr.msra.gmra.mrb[0].mxu0 %v18835_v28  ;;  %10697 = vmatmul.mubr.bf16.vlgmr.msra.gmra.mrb[0].mxu1 %v18835_v28 }
 0x271   : > { %10214 = vmatpush1.bf16.msra.mxu0 %v15502_v31  ;;  %10706 = vmatpush1.bf16.msra.mxu1 %v15504_v32  ;;  %v15559_v31 = vcombine.high %v1227_v23, %v1231_v25  ;;  %v15561_v32 = vcombine.high %v1228_v26, %v1232_v27  ;;  %v1276_v23 = vld [vmem:[#allocation4 + $0x1348] sm:$0xff]  ;;  %v15600_v27 = vcombine.low %v1268_v35, %v1272_v15 }
 0x272   : > { %10215 = vmatprep.subr.bf16.mxu0 %v15511_v33  ;;  %10707 = vmatprep.subr.bf16.mxu1 %v15513_v63  ;;  %v1235_v33 = vld [vmem:[#allocation4 + $0x1200] sm:$0xff]  ;;  %v1280_v25 = vld [vmem:[#allocation4 + $0x1368] sm:$0xff] }
 0x273   : > { %10245 = vmatprep.mubr.bf16.mxu0 %v18838_v38  ;;  %10737 = vmatprep.mubr.bf16.mxu1 %v18838_v38  ;;  %v1239_v63 = vld [vmem:[#allocation4 + $0x1220] sm:$0xff] }
 0x274   : > { %v15566_v49 = vcombine.low %v1235_v33, %v1239_v63 }
 0x275   : > { %10216 = vmatpush1.bf16.msra.mxu0 %v15510_v41  ;;  %10708 = vmatpush1.bf16.msra.mxu1 %v15512_v42  ;;  %v15567_v41 = vcombine.high %v1235_v33, %v1239_v63  ;;  %v15569_v42 = vcombine.high %v1236_v59, %v1240_v37  ;;  %v1284_v33 = vld [vmem:[#allocation4 + $0x1388] sm:$0xff]  ;;  %v15608_v37 = vcombine.low %v1276_v23, %v1280_v25 }
 0x276   : > { %10217 = vmatprep.subr.bf16.mxu0 %v15519_v43  ;;  %10709 = vmatprep.subr.bf16.mxu1 %v15521_v46  ;;  %v1243_v43 = vld [vmem:[#allocation4 + $0x1240] sm:$0xff]  ;;  %v1288_v63 = vld [vmem:[#allocation4 + $0x13a8] sm:$0xff] }
 0x277   : > { %v1247_v46 = vld [vmem:[#allocation4 + $0x1260] sm:$0xff] }
 0x278   : > { %v15574_v60 = vcombine.low %v1243_v43, %v1247_v46 }
 0x279   : > { %10218 = vmatpush1.bf16.msra.mxu0 %v15518_v51  ;;  %10710 = vmatpush1.bf16.msra.mxu1 %v15520_v52  ;;  %v15575_v51 = vcombine.high %v1243_v43, %v1247_v46  ;;  %v15577_v52 = vcombine.high %v1244_v47, %v1248_v48  ;;  %v1292_v43 = vld [vmem:[#allocation4 + $0x13c8] sm:$0xff]  ;;  %v15616_v48 = vcombine.low %v1284_v33, %v1288_v63 }
 0x27a   : > { %10219 = vmatprep.subr.bf16.mxu0 %v15527_v54  ;;  %10711 = vmatprep.subr.bf16.mxu1 %v15529_v56  ;;  %v1251_v54 = vld [vmem:[#allocation4 + $0x1280] sm:$0xff]  ;;  %v1296_v46 = vld [vmem:[#allocation4 + $0x13e8] sm:$0xff] }
 0x27b   : > { %v1255_v56 = vld [vmem:[#allocation4 + $0x12a0] sm:$0xff] }
 0x27c   : > { %v15582_v6 = vcombine.low %v1251_v54, %v1255_v56 }
 0x27d   : > { %10220 = vmatpush1.bf16.msra.mxu0 %v15526_v62  ;;  %10712 = vmatpush1.bf16.msra.mxu1 %v15528_v0  ;;  %v15583_v62 = vcombine.high %v1251_v54, %v1255_v56  ;;  %v15585_v0 = vcombine.high %v1252_v57, %v1256_v58  ;;  %v1300_v54 = vld [vmem:[#allocation4 + $0x1408] sm:$0xff]  ;;  %v15624_v58 = vcombine.low %v1292_v43, %v1296_v46 }
 0x27e   : > { %10221 = vmatprep.subr.bf16.mxu0 %v15535_v1  ;;  %10713 = vmatprep.subr.bf16.mxu1 %v15537_v2  ;;  %v1259_v1 = vld [vmem:[#allocation4 + $0x12c0] sm:$0xff]  ;;  %v1304_v56 = vld [vmem:[#allocation4 + $0x1428] sm:$0xff] }
 0x27f   : > { %v1263_v2 = vld [vmem:[#allocation4 + $0x12e0] sm:$0xff] }
 0x280   : > { %v15590_v16 = vcombine.low %v1259_v1, %v1263_v2 }
 0x281   : > { %10222 = vmatpush1.bf16.msra.mxu0 %v15534_v8  ;;  %10714 = vmatpush1.bf16.msra.mxu1 %v15536_v11  ;;  %v15591_v8 = vcombine.high %v1259_v1, %v1263_v2  ;;  %v15593_v11 = vcombine.high %v1260_v3, %v1264_v5  ;;  %v18846_v1 = vrot.slane %v18829_v17, %v18766_v53  ;;  %v1308_v2 = vld [vmem:[#allocation4 + $0x1448] sm:$0xff] }
 0x282   : > { %10223 = vmatprep.subr.bf16.mxu0 %v15543_v12  ;;  %10715 = vmatprep.subr.bf16.mxu1 %v15545_v13  ;;  %v1267_v12 = vld [vmem:[#allocation4 + $0x1300] sm:$0xff]  ;;  %v1312_v3 = vld [vmem:[#allocation4 + $0x1468] sm:$0xff] }
 0x283   : > { %v1271_v13 = vld [vmem:[#allocation4 + $0x1320] sm:$0xff]  ;;  %v1316_v17 = vld [vmem:[#allocation4 + $0x1488] sm:$0xff] }
 0x284   : > { %v15598_v26 = vcombine.low %v1267_v12, %v1271_v13 }
 0x285   : > { %10224 = vmatpush1.bf16.msra.mxu0 %v15542_v19  ;;  %10716 = vmatpush1.bf16.msra.mxu1 %v15544_v20  ;;  %v15599_v19 = vcombine.high %v1267_v12, %v1271_v13  ;;  %v15601_v20 = vcombine.high %v1268_v35, %v1272_v15  ;;  %v1319_v12 = vld [vmem:[#allocation4 + $0x14a0] sm:$0xff]  ;;  %v18850_v13 = vcombine.high %v18838_v38, %v18838_v38  ;;  %v1320_v35 = vld [vmem:[#allocation4 + $0x14a8] sm:$0xff] }
 0x286   : > { %10225 = vmatprep.subr.bf16.mxu0 %v15551_v21  ;;  %10717 = vmatprep.subr.bf16.mxu1 %v15553_v22  ;;  %v1275_v21 = vld [vmem:[#allocation4 + $0x1340] sm:$0xff] }
 0x287   : > { %v1279_v22 = vld [vmem:[#allocation4 + $0x1360] sm:$0xff] }
 0x288   : > { %v15606_v59 = vcombine.low %v1275_v21, %v1279_v22 }
 0x289   : > { %10226 = vmatpush1.bf16.msra.mxu0 %v15550_v29  ;;  %10718 = vmatpush1.bf16.msra.mxu1 %v15552_v30  ;;  %v15607_v29 = vcombine.high %v1275_v21, %v1279_v22  ;;  %v15609_v30 = vcombine.high %v1276_v23, %v1280_v25  ;;  %v1327_v21 = vld [vmem:[#allocation4 + $0x14e0] sm:$0xff]  ;;  %v1324_v22 = vld [vmem:[#allocation4 + $0x14c8] sm:$0xff] }
 0x28a   : > { %10227 = vmatprep.subr.bf16.mxu0 %v15559_v31  ;;  %10719 = vmatprep.subr.bf16.mxu1 %v15561_v32  ;;  %v1283_v31 = vld [vmem:[#allocation4 + $0x1380] sm:$0xff]  ;;  %v1328_v23 = vld [vmem:[#allocation4 + $0x14e8] sm:$0xff] }
 0x28b   : > { %v1287_v32 = vld [vmem:[#allocation4 + $0x13a0] sm:$0xff] }
 0x28c   : > { %v15614_v47 = vcombine.low %v1283_v31, %v1287_v32 }
 0x28d   : > { %10228 = vmatpush1.bf16.msra.mxu0 %v15558_v39  ;;  %10720 = vmatpush1.bf16.msra.mxu1 %v15560_v40  ;;  %v15615_v39 = vcombine.high %v1283_v31, %v1287_v32  ;;  %v15617_v40 = vcombine.high %v1284_v33, %v1288_v63  ;;  %v1335_v31 = vld [vmem:[#allocation4 + $0x1520] sm:$0xff]  ;;  %v1332_v32 = vld [vmem:[#allocation4 + $0x1508] sm:$0xff] }
 0x28e   : > { %10229 = vmatprep.subr.bf16.mxu0 %v15567_v41  ;;  %10721 = vmatprep.subr.bf16.mxu1 %v15569_v42  ;;  %v1291_v41 = vld [vmem:[#allocation4 + $0x13c0] sm:$0xff]  ;;  %v1336_v33 = vld [vmem:[#allocation4 + $0x1528] sm:$0xff] }
 0x28f   : > { %v1295_v42 = vld [vmem:[#allocation4 + $0x13e0] sm:$0xff] }
 0x290   : > { %v15622_v57 = vcombine.low %v1291_v41, %v1295_v42 }
 0x291   : > { %10230 = vmatpush1.bf16.msra.mxu0 %v15566_v49  ;;  %10722 = vmatpush1.bf16.msra.mxu1 %v15568_v50  ;;  %v15623_v49 = vcombine.high %v1291_v41, %v1295_v42  ;;  %v15625_v50 = vcombine.high %v1292_v43, %v1296_v46  ;;  %v1343_v41 = vld [vmem:[#allocation4 + $0x1560] sm:$0xff]  ;;  %v1340_v42 = vld [vmem:[#allocation4 + $0x1548] sm:$0xff] }
 0x292   : > { %10231 = vmatprep.subr.bf16.mxu0 %v15575_v51  ;;  %10723 = vmatprep.subr.bf16.mxu1 %v15577_v52  ;;  %v1299_v51 = vld [vmem:[#allocation4 + $0x1400] sm:$0xff]  ;;  %v1344_v43 = vld [vmem:[#allocation4 + $0x1568] sm:$0xff] }
 0x293   : > { %v1303_v52 = vld [vmem:[#allocation4 + $0x1420] sm:$0xff] }
 0x294   : > { %v15630_v5 = vcombine.low %v1299_v51, %v1303_v52 }
 0x295   : > { %10232 = vmatpush1.bf16.msra.mxu0 %v15574_v60  ;;  %10724 = vmatpush1.bf16.msra.mxu1 %v15576_v61  ;;  %v15631_v60 = vcombine.high %v1299_v51, %v1303_v52  ;;  %v15633_v61 = vcombine.high %v1300_v54, %v1304_v56  ;;  %v1351_v51 = vld [vmem:[#allocation4 + $0x15a0] sm:$0xff]  ;;  %v1348_v52 = vld [vmem:[#allocation4 + $0x1588] sm:$0xff] }
 0x296   : > { %10233 = vmatprep.subr.bf16.mxu0 %v15583_v62  ;;  %10725 = vmatprep.subr.bf16.mxu1 %v15585_v0  ;;  %v1307_v62 = vld [vmem:[#allocation4 + $0x1440] sm:$0xff] }
 0x297   : > { %v1311_v0 = vld [vmem:[#allocation4 + $0x1460] sm:$0xff] }
 0x298   : > { %v15638_v15 = vcombine.low %v1307_v62, %v1311_v0 }
 0x299   : > { %10234 = vmatpush1.bf16.msra.mxu0 %v15582_v6  ;;  %10726 = vmatpush1.bf16.msra.mxu1 %v15584_v7  ;;  %v15632_v6 = vcombine.low %v1300_v54, %v1304_v56  ;;  %v15639_v7 = vcombine.high %v1307_v62, %v1311_v0  ;;  %v1352_v54 = vld [vmem:[#allocation4 + $0x15a8] sm:$0xff]  ;;  %v1359_v62 = vld [vmem:[#allocation4 + $0x15e0] sm:$0xff] }
 0x29a   : > { %10235 = vmatprep.subr.bf16.mxu0 %v15591_v8  ;;  %10727 = vmatprep.subr.bf16.mxu1 %v15593_v11  ;;  %v15641_v8 = vcombine.high %v1308_v2, %v1312_v3  ;;  %v1315_v11 = vld [vmem:[#allocation4 + $0x1480] sm:$0xff]  ;;  %v1356_v0 = vld [vmem:[#allocation4 + $0x15c8] sm:$0xff] }
 0x29b   : > { %v15646_v25 = vcombine.low %v1315_v11, %v1319_v12 }
 0x29d   : > { %10236 = vmatpush1.bf16.msra.mxu0 %v15590_v16  ;;  %10728 = vmatpush1.bf16.msra.mxu1 %v15592_v18  ;;  %v15640_v16 = vcombine.low %v1308_v2, %v1312_v3  ;;  %v15647_v18 = vcombine.high %v1315_v11, %v1319_v12  ;;  %v1360_v2 = vld [vmem:[#allocation4 + $0x15e8] sm:$0xff]  ;;  %v1367_v11 = vld [vmem:[#allocation4 + $0x1620] sm:$0xff] }
 0x29e   : > { %10237 = vmatprep.subr.bf16.mxu0 %v15599_v19  ;;  %10729 = vmatprep.subr.bf16.mxu1 %v15601_v20  ;;  %v15649_v19 = vcombine.high %v1316_v17, %v1320_v35  ;;  %v1323_v20 = vld [vmem:[#allocation4 + $0x14c0] sm:$0xff]  ;;  %v1364_v12 = vld [vmem:[#allocation4 + $0x1608] sm:$0xff] }
 0x29f   : > { %v15654_v63 = vcombine.low %v1323_v20, %v1327_v21 }
 0x2a1   : > { %10238 = vmatpush1.bf16.msra.mxu0 %v15598_v26  ;;  %10730 = vmatpush1.bf16.msra.mxu1 %v15600_v27  ;;  %v15648_v26 = vcombine.low %v1316_v17, %v1320_v35  ;;  %v15655_v27 = vcombine.high %v1323_v20, %v1327_v21  ;;  %v1368_v17 = vld [vmem:[#allocation4 + $0x1628] sm:$0xff]  ;;  %v1375_v20 = vld [vmem:[#allocation4 + $0x1660] sm:$0xff] }
 0x2a2   : > { %10239 = vmatprep.subr.bf16.mxu0 %v15607_v29  ;;  %10731 = vmatprep.subr.bf16.mxu1 %v15609_v30  ;;  %v15657_v29 = vcombine.high %v1324_v22, %v1328_v23  ;;  %v1331_v30 = vld [vmem:[#allocation4 + $0x1500] sm:$0xff]  ;;  %v1372_v21 = vld [vmem:[#allocation4 + $0x1648] sm:$0xff] }
 0x2a3   : > { %v15662_v46 = vcombine.low %v1331_v30, %v1335_v31 }
 0x2a5   : > { %10240 = vmatpush1.bf16.msra.mxu0 %v15606_v59  ;;  %10732 = vmatpush1.bf16.msra.mxu1 %v15608_v37  ;;  %v15656_v59 = vcombine.low %v1324_v22, %v1328_v23  ;;  %v15663_v37 = vcombine.high %v1331_v30, %v1335_v31  ;;  %v1376_v22 = vld [vmem:[#allocation4 + $0x1668] sm:$0xff]  ;;  %v1383_v30 = vld [vmem:[#allocation4 + $0x16a0] sm:$0xff] }
 0x2a6   : > { %10241 = vmatprep.subr.bf16.mxu0 %v15615_v39  ;;  %10733 = vmatprep.subr.bf16.mxu1 %v15617_v40  ;;  %v15665_v39 = vcombine.high %v1332_v32, %v1336_v33  ;;  %v1339_v40 = vld [vmem:[#allocation4 + $0x1540] sm:$0xff]  ;;  %v1380_v31 = vld [vmem:[#allocation4 + $0x1688] sm:$0xff] }
 0x2a7   : > { %v15670_v56 = vcombine.low %v1339_v40, %v1343_v41 }
 0x2a9   : > { %10242 = vmatpush1.bf16.msra.mxu0 %v15614_v47  ;;  %10734 = vmatpush1.bf16.msra.mxu1 %v15616_v48  ;;  %v15664_v47 = vcombine.low %v1332_v32, %v1336_v33  ;;  %v15671_v48 = vcombine.high %v1339_v40, %v1343_v41  ;;  %v1384_v32 = vld [vmem:[#allocation4 + $0x16a8] sm:$0xff]  ;;  %v1391_v40 = vld [vmem:[#allocation4 + $0x16e0] sm:$0xff] }
 0x2aa   : > { %10243 = vmatprep.subr.bf16.mxu0 %v15623_v49  ;;  %10735 = vmatprep.subr.bf16.mxu1 %v15625_v50  ;;  %v15673_v49 = vcombine.high %v1340_v42, %v1344_v43  ;;  %v1347_v50 = vld [vmem:[#allocation4 + $0x1580] sm:$0xff]  ;;  %v1388_v41 = vld [vmem:[#allocation4 + $0x16c8] sm:$0xff] }
 0x2ab   : > { %v15678_v3 = vcombine.low %v1347_v50, %v1351_v51 }
 0x2ad   : > { %10244 = vmatpush1.bf16.msra.mxu0 %v15622_v57  ;;  %10736 = vmatpush1.bf16.msra.mxu1 %v15624_v58  ;;  %v15672_v57 = vcombine.low %v1340_v42, %v1344_v43  ;;  %v15679_v58 = vcombine.high %v1347_v50, %v1351_v51  ;;  %v1392_v42 = vld [vmem:[#allocation4 + $0x16e8] sm:$0xff]  ;;  %v1399_v50 = vld [vmem:[#allocation4 + $0x1720] sm:$0xff] }
 0x2ae   : > { %10254 = vmatprep.subr.bf16.mxu0 %v15631_v60  ;;  %10746 = vmatprep.subr.bf16.mxu1 %v15633_v61  ;;  %v15681_v60 = vcombine.high %v1348_v52, %v1352_v54  ;;  %v1355_v61 = vld [vmem:[#allocation4 + $0x15c0] sm:$0xff]  ;;  %v1396_v51 = vld [vmem:[#allocation4 + $0x1708] sm:$0xff] }
 0x2af   : > { %v15686_v35 = vcombine.low %v1355_v61, %v1359_v62 }
 0x2b0   : > { %10246 = vmatmul.mubr.bf16.vlgmr.msra.gmra.mrb[0].mxu0 %v18846_v1  ;;  %10738 = vmatmul.mubr.bf16.vlgmr.msra.gmra.mrb[0].mxu1 %v18846_v1 }
 0x2b1   : > { %10255 = vmatpush1.bf16.msra.mxu0 %v15630_v5  ;;  %10747 = vmatpush1.bf16.msra.mxu1 %v15632_v6  ;;  %v15680_v5 = vcombine.low %v1348_v52, %v1352_v54  ;;  %v15687_v6 = vcombine.high %v1355_v61, %v1359_v62  ;;  %v1400_v52 = vld [vmem:[#allocation4 + $0x1728] sm:$0xff]  ;;  %v1407_v61 = vld [vmem:[#allocation4 + $0x1760] sm:$0xff] }
 0x2b2   : > { %10256 = vmatprep.subr.bf16.mxu0 %v15639_v7  ;;  %10748 = vmatprep.subr.bf16.mxu1 %v15641_v8  ;;  %v15689_v7 = vcombine.high %v1356_v0, %v1360_v2  ;;  %v1363_v8 = vld [vmem:[#allocation4 + $0x1600] sm:$0xff]  ;;  %v1404_v62 = vld [vmem:[#allocation4 + $0x1748] sm:$0xff] }
 0x2b3   : > { %10286 = vmatprep.mubr.bf16.mxu0 %v18850_v13  ;;  %10778 = vmatprep.mubr.bf16.mxu1 %v18850_v13  ;;  %v15694_v23 = vcombine.low %v1363_v8, %v1367_v11 }
 0x2b5   : > { %10257 = vmatpush1.bf16.msra.mxu0 %v15638_v15  ;;  %10749 = vmatpush1.bf16.msra.mxu1 %v15640_v16  ;;  %v15688_v15 = vcombine.low %v1356_v0, %v1360_v2  ;;  %v15695_v16 = vcombine.high %v1363_v8, %v1367_v11  ;;  %v1408_v0 = vld [vmem:[#allocation4 + $0x1768] sm:$0xff]  ;;  %v1415_v8 = vld [vmem:[#allocation4 + $0x17a0] sm:$0xff] }
 0x2b6   : > { %10258 = vmatprep.subr.bf16.mxu0 %v15647_v18  ;;  %10750 = vmatprep.subr.bf16.mxu1 %v15649_v19  ;;  %v15697_v18 = vcombine.high %v1364_v12, %v1368_v17  ;;  %v1371_v19 = vld [vmem:[#allocation4 + $0x1640] sm:$0xff]  ;;  %v1412_v11 = vld [vmem:[#allocation4 + $0x1788] sm:$0xff] }
 0x2b7   : > { %v15702_v33 = vcombine.low %v1371_v19, %v1375_v20 }
 0x2b9   : > { %10259 = vmatpush1.bf16.msra.mxu0 %v15646_v25  ;;  %10751 = vmatpush1.bf16.msra.mxu1 %v15648_v26  ;;  %v15696_v25 = vcombine.low %v1364_v12, %v1368_v17  ;;  %v15703_v26 = vcombine.high %v1371_v19, %v1375_v20  ;;  %v1416_v12 = vld [vmem:[#allocation4 + $0x17a8] sm:$0xff]  ;;  %v1423_v19 = vld [vmem:[#allocation4 + $0x17e0] sm:$0xff]  ;;  %v2247_v20 = vcombine.high %v18825_v10, %v18825_v10 }
 0x2ba   : > { %10260 = vmatprep.subr.bf16.mxu0 %v15655_v27  ;;  %10752 = vmatprep.subr.bf16.mxu1 %v15657_v29  ;;  %v15705_v27 = vcombine.high %v1372_v21, %v1376_v22  ;;  %v1379_v29 = vld [vmem:[#allocation4 + $0x1680] sm:$0xff] }
 0x2bb   : > { %v15710_v43 = vcombine.low %v1379_v29, %v1383_v30 }
 0x2bd   : > { %10261 = vmatpush1.bf16.msra.mxu0 %v15654_v63  ;;  %10753 = vmatpush1.bf16.msra.mxu1 %v15656_v59  ;;  %v15704_v63 = vcombine.low %v1372_v21, %v1376_v22  ;;  %v15711_v59 = vcombine.high %v1379_v29, %v1383_v30  ;;  %v1420_v21 = vld [vmem:[#allocation4 + $0x17c8] sm:$0xff]  ;;  %v1427_v29 = vld [vmem:[#allocation4 + $0x1800] sm:$0xff] }
 0x2be   : > { %10262 = vmatprep.subr.bf16.mxu0 %v15663_v37  ;;  %10754 = vmatprep.subr.bf16.mxu1 %v15665_v39  ;;  %v15713_v37 = vcombine.high %v1380_v31, %v1384_v32  ;;  %v1387_v39 = vld [vmem:[#allocation4 + $0x16c0] sm:$0xff]  ;;  %v1424_v22 = vld [vmem:[#allocation4 + $0x17e8] sm:$0xff] }
 0x2bf   : > { %v15718_v54 = vcombine.low %v1387_v39, %v1391_v40  ;;  %v1431_v30 = vld [vmem:[#allocation4 + $0x1820] sm:$0xff]  ;;  %v15752_v10 = vcombine.low %v1420_v21, %v1424_v22 }
 0x2c1   : > { %10263 = vmatpush1.bf16.msra.mxu0 %v15662_v46  ;;  %10755 = vmatpush1.bf16.msra.mxu1 %v15664_v47  ;;  %v15712_v46 = vcombine.low %v1380_v31, %v1384_v32  ;;  %v15719_v47 = vcombine.high %v1387_v39, %v1391_v40  ;;  %v18859_v31 = vrot.slane %v2247_v20, %v18766_v53  ;;  %v1428_v32 = vld [vmem:[#allocation4 + $0x1808] sm:$0xff]  ;;  %v1435_v39 = vld [vmem:[#allocation4 + $0x1840] sm:$0xff] }
 0x2c2   : > { %10264 = vmatprep.subr.bf16.mxu0 %v15671_v48  ;;  %10756 = vmatprep.subr.bf16.mxu1 %v15673_v49  ;;  %v15721_v48 = vcombine.high %v1388_v41, %v1392_v42  ;;  %v1395_v49 = vld [vmem:[#allocation4 + $0x1700] sm:$0xff] }
 0x2c3   : > { %v15726_v2 = vcombine.low %v1395_v49, %v1399_v50  ;;  %v1439_v40 = vld [vmem:[#allocation4 + $0x1860] sm:$0xff] }
 0x2c5   : > { %10265 = vmatpush1.bf16.msra.mxu0 %v15670_v56  ;;  %10757 = vmatpush1.bf16.msra.mxu1 %v15672_v57  ;;  %v15720_v56 = vcombine.low %v1388_v41, %v1392_v42  ;;  %v15727_v57 = vcombine.high %v1395_v49, %v1399_v50  ;;  %v2263_v41 = vcombine.high %v18859_v31, %v18859_v31 }
 0x2c6   : > { %10266 = vmatprep.subr.bf16.mxu0 %v15679_v58  ;;  %10758 = vmatprep.subr.bf16.mxu1 %v15681_v60  ;;  %v15729_v58 = vcombine.high %v1396_v51, %v1400_v52  ;;  %v1403_v60 = vld [vmem:[#allocation4 + $0x1740] sm:$0xff]  ;;  %v18865_v42 = vcombine.high %v18846_v1, %v18846_v1  ;;  %v15767_v49 = vcombine.high %v1435_v39, %v1439_v40 }
 0x2c7   : > { %v15734_v17 = vcombine.low %v1403_v60, %v1407_v61 }
 0x2c9   : > { %10267 = vmatpush1.bf16.msra.mxu0 %v15678_v3  ;;  %10759 = vmatpush1.bf16.msra.mxu1 %v15680_v5  ;;  %v15728_v3 = vcombine.low %v1396_v51, %v1400_v52  ;;  %v15735_v5 = vcombine.high %v1403_v60, %v1407_v61  ;;  %v1443_v51 = vld [vmem:[#allocation4 + $0x1880] sm:$0xff] }
 0x2ca   : > { %10268 = vmatprep.subr.bf16.mxu0 %v15687_v6  ;;  %10760 = vmatprep.subr.bf16.mxu1 %v15689_v7  ;;  %v15737_v6 = vcombine.high %v1404_v62, %v1408_v0  ;;  %v1411_v7 = vld [vmem:[#allocation4 + $0x1780] sm:$0xff] }
 0x2cb   : > { %v1447_v52 = vld [vmem:[#allocation4 + $0x18a0] sm:$0xff] }
 0x2cc   : > { %v15775_v61 = vcombine.high %v1443_v51, %v1447_v52 }
 0x2cd   : > { %10269 = vmatpush1.bf16.msra.mxu0 %v15686_v35  ;;  %10761 = vmatpush1.bf16.msra.mxu1 %v15688_v15  ;;  %v15736_v35 = vcombine.low %v1404_v62, %v1408_v0  ;;  %v15743_v15 = vcombine.high %v1411_v7, %v1415_v8  ;;  %v1451_v0 = vld [vmem:[#allocation4 + $0x18c0] sm:$0xff] }
 0x2ce   : > { %10270 = vmatprep.subr.bf16.mxu0 %v15695_v16  ;;  %10762 = vmatprep.subr.bf16.mxu1 %v15697_v18  ;;  %v15745_v16 = vcombine.high %v1412_v11, %v1416_v12  ;;  %v1419_v18 = vld [vmem:[#allocation4 + $0x17c0] sm:$0xff] }
 0x2d1   : > { %10271 = vmatpush1.bf16.msra.mxu0 %v15694_v23  ;;  %10763 = vmatpush1.bf16.msra.mxu1 %v15696_v25  ;;  %v15742_v23 = vcombine.low %v1411_v7, %v1415_v8  ;;  %v15744_v25 = vcombine.low %v1412_v11, %v1416_v12  ;;  %v1459_v12 = vld [vmem:[#allocation4 + $0x1900] sm:$0xff] }
 0x2d2   : > { %10272 = vmatprep.subr.bf16.mxu0 %v15703_v26  ;;  %10764 = vmatprep.subr.bf16.mxu1 %v15705_v27  ;;  %v15751_v26 = vcombine.high %v1419_v18, %v1423_v19  ;;  %v15753_v27 = vcombine.high %v1420_v21, %v1424_v22  ;;  %v1467_v21 = vld [vmem:[#allocation4 + $0x1940] sm:$0xff] }
 0x2d3   : > { %v1471_v22 = vld [vmem:[#allocation4 + $0x1960] sm:$0xff] }
 0x2d5   : > { %10273 = vmatpush1.bf16.msra.mxu0 %v15702_v33  ;;  %10765 = vmatpush1.bf16.msra.mxu1 %v15704_v63  ;;  %v1432_v33 = vld [vmem:[#allocation4 + $0x1828] sm:$0xff]  ;;  %v15750_v63 = vcombine.low %v1419_v18, %v1423_v19 }
 0x2d6   : > { %10274 = vmatprep.subr.bf16.mxu0 %v15711_v59  ;;  %10766 = vmatprep.subr.bf16.mxu1 %v15713_v37  ;;  %v15759_v59 = vcombine.high %v1427_v29, %v1431_v30  ;;  %v15761_v37 = vcombine.high %v1428_v32, %v1432_v33 }
 0x2d9   : > { %10275 = vmatpush1.bf16.msra.mxu0 %v15710_v43  ;;  %10767 = vmatpush1.bf16.msra.mxu1 %v15712_v46  ;;  %v1436_v43 = vld [vmem:[#allocation4 + $0x1848] sm:$0xff] }
 0x2da   : > { %10276 = vmatprep.subr.bf16.mxu0 %v15719_v47  ;;  %10768 = vmatprep.subr.bf16.mxu1 %v15721_v48  ;;  %v1440_v46 = vld [vmem:[#allocation4 + $0x1868] sm:$0xff]  ;;  %v15758_v47 = vcombine.low %v1427_v29, %v1431_v30  ;;  %v15760_v48 = vcombine.low %v1428_v32, %v1432_v33  ;;  %v15799_v29 = vcombine.high %v1467_v21, %v1471_v22  ;;  %v1475_v32 = vld [vmem:[#allocation4 + $0x1980] sm:$0xff] }
 0x2db   : > { %v15769_v50 = vcombine.high %v1436_v43, %v1440_v46  ;;  %v15768_v60 = vcombine.low %v1436_v43, %v1440_v46  ;;  %v1479_v33 = vld [vmem:[#allocation4 + $0x19a0] sm:$0xff]  ;;  %v1484_v46 = vld [vmem:[#allocation4 + $0x19c8] sm:$0xff] }
 0x2dc   : > { %v1487_v43 = vld [vmem:[#allocation4 + $0x19e0] sm:$0xff] }
 0x2dd   : > { %10277 = vmatpush1.bf16.msra.mxu0 %v15718_v54  ;;  %10769 = vmatpush1.bf16.msra.mxu1 %v15720_v56  ;;  %v18868_v54 = vrot.slane %v2263_v41, %v18766_v53  ;;  %v1444_v56 = vld [vmem:[#allocation4 + $0x1888] sm:$0xff]  ;;  %v1483_v41 = vld [vmem:[#allocation4 + $0x19c0] sm:$0xff] }
 0x2de   : > { %10278 = vmatprep.subr.bf16.mxu0 %v15727_v57  ;;  %10770 = vmatprep.subr.bf16.mxu1 %v15729_v58  ;;  %v1448_v57 = vld [vmem:[#allocation4 + $0x18a8] sm:$0xff]  ;;  %v15766_v58 = vcombine.low %v1435_v39, %v1439_v40  ;;  %v15807_v39 = vcombine.high %v1475_v32, %v1479_v33 }
 0x2df   : > { %v15777_v62 = vcombine.high %v1444_v56, %v1448_v57  ;;  %v15776_v7 = vcombine.low %v1444_v56, %v1448_v57  ;;  %v1495_v56 = vld [vmem:[#allocation4 + $0x1a20] sm:$0xff]  ;;  %v1492_v57 = vld [vmem:[#allocation4 + $0x1a08] sm:$0xff] }
 0x2e1   : > { %10279 = vmatpush1.bf16.msra.mxu0 %v15726_v2  ;;  %10771 = vmatpush1.bf16.msra.mxu1 %v15728_v3  ;;  %v1455_v2 = vld [vmem:[#allocation4 + $0x18e0] sm:$0xff]  ;;  %v1452_v3 = vld [vmem:[#allocation4 + $0x18c8] sm:$0xff] }
 0x2e2   : > { %10280 = vmatprep.subr.bf16.mxu0 %v15735_v5  ;;  %10772 = vmatprep.subr.bf16.mxu1 %v15737_v6  ;;  %v1456_v5 = vld [vmem:[#allocation4 + $0x18e8] sm:$0xff]  ;;  %v15774_v6 = vcombine.low %v1443_v51, %v1447_v52  ;;  %v15783_v8 = vcombine.high %v1451_v0, %v1455_v2  ;;  %v1491_v52 = vld [vmem:[#allocation4 + $0x1a00] sm:$0xff] }
 0x2e3   : > { %v15785_v11 = vcombine.high %v1452_v3, %v1456_v5  ;;  %v15784_v18 = vcombine.low %v1452_v3, %v1456_v5  ;;  %v1503_v3 = vld [vmem:[#allocation4 + $0x1a60] sm:$0xff]  ;;  %v1500_v5 = vld [vmem:[#allocation4 + $0x1a48] sm:$0xff] }
 0x2e5   : > { %10281 = vmatpush1.bf16.msra.mxu0 %v15734_v17  ;;  %10773 = vmatpush1.bf16.msra.mxu1 %v15736_v35  ;;  %v1463_v17 = vld [vmem:[#allocation4 + $0x1920] sm:$0xff]  ;;  %v1460_v35 = vld [vmem:[#allocation4 + $0x1908] sm:$0xff] }
 0x2e6   : > { %10282 = vmatprep.subr.bf16.mxu0 %v15743_v15  ;;  %10774 = vmatprep.subr.bf16.mxu1 %v15745_v16  ;;  %v1464_v15 = vld [vmem:[#allocation4 + $0x1928] sm:$0xff]  ;;  %v15782_v16 = vcombine.low %v1451_v0, %v1455_v2  ;;  %v15791_v19 = vcombine.high %v1459_v12, %v1463_v17  ;;  %v1499_v2 = vld [vmem:[#allocation4 + $0x1a40] sm:$0xff] }
 0x2e7   : > { %v15793_v20 = vcombine.high %v1460_v35, %v1464_v15 }
 0x2e9   : > { %10283 = vmatpush1.bf16.msra.mxu0 %v15742_v23  ;;  %10775 = vmatpush1.bf16.msra.mxu1 %v15744_v25  ;;  %v1468_v23 = vld [vmem:[#allocation4 + $0x1948] sm:$0xff] }
 0x2ea   : > { %10284 = vmatprep.subr.bf16.mxu0 %v15751_v26  ;;  %10776 = vmatprep.subr.bf16.mxu1 %v15753_v27  ;;  %v1472_v25 = vld [vmem:[#allocation4 + $0x1968] sm:$0xff]  ;;  %v15790_v26 = vcombine.low %v1459_v12, %v1463_v17  ;;  %v15792_v27 = vcombine.low %v1460_v35, %v1464_v15  ;;  %v1507_v17 = vld [vmem:[#allocation4 + $0x1a80] sm:$0xff] }
 0x2eb   : > { %v15801_v30 = vcombine.high %v1468_v23, %v1472_v25  ;;  %v1511_v35 = vld [vmem:[#allocation4 + $0x1aa0] sm:$0xff]  ;;  %v1508_v15 = vld [vmem:[#allocation4 + $0x1a88] sm:$0xff] }
 0x2ed   : > { %10285 = vmatpush1.bf16.msra.mxu0 %v15750_v63  ;;  %10777 = vmatpush1.bf16.msra.mxu1 %v15752_v10  ;;  %v1476_v63 = vld [vmem:[#allocation4 + $0x1988] sm:$0xff] }
 0x2ee   : > { %10295 = vmatprep.subr.bf16.mxu0 %v15759_v59  ;;  %10787 = vmatprep.subr.bf16.mxu1 %v15761_v37  ;;  %v1480_v10 = vld [vmem:[#allocation4 + $0x19a8] sm:$0xff]  ;;  %v15798_v59 = vcombine.low %v1467_v21, %v1471_v22  ;;  %v15800_v37 = vcombine.low %v1468_v23, %v1472_v25  ;;  %v1515_v22 = vld [vmem:[#allocation4 + $0x1ac0] sm:$0xff] }
 0x2ef   : > { %v15809_v40 = vcombine.high %v1476_v63, %v1480_v10  ;;  %v1519_v23 = vld [vmem:[#allocation4 + $0x1ae0] sm:$0xff]  ;;  %v1516_v25 = vld [vmem:[#allocation4 + $0x1ac8] sm:$0xff] }
 0x2f0   : > { %10287 = vmatmul.mubr.bf16.vlgmr.msra.gmra.mrb[0].mxu0 %v18865_v42  ;;  %10779 = vmatmul.mubr.bf16.vlgmr.msra.gmra.mrb[0].mxu1 %v18865_v42 }
 0x2f1   : > { %10296 = vmatpush1.bf16.msra.mxu0 %v15758_v47  ;;  %10788 = vmatpush1.bf16.msra.mxu1 %v15760_v48  ;;  %v1488_v47 = vld [vmem:[#allocation4 + $0x19e8] sm:$0xff]  ;;  %v15806_v48 = vcombine.low %v1475_v32, %v1479_v33  ;;  %v1523_v33 = vld [vmem:[#allocation4 + $0x1b00] sm:$0xff] }
 0x2f2   : > { %10297 = vmatprep.subr.bf16.mxu0 %v15767_v49  ;;  %10789 = vmatprep.subr.bf16.mxu1 %v15769_v50  ;;  %v15808_v49 = vcombine.low %v1476_v63, %v1480_v10  ;;  %v15815_v50 = vcombine.high %v1483_v41, %v1487_v43  ;;  %v15817_v51 = vcombine.high %v1484_v46, %v1488_v47  ;;  %v1527_v63 = vld [vmem:[#allocation4 + $0x1b20] sm:$0xff]  ;;  %v1524_v10 = vld [vmem:[#allocation4 + $0x1b08] sm:$0xff] }
 0x2f3   : > { %10327 = vmatprep.mubr.bf16.mxu0 %v18868_v54  ;;  %10819 = vmatprep.mubr.bf16.mxu1 %v18868_v54 }
 0x2f5   : > { %10298 = vmatpush1.bf16.msra.mxu0 %v15766_v58  ;;  %10790 = vmatpush1.bf16.msra.mxu1 %v15768_v60  ;;  %v1496_v58 = vld [vmem:[#allocation4 + $0x1a28] sm:$0xff]  ;;  %v15814_v60 = vcombine.low %v1483_v41, %v1487_v43  ;;  %v1531_v43 = vld [vmem:[#allocation4 + $0x1b40] sm:$0xff] }
 0x2f6   : > { %10299 = vmatprep.subr.bf16.mxu0 %v15775_v61  ;;  %10791 = vmatprep.subr.bf16.mxu1 %v15777_v62  ;;  %v15816_v61 = vcombine.low %v1484_v46, %v1488_v47  ;;  %v15823_v62 = vcombine.high %v1491_v52, %v1495_v56  ;;  %v15825_v0 = vcombine.high %v1492_v57, %v1496_v58  ;;  %v1535_v46 = vld [vmem:[#allocation4 + $0x1b60] sm:$0xff]  ;;  %v1532_v47 = vld [vmem:[#allocation4 + $0x1b48] sm:$0xff] }
 0x2f9   : > { %10300 = vmatpush1.bf16.msra.mxu0 %v15774_v6  ;;  %10792 = vmatpush1.bf16.msra.mxu1 %v15776_v7  ;;  %v1504_v6 = vld [vmem:[#allocation4 + $0x1a68] sm:$0xff]  ;;  %v15822_v7 = vcombine.low %v1491_v52, %v1495_v56  ;;  %v1539_v56 = vld [vmem:[#allocation4 + $0x1b80] sm:$0xff] }
 0x2fa   : > { %10301 = vmatprep.subr.bf16.mxu0 %v15783_v8  ;;  %10793 = vmatprep.subr.bf16.mxu1 %v15785_v11  ;;  %v15824_v8 = vcombine.low %v1492_v57, %v1496_v58  ;;  %v15831_v11 = vcombine.high %v1499_v2, %v1503_v3  ;;  %v15833_v12 = vcombine.high %v1500_v5, %v1504_v6  ;;  %v1543_v57 = vld [vmem:[#allocation4 + $0x1ba0] sm:$0xff]  ;;  %v1540_v58 = vld [vmem:[#allocation4 + $0x1b88] sm:$0xff] }
 0x2fd   : > { %10302 = vmatpush1.bf16.msra.mxu0 %v15782_v16  ;;  %10794 = vmatpush1.bf16.msra.mxu1 %v15784_v18  ;;  %v1512_v16 = vld [vmem:[#allocation4 + $0x1aa8] sm:$0xff]  ;;  %v15830_v18 = vcombine.low %v1499_v2, %v1503_v3  ;;  %v1547_v3 = vld [vmem:[#allocation4 + $0x1bc0] sm:$0xff] }
 0x2fe   : > { %10303 = vmatprep.subr.bf16.mxu0 %v15791_v19  ;;  %10795 = vmatprep.subr.bf16.mxu1 %v15793_v20  ;;  %v15832_v19 = vcombine.low %v1500_v5, %v1504_v6  ;;  %v15839_v20 = vcombine.high %v1507_v17, %v1511_v35  ;;  %v15841_v21 = vcombine.high %v1508_v15, %v1512_v16  ;;  %v1551_v5 = vld [vmem:[#allocation4 + $0x1be0] sm:$0xff]  ;;  %v1548_v6 = vld [vmem:[#allocation4 + $0x1bc8] sm:$0xff] }
 0x301   : > { %10304 = vmatpush1.bf16.msra.mxu0 %v15790_v26  ;;  %10796 = vmatpush1.bf16.msra.mxu1 %v15792_v27  ;;  %v1520_v26 = vld [vmem:[#allocation4 + $0x1ae8] sm:$0xff]  ;;  %v15838_v27 = vcombine.low %v1507_v17, %v1511_v35  ;;  %v1555_v35 = vld [vmem:[#allocation4 + $0x1c00] sm:$0xff] }
 0x302   : > { %10305 = vmatprep.subr.bf16.mxu0 %v15799_v29  ;;  %10797 = vmatprep.subr.bf16.mxu1 %v15801_v30  ;;  %v15840_v29 = vcombine.low %v1508_v15, %v1512_v16  ;;  %v15847_v30 = vcombine.high %v1515_v22, %v1519_v23  ;;  %v15849_v32 = vcombine.high %v1516_v25, %v1520_v26  ;;  %v1559_v15 = vld [vmem:[#allocation4 + $0x1c20] sm:$0xff]  ;;  %v1556_v16 = vld [vmem:[#allocation4 + $0x1c08] sm:$0xff] }
 0x305   : > { %10306 = vmatpush1.bf16.msra.mxu0 %v15798_v59  ;;  %10798 = vmatpush1.bf16.msra.mxu1 %v15800_v37  ;;  %v1528_v59 = vld [vmem:[#allocation4 + $0x1b28] sm:$0xff]  ;;  %v15846_v37 = vcombine.low %v1515_v22, %v1519_v23  ;;  %v1563_v23 = vld [vmem:[#allocation4 + $0x1c40] sm:$0xff] }
 0x306   : > { %10307 = vmatprep.subr.bf16.mxu0 %v15807_v39  ;;  %10799 = vmatprep.subr.bf16.mxu1 %v15809_v40  ;;  %v15848_v39 = vcombine.low %v1516_v25, %v1520_v26  ;;  %v15855_v40 = vcombine.high %v1523_v33, %v1527_v63  ;;  %v15857_v41 = vcombine.high %v1524_v10, %v1528_v59  ;;  %v1567_v25 = vld [vmem:[#allocation4 + $0x1c60] sm:$0xff] }
 0x307   : > { %v18876_v26 = vrot.slane %v18859_v31, %v18766_v53  ;;  %v1572_v31 = vld [vmem:[#allocation4 + $0x1c88] sm:$0xff] }
 0x309   : > { %10308 = vmatpush1.bf16.msra.mxu0 %v15806_v48  ;;  %10800 = vmatpush1.bf16.msra.mxu1 %v15808_v49  ;;  %v1536_v48 = vld [vmem:[#allocation4 + $0x1b68] sm:$0xff]  ;;  %v15854_v49 = vcombine.low %v1523_v33, %v1527_v63  ;;  %v15895_v33 = vcombine.high %v1563_v23, %v1567_v25 }
 0x30a   : > { %10309 = vmatprep.subr.bf16.mxu0 %v15815_v50  ;;  %10801 = vmatprep.subr.bf16.mxu1 %v15817_v51  ;;  %v15856_v50 = vcombine.low %v1524_v10, %v1528_v59  ;;  %v15863_v51 = vcombine.high %v1531_v43, %v1535_v46  ;;  %v15865_v52 = vcombine.high %v1532_v47, %v1536_v48  ;;  %v1571_v10 = vld [vmem:[#allocation4 + $0x1c80] sm:$0xff] }
 0x30b   : > { %v1575_v59 = vld [vmem:[#allocation4 + $0x1ca0] sm:$0xff] }
 0x30d   : > { %10310 = vmatpush1.bf16.msra.mxu0 %v15814_v60  ;;  %10802 = vmatpush1.bf16.msra.mxu1 %v15816_v61  ;;  %v1544_v60 = vld [vmem:[#allocation4 + $0x1ba8] sm:$0xff]  ;;  %v15862_v61 = vcombine.low %v1531_v43, %v1535_v46  ;;  %v15903_v43 = vcombine.high %v1571_v10, %v1575_v59 }
 0x30e   : > { %10311 = vmatprep.subr.bf16.mxu0 %v15823_v62  ;;  %10803 = vmatprep.subr.bf16.mxu1 %v15825_v0  ;;  %v15864_v62 = vcombine.low %v1532_v47, %v1536_v48  ;;  %v15871_v0 = vcombine.high %v1539_v56, %v1543_v57  ;;  %v15873_v2 = vcombine.high %v1540_v58, %v1544_v60  ;;  %v1579_v47 = vld [vmem:[#allocation4 + $0x1cc0] sm:$0xff] }
 0x30f   : > { %v1583_v48 = vld [vmem:[#allocation4 + $0x1ce0] sm:$0xff] }
 0x311   : > { %10312 = vmatpush1.bf16.msra.mxu0 %v15822_v7  ;;  %10804 = vmatpush1.bf16.msra.mxu1 %v15824_v8  ;;  %v1552_v7 = vld [vmem:[#allocation4 + $0x1be8] sm:$0xff]  ;;  %v15870_v8 = vcombine.low %v1539_v56, %v1543_v57  ;;  %v15911_v56 = vcombine.high %v1579_v47, %v1583_v48 }
 0x312   : > { %10313 = vmatprep.subr.bf16.mxu0 %v15831_v11  ;;  %10805 = vmatprep.subr.bf16.mxu1 %v15833_v12  ;;  %v15872_v11 = vcombine.low %v1540_v58, %v1544_v60  ;;  %v15879_v12 = vcombine.high %v1547_v3, %v1551_v5  ;;  %v15881_v17 = vcombine.high %v1548_v6, %v1552_v7  ;;  %v1587_v58 = vld [vmem:[#allocation4 + $0x1d00] sm:$0xff] }
 0x313   : > { %v1591_v60 = vld [vmem:[#allocation4 + $0x1d20] sm:$0xff] }
 0x315   : > { %10314 = vmatpush1.bf16.msra.mxu0 %v15830_v18  ;;  %10806 = vmatpush1.bf16.msra.mxu1 %v15832_v19  ;;  %v1560_v18 = vld [vmem:[#allocation4 + $0x1c28] sm:$0xff]  ;;  %v15878_v19 = vcombine.low %v1547_v3, %v1551_v5  ;;  %v15919_v3 = vcombine.high %v1587_v58, %v1591_v60 }
 0x316   : > { %10315 = vmatprep.subr.bf16.mxu0 %v15839_v20  ;;  %10807 = vmatprep.subr.bf16.mxu1 %v15841_v21  ;;  %v15880_v20 = vcombine.low %v1548_v6, %v1552_v7  ;;  %v15887_v21 = vcombine.high %v1555_v35, %v1559_v15  ;;  %v15889_v22 = vcombine.high %v1556_v16, %v1560_v18  ;;  %v1595_v6 = vld [vmem:[#allocation4 + $0x1d40] sm:$0xff] }
 0x317   : > { %v1599_v7 = vld [vmem:[#allocation4 + $0x1d60] sm:$0xff] }
 0x319   : > { %10316 = vmatpush1.bf16.msra.mxu0 %v15838_v27  ;;  %10808 = vmatpush1.bf16.msra.mxu1 %v15840_v29  ;;  %v1564_v27 = vld [vmem:[#allocation4 + $0x1c48] sm:$0xff] }
 0x31a   : > { %10317 = vmatprep.subr.bf16.mxu0 %v15847_v30  ;;  %10809 = vmatprep.subr.bf16.mxu1 %v15849_v32  ;;  %v1568_v29 = vld [vmem:[#allocation4 + $0x1c68] sm:$0xff]  ;;  %v15886_v30 = vcombine.low %v1555_v35, %v1559_v15  ;;  %v15888_v32 = vcombine.low %v1556_v16, %v1560_v18  ;;  %v15927_v35 = vcombine.high %v1595_v6, %v1599_v7  ;;  %v1603_v16 = vld [vmem:[#allocation4 + $0x1d80] sm:$0xff] }
 0x31b   : > { %v15897_v63 = vcombine.high %v1564_v27, %v1568_v29  ;;  %v1607_v18 = vld [vmem:[#allocation4 + $0x1da0] sm:$0xff] }
 0x31d   : > { %10318 = vmatpush1.bf16.msra.mxu0 %v15846_v37  ;;  %10810 = vmatpush1.bf16.msra.mxu1 %v15848_v39  ;;  %v18880_v37 = vcombine.high %v18868_v54, %v18868_v54  ;;  %v1576_v39 = vld [vmem:[#allocation4 + $0x1ca8] sm:$0xff] }
 0x31e   : > { %10319 = vmatprep.subr.bf16.mxu0 %v15855_v40  ;;  %10811 = vmatprep.subr.bf16.mxu1 %v15857_v41  ;;  %v15894_v40 = vcombine.low %v1563_v23, %v1567_v25  ;;  %v15896_v41 = vcombine.low %v1564_v27, %v1568_v29  ;;  %v15905_v46 = vcombine.high %v1572_v31, %v1576_v39  ;;  %v1611_v27 = vld [vmem:[#allocation4 + $0x1dc0] sm:$0xff] }
 0x31f   : > { %v15935_v23 = vcombine.high %v1603_v16, %v1607_v18  ;;  %v1615_v29 = vld [vmem:[#allocation4 + $0x1de0] sm:$0xff] }
 0x321   : > { %10320 = vmatpush1.bf16.msra.mxu0 %v15854_v49  ;;  %10812 = vmatpush1.bf16.msra.mxu1 %v15856_v50  ;;  %v1580_v49 = vld [vmem:[#allocation4 + $0x1cc8] sm:$0xff] }
 0x322   : > { %10321 = vmatprep.subr.bf16.mxu0 %v15863_v51  ;;  %10813 = vmatprep.subr.bf16.mxu1 %v15865_v52  ;;  %v1584_v50 = vld [vmem:[#allocation4 + $0x1ce8] sm:$0xff]  ;;  %v15902_v51 = vcombine.low %v1571_v10, %v1575_v59  ;;  %v15904_v52 = vcombine.low %v1572_v31, %v1576_v39  ;;  %v15943_v10 = vcombine.high %v1611_v27, %v1615_v29  ;;  %v1619_v31 = vld [vmem:[#allocation4 + $0x1e00] sm:$0xff] }
 0x323   : > { %v15913_v57 = vcombine.high %v1580_v49, %v1584_v50  ;;  %v1623_v39 = vld [vmem:[#allocation4 + $0x1e20] sm:$0xff] }
 0x325   : > { %10322 = vmatpush1.bf16.msra.mxu0 %v15862_v61  ;;  %10814 = vmatpush1.bf16.msra.mxu1 %v15864_v62  ;;  %v1588_v61 = vld [vmem:[#allocation4 + $0x1d08] sm:$0xff] }
 0x326   : > { %10323 = vmatprep.subr.bf16.mxu0 %v15871_v0  ;;  %10815 = vmatprep.subr.bf16.mxu1 %v15873_v2  ;;  %v1592_v62 = vld [vmem:[#allocation4 + $0x1d28] sm:$0xff]  ;;  %v15910_v0 = vcombine.low %v1579_v47, %v1583_v48  ;;  %v15912_v2 = vcombine.low %v1580_v49, %v1584_v50  ;;  %v15951_v47 = vcombine.high %v1619_v31, %v1623_v39  ;;  %v1627_v49 = vld [vmem:[#allocation4 + $0x1e40] sm:$0xff] }
 0x327   : > { %v15921_v5 = vcombine.high %v1588_v61, %v1592_v62  ;;  %v1631_v50 = vld [vmem:[#allocation4 + $0x1e60] sm:$0xff] }
 0x329   : > { %10324 = vmatpush1.bf16.msra.mxu0 %v15870_v8  ;;  %10816 = vmatpush1.bf16.msra.mxu1 %v15872_v11  ;;  %v1596_v8 = vld [vmem:[#allocation4 + $0x1d48] sm:$0xff] }
 0x32a   : > { %10325 = vmatprep.subr.bf16.mxu0 %v15879_v12  ;;  %10817 = vmatprep.subr.bf16.mxu1 %v15881_v17  ;;  %v1600_v11 = vld [vmem:[#allocation4 + $0x1d68] sm:$0xff]  ;;  %v15918_v12 = vcombine.low %v1587_v58, %v1591_v60  ;;  %v15920_v17 = vcombine.low %v1588_v61, %v1592_v62  ;;  %v15959_v58 = vcombine.high %v1627_v49, %v1631_v50  ;;  %v1635_v61 = vld [vmem:[#allocation4 + $0x1e80] sm:$0xff] }
 0x32b   : > { %v15929_v15 = vcombine.high %v1596_v8, %v1600_v11  ;;  %v1639_v62 = vld [vmem:[#allocation4 + $0x1ea0] sm:$0xff] }
 0x32d   : > { %10326 = vmatpush1.bf16.msra.mxu0 %v15878_v19  ;;  %10818 = vmatpush1.bf16.msra.mxu1 %v15880_v20  ;;  %v1604_v19 = vld [vmem:[#allocation4 + $0x1d88] sm:$0xff] }
 0x32e   : > { %10336 = vmatprep.subr.bf16.mxu0 %v15887_v21  ;;  %10828 = vmatprep.subr.bf16.mxu1 %v15889_v22  ;;  %v1608_v20 = vld [vmem:[#allocation4 + $0x1da8] sm:$0xff]  ;;  %v15926_v21 = vcombine.low %v1595_v6, %v1599_v7  ;;  %v15928_v22 = vcombine.low %v1596_v8, %v1600_v11  ;;  %v15967_v6 = vcombine.high %v1635_v61, %v1639_v62  ;;  %v1643_v8 = vld [vmem:[#allocation4 + $0x1ec0] sm:$0xff] }
 0x32f   : > { %v15937_v25 = vcombine.high %v1604_v19, %v1608_v20  ;;  %v1647_v11 = vld [vmem:[#allocation4 + $0x1ee0] sm:$0xff] }
 0x330   : > { %10328 = vmatmul.mubr.bf16.vlgmr.msra.gmra.mrb[0].mxu0 %v18876_v26  ;;  %10820 = vmatmul.mubr.bf16.vlgmr.msra.gmra.mrb[0].mxu1 %v18876_v26 }
 0x331   : > { %10337 = vmatpush1.bf16.msra.mxu0 %v15886_v30  ;;  %10829 = vmatpush1.bf16.msra.mxu1 %v15888_v32  ;;  %v1612_v30 = vld [vmem:[#allocation4 + $0x1dc8] sm:$0xff] }
 0x332   : > { %10338 = vmatprep.subr.bf16.mxu0 %v15895_v33  ;;  %10830 = vmatprep.subr.bf16.mxu1 %v15897_v63  ;;  %v1616_v32 = vld [vmem:[#allocation4 + $0x1de8] sm:$0xff]  ;;  %v15934_v33 = vcombine.low %v1603_v16, %v1607_v18  ;;  %v15936_v63 = vcombine.low %v1604_v19, %v1608_v20  ;;  %v15975_v16 = vcombine.high %v1643_v8, %v1647_v11  ;;  %v1651_v19 = vld [vmem:[#allocation4 + $0x1f00] sm:$0xff] }
 0x333   : > { %10368 = vmatprep.mubr.bf16.mxu0 %v18880_v37  ;;  %10860 = vmatprep.mubr.bf16.mxu1 %v18880_v37  ;;  %v15945_v59 = vcombine.high %v1612_v30, %v1616_v32  ;;  %v1655_v20 = vld [vmem:[#allocation4 + $0x1f20] sm:$0xff] }
 0x335   : > { %10339 = vmatpush1.bf16.msra.mxu0 %v15894_v40  ;;  %10831 = vmatpush1.bf16.msra.mxu1 %v15896_v41  ;;  %v1620_v40 = vld [vmem:[#allocation4 + $0x1e08] sm:$0xff] }
 0x336   : > { %10340 = vmatprep.subr.bf16.mxu0 %v15903_v43  ;;  %10832 = vmatprep.subr.bf16.mxu1 %v15905_v46  ;;  %v1624_v41 = vld [vmem:[#allocation4 + $0x1e28] sm:$0xff]  ;;  %v15942_v43 = vcombine.low %v1611_v27, %v1615_v29  ;;  %v15944_v46 = vcombine.low %v1612_v30, %v1616_v32  ;;  %v15983_v27 = vcombine.high %v1651_v19, %v1655_v20  ;;  %v1659_v30 = vld [vmem:[#allocation4 + $0x1f40] sm:$0xff] }
 0x337   : > { %v15953_v48 = vcombine.high %v1620_v40, %v1624_v41  ;;  %v1663_v32 = vld [vmem:[#allocation4 + $0x1f60] sm:$0xff] }
 0x339   : > { %10341 = vmatpush1.bf16.msra.mxu0 %v15902_v51  ;;  %10833 = vmatpush1.bf16.msra.mxu1 %v15904_v52  ;;  %v1628_v51 = vld [vmem:[#allocation4 + $0x1e48] sm:$0xff] }
 0x33a   : > { %10342 = vmatprep.subr.bf16.mxu0 %v15911_v56  ;;  %10834 = vmatprep.subr.bf16.mxu1 %v15913_v57  ;;  %v1632_v52 = vld [vmem:[#allocation4 + $0x1e68] sm:$0xff]  ;;  %v15950_v56 = vcombine.low %v1619_v31, %v1623_v39  ;;  %v15952_v57 = vcombine.low %v1620_v40, %v1624_v41  ;;  %v15991_v31 = vcombine.high %v1659_v30, %v1663_v32  ;;  %v1667_v40 = vld [vmem:[#allocation4 + $0x1f80] sm:$0xff] }
 0x33b   : > { %v15961_v60 = vcombine.high %v1628_v51, %v1632_v52  ;;  %v1671_v41 = vld [vmem:[#allocation4 + $0x1fa0] sm:$0xff] }
 0x33d   : > { %10343 = vmatpush1.bf16.msra.mxu0 %v15910_v0  ;;  %10835 = vmatpush1.bf16.msra.mxu1 %v15912_v2  ;;  %v1636_v0 = vld [vmem:[#allocation4 + $0x1e88] sm:$0xff] }
 0x33e   : > { %10344 = vmatprep.subr.bf16.mxu0 %v15919_v3  ;;  %10836 = vmatprep.subr.bf16.mxu1 %v15921_v5  ;;  %v1640_v2 = vld [vmem:[#allocation4 + $0x1ea8] sm:$0xff]  ;;  %v15958_v3 = vcombine.low %v1627_v49, %v1631_v50  ;;  %v15960_v5 = vcombine.low %v1628_v51, %v1632_v52  ;;  %v15999_v49 = vcombine.high %v1667_v40, %v1671_v41  ;;  %v1675_v51 = vld [vmem:[#allocation4 + $0x1fc0] sm:$0xff] }
 0x33f   : > { %v15969_v7 = vcombine.high %v1636_v0, %v1640_v2  ;;  %v1679_v52 = vld [vmem:[#allocation4 + $0x1fe0] sm:$0xff] }
 0x341   : > { %10345 = vmatpush1.bf16.msra.mxu0 %v15918_v12  ;;  %10837 = vmatpush1.bf16.msra.mxu1 %v15920_v17  ;;  %v1644_v12 = vld [vmem:[#allocation4 + $0x1ec8] sm:$0xff] }
 0x342   : > { %10346 = vmatprep.subr.bf16.mxu0 %v15927_v35  ;;  %10838 = vmatprep.subr.bf16.mxu1 %v15929_v15  ;;  %v1648_v17 = vld [vmem:[#allocation4 + $0x1ee8] sm:$0xff]  ;;  %v15966_v35 = vcombine.low %v1635_v61, %v1639_v62  ;;  %v15968_v15 = vcombine.low %v1636_v0, %v1640_v2  ;;  %v16007_v62 = vcombine.high %v1675_v51, %v1679_v52  ;;  %v1683_v2 = vld [vmem:[#allocation4 + $0x2000] sm:$0xff] }
 0x343   : > { %v15977_v18 = vcombine.high %v1644_v12, %v1648_v17 }
 0x345   : > { %10347 = vmatpush1.bf16.msra.mxu0 %v15926_v21  ;;  %10839 = vmatpush1.bf16.msra.mxu1 %v15928_v22  ;;  %v1652_v21 = vld [vmem:[#allocation4 + $0x1f08] sm:$0xff] }
 0x346   : > { %10348 = vmatprep.subr.bf16.mxu0 %v15935_v23  ;;  %10840 = vmatprep.subr.bf16.mxu1 %v15937_v25  ;;  %v1656_v22 = vld [vmem:[#allocation4 + $0x1f28] sm:$0xff]  ;;  %v15974_v23 = vcombine.low %v1643_v8, %v1647_v11  ;;  %v15976_v25 = vcombine.low %v1644_v12, %v1648_v17  ;;  %v16006_v8 = vcombine.low %v1675_v51, %v1679_v52  ;;  %v1719_v51 = vld [vmem:[#allocation4 + $0x2120] sm:$0xff] }
 0x347   : > { %v15985_v29 = vcombine.high %v1652_v21, %v1656_v22  ;;  %v1716_v52 = vld [vmem:[#allocation4 + $0x2108] sm:$0xff] }
 0x349   : > { %10349 = vmatpush1.bf16.msra.mxu0 %v15934_v33  ;;  %10841 = vmatpush1.bf16.msra.mxu1 %v15936_v63  ;;  %v1660_v33 = vld [vmem:[#allocation4 + $0x1f48] sm:$0xff] }
 0x34a   : > { %10350 = vmatprep.subr.bf16.mxu0 %v15943_v10  ;;  %10842 = vmatprep.subr.bf16.mxu1 %v15945_v59  ;;  %v1664_v63 = vld [vmem:[#allocation4 + $0x1f68] sm:$0xff]  ;;  %v15982_v10 = vcombine.low %v1651_v19, %v1655_v20  ;;  %v15984_v59 = vcombine.low %v1652_v21, %v1656_v22 }
 0x34b   : > { %v15993_v39 = vcombine.high %v1660_v33, %v1664_v63  ;;  %v1692_v19 = vld [vmem:[#allocation4 + $0x2048] sm:$0xff] }
 0x34c   : > { %v1696_v20 = vld [vmem:[#allocation4 + $0x2068] sm:$0xff] }
 0x34d   : > { %10351 = vmatpush1.bf16.msra.mxu0 %v15942_v43  ;;  %10843 = vmatpush1.bf16.msra.mxu1 %v15944_v46  ;;  %v1668_v43 = vld [vmem:[#allocation4 + $0x1f88] sm:$0xff] }
 0x34e   : > { %10352 = vmatprep.subr.bf16.mxu0 %v15951_v47  ;;  %10844 = vmatprep.subr.bf16.mxu1 %v15953_v48  ;;  %v1672_v46 = vld [vmem:[#allocation4 + $0x1fa8] sm:$0xff]  ;;  %v15990_v47 = vcombine.low %v1659_v30, %v1663_v32  ;;  %v15992_v48 = vcombine.low %v1660_v33, %v1664_v63 }
 0x34f   : > { %v16001_v50 = vcombine.high %v1668_v43, %v1672_v46  ;;  %v16000_v61 = vcombine.low %v1668_v43, %v1672_v46  ;;  %v1700_v32 = vld [vmem:[#allocation4 + $0x2088] sm:$0xff] }
 0x350   : > { %v1704_v33 = vld [vmem:[#allocation4 + $0x20a8] sm:$0xff] }
 0x351   : > { %10353 = vmatpush1.bf16.msra.mxu0 %v15950_v56  ;;  %10845 = vmatpush1.bf16.msra.mxu1 %v15952_v57  ;;  %v1676_v56 = vld [vmem:[#allocation4 + $0x1fc8] sm:$0xff] }
 0x352   : > { %10354 = vmatprep.subr.bf16.mxu0 %v15959_v58  ;;  %10846 = vmatprep.subr.bf16.mxu1 %v15961_v60  ;;  %v1680_v57 = vld [vmem:[#allocation4 + $0x1fe8] sm:$0xff]  ;;  %v15998_v60 = vcombine.low %v1667_v40, %v1671_v41  ;;  %v1711_v40 = vld [vmem:[#allocation4 + $0x20e0] sm:$0xff] }
 0x353   : > { %v18887_v58 = vld [vmem:[%s18763_s16 + $0x10] sm:$0xff]  ;;  %v16009_v0 = vcombine.high %v1676_v56, %v1680_v57  ;;  %v16008_v11 = vcombine.low %v1676_v56, %v1680_v57 }
 0x354   : > { %v1708_v41 = vld [vmem:[#allocation4 + $0x20c8] sm:$0xff] }
 0x355   : > { %10355 = vmatpush1.bf16.msra.mxu0 %v15958_v3  ;;  %10847 = vmatpush1.bf16.msra.mxu1 %v15960_v5  ;;  %v1687_v3 = vld [vmem:[#allocation4 + $0x2020] sm:$0xff]  ;;  %v18891_v5 = vrot.slane %v18887_v58, %v18766_v53  ;;  %v1712_v43 = vld [vmem:[#allocation4 + $0x20e8] sm:$0xff] }
 0x356   : > { %10356 = vmatprep.subr.bf16.mxu0 %v15967_v6  ;;  %10848 = vmatprep.subr.bf16.mxu1 %v15969_v7  ;;  %v1684_v6 = vld [vmem:[#allocation4 + $0x2008] sm:$0xff]  ;;  %v16015_v12 = vcombine.high %v1683_v2, %v1687_v3  ;;  %v16014_v21 = vcombine.low %v1683_v2, %v1687_v3  ;;  %v1727_v2 = vld [vmem:[#allocation4 + $0x2160] sm:$0xff] }
 0x357   : > { %v1688_v7 = vld [vmem:[#allocation4 + $0x2028] sm:$0xff] }
 0x358   : > { %v16017_v17 = vcombine.high %v1684_v6, %v1688_v7  ;;  %v16016_v22 = vcombine.low %v1684_v6, %v1688_v7  ;;  %v1720_v56 = vld [vmem:[#allocation4 + $0x2128] sm:$0xff] }
 0x359   : > { %10357 = vmatpush1.bf16.msra.mxu0 %v15966_v35  ;;  %10849 = vmatpush1.bf16.msra.mxu1 %v15968_v15  ;;  %v1691_v35 = vld [vmem:[#allocation4 + $0x2040] sm:$0xff]  ;;  %v1724_v3 = vld [vmem:[#allocation4 + $0x2148] sm:$0xff] }
 0x35a   : > { %10358 = vmatprep.subr.bf16.mxu0 %v15975_v16  ;;  %10850 = vmatprep.subr.bf16.mxu1 %v15977_v18  ;;  %v1695_v15 = vld [vmem:[#allocation4 + $0x2060] sm:$0xff]  ;;  %v2311_v16 = vcombine.high %v18891_v5, %v18891_v5  ;;  %v18897_v18 = vcombine.high %v18876_v26, %v18876_v26  ;;  %v1728_v6 = vld [vmem:[#allocation4 + $0x2168] sm:$0xff] }
 0x35b   : > { %v16022_v63 = vcombine.low %v1691_v35, %v1695_v15 }
 0x35c   : > { %v18900_v30 = vrot.slane %v2311_v16, %v18766_v53  ;;  %v1736_v16 = vld [vmem:[#allocation4 + $0x21a8] sm:$0xff] }
 0x35d   : > { %10359 = vmatpush1.bf16.msra.mxu0 %v15974_v23  ;;  %10851 = vmatpush1.bf16.msra.mxu1 %v15976_v25  ;;  %v16023_v23 = vcombine.high %v1691_v35, %v1695_v15  ;;  %v16025_v25 = vcombine.high %v1692_v19, %v1696_v20  ;;  %v1735_v35 = vld [vmem:[#allocation4 + $0x21a0] sm:$0xff]  ;;  %v1732_v15 = vld [vmem:[#allocation4 + $0x2188] sm:$0xff] }
 0x35e   : > { %10360 = vmatprep.subr.bf16.mxu0 %v15983_v27  ;;  %10852 = vmatprep.subr.bf16.mxu1 %v15985_v29  ;;  %v1699_v27 = vld [vmem:[#allocation4 + $0x2080] sm:$0xff] }
 0x35f   : > { %v1703_v29 = vld [vmem:[#allocation4 + $0x20a0] sm:$0xff] }
 0x360   : > { %v16030_v46 = vcombine.low %v1699_v27, %v1703_v29 }
 0x361   : > { %10361 = vmatpush1.bf16.msra.mxu0 %v15982_v10  ;;  %10853 = vmatpush1.bf16.msra.mxu1 %v15984_v59  ;;  %v16024_v10 = vcombine.low %v1692_v19, %v1696_v20  ;;  %v16031_v59 = vcombine.high %v1699_v27, %v1703_v29  ;;  %v16056_v20 = vcombine.low %v1724_v3, %v1728_v6  ;;  %v1740_v27 = vld [vmem:[#allocation4 + $0x21c8] sm:$0xff] }
 0x362   : > { %10362 = vmatprep.subr.bf16.mxu0 %v15991_v31  ;;  %10854 = vmatprep.subr.bf16.mxu1 %v15993_v39  ;;  %v16033_v31 = vcombine.high %v1700_v32, %v1704_v33  ;;  %v1707_v39 = vld [vmem:[#allocation4 + $0x20c0] sm:$0xff]  ;;  %v1744_v29 = vld [vmem:[#allocation4 + $0x21e8] sm:$0xff] }
 0x363   : > { %v16038_v57 = vcombine.low %v1707_v39, %v1711_v40 }
 0x365   : > { %10363 = vmatpush1.bf16.msra.mxu0 %v15990_v47  ;;  %10855 = vmatpush1.bf16.msra.mxu1 %v15992_v48  ;;  %v16032_v47 = vcombine.low %v1700_v32, %v1704_v33  ;;  %v16039_v48 = vcombine.high %v1707_v39, %v1711_v40  ;;  %v16064_v33 = vcombine.low %v1732_v15, %v1736_v16  ;;  %v1748_v39 = vld [vmem:[#allocation4 + $0x2208] sm:$0xff] }
 0x366   : > { %10364 = vmatprep.subr.bf16.mxu0 %v15999_v49  ;;  %10856 = vmatprep.subr.bf16.mxu1 %v16001_v50  ;;  %v16041_v49 = vcombine.high %v1708_v41, %v1712_v43  ;;  %v1715_v50 = vld [vmem:[#allocation4 + $0x2100] sm:$0xff]  ;;  %v1752_v40 = vld [vmem:[#allocation4 + $0x2228] sm:$0xff] }
 0x367   : > { %v16046_v7 = vcombine.low %v1715_v50, %v1719_v51 }
 0x369   : > { %10365 = vmatpush1.bf16.msra.mxu0 %v15998_v60  ;;  %10857 = vmatpush1.bf16.msra.mxu1 %v16000_v61  ;;  %v16040_v60 = vcombine.low %v1708_v41, %v1712_v43  ;;  %v16047_v61 = vcombine.high %v1715_v50, %v1719_v51  ;;  %v16072_v43 = vcombine.low %v1740_v27, %v1744_v29  ;;  %v1756_v50 = vld [vmem:[#allocation4 + $0x2248] sm:$0xff] }
 0x36a   : > { %10366 = vmatprep.subr.bf16.mxu0 %v16007_v62  ;;  %10858 = vmatprep.subr.bf16.mxu1 %v16009_v0  ;;  %v16049_v62 = vcombine.high %v1716_v52, %v1720_v56  ;;  %v1723_v0 = vld [vmem:[#allocation4 + $0x2140] sm:$0xff]  ;;  %v1760_v51 = vld [vmem:[#allocation4 + $0x2268] sm:$0xff] }
 0x36b   : > { %v16054_v19 = vcombine.low %v1723_v0, %v1727_v2 }
 0x36d   : > { %10367 = vmatpush1.bf16.msra.mxu0 %v16006_v8  ;;  %10859 = vmatpush1.bf16.msra.mxu1 %v16008_v11  ;;  %v16048_v8 = vcombine.low %v1716_v52, %v1720_v56  ;;  %v16055_v11 = vcombine.high %v1723_v0, %v1727_v2  ;;  %v16080_v56 = vcombine.low %v1748_v39, %v1752_v40  ;;  %v1764_v0 = vld [vmem:[#allocation4 + $0x2288] sm:$0xff] }
 0x36e   : > { %10377 = vmatprep.subr.bf16.mxu0 %v16015_v12  ;;  %10869 = vmatprep.subr.bf16.mxu1 %v16017_v17  ;;  %v16057_v12 = vcombine.high %v1724_v3, %v1728_v6  ;;  %v1731_v17 = vld [vmem:[#allocation4 + $0x2180] sm:$0xff]  ;;  %v1768_v2 = vld [vmem:[#allocation4 + $0x22a8] sm:$0xff]  ;;  %v16088_v6 = vcombine.low %v1756_v50, %v1760_v51 }
 0x36f   : > { %v16062_v32 = vcombine.low %v1731_v17, %v1735_v35 }
 0x370   : > { %10369 = vmatmul.mubr.bf16.vlgmr.msra.gmra.mrb[0].mxu0 %v18897_v18  ;;  %10861 = vmatmul.mubr.bf16.vlgmr.msra.gmra.mrb[0].mxu1 %v18897_v18 }
 0x371   : > { %10378 = vmatpush1.bf16.msra.mxu0 %v16014_v21  ;;  %10870 = vmatpush1.bf16.msra.mxu1 %v16016_v22  ;;  %v16063_v21 = vcombine.high %v1731_v17, %v1735_v35  ;;  %v16065_v22 = vcombine.high %v1732_v15, %v1736_v16  ;;  %v1772_v17 = vld [vmem:[#allocation4 + $0x22c8] sm:$0xff]  ;;  %v16096_v16 = vcombine.low %v1764_v0, %v1768_v2 }
 0x372   : > { %10379 = vmatprep.subr.bf16.mxu0 %v16023_v23  ;;  %10871 = vmatprep.subr.bf16.mxu1 %v16025_v25  ;;  %v1739_v23 = vld [vmem:[#allocation4 + $0x21c0] sm:$0xff]  ;;  %v1776_v35 = vld [vmem:[#allocation4 + $0x22e8] sm:$0xff] }
 0x373   : > { %10409 = vmatprep.mubr.bf16.mxu0 %v18900_v30  ;;  %10901 = vmatprep.mubr.bf16.mxu1 %v18900_v30  ;;  %v1743_v25 = vld [vmem:[#allocation4 + $0x21e0] sm:$0xff] }
 0x374   : > { %v16070_v41 = vcombine.low %v1739_v23, %v1743_v25 }
 0x375   : > { %10380 = vmatpush1.bf16.msra.mxu0 %v16022_v63  ;;  %10872 = vmatpush1.bf16.msra.mxu1 %v16024_v10  ;;  %v16071_v63 = vcombine.high %v1739_v23, %v1743_v25  ;;  %v16073_v10 = vcombine.high %v1740_v27, %v1744_v29  ;;  %v1780_v23 = vld [vmem:[#allocation4 + $0x2308] sm:$0xff]  ;;  %v16104_v29 = vcombine.low %v1772_v17, %v1776_v35 }
 0x376   : > { %10381 = vmatprep.subr.bf16.mxu0 %v16031_v59  ;;  %10873 = vmatprep.subr.bf16.mxu1 %v16033_v31  ;;  %v1747_v59 = vld [vmem:[#allocation4 + $0x2200] sm:$0xff]  ;;  %v1784_v25 = vld [vmem:[#allocation4 + $0x2328] sm:$0xff] }
 0x377   : > { %v1751_v31 = vld [vmem:[#allocation4 + $0x2220] sm:$0xff] }
 0x378   : > { %v16078_v52 = vcombine.low %v1747_v59, %v1751_v31 }
 0x379   : > { %10382 = vmatpush1.bf16.msra.mxu0 %v16030_v46  ;;  %10874 = vmatpush1.bf16.msra.mxu1 %v16032_v47  ;;  %v16079_v46 = vcombine.high %v1747_v59, %v1751_v31  ;;  %v16081_v47 = vcombine.high %v1748_v39, %v1752_v40  ;;  %v1788_v59 = vld [vmem:[#allocation4 + $0x2348] sm:$0xff]  ;;  %v16112_v40 = vcombine.low %v1780_v23, %v1784_v25 }
 0x37a   : > { %10383 = vmatprep.subr.bf16.mxu0 %v16039_v48  ;;  %10875 = vmatprep.subr.bf16.mxu1 %v16041_v49  ;;  %v1755_v48 = vld [vmem:[#allocation4 + $0x2240] sm:$0xff]  ;;  %v1792_v31 = vld [vmem:[#allocation4 + $0x2368] sm:$0xff] }
 0x37b   : > { %v1759_v49 = vld [vmem:[#allocation4 + $0x2260] sm:$0xff] }
 0x37c   : > { %v16086_v3 = vcombine.low %v1755_v48, %v1759_v49 }
 0x37d   : > { %10384 = vmatpush1.bf16.msra.mxu0 %v16038_v57  ;;  %10876 = vmatpush1.bf16.msra.mxu1 %v16040_v60  ;;  %v16087_v57 = vcombine.high %v1755_v48, %v1759_v49  ;;  %v16089_v60 = vcombine.high %v1756_v50, %v1760_v51  ;;  %v1796_v48 = vld [vmem:[#allocation4 + $0x2388] sm:$0xff]  ;;  %v16120_v51 = vcombine.low %v1788_v59, %v1792_v31 }
 0x37e   : > { %10385 = vmatprep.subr.bf16.mxu0 %v16047_v61  ;;  %10877 = vmatprep.subr.bf16.mxu1 %v16049_v62  ;;  %v1763_v61 = vld [vmem:[#allocation4 + $0x2280] sm:$0xff]  ;;  %v1800_v49 = vld [vmem:[#allocation4 + $0x23a8] sm:$0xff] }
 0x37f   : > { %v1767_v62 = vld [vmem:[#allocation4 + $0x22a0] sm:$0xff] }
 0x380   : > { %v16094_v15 = vcombine.low %v1763_v61, %v1767_v62 }
 0x381   : > { %10386 = vmatpush1.bf16.msra.mxu0 %v16046_v7  ;;  %10878 = vmatpush1.bf16.msra.mxu1 %v16048_v8  ;;  %v16095_v7 = vcombine.high %v1763_v61, %v1767_v62  ;;  %v16097_v8 = vcombine.high %v1764_v0, %v1768_v2  ;;  %v1804_v61 = vld [vmem:[#allocation4 + $0x23c8] sm:$0xff]  ;;  %v16128_v2 = vcombine.low %v1796_v48, %v1800_v49 }
 0x382   : > { %10387 = vmatprep.subr.bf16.mxu0 %v16055_v11  ;;  %10879 = vmatprep.subr.bf16.mxu1 %v16057_v12  ;;  %v1771_v11 = vld [vmem:[#allocation4 + $0x22c0] sm:$0xff]  ;;  %v1808_v62 = vld [vmem:[#allocation4 + $0x23e8] sm:$0xff] }
 0x383   : > { %v1775_v12 = vld [vmem:[#allocation4 + $0x22e0] sm:$0xff] }
 0x384   : > { %v16102_v27 = vcombine.low %v1771_v11, %v1775_v12 }
 0x385   : > { %10388 = vmatpush1.bf16.msra.mxu0 %v16054_v19  ;;  %10880 = vmatpush1.bf16.msra.mxu1 %v16056_v20  ;;  %v16103_v19 = vcombine.high %v1771_v11, %v1775_v12  ;;  %v16105_v20 = vcombine.high %v1772_v17, %v1776_v35  ;;  %v1812_v11 = vld [vmem:[#allocation4 + $0x2408] sm:$0xff]  ;;  %v16136_v35 = vcombine.low %v1804_v61, %v1808_v62 }
 0x386   : > { %10389 = vmatprep.subr.bf16.mxu0 %v16063_v21  ;;  %10881 = vmatprep.subr.bf16.mxu1 %v16065_v22  ;;  %v1779_v21 = vld [vmem:[#allocation4 + $0x2300] sm:$0xff]  ;;  %v1816_v12 = vld [vmem:[#allocation4 + $0x2428] sm:$0xff] }
 0x387   : > { %v1783_v22 = vld [vmem:[#allocation4 + $0x2320] sm:$0xff] }
 0x388   : > { %v16110_v39 = vcombine.low %v1779_v21, %v1783_v22 }
 0x389   : > { %10390 = vmatpush1.bf16.msra.mxu0 %v16062_v32  ;;  %10882 = vmatpush1.bf16.msra.mxu1 %v16064_v33  ;;  %v16111_v32 = vcombine.high %v1779_v21, %v1783_v22  ;;  %v16113_v33 = vcombine.high %v1780_v23, %v1784_v25  ;;  %v18908_v21 = vrot.slane %v18891_v5, %v18766_v53  ;;  %v1820_v22 = vld [vmem:[#allocation4 + $0x2448] sm:$0xff] }
 0x38a   : > { %10391 = vmatprep.subr.bf16.mxu0 %v16071_v63  ;;  %10883 = vmatprep.subr.bf16.mxu1 %v16073_v10  ;;  %v1787_v63 = vld [vmem:[#allocation4 + $0x2340] sm:$0xff]  ;;  %v1824_v23 = vld [vmem:[#allocation4 + $0x2468] sm:$0xff] }
 0x38b   : > { %v1791_v10 = vld [vmem:[#allocation4 + $0x2360] sm:$0xff]  ;;  %v1828_v5 = vld [vmem:[#allocation4 + $0x2488] sm:$0xff] }
 0x38c   : > { %v16118_v50 = vcombine.low %v1787_v63, %v1791_v10 }
 0x38d   : > { %10392 = vmatpush1.bf16.msra.mxu0 %v16070_v41  ;;  %10884 = vmatpush1.bf16.msra.mxu1 %v16072_v43  ;;  %v16119_v41 = vcombine.high %v1787_v63, %v1791_v10  ;;  %v16121_v43 = vcombine.high %v1788_v59, %v1792_v31  ;;  %v1831_v63 = vld [vmem:[#allocation4 + $0x24a0] sm:$0xff]  ;;  %v18912_v10 = vcombine.high %v18900_v30, %v18900_v30  ;;  %v1832_v59 = vld [vmem:[#allocation4 + $0x24a8] sm:$0xff] }
 0x38e   : > { %10393 = vmatprep.subr.bf16.mxu0 %v16079_v46  ;;  %10885 = vmatprep.subr.bf16.mxu1 %v16081_v47  ;;  %v1795_v46 = vld [vmem:[#allocation4 + $0x2380] sm:$0xff] }
 0x38f   : > { %v1799_v47 = vld [vmem:[#allocation4 + $0x23a0] sm:$0xff] }
 0x390   : > { %v16126_v0 = vcombine.low %v1795_v46, %v1799_v47 }
 0x391   : > { %10394 = vmatpush1.bf16.msra.mxu0 %v16078_v52  ;;  %10886 = vmatpush1.bf16.msra.mxu1 %v16080_v56  ;;  %v16127_v52 = vcombine.high %v1795_v46, %v1799_v47  ;;  %v16129_v56 = vcombine.high %v1796_v48, %v1800_v49  ;;  %v1839_v46 = vld [vmem:[#allocation4 + $0x24e0] sm:$0xff]  ;;  %v1836_v47 = vld [vmem:[#allocation4 + $0x24c8] sm:$0xff] }
 0x392   : > { %10395 = vmatprep.subr.bf16.mxu0 %v16087_v57  ;;  %10887 = vmatprep.subr.bf16.mxu1 %v16089_v60  ;;  %v1803_v57 = vld [vmem:[#allocation4 + $0x23c0] sm:$0xff]  ;;  %v1840_v48 = vld [vmem:[#allocation4 + $0x24e8] sm:$0xff] }
 0x393   : > { %v1807_v60 = vld [vmem:[#allocation4 + $0x23e0] sm:$0xff] }
 0x394   : > { %v16134_v17 = vcombine.low %v1803_v57, %v1807_v60 }
 0x395   : > { %10396 = vmatpush1.bf16.msra.mxu0 %v16086_v3  ;;  %10888 = vmatpush1.bf16.msra.mxu1 %v16088_v6  ;;  %v16135_v3 = vcombine.high %v1803_v57, %v1807_v60  ;;  %v16137_v6 = vcombine.high %v1804_v61, %v1808_v62  ;;  %v1847_v57 = vld [vmem:[#allocation4 + $0x2520] sm:$0xff]  ;;  %v1844_v60 = vld [vmem:[#allocation4 + $0x2508] sm:$0xff] }
 0x396   : > { %10397 = vmatprep.subr.bf16.mxu0 %v16095_v7  ;;  %10889 = vmatprep.subr.bf16.mxu1 %v16097_v8  ;;  %v1811_v7 = vld [vmem:[#allocation4 + $0x2400] sm:$0xff]  ;;  %v1848_v61 = vld [vmem:[#allocation4 + $0x2528] sm:$0xff] }
 0x397   : > { %v1815_v8 = vld [vmem:[#allocation4 + $0x2420] sm:$0xff] }
 0x398   : > { %v16142_v25 = vcombine.low %v1811_v7, %v1815_v8 }
 0x399   : > { %10398 = vmatpush1.bf16.msra.mxu0 %v16094_v15  ;;  %10890 = vmatpush1.bf16.msra.mxu1 %v16096_v16  ;;  %v16143_v15 = vcombine.high %v1811_v7, %v1815_v8  ;;  %v16145_v16 = vcombine.high %v1812_v11, %v1816_v12  ;;  %v1855_v7 = vld [vmem:[#allocation4 + $0x2560] sm:$0xff]  ;;  %v1852_v8 = vld [vmem:[#allocation4 + $0x2548] sm:$0xff] }
 0x39a   : > { %10399 = vmatprep.subr.bf16.mxu0 %v16103_v19  ;;  %10891 = vmatprep.subr.bf16.mxu1 %v16105_v20  ;;  %v1819_v19 = vld [vmem:[#allocation4 + $0x2440] sm:$0xff] }
 0x39b   : > { %v1823_v20 = vld [vmem:[#allocation4 + $0x2460] sm:$0xff] }
 0x39c   : > { %v16150_v31 = vcombine.low %v1819_v19, %v1823_v20 }
 0x39d   : > { %10400 = vmatpush1.bf16.msra.mxu0 %v16102_v27  ;;  %10892 = vmatpush1.bf16.msra.mxu1 %v16104_v29  ;;  %v16144_v27 = vcombine.low %v1812_v11, %v1816_v12  ;;  %v16151_v29 = vcombine.high %v1819_v19, %v1823_v20  ;;  %v1856_v11 = vld [vmem:[#allocation4 + $0x2568] sm:$0xff]  ;;  %v1863_v19 = vld [vmem:[#allocation4 + $0x25a0] sm:$0xff] }
 0x39e   : > { %10401 = vmatprep.subr.bf16.mxu0 %v16111_v32  ;;  %10893 = vmatprep.subr.bf16.mxu1 %v16113_v33  ;;  %v16153_v32 = vcombine.high %v1820_v22, %v1824_v23  ;;  %v1827_v33 = vld [vmem:[#allocation4 + $0x2480] sm:$0xff]  ;;  %v1860_v20 = vld [vmem:[#allocation4 + $0x2588] sm:$0xff] }
 0x39f   : > { %v16158_v49 = vcombine.low %v1827_v33, %v1831_v63 }
 0x3a1   : > { %10402 = vmatpush1.bf16.msra.mxu0 %v16110_v39  ;;  %10894 = vmatpush1.bf16.msra.mxu1 %v16112_v40  ;;  %v16152_v39 = vcombine.low %v1820_v22, %v1824_v23  ;;  %v16159_v40 = vcombine.high %v1827_v33, %v1831_v63  ;;  %v1864_v22 = vld [vmem:[#allocation4 + $0x25a8] sm:$0xff]  ;;  %v1871_v33 = vld [vmem:[#allocation4 + $0x25e0] sm:$0xff] }
 0x3a2   : > { %10403 = vmatprep.subr.bf16.mxu0 %v16119_v41  ;;  %10895 = vmatprep.subr.bf16.mxu1 %v16121_v43  ;;  %v16161_v41 = vcombine.high %v1828_v5, %v1832_v59  ;;  %v1835_v43 = vld [vmem:[#allocation4 + $0x24c0] sm:$0xff]  ;;  %v1868_v63 = vld [vmem:[#allocation4 + $0x25c8] sm:$0xff] }
 0x3a3   : > { %v16166_v62 = vcombine.low %v1835_v43, %v1839_v46 }
 0x3a5   : > { %10404 = vmatpush1.bf16.msra.mxu0 %v16118_v50  ;;  %10896 = vmatpush1.bf16.msra.mxu1 %v16120_v51  ;;  %v16160_v50 = vcombine.low %v1828_v5, %v1832_v59  ;;  %v16167_v51 = vcombine.high %v1835_v43, %v1839_v46  ;;  %v1872_v5 = vld [vmem:[#allocation4 + $0x25e8] sm:$0xff]  ;;  %v1879_v43 = vld [vmem:[#allocation4 + $0x2620] sm:$0xff] }
 0x3a6   : > { %10405 = vmatprep.subr.bf16.mxu0 %v16127_v52  ;;  %10897 = vmatprep.subr.bf16.mxu1 %v16129_v56  ;;  %v16169_v52 = vcombine.high %v1836_v47, %v1840_v48  ;;  %v1843_v56 = vld [vmem:[#allocation4 + $0x2500] sm:$0xff]  ;;  %v1876_v46 = vld [vmem:[#allocation4 + $0x2608] sm:$0xff] }
 0x3a7   : > { %v16174_v12 = vcombine.low %v1843_v56, %v1847_v57 }
 0x3a9   : > { %10406 = vmatpush1.bf16.msra.mxu0 %v16126_v0  ;;  %10898 = vmatpush1.bf16.msra.mxu1 %v16128_v2  ;;  %v16168_v0 = vcombine.low %v1836_v47, %v1840_v48  ;;  %v16175_v2 = vcombine.high %v1843_v56, %v1847_v57  ;;  %v1880_v47 = vld [vmem:[#allocation4 + $0x2628] sm:$0xff]  ;;  %v1887_v56 = vld [vmem:[#allocation4 + $0x2660] sm:$0xff] }
 0x3aa   : > { %10407 = vmatprep.subr.bf16.mxu0 %v16135_v3  ;;  %10899 = vmatprep.subr.bf16.mxu1 %v16137_v6  ;;  %v16177_v3 = vcombine.high %v1844_v60, %v1848_v61  ;;  %v1851_v6 = vld [vmem:[#allocation4 + $0x2540] sm:$0xff]  ;;  %v1884_v57 = vld [vmem:[#allocation4 + $0x2648] sm:$0xff] }
 0x3ab   : > { %v16182_v23 = vcombine.low %v1851_v6, %v1855_v7 }
 0x3ad   : > { %10408 = vmatpush1.bf16.msra.mxu0 %v16134_v17  ;;  %10900 = vmatpush1.bf16.msra.mxu1 %v16136_v35  ;;  %v16176_v17 = vcombine.low %v1844_v60, %v1848_v61  ;;  %v16183_v35 = vcombine.high %v1851_v6, %v1855_v7  ;;  %v1888_v60 = vld [vmem:[#allocation4 + $0x2668] sm:$0xff]  ;;  %v1895_v6 = vld [vmem:[#allocation4 + $0x26a0] sm:$0xff] }
 0x3ae   : > { %10418 = vmatprep.subr.bf16.mxu0 %v16143_v15  ;;  %10910 = vmatprep.subr.bf16.mxu1 %v16145_v16  ;;  %v16185_v15 = vcombine.high %v1852_v8, %v1856_v11  ;;  %v1859_v16 = vld [vmem:[#allocation4 + $0x2580] sm:$0xff]  ;;  %v1892_v7 = vld [vmem:[#allocation4 + $0x2688] sm:$0xff] }
 0x3af   : > { %v16190_v59 = vcombine.low %v1859_v16, %v1863_v19 }
 0x3b0   : > { %10410 = vmatmul.mubr.bf16.vlgmr.msra.gmra.mrb[0].mxu0 %v18908_v21  ;;  %10902 = vmatmul.mubr.bf16.vlgmr.msra.gmra.mrb[0].mxu1 %v18908_v21 }
 0x3b1   : > { %10419 = vmatpush1.bf16.msra.mxu0 %v16142_v25  ;;  %10911 = vmatpush1.bf16.msra.mxu1 %v16144_v27  ;;  %v16184_v25 = vcombine.low %v1852_v8, %v1856_v11  ;;  %v16191_v27 = vcombine.high %v1859_v16, %v1863_v19  ;;  %v1896_v8 = vld [vmem:[#allocation4 + $0x26a8] sm:$0xff]  ;;  %v1903_v16 = vld [vmem:[#allocation4 + $0x26e0] sm:$0xff] }
 0x3b2   : > { %10420 = vmatprep.subr.bf16.mxu0 %v16151_v29  ;;  %10912 = vmatprep.subr.bf16.mxu1 %v16153_v32  ;;  %v16193_v29 = vcombine.high %v1860_v20, %v1864_v22  ;;  %v1867_v32 = vld [vmem:[#allocation4 + $0x25c0] sm:$0xff]  ;;  %v1900_v19 = vld [vmem:[#allocation4 + $0x26c8] sm:$0xff] }
 0x3b3   : > { %10450 = vmatprep.mubr.bf16.mxu0 %v18912_v10  ;;  %10942 = vmatprep.mubr.bf16.mxu1 %v18912_v10  ;;  %v16198_v48 = vcombine.low %v1867_v32, %v1871_v33 }
 0x3b5   : > { %10421 = vmatpush1.bf16.msra.mxu0 %v16150_v31  ;;  %10913 = vmatpush1.bf16.msra.mxu1 %v16152_v39  ;;  %v16192_v31 = vcombine.low %v1860_v20, %v1864_v22  ;;  %v16199_v39 = vcombine.high %v1867_v32, %v1871_v33  ;;  %v1904_v20 = vld [vmem:[#allocation4 + $0x26e8] sm:$0xff]  ;;  %v1911_v32 = vld [vmem:[#allocation4 + $0x2720] sm:$0xff] }
 0x3b6   : > { %10422 = vmatprep.subr.bf16.mxu0 %v16159_v40  ;;  %10914 = vmatprep.subr.bf16.mxu1 %v16161_v41  ;;  %v16201_v40 = vcombine.high %v1868_v63, %v1872_v5  ;;  %v1875_v41 = vld [vmem:[#allocation4 + $0x2600] sm:$0xff]  ;;  %v1908_v33 = vld [vmem:[#allocation4 + $0x2708] sm:$0xff] }
 0x3b7   : > { %v16206_v61 = vcombine.low %v1875_v41, %v1879_v43 }
 0x3b9   : > { %10423 = vmatpush1.bf16.msra.mxu0 %v16158_v49  ;;  %10915 = vmatpush1.bf16.msra.mxu1 %v16160_v50  ;;  %v16200_v49 = vcombine.low %v1868_v63, %v1872_v5  ;;  %v16207_v50 = vcombine.high %v1875_v41, %v1879_v43  ;;  %v1912_v63 = vld [vmem:[#allocation4 + $0x2728] sm:$0xff]  ;;  %v1919_v41 = vld [vmem:[#allocation4 + $0x2760] sm:$0xff] }
 0x3ba   : > { %10424 = vmatprep.subr.bf16.mxu0 %v16167_v51  ;;  %10916 = vmatprep.subr.bf16.mxu1 %v16169_v52  ;;  %v16209_v51 = vcombine.high %v1876_v46, %v1880_v47  ;;  %v1883_v52 = vld [vmem:[#allocation4 + $0x2640] sm:$0xff]  ;;  %v1916_v43 = vld [vmem:[#allocation4 + $0x2748] sm:$0xff] }
 0x3bb   : > { %v16214_v11 = vcombine.low %v1883_v52, %v1887_v56 }
 0x3bd   : > { %10425 = vmatpush1.bf16.msra.mxu0 %v16166_v62  ;;  %10917 = vmatpush1.bf16.msra.mxu1 %v16168_v0  ;;  %v16208_v62 = vcombine.low %v1876_v46, %v1880_v47  ;;  %v16215_v0 = vcombine.high %v1883_v52, %v1887_v56  ;;  %v1920_v46 = vld [vmem:[#allocation4 + $0x2768] sm:$0xff]  ;;  %v1927_v52 = vld [vmem:[#allocation4 + $0x27a0] sm:$0xff] }
 0x3be   : > { %10426 = vmatprep.subr.bf16.mxu0 %v16175_v2  ;;  %10918 = vmatprep.subr.bf16.mxu1 %v16177_v3  ;;  %v16217_v2 = vcombine.high %v1884_v57, %v1888_v60  ;;  %v1891_v3 = vld [vmem:[#allocation4 + $0x2680] sm:$0xff]  ;;  %v1924_v56 = vld [vmem:[#allocation4 + $0x2788] sm:$0xff] }
 0x3bf   : > { %v16222_v22 = vcombine.low %v1891_v3, %v1895_v6 }
 0x3c1   : > { %10427 = vmatpush1.bf16.msra.mxu0 %v16174_v12  ;;  %10919 = vmatpush1.bf16.msra.mxu1 %v16176_v17  ;;  %v16216_v12 = vcombine.low %v1884_v57, %v1888_v60  ;;  %v16223_v17 = vcombine.high %v1891_v3, %v1895_v6  ;;  %v1928_v57 = vld [vmem:[#allocation4 + $0x27a8] sm:$0xff]  ;;  %v1935_v3 = vld [vmem:[#allocation4 + $0x27e0] sm:$0xff]  ;;  %v2296_v6 = vcombine.high %v18887_v58, %v18887_v58 }
 0x3c2   : > { %10428 = vmatprep.subr.bf16.mxu0 %v16183_v35  ;;  %10920 = vmatprep.subr.bf16.mxu1 %v16185_v15  ;;  %v16225_v35 = vcombine.high %v1892_v7, %v1896_v8  ;;  %v1899_v15 = vld [vmem:[#allocation4 + $0x26c0] sm:$0xff] }
 0x3c3   : > { %v16230_v5 = vcombine.low %v1899_v15, %v1903_v16 }
 0x3c5   : > { %10429 = vmatpush1.bf16.msra.mxu0 %v16182_v23  ;;  %10921 = vmatpush1.bf16.msra.mxu1 %v16184_v25  ;;  %v16224_v23 = vcombine.low %v1892_v7, %v1896_v8  ;;  %v16231_v25 = vcombine.high %v1899_v15, %v1903_v16  ;;  %v1932_v7 = vld [vmem:[#allocation4 + $0x27c8] sm:$0xff]  ;;  %v1939_v15 = vld [vmem:[#allocation4 + $0x2800] sm:$0xff] }
 0x3c6   : > { %10430 = vmatprep.subr.bf16.mxu0 %v16191_v27  ;;  %10922 = vmatprep.subr.bf16.mxu1 %v16193_v29  ;;  %v16233_v27 = vcombine.high %v1900_v19, %v1904_v20  ;;  %v1907_v29 = vld [vmem:[#allocation4 + $0x2700] sm:$0xff]  ;;  %v1936_v8 = vld [vmem:[#allocation4 + $0x27e8] sm:$0xff] }
 0x3c7   : > { %v16238_v47 = vcombine.low %v1907_v29, %v1911_v32  ;;  %v1943_v16 = vld [vmem:[#allocation4 + $0x2820] sm:$0xff]  ;;  %v16264_v58 = vcombine.low %v1932_v7, %v1936_v8 }
 0x3c9   : > { %10431 = vmatpush1.bf16.msra.mxu0 %v16190_v59  ;;  %10923 = vmatpush1.bf16.msra.mxu1 %v16192_v31  ;;  %v16232_v59 = vcombine.low %v1900_v19, %v1904_v20  ;;  %v16239_v31 = vcombine.high %v1907_v29, %v1911_v32  ;;  %v18921_v19 = vrot.slane %v2296_v6, %v18766_v53  ;;  %v1940_v20 = vld [vmem:[#allocation4 + $0x2808] sm:$0xff]  ;;  %v1947_v29 = vld [vmem:[#allocation4 + $0x2840] sm:$0xff] }
 0x3ca   : > { %10432 = vmatprep.subr.bf16.mxu0 %v16199_v39  ;;  %10924 = vmatprep.subr.bf16.mxu1 %v16201_v40  ;;  %v16241_v39 = vcombine.high %v1908_v33, %v1912_v63  ;;  %v1915_v40 = vld [vmem:[#allocation4 + $0x2740] sm:$0xff] }
 0x3cb   : > { %v16246_v60 = vcombine.low %v1915_v40, %v1919_v41  ;;  %v1951_v32 = vld [vmem:[#allocation4 + $0x2860] sm:$0xff] }
 0x3cd   : > { %10433 = vmatpush1.bf16.msra.mxu0 %v16198_v48  ;;  %10925 = vmatpush1.bf16.msra.mxu1 %v16200_v49  ;;  %v16240_v48 = vcombine.low %v1908_v33, %v1912_v63  ;;  %v16247_v49 = vcombine.high %v1915_v40, %v1919_v41  ;;  %v2312_v33 = vcombine.high %v18921_v19, %v18921_v19 }
 0x3ce   : > { %10434 = vmatprep.subr.bf16.mxu0 %v16207_v50  ;;  %10926 = vmatprep.subr.bf16.mxu1 %v16209_v51  ;;  %v16249_v50 = vcombine.high %v1916_v43, %v1920_v46  ;;  %v1923_v51 = vld [vmem:[#allocation4 + $0x2780] sm:$0xff]  ;;  %v18927_v63 = vcombine.high %v18908_v21, %v18908_v21  ;;  %v16279_v40 = vcombine.high %v1947_v29, %v1951_v32 }
 0x3d1   : > { %10435 = vmatpush1.bf16.msra.mxu0 %v16206_v61  ;;  %10927 = vmatpush1.bf16.msra.mxu1 %v16208_v62  ;;  %v16248_v61 = vcombine.low %v1916_v43, %v1920_v46  ;;  %v16255_v62 = vcombine.high %v1923_v51, %v1927_v52  ;;  %v1955_v43 = vld [vmem:[#allocation4 + $0x2880] sm:$0xff] }
 0x3d2   : > { %10436 = vmatprep.subr.bf16.mxu0 %v16215_v0  ;;  %10928 = vmatprep.subr.bf16.mxu1 %v16217_v2  ;;  %v16257_v0 = vcombine.high %v1924_v56, %v1928_v57  ;;  %v1931_v2 = vld [vmem:[#allocation4 + $0x27c0] sm:$0xff] }
 0x3d3   : > { %v1959_v46 = vld [vmem:[#allocation4 + $0x28a0] sm:$0xff] }
 0x3d5   : > { %10437 = vmatpush1.bf16.msra.mxu0 %v16214_v11  ;;  %10929 = vmatpush1.bf16.msra.mxu1 %v16216_v12  ;;  %v16254_v11 = vcombine.low %v1923_v51, %v1927_v52  ;;  %v16256_v12 = vcombine.low %v1924_v56, %v1928_v57  ;;  %v16287_v52 = vcombine.high %v1955_v43, %v1959_v46  ;;  %v1963_v57 = vld [vmem:[#allocation4 + $0x28c0] sm:$0xff] }
 0x3d6   : > { %10438 = vmatprep.subr.bf16.mxu0 %v16223_v17  ;;  %10930 = vmatprep.subr.bf16.mxu1 %v16225_v35  ;;  %v16263_v17 = vcombine.high %v1931_v2, %v1935_v3  ;;  %v16265_v35 = vcombine.high %v1932_v7, %v1936_v8  ;;  %v1971_v7 = vld [vmem:[#allocation4 + $0x2900] sm:$0xff] }
 0x3d7   : > { %v1975_v8 = vld [vmem:[#allocation4 + $0x2920] sm:$0xff] }
 0x3d9   : > { %10439 = vmatpush1.bf16.msra.mxu0 %v16222_v22  ;;  %10931 = vmatpush1.bf16.msra.mxu1 %v16224_v23  ;;  %v1944_v22 = vld [vmem:[#allocation4 + $0x2828] sm:$0xff]  ;;  %v16262_v23 = vcombine.low %v1931_v2, %v1935_v3 }
 0x3da   : > { %10440 = vmatprep.subr.bf16.mxu0 %v16231_v25  ;;  %10932 = vmatprep.subr.bf16.mxu1 %v16233_v27  ;;  %v16271_v25 = vcombine.high %v1939_v15, %v1943_v16  ;;  %v16273_v27 = vcombine.high %v1940_v20, %v1944_v22 }
 0x3dd   : > { %10441 = vmatpush1.bf16.msra.mxu0 %v16230_v5  ;;  %10933 = vmatpush1.bf16.msra.mxu1 %v16232_v59  ;;  %v1948_v5 = vld [vmem:[#allocation4 + $0x2848] sm:$0xff] }
 0x3de   : > { %10442 = vmatprep.subr.bf16.mxu0 %v16239_v31  ;;  %10934 = vmatprep.subr.bf16.mxu1 %v16241_v39  ;;  %v1952_v59 = vld [vmem:[#allocation4 + $0x2868] sm:$0xff]  ;;  %v16270_v31 = vcombine.low %v1939_v15, %v1943_v16  ;;  %v16272_v39 = vcombine.low %v1940_v20, %v1944_v22  ;;  %v16303_v15 = vcombine.high %v1971_v7, %v1975_v8  ;;  %v1979_v20 = vld [vmem:[#allocation4 + $0x2940] sm:$0xff] }
 0x3df   : > { %v16281_v41 = vcombine.high %v1948_v5, %v1952_v59  ;;  %v16280_v51 = vcombine.low %v1948_v5, %v1952_v59  ;;  %v1983_v22 = vld [vmem:[#allocation4 + $0x2960] sm:$0xff]  ;;  %v1988_v59 = vld [vmem:[#allocation4 + $0x2988] sm:$0xff] }
 0x3e0   : > { %v1991_v5 = vld [vmem:[#allocation4 + $0x29a0] sm:$0xff] }
 0x3e1   : > { %10443 = vmatpush1.bf16.msra.mxu0 %v16238_v47  ;;  %10935 = vmatpush1.bf16.msra.mxu1 %v16240_v48  ;;  %v18930_v47 = vrot.slane %v2312_v33, %v18766_v53  ;;  %v1956_v48 = vld [vmem:[#allocation4 + $0x2888] sm:$0xff]  ;;  %v1987_v33 = vld [vmem:[#allocation4 + $0x2980] sm:$0xff] }
 0x3e2   : > { %10444 = vmatprep.subr.bf16.mxu0 %v16247_v49  ;;  %10936 = vmatprep.subr.bf16.mxu1 %v16249_v50  ;;  %v1960_v49 = vld [vmem:[#allocation4 + $0x28a8] sm:$0xff]  ;;  %v16278_v50 = vcombine.low %v1947_v29, %v1951_v32  ;;  %v16311_v29 = vcombine.high %v1979_v20, %v1983_v22 }
 0x3e3   : > { %v16289_v56 = vcombine.high %v1956_v48, %v1960_v49  ;;  %v16288_v2 = vcombine.low %v1956_v48, %v1960_v49  ;;  %v1999_v48 = vld [vmem:[#allocation4 + $0x29e0] sm:$0xff]  ;;  %v1996_v49 = vld [vmem:[#allocation4 + $0x29c8] sm:$0xff] }
 0x3e5   : > { %10445 = vmatpush1.bf16.msra.mxu0 %v16246_v60  ;;  %10937 = vmatpush1.bf16.msra.mxu1 %v16248_v61  ;;  %v1967_v60 = vld [vmem:[#allocation4 + $0x28e0] sm:$0xff]  ;;  %v1964_v61 = vld [vmem:[#allocation4 + $0x28c8] sm:$0xff] }
 0x3e6   : > { %10446 = vmatprep.subr.bf16.mxu0 %v16255_v62  ;;  %10938 = vmatprep.subr.bf16.mxu1 %v16257_v0  ;;  %v1968_v62 = vld [vmem:[#allocation4 + $0x28e8] sm:$0xff]  ;;  %v16286_v0 = vcombine.low %v1955_v43, %v1959_v46  ;;  %v16295_v3 = vcombine.high %v1963_v57, %v1967_v60  ;;  %v1995_v46 = vld [vmem:[#allocation4 + $0x29c0] sm:$0xff] }
 0x3e7   : > { %v16297_v6 = vcombine.high %v1964_v61, %v1968_v62 }
 0x3e9   : > { %10447 = vmatpush1.bf16.msra.mxu0 %v16254_v11  ;;  %10939 = vmatpush1.bf16.msra.mxu1 %v16256_v12  ;;  %v1972_v11 = vld [vmem:[#allocation4 + $0x2908] sm:$0xff] }
 0x3ea   : > { %10448 = vmatprep.subr.bf16.mxu0 %v16263_v17  ;;  %10940 = vmatprep.subr.bf16.mxu1 %v16265_v35  ;;  %v1976_v12 = vld [vmem:[#allocation4 + $0x2928] sm:$0xff]  ;;  %v16294_v17 = vcombine.low %v1963_v57, %v1967_v60  ;;  %v16296_v35 = vcombine.low %v1964_v61, %v1968_v62  ;;  %v2003_v60 = vld [vmem:[#allocation4 + $0x2a00] sm:$0xff] }
 0x3eb   : > { %v16305_v16 = vcombine.high %v1972_v11, %v1976_v12  ;;  %v2007_v61 = vld [vmem:[#allocation4 + $0x2a20] sm:$0xff]  ;;  %v2004_v62 = vld [vmem:[#allocation4 + $0x2a08] sm:$0xff] }
 0x3ed   : > { %10449 = vmatpush1.bf16.msra.mxu0 %v16262_v23  ;;  %10941 = vmatpush1.bf16.msra.mxu1 %v16264_v58  ;;  %v1980_v23 = vld [vmem:[#allocation4 + $0x2948] sm:$0xff] }
 0x3ee   : > { %10459 = vmatprep.subr.bf16.mxu0 %v16271_v25  ;;  %10951 = vmatprep.subr.bf16.mxu1 %v16273_v27  ;;  %v1984_v58 = vld [vmem:[#allocation4 + $0x2968] sm:$0xff]  ;;  %v16302_v25 = vcombine.low %v1971_v7, %v1975_v8  ;;  %v16304_v27 = vcombine.low %v1972_v11, %v1976_v12  ;;  %v2011_v8 = vld [vmem:[#allocation4 + $0x2a40] sm:$0xff] }
 0x3ef   : > { %v16313_v32 = vcombine.high %v1980_v23, %v1984_v58  ;;  %v2015_v11 = vld [vmem:[#allocation4 + $0x2a60] sm:$0xff]  ;;  %v2012_v12 = vld [vmem:[#allocation4 + $0x2a48] sm:$0xff] }
 0x3f0   : > { %10451 = vmatmul.mubr.bf16.vlgmr.msra.gmra.mrb[0].mxu0 %v18927_v63  ;;  %10943 = vmatmul.mubr.bf16.vlgmr.msra.gmra.mrb[0].mxu1 %v18927_v63 }
 0x3f1   : > { %10460 = vmatpush1.bf16.msra.mxu0 %v16270_v31  ;;  %10952 = vmatpush1.bf16.msra.mxu1 %v16272_v39  ;;  %v1992_v31 = vld [vmem:[#allocation4 + $0x29a8] sm:$0xff]  ;;  %v16310_v39 = vcombine.low %v1979_v20, %v1983_v22  ;;  %v2019_v22 = vld [vmem:[#allocation4 + $0x2a80] sm:$0xff] }
 0x3f2   : > { %10461 = vmatprep.subr.bf16.mxu0 %v16279_v40  ;;  %10953 = vmatprep.subr.bf16.mxu1 %v16281_v41  ;;  %v16312_v40 = vcombine.low %v1980_v23, %v1984_v58  ;;  %v16319_v41 = vcombine.high %v1987_v33, %v1991_v5  ;;  %v16321_v43 = vcombine.high %v1988_v59, %v1992_v31  ;;  %v2023_v23 = vld [vmem:[#allocation4 + $0x2aa0] sm:$0xff]  ;;  %v2020_v58 = vld [vmem:[#allocation4 + $0x2a88] sm:$0xff] }
 0x3f3   : > { %10491 = vmatprep.mubr.bf16.mxu0 %v18930_v47  ;;  %10983 = vmatprep.mubr.bf16.mxu1 %v18930_v47 }
 0x3f5   : > { %10462 = vmatpush1.bf16.msra.mxu0 %v16278_v50  ;;  %10954 = vmatpush1.bf16.msra.mxu1 %v16280_v51  ;;  %v2000_v50 = vld [vmem:[#allocation4 + $0x29e8] sm:$0xff]  ;;  %v16318_v51 = vcombine.low %v1987_v33, %v1991_v5  ;;  %v2027_v5 = vld [vmem:[#allocation4 + $0x2ac0] sm:$0xff] }
 0x3f6   : > { %10463 = vmatprep.subr.bf16.mxu0 %v16287_v52  ;;  %10955 = vmatprep.subr.bf16.mxu1 %v16289_v56  ;;  %v16320_v52 = vcombine.low %v1988_v59, %v1992_v31  ;;  %v16327_v56 = vcombine.high %v1995_v46, %v1999_v48  ;;  %v16329_v57 = vcombine.high %v1996_v49, %v2000_v50  ;;  %v2031_v59 = vld [vmem:[#allocation4 + $0x2ae0] sm:$0xff]  ;;  %v2028_v31 = vld [vmem:[#allocation4 + $0x2ac8] sm:$0xff] }
 0x3f9   : > { %10464 = vmatpush1.bf16.msra.mxu0 %v16286_v0  ;;  %10956 = vmatpush1.bf16.msra.mxu1 %v16288_v2  ;;  %v2008_v0 = vld [vmem:[#allocation4 + $0x2a28] sm:$0xff]  ;;  %v16326_v2 = vcombine.low %v1995_v46, %v1999_v48  ;;  %v2035_v48 = vld [vmem:[#allocation4 + $0x2b00] sm:$0xff] }
 0x3fa   : > { %10465 = vmatprep.subr.bf16.mxu0 %v16295_v3  ;;  %10957 = vmatprep.subr.bf16.mxu1 %v16297_v6  ;;  %v16328_v3 = vcombine.low %v1996_v49, %v2000_v50  ;;  %v16335_v6 = vcombine.high %v2003_v60, %v2007_v61  ;;  %v16337_v7 = vcombine.high %v2004_v62, %v2008_v0  ;;  %v2039_v49 = vld [vmem:[#allocation4 + $0x2b20] sm:$0xff]  ;;  %v2036_v50 = vld [vmem:[#allocation4 + $0x2b08] sm:$0xff] }
 0x3fd   : > { %10466 = vmatpush1.bf16.msra.mxu0 %v16294_v17  ;;  %10958 = vmatpush1.bf16.msra.mxu1 %v16296_v35  ;;  %v2016_v17 = vld [vmem:[#allocation4 + $0x2a68] sm:$0xff]  ;;  %v16334_v35 = vcombine.low %v2003_v60, %v2007_v61  ;;  %v2043_v61 = vld [vmem:[#allocation4 + $0x2b40] sm:$0xff] }
 0x3fe   : > { %10467 = vmatprep.subr.bf16.mxu0 %v16303_v15  ;;  %10959 = vmatprep.subr.bf16.mxu1 %v16305_v16  ;;  %v16336_v15 = vcombine.low %v2004_v62, %v2008_v0  ;;  %v16343_v16 = vcombine.high %v2011_v8, %v2015_v11  ;;  %v16345_v20 = vcombine.high %v2012_v12, %v2016_v17  ;;  %v2047_v62 = vld [vmem:[#allocation4 + $0x2b60] sm:$0xff]  ;;  %v2044_v0 = vld [vmem:[#allocation4 + $0x2b48] sm:$0xff] }
 0x401   : > { %10468 = vmatpush1.bf16.msra.mxu0 %v16302_v25  ;;  %10960 = vmatpush1.bf16.msra.mxu1 %v16304_v27  ;;  %v2024_v25 = vld [vmem:[#allocation4 + $0x2aa8] sm:$0xff]  ;;  %v16342_v27 = vcombine.low %v2011_v8, %v2015_v11  ;;  %v2051_v11 = vld [vmem:[#allocation4 + $0x2b80] sm:$0xff] }
 0x402   : > { %10469 = vmatprep.subr.bf16.mxu0 %v16311_v29  ;;  %10961 = vmatprep.subr.bf16.mxu1 %v16313_v32  ;;  %v16344_v29 = vcombine.low %v2012_v12, %v2016_v17  ;;  %v16351_v32 = vcombine.high %v2019_v22, %v2023_v23  ;;  %v16353_v33 = vcombine.high %v2020_v58, %v2024_v25  ;;  %v2055_v12 = vld [vmem:[#allocation4 + $0x2ba0] sm:$0xff]  ;;  %v2052_v17 = vld [vmem:[#allocation4 + $0x2b88] sm:$0xff] }
 0x405   : > { %10470 = vmatpush1.bf16.msra.mxu0 %v16310_v39  ;;  %10962 = vmatpush1.bf16.msra.mxu1 %v16312_v40  ;;  %v2032_v39 = vld [vmem:[#allocation4 + $0x2ae8] sm:$0xff]  ;;  %v16350_v40 = vcombine.low %v2019_v22, %v2023_v23  ;;  %v2059_v23 = vld [vmem:[#allocation4 + $0x2bc0] sm:$0xff] }
 0x406   : > { %10471 = vmatprep.subr.bf16.mxu0 %v16319_v41  ;;  %10963 = vmatprep.subr.bf16.mxu1 %v16321_v43  ;;  %v16352_v41 = vcombine.low %v2020_v58, %v2024_v25  ;;  %v16359_v43 = vcombine.high %v2027_v5, %v2031_v59  ;;  %v16361_v46 = vcombine.high %v2028_v31, %v2032_v39  ;;  %v2063_v58 = vld [vmem:[#allocation4 + $0x2be0] sm:$0xff]  ;;  %v2060_v25 = vld [vmem:[#allocation4 + $0x2bc8] sm:$0xff] }
 0x409   : > { %10472 = vmatpush1.bf16.msra.mxu0 %v16318_v51  ;;  %10964 = vmatpush1.bf16.msra.mxu1 %v16320_v52  ;;  %v2040_v51 = vld [vmem:[#allocation4 + $0x2b28] sm:$0xff]  ;;  %v16358_v52 = vcombine.low %v2027_v5, %v2031_v59  ;;  %v2067_v59 = vld [vmem:[#allocation4 + $0x2c00] sm:$0xff] }
 0x40a   : > { %10473 = vmatprep.subr.bf16.mxu0 %v16327_v56  ;;  %10965 = vmatprep.subr.bf16.mxu1 %v16329_v57  ;;  %v16360_v56 = vcombine.low %v2028_v31, %v2032_v39  ;;  %v16367_v57 = vcombine.high %v2035_v48, %v2039_v49  ;;  %v16369_v60 = vcombine.high %v2036_v50, %v2040_v51  ;;  %v2071_v31 = vld [vmem:[#allocation4 + $0x2c20] sm:$0xff]  ;;  %v2068_v39 = vld [vmem:[#allocation4 + $0x2c08] sm:$0xff] }
 0x40d   : > { %10474 = vmatpush1.bf16.msra.mxu0 %v16326_v2  ;;  %10966 = vmatpush1.bf16.msra.mxu1 %v16328_v3  ;;  %v2048_v2 = vld [vmem:[#allocation4 + $0x2b68] sm:$0xff]  ;;  %v16366_v3 = vcombine.low %v2035_v48, %v2039_v49  ;;  %v2075_v49 = vld [vmem:[#allocation4 + $0x2c40] sm:$0xff] }
 0x40e   : > { %10475 = vmatprep.subr.bf16.mxu0 %v16335_v6  ;;  %10967 = vmatprep.subr.bf16.mxu1 %v16337_v7  ;;  %v16368_v6 = vcombine.low %v2036_v50, %v2040_v51  ;;  %v16375_v7 = vcombine.high %v2043_v61, %v2047_v62  ;;  %v16377_v8 = vcombine.high %v2044_v0, %v2048_v2  ;;  %v2079_v50 = vld [vmem:[#allocation4 + $0x2c60] sm:$0xff] }
 0x40f   : > { %v18938_v51 = vrot.slane %v18921_v19, %v18766_v53  ;;  %v2084_v53 = vld [vmem:[#allocation4 + $0x2c88] sm:$0xff] }
 0x410   : > { %v2088_v19 = vld [vmem:[#allocation4 + $0x2ca8] sm:$0xff] }
 0x411   : > { %10476 = vmatpush1.bf16.msra.mxu0 %v16334_v35  ;;  %10968 = vmatpush1.bf16.msra.mxu1 %v16336_v15  ;;  %v2056_v35 = vld [vmem:[#allocation4 + $0x2ba8] sm:$0xff]  ;;  %v16374_v15 = vcombine.low %v2043_v61, %v2047_v62  ;;  %v16407_v61 = vcombine.high %v2075_v49, %v2079_v50 }
 0x412   : > { %10477 = vmatprep.subr.bf16.mxu0 %v16343_v16  ;;  %10969 = vmatprep.subr.bf16.mxu1 %v16345_v20  ;;  %v16376_v16 = vcombine.low %v2044_v0, %v2048_v2  ;;  %v16383_v20 = vcombine.high %v2051_v11, %v2055_v12  ;;  %v16385_v22 = vcombine.high %v2052_v17, %v2056_v35  ;;  %v2083_v0 = vld [vmem:[#allocation4 + $0x2c80] sm:$0xff] }
 0x413   : > { %v2087_v2 = vld [vmem:[#allocation4 + $0x2ca0] sm:$0xff] }
 0x415   : > { %10478 = vmatpush1.bf16.msra.mxu0 %v16342_v27  ;;  %10970 = vmatpush1.bf16.msra.mxu1 %v16344_v29  ;;  %v2064_v27 = vld [vmem:[#allocation4 + $0x2be8] sm:$0xff]  ;;  %v16382_v29 = vcombine.low %v2051_v11, %v2055_v12  ;;  %v16417_v11 = vcombine.high %v2084_v53, %v2088_v19  ;;  %v2091_v12 = vld [vmem:[#allocation4 + $0x2cc0] sm:$0xff] }
 0x416   : > { %10479 = vmatprep.subr.bf16.mxu0 %v16351_v32  ;;  %10971 = vmatprep.subr.bf16.mxu1 %v16353_v33  ;;  %v16384_v32 = vcombine.low %v2052_v17, %v2056_v35  ;;  %v16391_v33 = vcombine.high %v2059_v23, %v2063_v58  ;;  %v16393_v5 = vcombine.high %v2060_v25, %v2064_v27  ;;  %v2095_v17 = vld [vmem:[#allocation4 + $0x2ce0] sm:$0xff]  ;;  %v2092_v35 = vld [vmem:[#allocation4 + $0x2cc8] sm:$0xff] }
 0x419   : > { %10480 = vmatpush1.bf16.msra.mxu0 %v16350_v40  ;;  %10972 = vmatpush1.bf16.msra.mxu1 %v16352_v41  ;;  %v2072_v40 = vld [vmem:[#allocation4 + $0x2c28] sm:$0xff]  ;;  %v16390_v41 = vcombine.low %v2059_v23, %v2063_v58  ;;  %v2099_v58 = vld [vmem:[#allocation4 + $0x2d00] sm:$0xff] }
 0x41a   : > { %10481 = vmatprep.subr.bf16.mxu0 %v16359_v43  ;;  %10973 = vmatprep.subr.bf16.mxu1 %v16361_v46  ;;  %v16392_v43 = vcombine.low %v2060_v25, %v2064_v27  ;;  %v16399_v46 = vcombine.high %v2067_v59, %v2071_v31  ;;  %v16401_v48 = vcombine.high %v2068_v39, %v2072_v40  ;;  %v2103_v25 = vld [vmem:[#allocation4 + $0x2d20] sm:$0xff]  ;;  %v2100_v27 = vld [vmem:[#allocation4 + $0x2d08] sm:$0xff] }
 0x41d   : > { %10482 = vmatpush1.bf16.msra.mxu0 %v16358_v52  ;;  %10974 = vmatpush1.bf16.msra.mxu1 %v16360_v56  ;;  %v2076_v52 = vld [vmem:[#allocation4 + $0x2c48] sm:$0xff] }
 0x41e   : > { %10483 = vmatprep.subr.bf16.mxu0 %v16367_v57  ;;  %10975 = vmatprep.subr.bf16.mxu1 %v16369_v60  ;;  %v2080_v56 = vld [vmem:[#allocation4 + $0x2c68] sm:$0xff]  ;;  %v16398_v57 = vcombine.low %v2067_v59, %v2071_v31  ;;  %v16400_v60 = vcombine.low %v2068_v39, %v2072_v40  ;;  %v2107_v31 = vld [vmem:[#allocation4 + $0x2d40] sm:$0xff] }
 0x41f   : > { %v16409_v62 = vcombine.high %v2076_v52, %v2080_v56  ;;  %v2111_v39 = vld [vmem:[#allocation4 + $0x2d60] sm:$0xff]  ;;  %v2108_v40 = vld [vmem:[#allocation4 + $0x2d48] sm:$0xff] }
 0x421   : > { %10484 = vmatpush1.bf16.msra.mxu0 %v16366_v3  ;;  %10976 = vmatpush1.bf16.msra.mxu1 %v16368_v6  ;;  %v18942_v3 = vcombine.high %v18930_v47, %v18930_v47  ;;  %v16406_v6 = vcombine.low %v2075_v49, %v2079_v50  ;;  %v2115_v50 = vld [vmem:[#allocation4 + $0x2d80] sm:$0xff] }
 0x422   : > { %10485 = vmatprep.subr.bf16.mxu0 %v16375_v7  ;;  %10977 = vmatprep.subr.bf16.mxu1 %v16377_v8  ;;  %v16408_v7 = vcombine.low %v2076_v52, %v2080_v56  ;;  %v16415_v8 = vcombine.high %v2083_v0, %v2087_v2  ;;  %v2119_v52 = vld [vmem:[#allocation4 + $0x2da0] sm:$0xff]  ;;  %v2116_v56 = vld [vmem:[#allocation4 + $0x2d88] sm:$0xff] }
 0x425   : > { %10486 = vmatpush1.bf16.msra.mxu0 %v16374_v15  ;;  %10978 = vmatpush1.bf16.msra.mxu1 %v16376_v16  ;;  %v2096_v15 = vld [vmem:[#allocation4 + $0x2ce8] sm:$0xff]  ;;  %v16414_v16 = vcombine.low %v2083_v0, %v2087_v2  ;;  %v2123_v2 = vld [vmem:[#allocation4 + $0x2dc0] sm:$0xff] }
 0x426   : > { %10487 = vmatprep.subr.bf16.mxu0 %v16383_v20  ;;  %10979 = vmatprep.subr.bf16.mxu1 %v16385_v22  ;;  %v16416_v20 = vcombine.low %v2084_v53, %v2088_v19  ;;  %v16423_v22 = vcombine.high %v2091_v12, %v2095_v17  ;;  %v16425_v23 = vcombine.high %v2092_v35, %v2096_v15  ;;  %v2127_v53 = vld [vmem:[#allocation4 + $0x2de0] sm:$0xff]  ;;  %v2124_v19 = vld [vmem:[#allocation4 + $0x2dc8] sm:$0xff] }
 0x429   : > { %10488 = vmatpush1.bf16.msra.mxu0 %v16382_v29  ;;  %10980 = vmatpush1.bf16.msra.mxu1 %v16384_v32  ;;  %v2104_v29 = vld [vmem:[#allocation4 + $0x2d28] sm:$0xff]  ;;  %v16422_v32 = vcombine.low %v2091_v12, %v2095_v17  ;;  %v2131_v17 = vld [vmem:[#allocation4 + $0x2e00] sm:$0xff] }
 0x42a   : > { %10489 = vmatprep.subr.bf16.mxu0 %v16391_v33  ;;  %10981 = vmatprep.subr.bf16.mxu1 %v16393_v5  ;;  %v16424_v33 = vcombine.low %v2092_v35, %v2096_v15  ;;  %v16431_v5 = vcombine.high %v2099_v58, %v2103_v25  ;;  %v16433_v59 = vcombine.high %v2100_v27, %v2104_v29  ;;  %v2135_v35 = vld [vmem:[#allocation4 + $0x2e20] sm:$0xff]  ;;  %v2132_v15 = vld [vmem:[#allocation4 + $0x2e08] sm:$0xff] }
 0x42d   : > { %10490 = vmatpush1.bf16.msra.mxu0 %v16390_v41  ;;  %10982 = vmatpush1.bf16.msra.mxu1 %v16392_v43  ;;  %v2112_v41 = vld [vmem:[#allocation4 + $0x2d68] sm:$0xff]  ;;  %v16430_v43 = vcombine.low %v2099_v58, %v2103_v25  ;;  %v2139_v25 = vld [vmem:[#allocation4 + $0x2e40] sm:$0xff] }
 0x42e   : > { %10500 = vmatprep.subr.bf16.mxu0 %v16399_v46  ;;  %10992 = vmatprep.subr.bf16.mxu1 %v16401_v48  ;;  %v16432_v46 = vcombine.low %v2100_v27, %v2104_v29  ;;  %v16439_v48 = vcombine.high %v2107_v31, %v2111_v39  ;;  %v16441_v49 = vcombine.high %v2108_v40, %v2112_v41  ;;  %v2143_v27 = vld [vmem:[#allocation4 + $0x2e60] sm:$0xff]  ;;  %v2140_v29 = vld [vmem:[#allocation4 + $0x2e48] sm:$0xff] }
 0x430   : > { %10492 = vmatmul.mubr.bf16.vlgmr.msra.gmra.mrb[0].mxu0 %v18938_v51  ;;  %10984 = vmatmul.mubr.bf16.vlgmr.msra.gmra.mrb[0].mxu1 %v18938_v51 }
 0x431   : > { %10501 = vmatpush1.bf16.msra.mxu0 %v16398_v57  ;;  %10993 = vmatpush1.bf16.msra.mxu1 %v16400_v60  ;;  %v2120_v57 = vld [vmem:[#allocation4 + $0x2da8] sm:$0xff]  ;;  %v16438_v60 = vcombine.low %v2107_v31, %v2111_v39  ;;  %v2147_v39 = vld [vmem:[#allocation4 + $0x2e80] sm:$0xff] }
 0x432   : > { %10502 = vmatprep.subr.bf16.mxu0 %v16407_v61  ;;  %10994 = vmatprep.subr.bf16.mxu1 %v16409_v62  ;;  %v16440_v61 = vcombine.low %v2108_v40, %v2112_v41  ;;  %v16447_v62 = vcombine.high %v2115_v50, %v2119_v52  ;;  %v16449_v0 = vcombine.high %v2116_v56, %v2120_v57  ;;  %v2151_v40 = vld [vmem:[#allocation4 + $0x2ea0] sm:$0xff]  ;;  %v2148_v41 = vld [vmem:[#allocation4 + $0x2e88] sm:$0xff] }
 0x433   : > { %10532 = vmatprep.mubr.bf16.mxu0 %v18942_v3  ;;  %11024 = vmatprep.mubr.bf16.mxu1 %v18942_v3 }
 0x435   : > { %10503 = vmatpush1.bf16.msra.mxu0 %v16406_v6  ;;  %10995 = vmatpush1.bf16.msra.mxu1 %v16408_v7  ;;  %v2128_v6 = vld [vmem:[#allocation4 + $0x2de8] sm:$0xff]  ;;  %v16446_v7 = vcombine.low %v2115_v50, %v2119_v52  ;;  %v2155_v52 = vld [vmem:[#allocation4 + $0x2ec0] sm:$0xff] }
 0x436   : > { %10504 = vmatprep.subr.bf16.mxu0 %v16415_v8  ;;  %10996 = vmatprep.subr.bf16.mxu1 %v16417_v11  ;;  %v16448_v8 = vcombine.low %v2116_v56, %v2120_v57  ;;  %v16455_v11 = vcombine.high %v2123_v2, %v2127_v53  ;;  %v16457_v12 = vcombine.high %v2124_v19, %v2128_v6  ;;  %v2159_v56 = vld [vmem:[#allocation4 + $0x2ee0] sm:$0xff]  ;;  %v2156_v57 = vld [vmem:[#allocation4 + $0x2ec8] sm:$0xff] }
 0x439   : > { %10505 = vmatpush1.bf16.msra.mxu0 %v16414_v16  ;;  %10997 = vmatpush1.bf16.msra.mxu1 %v16416_v20  ;;  %v2136_v16 = vld [vmem:[#allocation4 + $0x2e28] sm:$0xff]  ;;  %v16454_v20 = vcombine.low %v2123_v2, %v2127_v53  ;;  %v2163_v53 = vld [vmem:[#allocation4 + $0x2f00] sm:$0xff] }
 0x43a   : > { %10506 = vmatprep.subr.bf16.mxu0 %v16423_v22  ;;  %10998 = vmatprep.subr.bf16.mxu1 %v16425_v23  ;;  %v16456_v22 = vcombine.low %v2124_v19, %v2128_v6  ;;  %v16463_v23 = vcombine.high %v2131_v17, %v2135_v35  ;;  %v16465_v58 = vcombine.high %v2132_v15, %v2136_v16  ;;  %v2167_v19 = vld [vmem:[#allocation4 + $0x2f20] sm:$0xff]  ;;  %v2164_v6 = vld [vmem:[#allocation4 + $0x2f08] sm:$0xff] }
 0x43d   : > { %10507 = vmatpush1.bf16.msra.mxu0 %v16422_v32  ;;  %10999 = vmatpush1.bf16.msra.mxu1 %v16424_v33  ;;  %v2144_v32 = vld [vmem:[#allocation4 + $0x2e68] sm:$0xff]  ;;  %v16462_v33 = vcombine.low %v2131_v17, %v2135_v35  ;;  %v2171_v35 = vld [vmem:[#allocation4 + $0x2f40] sm:$0xff] }
 0x43e   : > { %10508 = vmatprep.subr.bf16.mxu0 %v16431_v5  ;;  %11000 = vmatprep.subr.bf16.mxu1 %v16433_v59  ;;  %v16464_v5 = vcombine.low %v2132_v15, %v2136_v16  ;;  %v16471_v59 = vcombine.high %v2139_v25, %v2143_v27  ;;  %v16473_v31 = vcombine.high %v2140_v29, %v2144_v32  ;;  %v2175_v15 = vld [vmem:[#allocation4 + $0x2f60] sm:$0xff]  ;;  %v2172_v16 = vld [vmem:[#allocation4 + $0x2f48] sm:$0xff] }
 0x441   : > { %10509 = vmatpush1.bf16.msra.mxu0 %v16430_v43  ;;  %11001 = vmatpush1.bf16.msra.mxu1 %v16432_v46  ;;  %v2152_v43 = vld [vmem:[#allocation4 + $0x2ea8] sm:$0xff]  ;;  %v16470_v46 = vcombine.low %v2139_v25, %v2143_v27  ;;  %v2179_v27 = vld [vmem:[#allocation4 + $0x2f80] sm:$0xff] }
 0x442   : > { %10510 = vmatprep.subr.bf16.mxu0 %v16439_v48  ;;  %11002 = vmatprep.subr.bf16.mxu1 %v16441_v49  ;;  %v16472_v48 = vcombine.low %v2140_v29, %v2144_v32  ;;  %v16479_v49 = vcombine.high %v2147_v39, %v2151_v40  ;;  %v16481_v50 = vcombine.high %v2148_v41, %v2152_v43  ;;  %v2183_v29 = vld [vmem:[#allocation4 + $0x2fa0] sm:$0xff]  ;;  %v2180_v32 = vld [vmem:[#allocation4 + $0x2f88] sm:$0xff] }
 0x445   : > { %10511 = vmatpush1.bf16.msra.mxu0 %v16438_v60  ;;  %11003 = vmatpush1.bf16.msra.mxu1 %v16440_v61  ;;  %v2160_v60 = vld [vmem:[#allocation4 + $0x2ee8] sm:$0xff]  ;;  %v16478_v61 = vcombine.low %v2147_v39, %v2151_v40  ;;  %v2187_v40 = vld [vmem:[#allocation4 + $0x2fc0] sm:$0xff] }
 0x446   : > { %10512 = vmatprep.subr.bf16.mxu0 %v16447_v62  ;;  %11004 = vmatprep.subr.bf16.mxu1 %v16449_v0  ;;  %v16480_v62 = vcombine.low %v2148_v41, %v2152_v43  ;;  %v16487_v0 = vcombine.high %v2155_v52, %v2159_v56  ;;  %v16489_v2 = vcombine.high %v2156_v57, %v2160_v60  ;;  %v2191_v41 = vld [vmem:[#allocation4 + $0x2fe0] sm:$0xff]  ;;  %v2188_v43 = vld [vmem:[#allocation4 + $0x2fc8] sm:$0xff] }
 0x449   : > { %10513 = vmatpush1.bf16.msra.mxu0 %v16446_v7  ;;  %11005 = vmatpush1.bf16.msra.mxu1 %v16448_v8  ;;  %v2168_v7 = vld [vmem:[#allocation4 + $0x2f28] sm:$0xff]  ;;  %v16486_v8 = vcombine.low %v2155_v52, %v2159_v56  ;;  %v661_v56 = vld [vmem:[#allocation4 + $0x10] sm:$0xff] }
 0x44a   : > { %10514 = vmatprep.subr.bf16.mxu0 %v16455_v11  ;;  %11006 = vmatprep.subr.bf16.mxu1 %v16457_v12  ;;  %v16488_v11 = vcombine.low %v2156_v57, %v2160_v60  ;;  %v16495_v12 = vcombine.high %v2163_v53, %v2167_v19  ;;  %v16497_v17 = vcombine.high %v2164_v6, %v2168_v7  ;;  %v665_v57 = vld [vmem:[#allocation4 + $0x30] sm:$0xff]  ;;  %v662_v60 = vld [vmem:[#allocation4 + $0x18] sm:$0xff] }
 0x44d   : > { %10515 = vmatpush1.bf16.msra.mxu0 %v16454_v20  ;;  %11007 = vmatpush1.bf16.msra.mxu1 %v16456_v22  ;;  %v2176_v20 = vld [vmem:[#allocation4 + $0x2f68] sm:$0xff]  ;;  %v16494_v22 = vcombine.low %v2163_v53, %v2167_v19  ;;  %v669_v19 = vld [vmem:[#allocation4 + $0x50] sm:$0xff] }
 0x44e   : > { %10516 = vmatprep.subr.bf16.mxu0 %v16463_v23  ;;  %11008 = vmatprep.subr.bf16.mxu1 %v16465_v58  ;;  %v16496_v23 = vcombine.low %v2164_v6, %v2168_v7  ;;  %v16503_v58 = vcombine.high %v2171_v35, %v2175_v15  ;;  %v16505_v25 = vcombine.high %v2172_v16, %v2176_v20  ;;  %v673_v6 = vld [vmem:[#allocation4 + $0x70] sm:$0xff] }
 0x44f   : > { %v18950_v7 = vcombine.high %v18938_v51, %v18938_v51 }
 0x451   : > { %10517 = vmatpush1.bf16.msra.mxu0 %v16462_v33  ;;  %11009 = vmatpush1.bf16.msra.mxu1 %v16464_v5  ;;  %v2184_v33 = vld [vmem:[#allocation4 + $0x2fa8] sm:$0xff]  ;;  %v16502_v5 = vcombine.low %v2171_v35, %v2175_v15  ;;  %v15003_v35 = vcombine.high %v669_v19, %v673_v6 }
 0x452   : > { %10518 = vmatprep.subr.bf16.mxu0 %v16471_v59  ;;  %11010 = vmatprep.subr.bf16.mxu1 %v16473_v31  ;;  %v16504_v59 = vcombine.low %v2172_v16, %v2176_v20  ;;  %v16511_v31 = vcombine.high %v2179_v27, %v2183_v29  ;;  %v16513_v39 = vcombine.high %v2180_v32, %v2184_v33  ;;  %v677_v16 = vld [vmem:[#allocation4 + $0x90] sm:$0xff] }
 0x453   : > { %v681_v20 = vld [vmem:[#allocation4 + $0xb0] sm:$0xff] }
 0x455   : > { %10519 = vmatpush1.bf16.msra.mxu0 %v16470_v46  ;;  %11011 = vmatpush1.bf16.msra.mxu1 %v16472_v48  ;;  %v2192_v46 = vld [vmem:[#allocation4 + $0x2fe8] sm:$0xff]  ;;  %v16510_v48 = vcombine.low %v2179_v27, %v2183_v29  ;;  %v15011_v27 = vcombine.high %v677_v16, %v681_v20 }
 0x456   : > { %10520 = vmatprep.subr.bf16.mxu0 %v16479_v49  ;;  %11012 = vmatprep.subr.bf16.mxu1 %v16481_v50  ;;  %v16512_v49 = vcombine.low %v2180_v32, %v2184_v33  ;;  %v16519_v50 = vcombine.high %v2187_v40, %v2191_v41  ;;  %v16521_v52 = vcombine.high %v2188_v43, %v2192_v46  ;;  %v685_v32 = vld [vmem:[#allocation4 + $0xd0] sm:$0xff] }
 0x457   : > { %v689_v33 = vld [vmem:[#allocation4 + $0xf0] sm:$0xff] }
 0x459   : > { %10521 = vmatpush1.bf16.msra.mxu0 %v16478_v61  ;;  %11013 = vmatpush1.bf16.msra.mxu1 %v16480_v62  ;;  %v666_v61 = vld [vmem:[#allocation4 + $0x38] sm:$0xff]  ;;  %v16518_v62 = vcombine.low %v2187_v40, %v2191_v41  ;;  %v15019_v40 = vcombine.high %v685_v32, %v689_v33 }
 0x45a   : > { %10522 = vmatprep.subr.bf16.mxu0 %v16487_v0  ;;  %11014 = vmatprep.subr.bf16.mxu1 %v16489_v2  ;;  %v16520_v0 = vcombine.low %v2188_v43, %v2192_v46  ;;  %v14995_v2 = vcombine.high %v661_v56, %v665_v57  ;;  %v14997_v53 = vcombine.high %v662_v60, %v666_v61  ;;  %v693_v43 = vld [vmem:[#allocation4 + $0x110] sm:$0xff] }
 0x45b   : > { %v697_v46 = vld [vmem:[#allocation4 + $0x130] sm:$0xff] }
 0x45d   : > { %10523 = vmatpush1.bf16.msra.mxu0 %v16486_v8  ;;  %11015 = vmatpush1.bf16.msra.mxu1 %v16488_v11  ;;  %v670_v8 = vld [vmem:[#allocation4 + $0x58] sm:$0xff] }
 0x45e   : > { %10524 = vmatprep.subr.bf16.mxu0 %v16495_v12  ;;  %11016 = vmatprep.subr.bf16.mxu1 %v16497_v17  ;;  %v674_v11 = vld [vmem:[#allocation4 + $0x78] sm:$0xff]  ;;  %v14994_v12 = vcombine.low %v661_v56, %v665_v57  ;;  %v14996_v17 = vcombine.low %v662_v60, %v666_v61  ;;  %v15027_v56 = vcombine.high %v693_v43, %v697_v46  ;;  %v701_v57 = vld [vmem:[#allocation4 + $0x150] sm:$0xff] }
 0x45f   : > { %v15005_v15 = vcombine.high %v670_v8, %v674_v11  ;;  %v705_v60 = vld [vmem:[#allocation4 + $0x170] sm:$0xff]  ;;  %v702_v61 = vld [vmem:[#allocation4 + $0x158] sm:$0xff] }
 0x461   : > { %10525 = vmatpush1.bf16.msra.mxu0 %v16494_v22  ;;  %11017 = vmatpush1.bf16.msra.mxu1 %v16496_v23  ;;  %v678_v22 = vld [vmem:[#allocation4 + $0x98] sm:$0xff] }
 0x462   : > { %10526 = vmatprep.subr.bf16.mxu0 %v16503_v58  ;;  %11018 = vmatprep.subr.bf16.mxu1 %v16505_v25  ;;  %v682_v23 = vld [vmem:[#allocation4 + $0xb8] sm:$0xff]  ;;  %v15002_v58 = vcombine.low %v669_v19, %v673_v6  ;;  %v15004_v25 = vcombine.low %v670_v8, %v674_v11  ;;  %v709_v6 = vld [vmem:[#allocation4 + $0x190] sm:$0xff] }
 0x463   : > { %v15013_v29 = vcombine.high %v678_v22, %v682_v23  ;;  %v713_v8 = vld [vmem:[#allocation4 + $0x1b0] sm:$0xff]  ;;  %v710_v11 = vld [vmem:[#allocation4 + $0x198] sm:$0xff] }
 0x465   : > { %10527 = vmatpush1.bf16.msra.mxu0 %v16502_v5  ;;  %11019 = vmatpush1.bf16.msra.mxu1 %v16504_v59  ;;  %v686_v5 = vld [vmem:[#allocation4 + $0xd8] sm:$0xff] }
 0x466   : > { %10528 = vmatprep.subr.bf16.mxu0 %v16511_v31  ;;  %11020 = vmatprep.subr.bf16.mxu1 %v16513_v39  ;;  %v690_v59 = vld [vmem:[#allocation4 + $0xf8] sm:$0xff]  ;;  %v15010_v31 = vcombine.low %v677_v16, %v681_v20  ;;  %v15012_v39 = vcombine.low %v678_v22, %v682_v23  ;;  %v717_v20 = vld [vmem:[#allocation4 + $0x1d0] sm:$0xff] }
 0x467   : > { %v15021_v41 = vcombine.high %v686_v5, %v690_v59  ;;  %v721_v22 = vld [vmem:[#allocation4 + $0x1f0] sm:$0xff]  ;;  %v718_v23 = vld [vmem:[#allocation4 + $0x1d8] sm:$0xff] }
 0x469   : > { %10529 = vmatpush1.bf16.msra.mxu0 %v16510_v48  ;;  %11021 = vmatpush1.bf16.msra.mxu1 %v16512_v49  ;;  %v694_v48 = vld [vmem:[#allocation4 + $0x118] sm:$0xff] }
 0x46a   : > { %10530 = vmatprep.subr.bf16.mxu0 %v16519_v50  ;;  %11022 = vmatprep.subr.bf16.mxu1 %v16521_v52  ;;  %v698_v49 = vld [vmem:[#allocation4 + $0x138] sm:$0xff]  ;;  %v15018_v50 = vcombine.low %v685_v32, %v689_v33  ;;  %v15020_v52 = vcombine.low %v686_v5, %v690_v59  ;;  %v725_v33 = vld [vmem:[#allocation4 + $0x210] sm:$0xff] }
 0x46b   : > { %v729_v5 = vld [vmem:[#allocation4 + $0x230] sm:$0xff]  ;;  %v726_v59 = vld [vmem:[#allocation4 + $0x218] sm:$0xff] }
 0x46d   : > { %10531 = vmatpush1.bf16.msra.mxu0 %v16518_v62  ;;  %11023 = vmatpush1.bf16.msra.mxu1 %v16520_v0  ;;  %v706_v62 = vld [vmem:[#allocation4 + $0x178] sm:$0xff]  ;;  %v15026_v0 = vcombine.low %v693_v43, %v697_v46  ;;  %v733_v46 = vld [vmem:[#allocation4 + $0x250] sm:$0xff] }
 0x46e   : > { %11033 = vmatprep.subr.bf16.mxu0 %v14995_v2  ;;  %11525 = vmatprep.subr.bf16.mxu1 %v14997_v53  ;;  %v15028_v2 = vcombine.low %v694_v48, %v698_v49  ;;  %v15035_v53 = vcombine.high %v701_v57, %v705_v60  ;;  %v15037_v19 = vcombine.high %v702_v61, %v706_v62 }
 0x470   : > { %10533 = vmatmul.mubr.bf16.vlgmr.msra.gmra.mrb[0].mxu0 %v18950_v7  ;;  %11025 = vmatmul.mubr.bf16.vlgmr.msra.gmra.mrb[0].mxu1 %v18950_v7 }
 0x471   : > { %11034 = vmatpush1.bf16.msra.mxu0 %v14994_v12  ;;  %11526 = vmatpush1.bf16.msra.mxu1 %v14996_v17  ;;  %v714_v12 = vld [vmem:[#allocation4 + $0x1b8] sm:$0xff]  ;;  %v15034_v17 = vcombine.low %v701_v57, %v705_v60  ;;  %v741_v60 = vld [vmem:[#allocation4 + $0x290] sm:$0xff] }
 0x472   : > { %11035 = vmatprep.subr.bf16.mxu0 %v15003_v35  ;;  %11527 = vmatprep.subr.bf16.mxu1 %v15005_v15  ;;  %v15036_v35 = vcombine.low %v702_v61, %v706_v62  ;;  %v15043_v15 = vcombine.high %v709_v6, %v713_v8  ;;  %v15045_v16 = vcombine.high %v710_v11, %v714_v12  ;;  %v745_v61 = vld [vmem:[#allocation4 + $0x2b0] sm:$0xff]  ;;  %v742_v62 = vld [vmem:[#allocation4 + $0x298] sm:$0xff] }
 0x473   : > { %11065 = vmatprep.mubr.bf16.mxu0 %v18778_v9  ;;  %11557 = vmatprep.mubr.bf16.mxu1 %v18778_v9  ;;  %v15029_v9 = vcombine.high %v694_v48, %v698_v49  ;;  %v737_v48 = vld [vmem:[#allocation4 + $0x270] sm:$0xff]  ;;  %v734_v49 = vld [vmem:[#allocation4 + $0x258] sm:$0xff] }
 0x475   : > { %11036 = vmatpush1.bf16.msra.mxu0 %v15002_v58  ;;  %11528 = vmatpush1.bf16.msra.mxu1 %v15004_v25  ;;  %v722_v58 = vld [vmem:[#allocation4 + $0x1f8] sm:$0xff]  ;;  %v15042_v25 = vcombine.low %v709_v6, %v713_v8  ;;  %v749_v8 = vld [vmem:[#allocation4 + $0x2d0] sm:$0xff] }
 0x476   : > { %11037 = vmatprep.subr.bf16.mxu0 %v15011_v27  ;;  %11529 = vmatprep.subr.bf16.mxu1 %v15013_v29  ;;  %v15044_v27 = vcombine.low %v710_v11, %v714_v12  ;;  %v15051_v29 = vcombine.high %v717_v20, %v721_v22  ;;  %v15053_v32 = vcombine.high %v718_v23, %v722_v58  ;;  %v753_v11 = vld [vmem:[#allocation4 + $0x2f0] sm:$0xff]  ;;  %v750_v12 = vld [vmem:[#allocation4 + $0x2d8] sm:$0xff] }
 0x479   : > { %11038 = vmatpush1.bf16.msra.mxu0 %v15010_v31  ;;  %11530 = vmatpush1.bf16.msra.mxu1 %v15012_v39  ;;  %v730_v31 = vld [vmem:[#allocation4 + $0x238] sm:$0xff]  ;;  %v15050_v39 = vcombine.low %v717_v20, %v721_v22  ;;  %v757_v22 = vld [vmem:[#allocation4 + $0x310] sm:$0xff] }
 0x47a   : > { %11039 = vmatprep.subr.bf16.mxu0 %v15019_v40  ;;  %11531 = vmatprep.subr.bf16.mxu1 %v15021_v41  ;;  %v15052_v40 = vcombine.low %v718_v23, %v722_v58  ;;  %v15059_v41 = vcombine.high %v725_v33, %v729_v5  ;;  %v15061_v43 = vcombine.high %v726_v59, %v730_v31  ;;  %v761_v23 = vld [vmem:[#allocation4 + $0x330] sm:$0xff]  ;;  %v758_v58 = vld [vmem:[#allocation4 + $0x318] sm:$0xff] }
 0x47d   : > { %11040 = vmatpush1.bf16.msra.mxu0 %v15018_v50  ;;  %11532 = vmatpush1.bf16.msra.mxu1 %v15020_v52  ;;  %v738_v50 = vld [vmem:[#allocation4 + $0x278] sm:$0xff]  ;;  %v15058_v52 = vcombine.low %v725_v33, %v729_v5  ;;  %v765_v5 = vld [vmem:[#allocation4 + $0x350] sm:$0xff] }
 0x47e   : > { %11041 = vmatprep.subr.bf16.mxu0 %v15027_v56  ;;  %11533 = vmatprep.subr.bf16.mxu1 %v15029_v9  ;;  %v15060_v56 = vcombine.low %v726_v59, %v730_v31  ;;  %v15067_v9 = vcombine.high %v733_v46, %v737_v48  ;;  %v15069_v57 = vcombine.high %v734_v49, %v738_v50  ;;  %v769_v59 = vld [vmem:[#allocation4 + $0x370] sm:$0xff]  ;;  %v766_v31 = vld [vmem:[#allocation4 + $0x358] sm:$0xff] }
 0x481   : > { %11042 = vmatpush1.bf16.msra.mxu0 %v15026_v0  ;;  %11534 = vmatpush1.bf16.msra.mxu1 %v15028_v2  ;;  %v746_v0 = vld [vmem:[#allocation4 + $0x2b8] sm:$0xff]  ;;  %v15066_v2 = vcombine.low %v733_v46, %v737_v48  ;;  %v773_v48 = vld [vmem:[#allocation4 + $0x390] sm:$0xff] }
 0x482   : > { %11043 = vmatprep.subr.bf16.mxu0 %v15035_v53  ;;  %11535 = vmatprep.subr.bf16.mxu1 %v15037_v19  ;;  %v15068_v53 = vcombine.low %v734_v49, %v738_v50  ;;  %v15075_v19 = vcombine.high %v741_v60, %v745_v61  ;;  %v15077_v6 = vcombine.high %v742_v62, %v746_v0  ;;  %v777_v49 = vld [vmem:[#allocation4 + $0x3b0] sm:$0xff]  ;;  %v774_v50 = vld [vmem:[#allocation4 + $0x398] sm:$0xff] }
 0x485   : > { %11044 = vmatpush1.bf16.msra.mxu0 %v15034_v17  ;;  %11536 = vmatpush1.bf16.msra.mxu1 %v15036_v35  ;;  %v754_v17 = vld [vmem:[#allocation4 + $0x2f8] sm:$0xff]  ;;  %v15074_v35 = vcombine.low %v741_v60, %v745_v61  ;;  %v781_v61 = vld [vmem:[#allocation4 + $0x3d0] sm:$0xff] }
 0x486   : > { %11045 = vmatprep.subr.bf16.mxu0 %v15043_v15  ;;  %11537 = vmatprep.subr.bf16.mxu1 %v15045_v16  ;;  %v15076_v15 = vcombine.low %v742_v62, %v746_v0  ;;  %v15083_v16 = vcombine.high %v749_v8, %v753_v11  ;;  %v15085_v20 = vcombine.high %v750_v12, %v754_v17  ;;  %v785_v62 = vld [vmem:[#allocation4 + $0x3f0] sm:$0xff]  ;;  %v782_v0 = vld [vmem:[#allocation4 + $0x3d8] sm:$0xff] }
 0x489   : > { %11046 = vmatpush1.bf16.msra.mxu0 %v15042_v25  ;;  %11538 = vmatpush1.bf16.msra.mxu1 %v15044_v27  ;;  %v762_v25 = vld [vmem:[#allocation4 + $0x338] sm:$0xff]  ;;  %v15082_v27 = vcombine.low %v749_v8, %v753_v11  ;;  %v789_v11 = vld [vmem:[#allocation4 + $0x410] sm:$0xff] }
 0x48a   : > { %11047 = vmatprep.subr.bf16.mxu0 %v15051_v29  ;;  %11539 = vmatprep.subr.bf16.mxu1 %v15053_v32  ;;  %v15084_v29 = vcombine.low %v750_v12, %v754_v17  ;;  %v15091_v32 = vcombine.high %v757_v22, %v761_v23  ;;  %v15093_v33 = vcombine.high %v758_v58, %v762_v25  ;;  %v793_v12 = vld [vmem:[#allocation4 + $0x430] sm:$0xff]  ;;  %v790_v17 = vld [vmem:[#allocation4 + $0x418] sm:$0xff] }
 0x48d   : > { %11048 = vmatpush1.bf16.msra.mxu0 %v15050_v39  ;;  %11540 = vmatpush1.bf16.msra.mxu1 %v15052_v40  ;;  %v770_v39 = vld [vmem:[#allocation4 + $0x378] sm:$0xff]  ;;  %v15090_v40 = vcombine.low %v757_v22, %v761_v23  ;;  %v797_v23 = vld [vmem:[#allocation4 + $0x450] sm:$0xff] }
 0x48e   : > { %11049 = vmatprep.subr.bf16.mxu0 %v15059_v41  ;;  %11541 = vmatprep.subr.bf16.mxu1 %v15061_v43  ;;  %v15092_v41 = vcombine.low %v758_v58, %v762_v25  ;;  %v15099_v43 = vcombine.high %v765_v5, %v769_v59  ;;  %v15101_v46 = vcombine.high %v766_v31, %v770_v39  ;;  %v801_v58 = vld [vmem:[#allocation4 + $0x470] sm:$0xff]  ;;  %v798_v25 = vld [vmem:[#allocation4 + $0x458] sm:$0xff] }
 0x491   : > { %11050 = vmatpush1.bf16.msra.mxu0 %v15058_v52  ;;  %11542 = vmatpush1.bf16.msra.mxu1 %v15060_v56  ;;  %v778_v52 = vld [vmem:[#allocation4 + $0x3b8] sm:$0xff]  ;;  %v15098_v56 = vcombine.low %v765_v5, %v769_v59  ;;  %v805_v59 = vld [vmem:[#allocation4 + $0x490] sm:$0xff] }
 0x492   : > { %11051 = vmatprep.subr.bf16.mxu0 %v15067_v9  ;;  %11543 = vmatprep.subr.bf16.mxu1 %v15069_v57  ;;  %v15100_v9 = vcombine.low %v766_v31, %v770_v39  ;;  %v15107_v57 = vcombine.high %v773_v48, %v777_v49  ;;  %v15109_v60 = vcombine.high %v774_v50, %v778_v52  ;;  %v809_v31 = vld [vmem:[#allocation4 + $0x4b0] sm:$0xff]  ;;  %v806_v39 = vld [vmem:[#allocation4 + $0x498] sm:$0xff] }
 0x495   : > { %11052 = vmatpush1.bf16.msra.mxu0 %v15066_v2  ;;  %11544 = vmatpush1.bf16.msra.mxu1 %v15068_v53  ;;  %v786_v2 = vld [vmem:[#allocation4 + $0x3f8] sm:$0xff]  ;;  %v15106_v53 = vcombine.low %v773_v48, %v777_v49  ;;  %v813_v49 = vld [vmem:[#allocation4 + $0x4d0] sm:$0xff] }
 0x496   : > { %11053 = vmatprep.subr.bf16.mxu0 %v15075_v19  ;;  %11545 = vmatprep.subr.bf16.mxu1 %v15077_v6  ;;  %v15108_v19 = vcombine.low %v774_v50, %v778_v52  ;;  %v15115_v6 = vcombine.high %v781_v61, %v785_v62  ;;  %v15117_v8 = vcombine.high %v782_v0, %v786_v2  ;;  %v817_v50 = vld [vmem:[#allocation4 + $0x4f0] sm:$0xff]  ;;  %v814_v52 = vld [vmem:[#allocation4 + $0x4d8] sm:$0xff] }
 0x499   : > { %11054 = vmatpush1.bf16.msra.mxu0 %v15074_v35  ;;  %11546 = vmatpush1.bf16.msra.mxu1 %v15076_v15  ;;  %v794_v35 = vld [vmem:[#allocation4 + $0x438] sm:$0xff]  ;;  %v15114_v15 = vcombine.low %v781_v61, %v785_v62  ;;  %v821_v61 = vld [vmem:[#allocation4 + $0x510] sm:$0xff] }
 0x49a   : > { %11055 = vmatprep.subr.bf16.mxu0 %v15083_v16  ;;  %11547 = vmatprep.subr.bf16.mxu1 %v15085_v20  ;;  %v15116_v16 = vcombine.low %v782_v0, %v786_v2  ;;  %v15123_v20 = vcombine.high %v789_v11, %v793_v12  ;;  %v15125_v22 = vcombine.high %v790_v17, %v794_v35  ;;  %v825_v62 = vld [vmem:[#allocation4 + $0x530] sm:$0xff]  ;;  %v822_v0 = vld [vmem:[#allocation4 + $0x518] sm:$0xff] }
 0x49b   : > { %v826_v2 = vld [vmem:[#allocation4 + $0x538] sm:$0xff] }
 0x49d   : > { %11056 = vmatpush1.bf16.msra.mxu0 %v15082_v27  ;;  %11548 = vmatpush1.bf16.msra.mxu1 %v15084_v29  ;;  %v802_v27 = vld [vmem:[#allocation4 + $0x478] sm:$0xff]  ;;  %v15122_v29 = vcombine.low %v789_v11, %v793_v12  ;;  %v833_v11 = vld [vmem:[#allocation4 + $0x570] sm:$0xff] }
 0x49e   : > { %11057 = vmatprep.subr.bf16.mxu0 %v15091_v32  ;;  %11549 = vmatprep.subr.bf16.mxu1 %v15093_v33  ;;  %v15124_v32 = vcombine.low %v790_v17, %v794_v35  ;;  %v15131_v33 = vcombine.high %v797_v23, %v801_v58  ;;  %v15133_v5 = vcombine.high %v798_v25, %v802_v27  ;;  %v830_v12 = vld [vmem:[#allocation4 + $0x558] sm:$0xff] }
 0x49f   : > { %v834_v17 = vld [vmem:[#allocation4 + $0x578] sm:$0xff]  ;;  %v15154_v35 = vcombine.low %v821_v61, %v825_v62 }
 0x4a1   : > { %11058 = vmatpush1.bf16.msra.mxu0 %v15090_v40  ;;  %11550 = vmatpush1.bf16.msra.mxu1 %v15092_v41  ;;  %v810_v40 = vld [vmem:[#allocation4 + $0x4b8] sm:$0xff]  ;;  %v15130_v41 = vcombine.low %v797_v23, %v801_v58  ;;  %v841_v23 = vld [vmem:[#allocation4 + $0x5b0] sm:$0xff] }
 0x4a2   : > { %11059 = vmatprep.subr.bf16.mxu0 %v15099_v43  ;;  %11551 = vmatprep.subr.bf16.mxu1 %v15101_v46  ;;  %v15132_v43 = vcombine.low %v798_v25, %v802_v27  ;;  %v15139_v46 = vcombine.high %v805_v59, %v809_v31  ;;  %v15141_v48 = vcombine.high %v806_v39, %v810_v40  ;;  %v838_v58 = vld [vmem:[#allocation4 + $0x598] sm:$0xff] }
 0x4a3   : > { %v842_v25 = vld [vmem:[#allocation4 + $0x5b8] sm:$0xff] }
 0x4a5   : > { %11060 = vmatpush1.bf16.msra.mxu0 %v15098_v56  ;;  %11552 = vmatpush1.bf16.msra.mxu1 %v15100_v9  ;;  %v818_v56 = vld [vmem:[#allocation4 + $0x4f8] sm:$0xff]  ;;  %v15138_v9 = vcombine.low %v805_v59, %v809_v31  ;;  %v849_v59 = vld [vmem:[#allocation4 + $0x5f0] sm:$0xff] }
 0x4a6   : > { %11061 = vmatprep.subr.bf16.mxu0 %v15107_v57  ;;  %11553 = vmatprep.subr.bf16.mxu1 %v15109_v60  ;;  %v15147_v57 = vcombine.high %v813_v49, %v817_v50  ;;  %v15149_v60 = vcombine.high %v814_v52, %v818_v56  ;;  %v846_v31 = vld [vmem:[#allocation4 + $0x5d8] sm:$0xff] }
 0x4a9   : > { %11062 = vmatpush1.bf16.msra.mxu0 %v15106_v53  ;;  %11554 = vmatpush1.bf16.msra.mxu1 %v15108_v19  ;;  %v15146_v53 = vcombine.low %v813_v49, %v817_v50  ;;  %v15148_v19 = vcombine.low %v814_v52, %v818_v56  ;;  %v857_v49 = vld [vmem:[#allocation4 + $0x630] sm:$0xff]  ;;  %v854_v50 = vld [vmem:[#allocation4 + $0x618] sm:$0xff] }
 0x4aa   : > { %11063 = vmatprep.subr.bf16.mxu0 %v15115_v6  ;;  %11555 = vmatprep.subr.bf16.mxu1 %v15117_v8  ;;  %v15155_v6 = vcombine.high %v821_v61, %v825_v62  ;;  %v829_v8 = vld [vmem:[#allocation4 + $0x550] sm:$0xff]  ;;  %v858_v52 = vld [vmem:[#allocation4 + $0x638] sm:$0xff] }
 0x4ab   : > { %v15162_v27 = vcombine.low %v829_v8, %v833_v11  ;;  %v865_v61 = vld [vmem:[#allocation4 + $0x670] sm:$0xff]  ;;  %v862_v62 = vld [vmem:[#allocation4 + $0x658] sm:$0xff] }
 0x4ad   : > { %11064 = vmatpush1.bf16.msra.mxu0 %v15114_v15  ;;  %11556 = vmatpush1.bf16.msra.mxu1 %v15116_v16  ;;  %v15156_v15 = vcombine.low %v822_v0, %v826_v2  ;;  %v15163_v16 = vcombine.high %v829_v8, %v833_v11  ;;  %v873_v8 = vld [vmem:[#allocation4 + $0x6b0] sm:$0xff]  ;;  %v870_v11 = vld [vmem:[#allocation4 + $0x698] sm:$0xff] }
 0x4ae   : > { %11074 = vmatprep.subr.bf16.mxu0 %v15123_v20  ;;  %11566 = vmatprep.subr.bf16.mxu1 %v15125_v22  ;;  %v15165_v20 = vcombine.high %v830_v12, %v834_v17  ;;  %v837_v22 = vld [vmem:[#allocation4 + $0x590] sm:$0xff] }
 0x4b0   : > { %11066 = vmatmul.mubr.bf16.vlgmr.msra.gmra.mrb[4].mxu0 %v18784_v24  ;;  %11558 = vmatmul.mubr.bf16.vlgmr.msra.gmra.mrb[4].mxu1 %v18784_v24  ;;  %v15140_v24 = vcombine.low %v806_v39, %v810_v40  ;;  %v850_v39 = vld [vmem:[#allocation4 + $0x5f8] sm:$0xff]  ;;  %v15170_v40 = vcombine.low %v837_v22, %v841_v23 }
 0x4b1   : > { %11075 = vmatpush1.bf16.msra.mxu0 %v15122_v29  ;;  %11567 = vmatpush1.bf16.msra.mxu1 %v15124_v32  ;;  %v15164_v29 = vcombine.low %v830_v12, %v834_v17  ;;  %v15171_v32 = vcombine.high %v837_v22, %v841_v23  ;;  %v874_v12 = vld [vmem:[#allocation4 + $0x6b8] sm:$0xff]  ;;  %v881_v22 = vld [vmem:[#allocation4 + $0x6f0] sm:$0xff] }
 0x4b2   : > { %11076 = vmatprep.subr.bf16.mxu0 %v15131_v33  ;;  %11568 = vmatprep.subr.bf16.mxu1 %v15133_v5  ;;  %v15173_v33 = vcombine.high %v838_v58, %v842_v25  ;;  %v845_v5 = vld [vmem:[#allocation4 + $0x5d0] sm:$0xff]  ;;  %v878_v23 = vld [vmem:[#allocation4 + $0x6d8] sm:$0xff] }
 0x4b3   : > { %11106 = vmatprep.mubr.bf16.mxu0 %v18788_v36  ;;  %11598 = vmatprep.mubr.bf16.mxu1 %v18788_v36  ;;  %v15157_v36 = vcombine.high %v822_v0, %v826_v2  ;;  %v15178_v56 = vcombine.low %v845_v5, %v849_v59  ;;  %v866_v0 = vld [vmem:[#allocation4 + $0x678] sm:$0xff] }
 0x4b5   : > { %11077 = vmatpush1.bf16.msra.mxu0 %v15130_v41  ;;  %11569 = vmatpush1.bf16.msra.mxu1 %v15132_v43  ;;  %v15172_v41 = vcombine.low %v838_v58, %v842_v25  ;;  %v15179_v43 = vcombine.high %v845_v5, %v849_v59  ;;  %v882_v58 = vld [vmem:[#allocation4 + $0x6f8] sm:$0xff]  ;;  %v889_v5 = vld [vmem:[#allocation4 + $0x730] sm:$0xff] }
 0x4b6   : > { %11078 = vmatprep.subr.bf16.mxu0 %v15139_v46  ;;  %11570 = vmatprep.subr.bf16.mxu1 %v15141_v48  ;;  %v15181_v46 = vcombine.high %v846_v31, %v850_v39  ;;  %v853_v48 = vld [vmem:[#allocation4 + $0x610] sm:$0xff]  ;;  %v886_v59 = vld [vmem:[#allocation4 + $0x718] sm:$0xff] }
 0x4b7   : > { %v15186_v2 = vcombine.low %v853_v48, %v857_v49 }
 0x4b9   : > { %11079 = vmatpush1.bf16.msra.mxu0 %v15138_v9  ;;  %11571 = vmatpush1.bf16.msra.mxu1 %v15140_v24  ;;  %v15180_v9 = vcombine.low %v846_v31, %v850_v39  ;;  %v15187_v24 = vcombine.high %v853_v48, %v857_v49  ;;  %v890_v31 = vld [vmem:[#allocation4 + $0x738] sm:$0xff]  ;;  %v897_v48 = vld [vmem:[#allocation4 + $0x770] sm:$0xff] }
 0x4ba   : > { %11080 = vmatprep.subr.bf16.mxu0 %v15147_v57  ;;  %11572 = vmatprep.subr.bf16.mxu1 %v15149_v60  ;;  %v15189_v57 = vcombine.high %v854_v50, %v858_v52  ;;  %v861_v60 = vld [vmem:[#allocation4 + $0x650] sm:$0xff]  ;;  %v894_v49 = vld [vmem:[#allocation4 + $0x758] sm:$0xff] }
 0x4bb   : > { %v15194_v17 = vcombine.low %v861_v60, %v865_v61 }
 0x4bd   : > { %11081 = vmatpush1.bf16.msra.mxu0 %v15146_v53  ;;  %11573 = vmatpush1.bf16.msra.mxu1 %v15148_v19  ;;  %v15188_v53 = vcombine.low %v854_v50, %v858_v52  ;;  %v15195_v19 = vcombine.high %v861_v60, %v865_v61  ;;  %v898_v50 = vld [vmem:[#allocation4 + $0x778] sm:$0xff]  ;;  %v905_v60 = vld [vmem:[#allocation4 + $0x7b0] sm:$0xff] }
 0x4be   : > { %11082 = vmatprep.subr.bf16.mxu0 %v15155_v6  ;;  %11574 = vmatprep.subr.bf16.mxu1 %v15157_v36  ;;  %v15197_v6 = vcombine.high %v862_v62, %v866_v0  ;;  %v869_v36 = vld [vmem:[#allocation4 + $0x690] sm:$0xff]  ;;  %v902_v61 = vld [vmem:[#allocation4 + $0x798] sm:$0xff] }
 0x4bf   : > { %v15202_v25 = vcombine.low %v869_v36, %v873_v8 }
 0x4c1   : > { %11083 = vmatpush1.bf16.msra.mxu0 %v15154_v35  ;;  %11575 = vmatpush1.bf16.msra.mxu1 %v15156_v15  ;;  %v15196_v35 = vcombine.low %v862_v62, %v866_v0  ;;  %v15203_v15 = vcombine.high %v869_v36, %v873_v8  ;;  %v906_v62 = vld [vmem:[#allocation4 + $0x7b8] sm:$0xff]  ;;  %v913_v36 = vld [vmem:[#allocation4 + $0x7f0] sm:$0xff] }
 0x4c2   : > { %11084 = vmatprep.subr.bf16.mxu0 %v15163_v16  ;;  %11576 = vmatprep.subr.bf16.mxu1 %v15165_v20  ;;  %v15205_v16 = vcombine.high %v870_v11, %v874_v12  ;;  %v877_v20 = vld [vmem:[#allocation4 + $0x6d0] sm:$0xff]  ;;  %v910_v8 = vld [vmem:[#allocation4 + $0x7d8] sm:$0xff] }
 0x4c3   : > { %v15210_v39 = vcombine.low %v877_v20, %v881_v22 }
 0x4c5   : > { %11085 = vmatpush1.bf16.msra.mxu0 %v15162_v27  ;;  %11577 = vmatpush1.bf16.msra.mxu1 %v15164_v29  ;;  %v15204_v27 = vcombine.low %v870_v11, %v874_v12  ;;  %v15211_v29 = vcombine.high %v877_v20, %v881_v22  ;;  %v914_v11 = vld [vmem:[#allocation4 + $0x7f8] sm:$0xff]  ;;  %v921_v20 = vld [vmem:[#allocation4 + $0x830] sm:$0xff] }
 0x4c6   : > { %11086 = vmatprep.subr.bf16.mxu0 %v15171_v32  ;;  %11578 = vmatprep.subr.bf16.mxu1 %v15173_v33  ;;  %v15213_v32 = vcombine.high %v878_v23, %v882_v58  ;;  %v885_v33 = vld [vmem:[#allocation4 + $0x710] sm:$0xff]  ;;  %v918_v22 = vld [vmem:[#allocation4 + $0x818] sm:$0xff] }
 0x4c7   : > { %v15218_v52 = vcombine.low %v885_v33, %v889_v5 }
 0x4c9   : > { %11087 = vmatpush1.bf16.msra.mxu0 %v15170_v40  ;;  %11579 = vmatpush1.bf16.msra.mxu1 %v15172_v41  ;;  %v15212_v40 = vcombine.low %v878_v23, %v882_v58  ;;  %v15219_v41 = vcombine.high %v885_v33, %v889_v5  ;;  %v922_v23 = vld [vmem:[#allocation4 + $0x838] sm:$0xff]  ;;  %v929_v33 = vld [vmem:[#allocation4 + $0x870] sm:$0xff] }
 0x4ca   : > { %11088 = vmatprep.subr.bf16.mxu0 %v15179_v43  ;;  %11580 = vmatprep.subr.bf16.mxu1 %v15181_v46  ;;  %v15221_v43 = vcombine.high %v886_v59, %v890_v31  ;;  %v893_v46 = vld [vmem:[#allocation4 + $0x750] sm:$0xff]  ;;  %v926_v5 = vld [vmem:[#allocation4 + $0x858] sm:$0xff] }
 0x4cb   : > { %v15226_v0 = vcombine.low %v893_v46, %v897_v48 }
 0x4cd   : > { %11089 = vmatpush1.bf16.msra.mxu0 %v15178_v56  ;;  %11581 = vmatpush1.bf16.msra.mxu1 %v15180_v9  ;;  %v15220_v56 = vcombine.low %v886_v59, %v890_v31  ;;  %v15227_v9 = vcombine.high %v893_v46, %v897_v48  ;;  %v930_v59 = vld [vmem:[#allocation4 + $0x878] sm:$0xff]  ;;  %v937_v46 = vld [vmem:[#allocation4 + $0x8b0] sm:$0xff] }
 0x4ce   : > { %11090 = vmatprep.subr.bf16.mxu0 %v15187_v24  ;;  %11582 = vmatprep.subr.bf16.mxu1 %v15189_v57  ;;  %v15229_v24 = vcombine.high %v894_v49, %v898_v50  ;;  %v901_v57 = vld [vmem:[#allocation4 + $0x790] sm:$0xff]  ;;  %v934_v48 = vld [vmem:[#allocation4 + $0x898] sm:$0xff] }
 0x4cf   : > { %v15234_v12 = vcombine.low %v901_v57, %v905_v60 }
 0x4d1   : > { %11091 = vmatpush1.bf16.msra.mxu0 %v15186_v2  ;;  %11583 = vmatpush1.bf16.msra.mxu1 %v15188_v53  ;;  %v15228_v2 = vcombine.low %v894_v49, %v898_v50  ;;  %v15235_v53 = vcombine.high %v901_v57, %v905_v60  ;;  %v938_v49 = vld [vmem:[#allocation4 + $0x8b8] sm:$0xff]  ;;  %v945_v57 = vld [vmem:[#allocation4 + $0x8f0] sm:$0xff] }
 0x4d2   : > { %11092 = vmatprep.subr.bf16.mxu0 %v15195_v19  ;;  %11584 = vmatprep.subr.bf16.mxu1 %v15197_v6  ;;  %v15237_v19 = vcombine.high %v902_v61, %v906_v62  ;;  %v909_v6 = vld [vmem:[#allocation4 + $0x7d0] sm:$0xff]  ;;  %v942_v60 = vld [vmem:[#allocation4 + $0x8d8] sm:$0xff] }
 0x4d3   : > { %v15242_v58 = vcombine.low %v909_v6, %v913_v36 }
 0x4d5   : > { %11093 = vmatpush1.bf16.msra.mxu0 %v15194_v17  ;;  %11585 = vmatpush1.bf16.msra.mxu1 %v15196_v35  ;;  %v15236_v17 = vcombine.low %v902_v61, %v906_v62  ;;  %v15243_v35 = vcombine.high %v909_v6, %v913_v36  ;;  %v946_v61 = vld [vmem:[#allocation4 + $0x8f8] sm:$0xff] }
 0x4d6   : > { %11094 = vmatprep.subr.bf16.mxu0 %v15203_v15  ;;  %11586 = vmatprep.subr.bf16.mxu1 %v15205_v16  ;;  %v15245_v15 = vcombine.high %v910_v8, %v914_v11  ;;  %v917_v16 = vld [vmem:[#allocation4 + $0x810] sm:$0xff]  ;;  %v950_v6 = vld [vmem:[#allocation4 + $0x918] sm:$0xff] }
 0x4d7   : > { %v15250_v31 = vcombine.low %v917_v16, %v921_v20  ;;  %v954_v36 = vld [vmem:[#allocation4 + $0x938] sm:$0xff] }
 0x4d9   : > { %11095 = vmatpush1.bf16.msra.mxu0 %v15202_v25  ;;  %11587 = vmatpush1.bf16.msra.mxu1 %v15204_v27  ;;  %v15244_v25 = vcombine.low %v910_v8, %v914_v11  ;;  %v15251_v27 = vcombine.high %v917_v16, %v921_v20  ;;  %v15276_v11 = vcombine.low %v942_v60, %v946_v61  ;;  %v962_v16 = vld [vmem:[#allocation4 + $0x978] sm:$0xff] }
 0x4da   : > { %11096 = vmatprep.subr.bf16.mxu0 %v15211_v29  ;;  %11588 = vmatprep.subr.bf16.mxu1 %v15213_v32  ;;  %v15253_v29 = vcombine.high %v918_v22, %v922_v23  ;;  %v925_v32 = vld [vmem:[#allocation4 + $0x850] sm:$0xff] }
 0x4db   : > { %v15258_v50 = vcombine.low %v925_v32, %v929_v33 }
 0x4dd   : > { %11097 = vmatpush1.bf16.msra.mxu0 %v15210_v39  ;;  %11589 = vmatpush1.bf16.msra.mxu1 %v15212_v40  ;;  %v15252_v39 = vcombine.low %v918_v22, %v922_v23  ;;  %v15259_v40 = vcombine.high %v925_v32, %v929_v33  ;;  %v15284_v22 = vcombine.low %v950_v6, %v954_v36  ;;  %v970_v32 = vld [vmem:[#allocation4 + $0x9b8] sm:$0xff] }
 0x4de   : > { %11098 = vmatprep.subr.bf16.mxu0 %v15219_v41  ;;  %11590 = vmatprep.subr.bf16.mxu1 %v15221_v43  ;;  %v15261_v41 = vcombine.high %v926_v5, %v930_v59  ;;  %v933_v43 = vld [vmem:[#allocation4 + $0x890] sm:$0xff] }
 0x4df   : > { %v15266_v62 = vcombine.low %v933_v43, %v937_v46 }
 0x4e1   : > { %11099 = vmatpush1.bf16.msra.mxu0 %v15218_v52  ;;  %11591 = vmatpush1.bf16.msra.mxu1 %v15220_v56  ;;  %v15260_v52 = vcombine.low %v926_v5, %v930_v59  ;;  %v15267_v56 = vcombine.high %v933_v43, %v937_v46  ;;  %v978_v43 = vld [vmem:[#allocation4 + $0x9f8] sm:$0xff] }
 0x4e2   : > { %11100 = vmatprep.subr.bf16.mxu0 %v15227_v9  ;;  %11592 = vmatprep.subr.bf16.mxu1 %v15229_v24  ;;  %v15269_v9 = vcombine.high %v934_v48, %v938_v49  ;;  %v941_v24 = vld [vmem:[#allocation4 + $0x8d0] sm:$0xff] }
 0x4e3   : > { %v15274_v8 = vcombine.low %v941_v24, %v945_v57 }
 0x4e5   : > { %11101 = vmatpush1.bf16.msra.mxu0 %v15226_v0  ;;  %11593 = vmatpush1.bf16.msra.mxu1 %v15228_v2  ;;  %v15275_v0 = vcombine.high %v941_v24, %v945_v57  ;;  %v15277_v2 = vcombine.high %v942_v60, %v946_v61  ;;  %v986_v24 = vld [vmem:[#allocation4 + $0xa38] sm:$0xff] }
 0x4e6   : > { %11102 = vmatprep.subr.bf16.mxu0 %v15235_v53  ;;  %11594 = vmatprep.subr.bf16.mxu1 %v15237_v19  ;;  %v949_v53 = vld [vmem:[#allocation4 + $0x910] sm:$0xff] }
 0x4e7   : > { %v953_v19 = vld [vmem:[#allocation4 + $0x930] sm:$0xff] }
 0x4e8   : > { %v15282_v20 = vcombine.low %v949_v53, %v953_v19 }
 0x4e9   : > { %11103 = vmatpush1.bf16.msra.mxu0 %v15234_v12  ;;  %11595 = vmatpush1.bf16.msra.mxu1 %v15236_v17  ;;  %v15283_v12 = vcombine.high %v949_v53, %v953_v19  ;;  %v957_v17 = vld [vmem:[#allocation4 + $0x950] sm:$0xff]  ;;  %v994_v53 = vld [vmem:[#allocation4 + $0xa78] sm:$0xff] }
 0x4ea   : > { %11104 = vmatprep.subr.bf16.mxu0 %v15243_v35  ;;  %11596 = vmatprep.subr.bf16.mxu1 %v15245_v15  ;;  %v961_v35 = vld [vmem:[#allocation4 + $0x970] sm:$0xff]  ;;  %v958_v15 = vld [vmem:[#allocation4 + $0x958] sm:$0xff] }
 0x4eb   : > { %v15291_v23 = vcombine.high %v957_v17, %v961_v35  ;;  %v15290_v33 = vcombine.low %v957_v17, %v961_v35  ;;  %v15292_v5 = vcombine.low %v958_v15, %v962_v16  ;;  %v1002_v17 = vld [vmem:[#allocation4 + $0xab8] sm:$0xff] }
 0x4ed   : > { %11105 = vmatpush1.bf16.msra.mxu0 %v15242_v58  ;;  %11597 = vmatpush1.bf16.msra.mxu1 %v15244_v25  ;;  %v15293_v58 = vcombine.high %v958_v15, %v962_v16  ;;  %v965_v25 = vld [vmem:[#allocation4 + $0x990] sm:$0xff] }
 0x4ee   : > { %11115 = vmatprep.subr.bf16.mxu0 %v15251_v27  ;;  %11607 = vmatprep.subr.bf16.mxu1 %v15253_v29  ;;  %v969_v27 = vld [vmem:[#allocation4 + $0x9b0] sm:$0xff]  ;;  %v966_v29 = vld [vmem:[#allocation4 + $0x998] sm:$0xff] }
 0x4ef   : > { %v15299_v59 = vcombine.high %v965_v25, %v969_v27  ;;  %v15298_v46 = vcombine.low %v965_v25, %v969_v27  ;;  %v1010_v25 = vld [vmem:[#allocation4 + $0xaf8] sm:$0xff] }
 0x4f0   : > { %11107 = vmatmul.mubr.bf16.vlgmr.msra.gmra.mrb[4].mxu0 %v18803_v45  ;;  %11599 = vmatmul.mubr.bf16.vlgmr.msra.gmra.mrb[4].mxu1 %v18803_v45  ;;  %v15268_v45 = vcombine.low %v934_v48, %v938_v49  ;;  %v15300_v48 = vcombine.low %v966_v29, %v970_v32 }
 0x4f1   : > { %11116 = vmatpush1.bf16.msra.mxu0 %v15250_v31  ;;  %11608 = vmatpush1.bf16.msra.mxu1 %v15252_v39  ;;  %v15301_v31 = vcombine.high %v966_v29, %v970_v32  ;;  %v973_v39 = vld [vmem:[#allocation4 + $0x9d0] sm:$0xff] }
 0x4f2   : > { %11117 = vmatprep.subr.bf16.mxu0 %v15259_v40  ;;  %11609 = vmatprep.subr.bf16.mxu1 %v15261_v41  ;;  %v977_v40 = vld [vmem:[#allocation4 + $0x9f0] sm:$0xff]  ;;  %v974_v41 = vld [vmem:[#allocation4 + $0x9d8] sm:$0xff] }
 0x4f3   : > { %11147 = vmatprep.mubr.bf16.mxu0 %v18806_v55  ;;  %11639 = vmatprep.mubr.bf16.mxu1 %v18806_v55  ;;  %v15285_v55 = vcombine.high %v950_v6, %v954_v36  ;;  %v15307_v49 = vcombine.high %v973_v39, %v977_v40  ;;  %v15306_v57 = vcombine.low %v973_v39, %v977_v40  ;;  %v1018_v39 = vld [vmem:[#allocation4 + $0xb38] sm:$0xff] }
 0x4f4   : > { %v15308_v60 = vcombine.low %v974_v41, %v978_v43 }
 0x4f5   : > { %11118 = vmatpush1.bf16.msra.mxu0 %v15258_v50  ;;  %11610 = vmatpush1.bf16.msra.mxu1 %v15260_v52  ;;  %v15309_v50 = vcombine.high %v974_v41, %v978_v43  ;;  %v981_v52 = vld [vmem:[#allocation4 + $0xa10] sm:$0xff] }
 0x4f6   : > { %11119 = vmatprep.subr.bf16.mxu0 %v15267_v56  ;;  %11611 = vmatprep.subr.bf16.mxu1 %v15269_v9  ;;  %v985_v56 = vld [vmem:[#allocation4 + $0xa30] sm:$0xff]  ;;  %v982_v9 = vld [vmem:[#allocation4 + $0xa18] sm:$0xff] }
 0x4f7   : > { %v15315_v61 = vcombine.high %v981_v52, %v985_v56  ;;  %v15314_v19 = vcombine.low %v981_v52, %v985_v56  ;;  %v15316_v6 = vcombine.low %v982_v9, %v986_v24  ;;  %v1026_v52 = vld [vmem:[#allocation4 + $0xb78] sm:$0xff] }
 0x4f9   : > { %11120 = vmatpush1.bf16.msra.mxu0 %v15266_v62  ;;  %11612 = vmatpush1.bf16.msra.mxu1 %v15268_v45  ;;  %v15317_v62 = vcombine.high %v982_v9, %v986_v24  ;;  %v989_v45 = vld [vmem:[#allocation4 + $0xa50] sm:$0xff] }
 0x4fa   : > { %11121 = vmatprep.subr.bf16.mxu0 %v15275_v0  ;;  %11613 = vmatprep.subr.bf16.mxu1 %v15277_v2  ;;  %v993_v0 = vld [vmem:[#allocation4 + $0xa70] sm:$0xff]  ;;  %v990_v2 = vld [vmem:[#allocation4 + $0xa58] sm:$0xff] }
 0x4fb   : > { %v15323_v36 = vcombine.high %v989_v45, %v993_v0  ;;  %v15322_v35 = vcombine.low %v989_v45, %v993_v0  ;;  %v15324_v15 = vcombine.low %v990_v2, %v994_v53  ;;  %v1034_v45 = vld [vmem:[#allocation4 + $0xbb8] sm:$0xff] }
 0x4fd   : > { %11122 = vmatpush1.bf16.msra.mxu0 %v15274_v8  ;;  %11614 = vmatpush1.bf16.msra.mxu1 %v15276_v11  ;;  %v15325_v8 = vcombine.high %v990_v2, %v994_v53  ;;  %v997_v11 = vld [vmem:[#allocation4 + $0xa90] sm:$0xff] }
 0x4fe   : > { %11123 = vmatprep.subr.bf16.mxu0 %v15283_v12  ;;  %11615 = vmatprep.subr.bf16.mxu1 %v15285_v55  ;;  %v1001_v12 = vld [vmem:[#allocation4 + $0xab0] sm:$0xff]  ;;  %v998_v55 = vld [vmem:[#allocation4 + $0xa98] sm:$0xff] }
 0x4ff   : > { %v15331_v16 = vcombine.high %v997_v11, %v1001_v12  ;;  %v15330_v27 = vcombine.low %v997_v11, %v1001_v12  ;;  %v15332_v29 = vcombine.low %v998_v55, %v1002_v17  ;;  %v1042_v11 = vld [vmem:[#allocation4 + $0xbf8] sm:$0xff] }
 0x501   : > { %11124 = vmatpush1.bf16.msra.mxu0 %v15282_v20  ;;  %11616 = vmatpush1.bf16.msra.mxu1 %v15284_v22  ;;  %v15333_v20 = vcombine.high %v998_v55, %v1002_v17  ;;  %v1005_v22 = vld [vmem:[#allocation4 + $0xad0] sm:$0xff] }
 0x502   : > { %11125 = vmatprep.subr.bf16.mxu0 %v15291_v23  ;;  %11617 = vmatprep.subr.bf16.mxu1 %v15293_v58  ;;  %v1009_v23 = vld [vmem:[#allocation4 + $0xaf0] sm:$0xff]  ;;  %v1006_v58 = vld [vmem:[#allocation4 + $0xad8] sm:$0xff] }
 0x503   : > { %v15339_v32 = vcombine.high %v1005_v22, %v1009_v23  ;;  %v15338_v40 = vcombine.low %v1005_v22, %v1009_v23  ;;  %v15340_v41 = vcombine.low %v1006_v58, %v1010_v25  ;;  %v1050_v22 = vld [vmem:[#allocation4 + $0xc38] sm:$0xff] }
 0x505   : > { %11126 = vmatpush1.bf16.msra.mxu0 %v15290_v33  ;;  %11618 = vmatpush1.bf16.msra.mxu1 %v15292_v5  ;;  %v15341_v33 = vcombine.high %v1006_v58, %v1010_v25  ;;  %v1013_v5 = vld [vmem:[#allocation4 + $0xb10] sm:$0xff] }
 0x506   : > { %11127 = vmatprep.subr.bf16.mxu0 %v15299_v59  ;;  %11619 = vmatprep.subr.bf16.mxu1 %v15301_v31  ;;  %v1017_v59 = vld [vmem:[#allocation4 + $0xb30] sm:$0xff]  ;;  %v1014_v31 = vld [vmem:[#allocation4 + $0xb18] sm:$0xff] }
 0x507   : > { %v15347_v43 = vcombine.high %v1013_v5, %v1017_v59  ;;  %v15346_v56 = vcombine.low %v1013_v5, %v1017_v59  ;;  %v15348_v9 = vcombine.low %v1014_v31, %v1018_v39  ;;  %v1058_v5 = vld [vmem:[#allocation4 + $0xc78] sm:$0xff] }
 0x509   : > { %11128 = vmatpush1.bf16.msra.mxu0 %v15298_v46  ;;  %11620 = vmatpush1.bf16.msra.mxu1 %v15300_v48  ;;  %v15349_v46 = vcombine.high %v1014_v31, %v1018_v39  ;;  %v1021_v48 = vld [vmem:[#allocation4 + $0xb50] sm:$0xff] }
 0x50a   : > { %11129 = vmatprep.subr.bf16.mxu0 %v15307_v49  ;;  %11621 = vmatprep.subr.bf16.mxu1 %v15309_v50  ;;  %v1025_v49 = vld [vmem:[#allocation4 + $0xb70] sm:$0xff]  ;;  %v1022_v50 = vld [vmem:[#allocation4 + $0xb58] sm:$0xff] }
 0x50b   : > { %v15355_v24 = vcombine.high %v1021_v48, %v1025_v49  ;;  %v15354_v0 = vcombine.low %v1021_v48, %v1025_v49  ;;  %v15356_v2 = vcombine.low %v1022_v50, %v1026_v52  ;;  %v1066_v48 = vld [vmem:[#allocation4 + $0xcb8] sm:$0xff] }
 0x50d   : > { %11130 = vmatpush1.bf16.msra.mxu0 %v15306_v57  ;;  %11622 = vmatpush1.bf16.msra.mxu1 %v15308_v60  ;;  %v15357_v57 = vcombine.high %v1022_v50, %v1026_v52  ;;  %v1029_v60 = vld [vmem:[#allocation4 + $0xb90] sm:$0xff] }
 0x50e   : > { %11131 = vmatprep.subr.bf16.mxu0 %v15315_v61  ;;  %11623 = vmatprep.subr.bf16.mxu1 %v15317_v62  ;;  %v1033_v61 = vld [vmem:[#allocation4 + $0xbb0] sm:$0xff]  ;;  %v1030_v62 = vld [vmem:[#allocation4 + $0xb98] sm:$0xff] }
 0x50f   : > { %v15363_v53 = vcombine.high %v1029_v60, %v1033_v61  ;;  %v15362_v12 = vcombine.low %v1029_v60, %v1033_v61  ;;  %v15364_v55 = vcombine.low %v1030_v62, %v1034_v45  ;;  %v1074_v60 = vld [vmem:[#allocation4 + $0xcf8] sm:$0xff] }
 0x511   : > { %11132 = vmatpush1.bf16.msra.mxu0 %v15314_v19  ;;  %11624 = vmatpush1.bf16.msra.mxu1 %v15316_v6  ;;  %v15365_v19 = vcombine.high %v1030_v62, %v1034_v45  ;;  %v1037_v6 = vld [vmem:[#allocation4 + $0xbd0] sm:$0xff] }
 0x512   : > { %11133 = vmatprep.subr.bf16.mxu0 %v15323_v36  ;;  %11625 = vmatprep.subr.bf16.mxu1 %v15325_v8  ;;  %v1041_v36 = vld [vmem:[#allocation4 + $0xbf0] sm:$0xff]  ;;  %v1038_v8 = vld [vmem:[#allocation4 + $0xbd8] sm:$0xff] }
 0x513   : > { %v15371_v17 = vcombine.high %v1037_v6, %v1041_v36  ;;  %v15370_v23 = vcombine.low %v1037_v6, %v1041_v36  ;;  %v15372_v58 = vcombine.low %v1038_v8, %v1042_v11 }
 0x515   : > { %11134 = vmatpush1.bf16.msra.mxu0 %v15322_v35  ;;  %11626 = vmatpush1.bf16.msra.mxu1 %v15324_v15  ;;  %v15373_v35 = vcombine.high %v1038_v8, %v1042_v11  ;;  %v1045_v15 = vld [vmem:[#allocation4 + $0xc10] sm:$0xff] }
 0x516   : > { %11135 = vmatprep.subr.bf16.mxu0 %v15331_v16  ;;  %11627 = vmatprep.subr.bf16.mxu1 %v15333_v20  ;;  %v1049_v16 = vld [vmem:[#allocation4 + $0xc30] sm:$0xff]  ;;  %v1046_v20 = vld [vmem:[#allocation4 + $0xc18] sm:$0xff] }
 0x517   : > { %v15379_v25 = vcombine.high %v1045_v15, %v1049_v16  ;;  %v15378_v59 = vcombine.low %v1045_v15, %v1049_v16  ;;  %v15380_v31 = vcombine.low %v1046_v20, %v1050_v22  ;;  %v1085_v11 = vld [vmem:[#allocation4 + $0xd50] sm:$0xff] }
 0x519   : > { %11136 = vmatpush1.bf16.msra.mxu0 %v15330_v27  ;;  %11628 = vmatpush1.bf16.msra.mxu1 %v15332_v29  ;;  %v15381_v27 = vcombine.high %v1046_v20, %v1050_v22  ;;  %v1053_v29 = vld [vmem:[#allocation4 + $0xc50] sm:$0xff] }
 0x51a   : > { %11137 = vmatprep.subr.bf16.mxu0 %v15339_v32  ;;  %11629 = vmatprep.subr.bf16.mxu1 %v15341_v33  ;;  %v1057_v32 = vld [vmem:[#allocation4 + $0xc70] sm:$0xff]  ;;  %v1054_v33 = vld [vmem:[#allocation4 + $0xc58] sm:$0xff] }
 0x51b   : > { %v15387_v39 = vcombine.high %v1053_v29, %v1057_v32  ;;  %v15386_v49 = vcombine.low %v1053_v29, %v1057_v32  ;;  %v15388_v50 = vcombine.low %v1054_v33, %v1058_v5  ;;  %v1093_v22 = vld [vmem:[#allocation4 + $0xd90] sm:$0xff] }
 0x51d   : > { %11138 = vmatpush1.bf16.msra.mxu0 %v15338_v40  ;;  %11630 = vmatpush1.bf16.msra.mxu1 %v15340_v41  ;;  %v15389_v40 = vcombine.high %v1054_v33, %v1058_v5  ;;  %v1061_v41 = vld [vmem:[#allocation4 + $0xc90] sm:$0xff] }
 0x51e   : > { %11139 = vmatprep.subr.bf16.mxu0 %v15347_v43  ;;  %11631 = vmatprep.subr.bf16.mxu1 %v15349_v46  ;;  %v1065_v43 = vld [vmem:[#allocation4 + $0xcb0] sm:$0xff]  ;;  %v1062_v46 = vld [vmem:[#allocation4 + $0xc98] sm:$0xff] }
 0x51f   : > { %v15395_v52 = vcombine.high %v1061_v41, %v1065_v43  ;;  %v15394_v61 = vcombine.low %v1061_v41, %v1065_v43  ;;  %v1102_v41 = vld [vmem:[#allocation4 + $0xdd8] sm:$0xff] }
 0x520   : > { %v1106_v43 = vld [vmem:[#allocation4 + $0xdf8] sm:$0xff] }
 0x521   : > { %11140 = vmatpush1.bf16.msra.mxu0 %v15346_v56  ;;  %11632 = vmatpush1.bf16.msra.mxu1 %v15348_v9  ;;  %v15397_v56 = vcombine.high %v1062_v46, %v1066_v48  ;;  %v1069_v9 = vld [vmem:[#allocation4 + $0xcd0] sm:$0xff] }
 0x522   : > { %11141 = vmatprep.subr.bf16.mxu0 %v15355_v24  ;;  %11633 = vmatprep.subr.bf16.mxu1 %v15357_v57  ;;  %v1073_v24 = vld [vmem:[#allocation4 + $0xcf0] sm:$0xff]  ;;  %v1070_v57 = vld [vmem:[#allocation4 + $0xcd8] sm:$0xff] }
 0x523   : > { %v15403_v62 = vcombine.high %v1069_v9, %v1073_v24  ;;  %v15405_v45 = vcombine.high %v1070_v57, %v1074_v60  ;;  %v15402_v6 = vcombine.low %v1069_v9, %v1073_v24  ;;  %v15404_v36 = vcombine.low %v1070_v57, %v1074_v60  ;;  %v1109_v60 = vld [vmem:[#allocation4 + $0xe10] sm:$0xff] }
 0x524   : > { %v15437_v57 = vcombine.high %v1102_v41, %v1106_v43 }
 0x525   : > { %11142 = vmatpush1.bf16.msra.mxu0 %v15354_v0  ;;  %11634 = vmatpush1.bf16.msra.mxu1 %v15356_v2  ;;  %v1077_v0 = vld [vmem:[#allocation4 + $0xd10] sm:$0xff] }
 0x526   : > { %11143 = vmatprep.subr.bf16.mxu0 %v15363_v53  ;;  %11635 = vmatprep.subr.bf16.mxu1 %v15365_v19  ;;  %v1081_v2 = vld [vmem:[#allocation4 + $0xd30] sm:$0xff]  ;;  %v1078_v53 = vld [vmem:[#allocation4 + $0xd18] sm:$0xff] }
 0x527   : > { %v1082_v19 = vld [vmem:[#allocation4 + $0xd38] sm:$0xff]  ;;  %v15411_v8 = vcombine.high %v1077_v0, %v1081_v2 }
 0x528   : > { %v15412_v15 = vcombine.low %v1078_v53, %v1082_v19 }
 0x529   : > { %11144 = vmatpush1.bf16.msra.mxu0 %v15362_v12  ;;  %11636 = vmatpush1.bf16.msra.mxu1 %v15364_v55  ;;  %v1089_v12 = vld [vmem:[#allocation4 + $0xd70] sm:$0xff]  ;;  %v1086_v55 = vld [vmem:[#allocation4 + $0xd58] sm:$0xff] }
 0x52a   : > { %11145 = vmatprep.subr.bf16.mxu0 %v15371_v17  ;;  %11637 = vmatprep.subr.bf16.mxu1 %v15373_v35  ;;  %v1090_v17 = vld [vmem:[#allocation4 + $0xd78] sm:$0xff]  ;;  %v15410_v35 = vcombine.low %v1077_v0, %v1081_v2  ;;  %v15419_v16 = vcombine.high %v1085_v11, %v1089_v12  ;;  %v15436_v0 = vcombine.low %v1102_v41, %v1106_v43  ;;  %v1141_v43 = vld [vmem:[#allocation4 + $0xf10] sm:$0xff] }
 0x52b   : > { %v15421_v20 = vcombine.high %v1086_v55, %v1090_v17  ;;  %v15420_v29 = vcombine.low %v1086_v55, %v1090_v17  ;;  %v1125_v17 = vld [vmem:[#allocation4 + $0xe90] sm:$0xff] }
 0x52d   : > { %11146 = vmatpush1.bf16.msra.mxu0 %v15370_v23  ;;  %11638 = vmatpush1.bf16.msra.mxu1 %v15372_v58  ;;  %v1097_v23 = vld [vmem:[#allocation4 + $0xdb0] sm:$0xff]  ;;  %v1094_v58 = vld [vmem:[#allocation4 + $0xd98] sm:$0xff] }
 0x52e   : > { %11156 = vmatprep.subr.bf16.mxu0 %v15379_v25  ;;  %11648 = vmatprep.subr.bf16.mxu1 %v15381_v27  ;;  %v1098_v25 = vld [vmem:[#allocation4 + $0xdb8] sm:$0xff]  ;;  %v15418_v27 = vcombine.low %v1085_v11, %v1089_v12  ;;  %v15427_v32 = vcombine.high %v1093_v22, %v1097_v23 }
 0x52f   : > { %v15429_v5 = vcombine.high %v1094_v58, %v1098_v25 }
 0x530   : > { %11148 = vmatmul.mubr.bf16.vlgmr.msra.gmra.mrb[4].mxu0 %v18814_v4  ;;  %11640 = vmatmul.mubr.bf16.vlgmr.msra.gmra.mrb[4].mxu1 %v18814_v4  ;;  %v15396_v4 = vcombine.low %v1062_v46, %v1066_v48 }
 0x531   : > { %11157 = vmatpush1.bf16.msra.mxu0 %v15378_v59  ;;  %11649 = vmatpush1.bf16.msra.mxu1 %v15380_v31  ;;  %v1101_v59 = vld [vmem:[#allocation4 + $0xdd0] sm:$0xff] }
 0x532   : > { %11158 = vmatprep.subr.bf16.mxu0 %v15387_v39  ;;  %11650 = vmatprep.subr.bf16.mxu1 %v15389_v40  ;;  %v1105_v31 = vld [vmem:[#allocation4 + $0xdf0] sm:$0xff] }
 0x533   : > { %11188 = vmatprep.mubr.bf16.mxu0 %v18818_v14  ;;  %11680 = vmatprep.mubr.bf16.mxu1 %v18818_v14  ;;  %v15413_v14 = vcombine.high %v1078_v53, %v1082_v19  ;;  %v15435_v9 = vcombine.high %v1101_v59, %v1105_v31  ;;  %v1117_v19 = vld [vmem:[#allocation4 + $0xe50] sm:$0xff] }
 0x535   : > { %11159 = vmatpush1.bf16.msra.mxu0 %v15386_v49  ;;  %11651 = vmatpush1.bf16.msra.mxu1 %v15388_v50  ;;  %v15426_v49 = vcombine.low %v1093_v22, %v1097_v23 }
 0x536   : > { %11160 = vmatprep.subr.bf16.mxu0 %v15395_v52  ;;  %11652 = vmatprep.subr.bf16.mxu1 %v15397_v56  ;;  %v15428_v56 = vcombine.low %v1094_v58, %v1098_v25  ;;  %v1133_v25 = vld [vmem:[#allocation4 + $0xed0] sm:$0xff] }
 0x539   : > { %11161 = vmatpush1.bf16.msra.mxu0 %v15394_v61  ;;  %11653 = vmatpush1.bf16.msra.mxu1 %v15396_v4  ;;  %v1113_v61 = vld [vmem:[#allocation4 + $0xe30] sm:$0xff]  ;;  %v1110_v4 = vld [vmem:[#allocation4 + $0xe18] sm:$0xff] }
 0x53a   : > { %11162 = vmatprep.subr.bf16.mxu0 %v15403_v62  ;;  %11654 = vmatprep.subr.bf16.mxu1 %v15405_v45  ;;  %v1114_v62 = vld [vmem:[#allocation4 + $0xe38] sm:$0xff]  ;;  %v15434_v45 = vcombine.low %v1101_v59, %v1105_v31  ;;  %v15443_v2 = vcombine.high %v1109_v60, %v1113_v61 }
 0x53b   : > { %v15445_v53 = vcombine.high %v1110_v4, %v1114_v62  ;;  %v15444_v11 = vcombine.low %v1110_v4, %v1114_v62  ;;  %v1154_v4 = vld [vmem:[#allocation4 + $0xf78] sm:$0xff] }
 0x53d   : > { %11163 = vmatpush1.bf16.msra.mxu0 %v15402_v6  ;;  %11655 = vmatpush1.bf16.msra.mxu1 %v15404_v36  ;;  %v1121_v6 = vld [vmem:[#allocation4 + $0xe70] sm:$0xff]  ;;  %v1118_v36 = vld [vmem:[#allocation4 + $0xe58] sm:$0xff] }
 0x53e   : > { %11164 = vmatprep.subr.bf16.mxu0 %v15411_v8  ;;  %11656 = vmatprep.subr.bf16.mxu1 %v15413_v14  ;;  %v1122_v8 = vld [vmem:[#allocation4 + $0xe78] sm:$0xff]  ;;  %v15442_v14 = vcombine.low %v1109_v60, %v1113_v61  ;;  %v15451_v12 = vcombine.high %v1117_v19, %v1121_v6  ;;  %v1153_v60 = vld [vmem:[#allocation4 + $0xf70] sm:$0xff] }
 0x53f   : > { %v15453_v55 = vcombine.high %v1118_v36, %v1122_v8  ;;  %v15452_v22 = vcombine.low %v1118_v36, %v1122_v8  ;;  %v1150_v61 = vld [vmem:[#allocation4 + $0xf58] sm:$0xff] }
 0x540   : > { %v1162_v36 = vld [vmem:[#allocation4 + $0xfb8] sm:$0xff] }
 0x541   : > { %11165 = vmatpush1.bf16.msra.mxu0 %v15410_v35  ;;  %11657 = vmatpush1.bf16.msra.mxu1 %v15412_v15  ;;  %v1129_v35 = vld [vmem:[#allocation4 + $0xeb0] sm:$0xff]  ;;  %v1126_v15 = vld [vmem:[#allocation4 + $0xe98] sm:$0xff] }
 0x542   : > { %11166 = vmatprep.subr.bf16.mxu0 %v15419_v16  ;;  %11658 = vmatprep.subr.bf16.mxu1 %v15421_v20  ;;  %v1130_v16 = vld [vmem:[#allocation4 + $0xeb8] sm:$0xff]  ;;  %v15450_v20 = vcombine.low %v1117_v19, %v1121_v6  ;;  %v15459_v23 = vcombine.high %v1125_v17, %v1129_v35  ;;  %v1161_v19 = vld [vmem:[#allocation4 + $0xfb0] sm:$0xff] }
 0x543   : > { %v18968_v33 = vpop.f32.mrb[0].mxu0  ;;  %v18970_v39 = vpop.f32.mrb[0].mxu1  ;;  %v15461_v58 = vcombine.high %v1126_v15, %v1130_v16  ;;  %v15460_v59 = vcombine.low %v1126_v15, %v1130_v16  ;;  %v1158_v6 = vld [vmem:[#allocation4 + $0xf98] sm:$0xff] }
 0x544   : > { %v18972_v40 = vpop.f32.mrb[1].mxu0  ;;  %v18974_v46 = vpop.f32.mrb[1].mxu1  ;;  %v1170_v15 = vld [vmem:[#allocation4 + $0xff8] sm:$0xff] }
 0x545   : > { %v10538_v48 = vpop.f32.mrb[2].mxu0  ;;  %11167 = vmatpush1.bf16.msra.mxu0 %v15418_v27  ;;  %v11030_v50 = vpop.f32.mrb[2].mxu1  ;;  %11659 = vmatpush1.bf16.msra.mxu1 %v15420_v29  ;;  %v1137_v27 = vld [vmem:[#allocation4 + $0xef0] sm:$0xff]  ;;  %v1134_v29 = vld [vmem:[#allocation4 + $0xed8] sm:$0xff] }
 0x546   : > { %v10539_v52 = vpop.f32.mrb[3].mxu0  ;;  %11168 = vmatprep.subr.bf16.mxu0 %v15427_v32  ;;  %v11031_v24 = vpop.f32.mrb[3].mxu1  ;;  %11660 = vmatprep.subr.bf16.mxu1 %v15429_v5  ;;  %v1138_v32 = vld [vmem:[#allocation4 + $0xef8] sm:$0xff]  ;;  %v15458_v5 = vcombine.low %v1125_v17, %v1129_v35  ;;  %v15467_v31 = vcombine.high %v1133_v25, %v1137_v27  ;;  %v1145_v48 = vld [vmem:[#allocation4 + $0xf30] sm:$0xff] }
 0x547   : > { %v15469_v41 = vcombine.high %v1134_v29, %v1138_v32  ;;  %v1146_v50 = vld [vmem:[#allocation4 + $0xf38] sm:$0xff]  ;;  %v15466_v52 = vcombine.low %v1133_v25, %v1137_v27  ;;  %v15474_v62 = vcombine.low %v1141_v43, %v1145_v48  ;;  %v1169_v17 = vld [vmem:[#allocation4 + $0xff0] sm:$0xff] }
 0x548   : > { %v1166_v35 = vld [vmem:[#allocation4 + $0xfd8] sm:$0xff]  ;;  %v1177_v25 = vld [vmem:[#allocation4 + $0x1030] sm:$0xff] }
 0x549   : > { %11169 = vmatpush1.bf16.msra.mxu0 %v15426_v49  ;;  %11661 = vmatpush1.bf16.msra.mxu1 %v15428_v56  ;;  %v1142_v49 = vld [vmem:[#allocation4 + $0xf18] sm:$0xff]  ;;  %v15468_v56 = vcombine.low %v1134_v29, %v1138_v32 }
 0x54a   : > { %11170 = vmatprep.subr.bf16.mxu0 %v15435_v9  ;;  %11662 = vmatprep.subr.bf16.mxu1 %v15437_v57  ;;  %v15475_v9 = vcombine.high %v1141_v43, %v1145_v48  ;;  %v15477_v24 = vcombine.high %v1142_v49, %v1146_v50  ;;  %v1149_v57 = vld [vmem:[#allocation4 + $0xf50] sm:$0xff]  ;;  %v1174_v27 = vld [vmem:[#allocation4 + $0x1018] sm:$0xff] }
 0x54b   : > { %v15482_v8 = vcombine.low %v1149_v57, %v1153_v60  ;;  %v1178_v29 = vld [vmem:[#allocation4 + $0x1038] sm:$0xff]  ;;  %v1185_v43 = vld [vmem:[#allocation4 + $0x1070] sm:$0xff] }
 0x54c   : > { %v1182_v48 = vld [vmem:[#allocation4 + $0x1058] sm:$0xff] }
 0x54d   : > { %11171 = vmatpush1.bf16.msra.mxu0 %v15434_v45  ;;  %11663 = vmatpush1.bf16.msra.mxu1 %v15436_v0  ;;  %v15476_v45 = vcombine.low %v1142_v49, %v1146_v50  ;;  %v15483_v0 = vcombine.high %v1149_v57, %v1153_v60  ;;  %v1186_v49 = vld [vmem:[#allocation4 + $0x1078] sm:$0xff]  ;;  %v1193_v57 = vld [vmem:[#allocation4 + $0x10b0] sm:$0xff] }
 0x54e   : > { %11172 = vmatprep.subr.bf16.mxu0 %v15443_v2  ;;  %11664 = vmatprep.subr.bf16.mxu1 %v15445_v53  ;;  %v15485_v2 = vcombine.high %v1150_v61, %v1154_v4  ;;  %v1157_v53 = vld [vmem:[#allocation4 + $0xf90] sm:$0xff]  ;;  %v1190_v60 = vld [vmem:[#allocation4 + $0x1098] sm:$0xff] }
 0x54f   : > { %v15490_v16 = vcombine.low %v1157_v53, %v1161_v19 }
 0x551   : > { %11173 = vmatpush1.bf16.msra.mxu0 %v15442_v14  ;;  %11665 = vmatpush1.bf16.msra.mxu1 %v15444_v11  ;;  %v15484_v14 = vcombine.low %v1150_v61, %v1154_v4  ;;  %v15491_v11 = vcombine.high %v1157_v53, %v1161_v19  ;;  %v1194_v61 = vld [vmem:[#allocation4 + $0x10b8] sm:$0xff]  ;;  %v1201_v53 = vld [vmem:[#allocation4 + $0x10f0] sm:$0xff] }
 0x552   : > { %11174 = vmatprep.subr.bf16.mxu0 %v15451_v12  ;;  %11666 = vmatprep.subr.bf16.mxu1 %v15453_v55  ;;  %v15493_v12 = vcombine.high %v1158_v6, %v1162_v36  ;;  %v1165_v55 = vld [vmem:[#allocation4 + $0xfd0] sm:$0xff]  ;;  %v1198_v19 = vld [vmem:[#allocation4 + $0x10d8] sm:$0xff] }
 0x553   : > { %v15498_v32 = vcombine.low %v1165_v55, %v1169_v17 }
 0x555   : > { %11175 = vmatpush1.bf16.msra.mxu0 %v15450_v20  ;;  %11667 = vmatpush1.bf16.msra.mxu1 %v15452_v22  ;;  %v15492_v20 = vcombine.low %v1158_v6, %v1162_v36  ;;  %v15499_v22 = vcombine.high %v1165_v55, %v1169_v17  ;;  %v1202_v6 = vld [vmem:[#allocation4 + $0x10f8] sm:$0xff] }
 0x556   : > { %11176 = vmatprep.subr.bf16.mxu0 %v15459_v23  ;;  %11668 = vmatprep.subr.bf16.mxu1 %v15461_v58  ;;  %v15501_v23 = vcombine.high %v1166_v35, %v1170_v15  ;;  %v1173_v58 = vld [vmem:[#allocation4 + $0x1010] sm:$0xff]  ;;  %v1206_v55 = vld [vmem:[#allocation4 + $0x1118] sm:$0xff] }
 0x557   : > { %v15506_v50 = vcombine.low %v1173_v58, %v1177_v25  ;;  %v1210_v17 = vld [vmem:[#allocation4 + $0x1138] sm:$0xff] }
 0x559   : > { %11177 = vmatpush1.bf16.msra.mxu0 %v15458_v5  ;;  %11669 = vmatpush1.bf16.msra.mxu1 %v15460_v59  ;;  %v15500_v5 = vcombine.low %v1166_v35, %v1170_v15  ;;  %v15507_v59 = vcombine.high %v1173_v58, %v1177_v25  ;;  %v15532_v15 = vcombine.low %v1198_v19, %v1202_v6  ;;  %v1218_v58 = vld [vmem:[#allocation4 + $0x1178] sm:$0xff] }
 0x55a   : > { %11178 = vmatprep.subr.bf16.mxu0 %v15467_v31  ;;  %11670 = vmatprep.subr.bf16.mxu1 %v15469_v41  ;;  %v15509_v31 = vcombine.high %v1174_v27, %v1178_v29  ;;  %v1181_v41 = vld [vmem:[#allocation4 + $0x1050] sm:$0xff] }
 0x55b   : > { %v15514_v4 = vcombine.low %v1181_v41, %v1185_v43 }
 0x55d   : > { %11179 = vmatpush1.bf16.msra.mxu0 %v15466_v52  ;;  %11671 = vmatpush1.bf16.msra.mxu1 %v15468_v56  ;;  %v15508_v52 = vcombine.low %v1174_v27, %v1178_v29  ;;  %v15515_v56 = vcombine.high %v1181_v41, %v1185_v43  ;;  %v15540_v27 = vcombine.low %v1206_v55, %v1210_v17  ;;  %v1226_v41 = vld [vmem:[#allocation4 + $0x11b8] sm:$0xff] }
 0x55e   : > { %11180 = vmatprep.subr.bf16.mxu0 %v15475_v9  ;;  %11672 = vmatprep.subr.bf16.mxu1 %v15477_v24  ;;  %v15517_v9 = vcombine.high %v1182_v48, %v1186_v49  ;;  %v1189_v24 = vld [vmem:[#allocation4 + $0x1090] sm:$0xff] }
 0x55f   : > { %v15522_v36 = vcombine.low %v1189_v24, %v1193_v57 }
 0x561   : > { %11181 = vmatpush1.bf16.msra.mxu0 %v15474_v62  ;;  %11673 = vmatpush1.bf16.msra.mxu1 %v15476_v45  ;;  %v15516_v62 = vcombine.low %v1182_v48, %v1186_v49  ;;  %v15523_v45 = vcombine.high %v1189_v24, %v1193_v57  ;;  %v1234_v24 = vld [vmem:[#allocation4 + $0x11f8] sm:$0xff] }
 0x562   : > { %11182 = vmatprep.subr.bf16.mxu0 %v15483_v0  ;;  %11674 = vmatprep.subr.bf16.mxu1 %v15485_v2  ;;  %v15525_v0 = vcombine.high %v1190_v60, %v1194_v61  ;;  %v1197_v2 = vld [vmem:[#allocation4 + $0x10d0] sm:$0xff] }
 0x563   : > { %v15530_v35 = vcombine.low %v1197_v2, %v1201_v53 }
 0x565   : > { %11183 = vmatpush1.bf16.msra.mxu0 %v15482_v8  ;;  %11675 = vmatpush1.bf16.msra.mxu1 %v15484_v14  ;;  %v15531_v8 = vcombine.high %v1197_v2, %v1201_v53  ;;  %v15533_v14 = vcombine.high %v1198_v19, %v1202_v6  ;;  %v1242_v2 = vld [vmem:[#allocation4 + $0x1238] sm:$0xff] }
 0x566   : > { %11184 = vmatprep.subr.bf16.mxu0 %v15491_v11  ;;  %11676 = vmatprep.subr.bf16.mxu1 %v15493_v12  ;;  %v1205_v11 = vld [vmem:[#allocation4 + $0x1110] sm:$0xff] }
 0x567   : > { %v1209_v12 = vld [vmem:[#allocation4 + $0x1130] sm:$0xff] }
 0x568   : > { %v15538_v25 = vcombine.low %v1205_v11, %v1209_v12 }
 0x569   : > { %11185 = vmatpush1.bf16.msra.mxu0 %v15490_v16  ;;  %11677 = vmatpush1.bf16.msra.mxu1 %v15492_v20  ;;  %v15539_v16 = vcombine.high %v1205_v11, %v1209_v12  ;;  %v1213_v20 = vld [vmem:[#allocation4 + $0x1150] sm:$0xff]  ;;  %v1250_v11 = vld [vmem:[#allocation4 + $0x1278] sm:$0xff] }
 0x56a   : > { %11186 = vmatprep.subr.bf16.mxu0 %v15499_v22  ;;  %11678 = vmatprep.subr.bf16.mxu1 %v15501_v23  ;;  %v1217_v22 = vld [vmem:[#allocation4 + $0x1170] sm:$0xff]  ;;  %v1214_v23 = vld [vmem:[#allocation4 + $0x1158] sm:$0xff] }
 0x56b   : > { %v15547_v29 = vcombine.high %v1213_v20, %v1217_v22  ;;  %v15546_v43 = vcombine.low %v1213_v20, %v1217_v22  ;;  %v15548_v48 = vcombine.low %v1214_v23, %v1218_v58  ;;  %v1258_v20 = vld [vmem:[#allocation4 + $0x12b8] sm:$0xff] }
 0x56d   : > { %11187 = vmatpush1.bf16.msra.mxu0 %v15498_v32  ;;  %11679 = vmatpush1.bf16.msra.mxu1 %v15500_v5  ;;  %v15549_v32 = vcombine.high %v1214_v23, %v1218_v58  ;;  %v1221_v5 = vld [vmem:[#allocation4 + $0x1190] sm:$0xff] }
 0x56e   : > { %11197 = vmatprep.subr.bf16.mxu0 %v15507_v59  ;;  %11689 = vmatprep.subr.bf16.mxu1 %v15509_v31  ;;  %v1225_v59 = vld [vmem:[#allocation4 + $0x11b0] sm:$0xff]  ;;  %v1222_v31 = vld [vmem:[#allocation4 + $0x1198] sm:$0xff] }
 0x56f   : > { %v15555_v49 = vcombine.high %v1221_v5, %v1225_v59  ;;  %v15554_v57 = vcombine.low %v1221_v5, %v1225_v59  ;;  %v1266_v5 = vld [vmem:[#allocation4 + $0x12f8] sm:$0xff] }
 0x570   : > { %11189 = vmatmul.mubr.bf16.vlgmr.msra.gmra.mrb[4].mxu0 %v18835_v28  ;;  %11681 = vmatmul.mubr.bf16.vlgmr.msra.gmra.mrb[4].mxu1 %v18835_v28  ;;  %v15524_v28 = vcombine.low %v1190_v60, %v1194_v61  ;;  %v15556_v60 = vcombine.low %v1222_v31, %v1226_v41 }
 0x571   : > { %11198 = vmatpush1.bf16.msra.mxu0 %v15506_v50  ;;  %11690 = vmatpush1.bf16.msra.mxu1 %v15508_v52  ;;  %v15557_v50 = vcombine.high %v1222_v31, %v1226_v41  ;;  %v1229_v52 = vld [vmem:[#allocation4 + $0x11d0] sm:$0xff] }
 0x572   : > { %11199 = vmatprep.subr.bf16.mxu0 %v15515_v56  ;;  %11691 = vmatprep.subr.bf16.mxu1 %v15517_v9  ;;  %v1233_v56 = vld [vmem:[#allocation4 + $0x11f0] sm:$0xff]  ;;  %v1230_v9 = vld [vmem:[#allocation4 + $0x11d8] sm:$0xff] }
 0x573   : > { %11229 = vmatprep.mubr.bf16.mxu0 %v18838_v38  ;;  %11721 = vmatprep.mubr.bf16.mxu1 %v18838_v38  ;;  %v15541_v38 = vcombine.high %v1206_v55, %v1210_v17  ;;  %v15563_v61 = vcombine.high %v1229_v52, %v1233_v56  ;;  %v15562_v53 = vcombine.low %v1229_v52, %v1233_v56  ;;  %v1274_v52 = vld [vmem:[#allocation4 + $0x1338] sm:$0xff] }
 0x574   : > { %v15564_v19 = vcombine.low %v1230_v9, %v1234_v24 }
 0x575   : > { %11200 = vmatpush1.bf16.msra.mxu0 %v15514_v4  ;;  %11692 = vmatpush1.bf16.msra.mxu1 %v15516_v62  ;;  %v15565_v4 = vcombine.high %v1230_v9, %v1234_v24  ;;  %v1237_v62 = vld [vmem:[#allocation4 + $0x1210] sm:$0xff] }
 0x576   : > { %11201 = vmatprep.subr.bf16.mxu0 %v15523_v45  ;;  %11693 = vmatprep.subr.bf16.mxu1 %v15525_v0  ;;  %v1241_v45 = vld [vmem:[#allocation4 + $0x1230] sm:$0xff]  ;;  %v1238_v0 = vld [vmem:[#allocation4 + $0x1218] sm:$0xff] }
 0x577   : > { %v15571_v6 = vcombine.high %v1237_v62, %v1241_v45  ;;  %v15570_v12 = vcombine.low %v1237_v62, %v1241_v45  ;;  %v15572_v55 = vcombine.low %v1238_v0, %v1242_v2  ;;  %v1282_v62 = vld [vmem:[#allocation4 + $0x1378] sm:$0xff] }
 0x579   : > { %11202 = vmatpush1.bf16.msra.mxu0 %v15522_v36  ;;  %11694 = vmatpush1.bf16.msra.mxu1 %v15524_v28  ;;  %v15573_v36 = vcombine.high %v1238_v0, %v1242_v2  ;;  %v1245_v28 = vld [vmem:[#allocation4 + $0x1250] sm:$0xff] }
 0x57a   : > { %11203 = vmatprep.subr.bf16.mxu0 %v15531_v8  ;;  %11695 = vmatprep.subr.bf16.mxu1 %v15533_v14  ;;  %v1249_v8 = vld [vmem:[#allocation4 + $0x1270] sm:$0xff]  ;;  %v1246_v14 = vld [vmem:[#allocation4 + $0x1258] sm:$0xff] }
 0x57b   : > { %v15579_v17 = vcombine.high %v1245_v28, %v1249_v8  ;;  %v15578_v22 = vcombine.low %v1245_v28, %v1249_v8  ;;  %v15580_v23 = vcombine.low %v1246_v14, %v1250_v11  ;;  %v1290_v28 = vld [vmem:[#allocation4 + $0x13b8] sm:$0xff] }
 0x57d   : > { %11204 = vmatpush1.bf16.msra.mxu0 %v15530_v35  ;;  %11696 = vmatpush1.bf16.msra.mxu1 %v15532_v15  ;;  %v15581_v35 = vcombine.high %v1246_v14, %v1250_v11  ;;  %v1253_v15 = vld [vmem:[#allocation4 + $0x1290] sm:$0xff] }
 0x57e   : > { %11205 = vmatprep.subr.bf16.mxu0 %v15539_v16  ;;  %11697 = vmatprep.subr.bf16.mxu1 %v15541_v38  ;;  %v1257_v16 = vld [vmem:[#allocation4 + $0x12b0] sm:$0xff]  ;;  %v1254_v38 = vld [vmem:[#allocation4 + $0x1298] sm:$0xff] }
 0x57f   : > { %v15587_v58 = vcombine.high %v1253_v15, %v1257_v16  ;;  %v15586_v59 = vcombine.low %v1253_v15, %v1257_v16  ;;  %v15588_v31 = vcombine.low %v1254_v38, %v1258_v20  ;;  %v1298_v15 = vld [vmem:[#allocation4 + $0x13f8] sm:$0xff] }
 0x581   : > { %11206 = vmatpush1.bf16.msra.mxu0 %v15538_v25  ;;  %11698 = vmatpush1.bf16.msra.mxu1 %v15540_v27  ;;  %v15589_v25 = vcombine.high %v1254_v38, %v1258_v20  ;;  %v1261_v27 = vld [vmem:[#allocation4 + $0x12d0] sm:$0xff] }
 0x582   : > { %11207 = vmatprep.subr.bf16.mxu0 %v15547_v29  ;;  %11699 = vmatprep.subr.bf16.mxu1 %v15549_v32  ;;  %v1265_v29 = vld [vmem:[#allocation4 + $0x12f0] sm:$0xff]  ;;  %v1262_v32 = vld [vmem:[#allocation4 + $0x12d8] sm:$0xff] }
 0x583   : > { %v15595_v41 = vcombine.high %v1261_v27, %v1265_v29  ;;  %v15594_v56 = vcombine.low %v1261_v27, %v1265_v29  ;;  %v15596_v9 = vcombine.low %v1262_v32, %v1266_v5  ;;  %v1306_v27 = vld [vmem:[#allocation4 + $0x1438] sm:$0xff] }
 0x585   : > { %11208 = vmatpush1.bf16.msra.mxu0 %v15546_v43  ;;  %11700 = vmatpush1.bf16.msra.mxu1 %v15548_v48  ;;  %v15597_v43 = vcombine.high %v1262_v32, %v1266_v5  ;;  %v1269_v48 = vld [vmem:[#allocation4 + $0x1310] sm:$0xff] }
 0x586   : > { %11209 = vmatprep.subr.bf16.mxu0 %v15555_v49  ;;  %11701 = vmatprep.subr.bf16.mxu1 %v15557_v50  ;;  %v1273_v49 = vld [vmem:[#allocation4 + $0x1330] sm:$0xff]  ;;  %v1270_v50 = vld [vmem:[#allocation4 + $0x1318] sm:$0xff] }
 0x587   : > { %v15603_v24 = vcombine.high %v1269_v48, %v1273_v49  ;;  %v15602_v45 = vcombine.low %v1269_v48, %v1273_v49  ;;  %v15604_v0 = vcombine.low %v1270_v50, %v1274_v52  ;;  %v1314_v48 = vld [vmem:[#allocation4 + $0x1478] sm:$0xff] }
 0x589   : > { %11210 = vmatpush1.bf16.msra.mxu0 %v15554_v57  ;;  %11702 = vmatpush1.bf16.msra.mxu1 %v15556_v60  ;;  %v15605_v57 = vcombine.high %v1270_v50, %v1274_v52  ;;  %v1277_v60 = vld [vmem:[#allocation4 + $0x1350] sm:$0xff] }
 0x58a   : > { %11211 = vmatprep.subr.bf16.mxu0 %v15563_v61  ;;  %11703 = vmatprep.subr.bf16.mxu1 %v15565_v4  ;;  %v1281_v61 = vld [vmem:[#allocation4 + $0x1370] sm:$0xff]  ;;  %v1278_v4 = vld [vmem:[#allocation4 + $0x1358] sm:$0xff] }
 0x58b   : > { %v15611_v2 = vcombine.high %v1277_v60, %v1281_v61  ;;  %v15610_v8 = vcombine.low %v1277_v60, %v1281_v61  ;;  %v15612_v14 = vcombine.low %v1278_v4, %v1282_v62  ;;  %v1322_v60 = vld [vmem:[#allocation4 + $0x14b8] sm:$0xff] }
 0x58d   : > { %11212 = vmatpush1.bf16.msra.mxu0 %v15562_v53  ;;  %11704 = vmatpush1.bf16.msra.mxu1 %v15564_v19  ;;  %v15613_v53 = vcombine.high %v1278_v4, %v1282_v62  ;;  %v1285_v19 = vld [vmem:[#allocation4 + $0x1390] sm:$0xff] }
 0x58e   : > { %11213 = vmatprep.subr.bf16.mxu0 %v15571_v6  ;;  %11705 = vmatprep.subr.bf16.mxu1 %v15573_v36  ;;  %v1289_v6 = vld [vmem:[#allocation4 + $0x13b0] sm:$0xff]  ;;  %v1286_v36 = vld [vmem:[#allocation4 + $0x1398] sm:$0xff] }
 0x58f   : > { %v15619_v11 = vcombine.high %v1285_v19, %v1289_v6  ;;  %v15618_v16 = vcombine.low %v1285_v19, %v1289_v6  ;;  %v15620_v38 = vcombine.low %v1286_v36, %v1290_v28  ;;  %v1330_v19 = vld [vmem:[#allocation4 + $0x14f8] sm:$0xff] }
 0x591   : > { %11214 = vmatpush1.bf16.msra.mxu0 %v15570_v12  ;;  %11706 = vmatpush1.bf16.msra.mxu1 %v15572_v55  ;;  %v15621_v12 = vcombine.high %v1286_v36, %v1290_v28  ;;  %v1293_v55 = vld [vmem:[#allocation4 + $0x13d0] sm:$0xff] }
 0x592   : > { %11215 = vmatprep.subr.bf16.mxu0 %v15579_v17  ;;  %11707 = vmatprep.subr.bf16.mxu1 %v15581_v35  ;;  %v1297_v17 = vld [vmem:[#allocation4 + $0x13f0] sm:$0xff]  ;;  %v1294_v35 = vld [vmem:[#allocation4 + $0x13d8] sm:$0xff] }
 0x593   : > { %v15627_v20 = vcombine.high %v1293_v55, %v1297_v17  ;;  %v15626_v29 = vcombine.low %v1293_v55, %v1297_v17  ;;  %v15628_v32 = vcombine.low %v1294_v35, %v1298_v15 }
 0x595   : > { %11216 = vmatpush1.bf16.msra.mxu0 %v15578_v22  ;;  %11708 = vmatpush1.bf16.msra.mxu1 %v15580_v23  ;;  %v15629_v22 = vcombine.high %v1294_v35, %v1298_v15  ;;  %v1301_v23 = vld [vmem:[#allocation4 + $0x1410] sm:$0xff] }
 0x596   : > { %11217 = vmatprep.subr.bf16.mxu0 %v15587_v58  ;;  %11709 = vmatprep.subr.bf16.mxu1 %v15589_v25  ;;  %v1305_v58 = vld [vmem:[#allocation4 + $0x1430] sm:$0xff]  ;;  %v1302_v25 = vld [vmem:[#allocation4 + $0x1418] sm:$0xff] }
 0x597   : > { %v15635_v5 = vcombine.high %v1301_v23, %v1305_v58  ;;  %v15634_v49 = vcombine.low %v1301_v23, %v1305_v58  ;;  %v15636_v50 = vcombine.low %v1302_v25, %v1306_v27  ;;  %v1341_v15 = vld [vmem:[#allocation4 + $0x1550] sm:$0xff] }
 0x599   : > { %11218 = vmatpush1.bf16.msra.mxu0 %v15586_v59  ;;  %11710 = vmatpush1.bf16.msra.mxu1 %v15588_v31  ;;  %v15637_v59 = vcombine.high %v1302_v25, %v1306_v27  ;;  %v1309_v31 = vld [vmem:[#allocation4 + $0x1450] sm:$0xff] }
 0x59a   : > { %11219 = vmatprep.subr.bf16.mxu0 %v15595_v41  ;;  %11711 = vmatprep.subr.bf16.mxu1 %v15597_v43  ;;  %v1313_v41 = vld [vmem:[#allocation4 + $0x1470] sm:$0xff]  ;;  %v1310_v43 = vld [vmem:[#allocation4 + $0x1458] sm:$0xff] }
 0x59b   : > { %v15643_v52 = vcombine.high %v1309_v31, %v1313_v41  ;;  %v15642_v61 = vcombine.low %v1309_v31, %v1313_v41  ;;  %v15644_v4 = vcombine.low %v1310_v43, %v1314_v48  ;;  %v1349_v27 = vld [vmem:[#allocation4 + $0x1590] sm:$0xff] }
 0x59d   : > { %11220 = vmatpush1.bf16.msra.mxu0 %v15594_v56  ;;  %11712 = vmatpush1.bf16.msra.mxu1 %v15596_v9  ;;  %v15645_v56 = vcombine.high %v1310_v43, %v1314_v48  ;;  %v1317_v9 = vld [vmem:[#allocation4 + $0x1490] sm:$0xff] }
 0x59e   : > { %11221 = vmatprep.subr.bf16.mxu0 %v15603_v24  ;;  %11713 = vmatprep.subr.bf16.mxu1 %v15605_v57  ;;  %v1321_v24 = vld [vmem:[#allocation4 + $0x14b0] sm:$0xff]  ;;  %v1318_v57 = vld [vmem:[#allocation4 + $0x1498] sm:$0xff] }
 0x59f   : > { %v15651_v62 = vcombine.high %v1317_v9, %v1321_v24  ;;  %v15650_v6 = vcombine.low %v1317_v9, %v1321_v24  ;;  %v1357_v48 = vld [vmem:[#allocation4 + $0x15d0] sm:$0xff] }
 0x5a1   : > { %11222 = vmatpush1.bf16.msra.mxu0 %v15602_v45  ;;  %11714 = vmatpush1.bf16.msra.mxu1 %v15604_v0  ;;  %v15653_v45 = vcombine.high %v1318_v57, %v1322_v60  ;;  %v1325_v0 = vld [vmem:[#allocation4 + $0x14d0] sm:$0xff] }
 0x5a2   : > { %11223 = vmatprep.subr.bf16.mxu0 %v15611_v2  ;;  %11715 = vmatprep.subr.bf16.mxu1 %v15613_v53  ;;  %v1329_v2 = vld [vmem:[#allocation4 + $0x14f0] sm:$0xff]  ;;  %v1326_v53 = vld [vmem:[#allocation4 + $0x14d8] sm:$0xff] }
 0x5a3   : > { %v15659_v36 = vcombine.high %v1325_v0, %v1329_v2  ;;  %v15661_v28 = vcombine.high %v1326_v53, %v1330_v19  ;;  %v15658_v55 = vcombine.low %v1325_v0, %v1329_v2  ;;  %v15660_v17 = vcombine.low %v1326_v53, %v1330_v19  ;;  %v1373_v19 = vld [vmem:[#allocation4 + $0x1650] sm:$0xff] }
 0x5a5   : > { %11224 = vmatpush1.bf16.msra.mxu0 %v15610_v8  ;;  %11716 = vmatpush1.bf16.msra.mxu1 %v15612_v14  ;;  %v1333_v8 = vld [vmem:[#allocation4 + $0x1510] sm:$0xff] }
 0x5a6   : > { %11225 = vmatprep.subr.bf16.mxu0 %v15619_v11  ;;  %11717 = vmatprep.subr.bf16.mxu1 %v15621_v12  ;;  %v1337_v14 = vld [vmem:[#allocation4 + $0x1530] sm:$0xff]  ;;  %v1334_v11 = vld [vmem:[#allocation4 + $0x1518] sm:$0xff] }
 0x5a7   : > { %v1338_v12 = vld [vmem:[#allocation4 + $0x1538] sm:$0xff]  ;;  %v15667_v35 = vcombine.high %v1333_v8, %v1337_v14 }
 0x5a8   : > { %v15668_v23 = vcombine.low %v1334_v11, %v1338_v12 }
 0x5a9   : > { %11226 = vmatpush1.bf16.msra.mxu0 %v15618_v16  ;;  %11718 = vmatpush1.bf16.msra.mxu1 %v15620_v38  ;;  %v1345_v16 = vld [vmem:[#allocation4 + $0x1570] sm:$0xff]  ;;  %v1342_v38 = vld [vmem:[#allocation4 + $0x1558] sm:$0xff] }
 0x5aa   : > { %11227 = vmatprep.subr.bf16.mxu0 %v15627_v20  ;;  %11719 = vmatprep.subr.bf16.mxu1 %v15629_v22  ;;  %v1346_v20 = vld [vmem:[#allocation4 + $0x1578] sm:$0xff]  ;;  %v15666_v22 = vcombine.low %v1333_v8, %v1337_v14  ;;  %v15675_v58 = vcombine.high %v1341_v15, %v1345_v16 }
 0x5ab   : > { %v15677_v25 = vcombine.high %v1342_v38, %v1346_v20  ;;  %v15676_v31 = vcombine.low %v1342_v38, %v1346_v20  ;;  %v1389_v20 = vld [vmem:[#allocation4 + $0x16d0] sm:$0xff] }
 0x5ad   : > { %11228 = vmatpush1.bf16.msra.mxu0 %v15626_v29  ;;  %11720 = vmatpush1.bf16.msra.mxu1 %v15628_v32  ;;  %v1353_v29 = vld [vmem:[#allocation4 + $0x15b0] sm:$0xff]  ;;  %v1350_v32 = vld [vmem:[#allocation4 + $0x1598] sm:$0xff] }
 0x5ae   : > { %11238 = vmatprep.subr.bf16.mxu0 %v15635_v5  ;;  %11730 = vmatprep.subr.bf16.mxu1 %v15637_v59  ;;  %v1354_v5 = vld [vmem:[#allocation4 + $0x15b8] sm:$0xff]  ;;  %v15674_v59 = vcombine.low %v1341_v15, %v1345_v16  ;;  %v15683_v41 = vcombine.high %v1349_v27, %v1353_v29 }
 0x5af   : > { %v15685_v43 = vcombine.high %v1350_v32, %v1354_v5  ;;  %v15684_v9 = vcombine.low %v1350_v32, %v1354_v5  ;;  %v1397_v5 = vld [vmem:[#allocation4 + $0x1710] sm:$0xff] }
 0x5b0   : > { %11230 = vmatmul.mubr.bf16.vlgmr.msra.gmra.mrb[4].mxu0 %v18846_v1  ;;  %11722 = vmatmul.mubr.bf16.vlgmr.msra.gmra.mrb[4].mxu1 %v18846_v1  ;;  %v15652_v1 = vcombine.low %v1318_v57, %v1322_v60  ;;  %v1365_v60 = vld [vmem:[#allocation4 + $0x1610] sm:$0xff] }
 0x5b1   : > { %11239 = vmatpush1.bf16.msra.mxu0 %v15634_v49  ;;  %11731 = vmatpush1.bf16.msra.mxu1 %v15636_v50  ;;  %v1361_v49 = vld [vmem:[#allocation4 + $0x15f0] sm:$0xff]  ;;  %v1358_v50 = vld [vmem:[#allocation4 + $0x15d8] sm:$0xff] }
 0x5b2   : > { %11240 = vmatprep.subr.bf16.mxu0 %v15643_v52  ;;  %11732 = vmatprep.subr.bf16.mxu1 %v15645_v56  ;;  %v1362_v52 = vld [vmem:[#allocation4 + $0x15f8] sm:$0xff]  ;;  %v15682_v56 = vcombine.low %v1349_v27, %v1353_v29  ;;  %v15691_v24 = vcombine.high %v1357_v48, %v1361_v49 }
 0x5b3   : > { %11270 = vmatprep.mubr.bf16.mxu0 %v18850_v13  ;;  %11762 = vmatprep.mubr.bf16.mxu1 %v18850_v13  ;;  %v15669_v13 = vcombine.high %v1334_v11, %v1338_v12  ;;  %v15693_v57 = vcombine.high %v1358_v50, %v1362_v52  ;;  %v15692_v0 = vcombine.low %v1358_v50, %v1362_v52  ;;  %v1381_v12 = vld [vmem:[#allocation4 + $0x1690] sm:$0xff] }
 0x5b4   : > { %v1405_v52 = vld [vmem:[#allocation4 + $0x1750] sm:$0xff] }
 0x5b5   : > { %11241 = vmatpush1.bf16.msra.mxu0 %v15642_v61  ;;  %11733 = vmatpush1.bf16.msra.mxu1 %v15644_v4  ;;  %v1369_v61 = vld [vmem:[#allocation4 + $0x1630] sm:$0xff]  ;;  %v1366_v4 = vld [vmem:[#allocation4 + $0x1618] sm:$0xff] }
 0x5b6   : > { %11242 = vmatprep.subr.bf16.mxu0 %v15651_v62  ;;  %11734 = vmatprep.subr.bf16.mxu1 %v15653_v45  ;;  %v1370_v62 = vld [vmem:[#allocation4 + $0x1638] sm:$0xff]  ;;  %v15690_v45 = vcombine.low %v1357_v48, %v1361_v49  ;;  %v15699_v2 = vcombine.high %v1365_v60, %v1369_v61 }
 0x5b7   : > { %v15701_v53 = vcombine.high %v1366_v4, %v1370_v62  ;;  %v15700_v8 = vcombine.low %v1366_v4, %v1370_v62  ;;  %v1413_v62 = vld [vmem:[#allocation4 + $0x1790] sm:$0xff] }
 0x5b9   : > { %11243 = vmatpush1.bf16.msra.mxu0 %v15650_v6  ;;  %11735 = vmatpush1.bf16.msra.mxu1 %v15652_v1  ;;  %v1377_v6 = vld [vmem:[#allocation4 + $0x1670] sm:$0xff]  ;;  %v1374_v1 = vld [vmem:[#allocation4 + $0x1658] sm:$0xff] }
 0x5ba   : > { %11244 = vmatprep.subr.bf16.mxu0 %v15659_v36  ;;  %11736 = vmatprep.subr.bf16.mxu1 %v15661_v28  ;;  %v1378_v36 = vld [vmem:[#allocation4 + $0x1678] sm:$0xff]  ;;  %v15698_v28 = vcombine.low %v1365_v60, %v1369_v61  ;;  %v15707_v14 = vcombine.high %v1373_v19, %v1377_v6 }
 0x5bb   : > { %v15709_v11 = vcombine.high %v1374_v1, %v1378_v36  ;;  %v15708_v15 = vcombine.low %v1374_v1, %v1378_v36  ;;  %v1421_v36 = vld [vmem:[#allocation4 + $0x17d0] sm:$0xff] }
 0x5bd   : > { %11245 = vmatpush1.bf16.msra.mxu0 %v15658_v55  ;;  %11737 = vmatpush1.bf16.msra.mxu1 %v15660_v17  ;;  %v1385_v55 = vld [vmem:[#allocation4 + $0x16b0] sm:$0xff]  ;;  %v1382_v17 = vld [vmem:[#allocation4 + $0x1698] sm:$0xff] }
 0x5be   : > { %11246 = vmatprep.subr.bf16.mxu0 %v15667_v35  ;;  %11738 = vmatprep.subr.bf16.mxu1 %v15669_v13  ;;  %v1386_v35 = vld [vmem:[#allocation4 + $0x16b8] sm:$0xff]  ;;  %v15706_v13 = vcombine.low %v1373_v19, %v1377_v6  ;;  %v15715_v16 = vcombine.high %v1381_v12, %v1385_v55 }
 0x5bf   : > { %v15717_v38 = vcombine.high %v1382_v17, %v1386_v35  ;;  %v15716_v27 = vcombine.low %v1382_v17, %v1386_v35  ;;  %v1429_v35 = vld [vmem:[#allocation4 + $0x1810] sm:$0xff] }
 0x5c1   : > { %11247 = vmatpush1.bf16.msra.mxu0 %v15666_v22  ;;  %11739 = vmatpush1.bf16.msra.mxu1 %v15668_v23  ;;  %v1393_v22 = vld [vmem:[#allocation4 + $0x16f0] sm:$0xff]  ;;  %v1390_v23 = vld [vmem:[#allocation4 + $0x16d8] sm:$0xff] }
 0x5c2   : > { %11248 = vmatprep.subr.bf16.mxu0 %v15675_v58  ;;  %11740 = vmatprep.subr.bf16.mxu1 %v15677_v25  ;;  %v1394_v58 = vld [vmem:[#allocation4 + $0x16f8] sm:$0xff]  ;;  %v15714_v25 = vcombine.low %v1381_v12, %v1385_v55  ;;  %v15723_v29 = vcombine.high %v1389_v20, %v1393_v22 }
 0x5c3   : > { %v15725_v32 = vcombine.high %v1390_v23, %v1394_v58  ;;  %v15724_v48 = vcombine.low %v1390_v23, %v1394_v58  ;;  %v1437_v58 = vld [vmem:[#allocation4 + $0x1850] sm:$0xff] }
 0x5c5   : > { %11249 = vmatpush1.bf16.msra.mxu0 %v15674_v59  ;;  %11741 = vmatpush1.bf16.msra.mxu1 %v15676_v31  ;;  %v1401_v59 = vld [vmem:[#allocation4 + $0x1730] sm:$0xff]  ;;  %v1398_v31 = vld [vmem:[#allocation4 + $0x1718] sm:$0xff] }
 0x5c6   : > { %11250 = vmatprep.subr.bf16.mxu0 %v15683_v41  ;;  %11742 = vmatprep.subr.bf16.mxu1 %v15685_v43  ;;  %v1402_v41 = vld [vmem:[#allocation4 + $0x1738] sm:$0xff]  ;;  %v15722_v43 = vcombine.low %v1389_v20, %v1393_v22  ;;  %v15731_v49 = vcombine.high %v1397_v5, %v1401_v59 }
 0x5c7   : > { %v15733_v50 = vcombine.high %v1398_v31, %v1402_v41  ;;  %v15732_v60 = vcombine.low %v1398_v31, %v1402_v41  ;;  %v1445_v41 = vld [vmem:[#allocation4 + $0x1890] sm:$0xff] }
 0x5c9   : > { %11251 = vmatpush1.bf16.msra.mxu0 %v15682_v56  ;;  %11743 = vmatpush1.bf16.msra.mxu1 %v15684_v9  ;;  %v1409_v56 = vld [vmem:[#allocation4 + $0x1770] sm:$0xff]  ;;  %v1406_v9 = vld [vmem:[#allocation4 + $0x1758] sm:$0xff] }
 0x5ca   : > { %11252 = vmatprep.subr.bf16.mxu0 %v15691_v24  ;;  %11744 = vmatprep.subr.bf16.mxu1 %v15693_v57  ;;  %v1410_v24 = vld [vmem:[#allocation4 + $0x1778] sm:$0xff]  ;;  %v15730_v57 = vcombine.low %v1397_v5, %v1401_v59  ;;  %v15739_v61 = vcombine.high %v1405_v52, %v1409_v56 }
 0x5cb   : > { %v15741_v4 = vcombine.high %v1406_v9, %v1410_v24  ;;  %v15740_v19 = vcombine.low %v1406_v9, %v1410_v24  ;;  %v1453_v24 = vld [vmem:[#allocation4 + $0x18d0] sm:$0xff] }
 0x5cd   : > { %11253 = vmatpush1.bf16.msra.mxu0 %v15690_v45  ;;  %11745 = vmatpush1.bf16.msra.mxu1 %v15692_v0  ;;  %v1417_v45 = vld [vmem:[#allocation4 + $0x17b0] sm:$0xff]  ;;  %v1414_v0 = vld [vmem:[#allocation4 + $0x1798] sm:$0xff] }
 0x5ce   : > { %11254 = vmatprep.subr.bf16.mxu0 %v15699_v2  ;;  %11746 = vmatprep.subr.bf16.mxu1 %v15701_v53  ;;  %v1418_v2 = vld [vmem:[#allocation4 + $0x17b8] sm:$0xff]  ;;  %v15738_v53 = vcombine.low %v1405_v52, %v1409_v56  ;;  %v15747_v6 = vcombine.high %v1413_v62, %v1417_v45 }
 0x5cf   : > { %v15749_v1 = vcombine.high %v1414_v0, %v1418_v2  ;;  %v15748_v12 = vcombine.low %v1414_v0, %v1418_v2  ;;  %v1461_v0 = vld [vmem:[#allocation4 + $0x1910] sm:$0xff] }
 0x5d0   : > { %v1465_v2 = vld [vmem:[#allocation4 + $0x1930] sm:$0xff] }
 0x5d1   : > { %11255 = vmatpush1.bf16.msra.mxu0 %v15698_v28  ;;  %11747 = vmatpush1.bf16.msra.mxu1 %v15700_v8  ;;  %v1425_v28 = vld [vmem:[#allocation4 + $0x17f0] sm:$0xff]  ;;  %v1422_v8 = vld [vmem:[#allocation4 + $0x17d8] sm:$0xff] }
 0x5d2   : > { %11256 = vmatprep.subr.bf16.mxu0 %v15707_v14  ;;  %11748 = vmatprep.subr.bf16.mxu1 %v15709_v11  ;;  %v1426_v14 = vld [vmem:[#allocation4 + $0x17f8] sm:$0xff]  ;;  %v15746_v11 = vcombine.low %v1413_v62, %v1417_v45  ;;  %v15755_v55 = vcombine.high %v1421_v36, %v1425_v28 }
 0x5d3   : > { %v15757_v17 = vcombine.high %v1422_v8, %v1426_v14  ;;  %v15756_v20 = vcombine.low %v1422_v8, %v1426_v14  ;;  %v1473_v8 = vld [vmem:[#allocation4 + $0x1970] sm:$0xff]  ;;  %v1470_v14 = vld [vmem:[#allocation4 + $0x1958] sm:$0xff] }
 0x5d5   : > { %11257 = vmatpush1.bf16.msra.mxu0 %v15706_v13  ;;  %11749 = vmatpush1.bf16.msra.mxu1 %v15708_v15  ;;  %v1433_v13 = vld [vmem:[#allocation4 + $0x1830] sm:$0xff]  ;;  %v1430_v15 = vld [vmem:[#allocation4 + $0x1818] sm:$0xff] }
 0x5d6   : > { %11258 = vmatprep.subr.bf16.mxu0 %v15715_v16  ;;  %11750 = vmatprep.subr.bf16.mxu1 %v15717_v38  ;;  %v1434_v16 = vld [vmem:[#allocation4 + $0x1838] sm:$0xff]  ;;  %v15754_v38 = vcombine.low %v1421_v36, %v1425_v28  ;;  %v15763_v22 = vcombine.high %v1429_v35, %v1433_v13  ;;  %v15795_v36 = vcombine.high %v1461_v0, %v1465_v2  ;;  %v1469_v28 = vld [vmem:[#allocation4 + $0x1950] sm:$0xff] }
 0x5d7   : > { %v15765_v23 = vcombine.high %v1430_v15, %v1434_v16  ;;  %v15764_v5 = vcombine.low %v1430_v15, %v1434_v16  ;;  %v1481_v15 = vld [vmem:[#allocation4 + $0x19b0] sm:$0xff]  ;;  %v1478_v16 = vld [vmem:[#allocation4 + $0x1998] sm:$0xff] }
 0x5d9   : > { %11259 = vmatpush1.bf16.msra.mxu0 %v15714_v25  ;;  %11751 = vmatpush1.bf16.msra.mxu1 %v15716_v27  ;;  %v1441_v25 = vld [vmem:[#allocation4 + $0x1870] sm:$0xff]  ;;  %v1438_v27 = vld [vmem:[#allocation4 + $0x1858] sm:$0xff] }
 0x5da   : > { %11260 = vmatprep.subr.bf16.mxu0 %v15723_v29  ;;  %11752 = vmatprep.subr.bf16.mxu1 %v15725_v32  ;;  %v1442_v29 = vld [vmem:[#allocation4 + $0x1878] sm:$0xff]  ;;  %v15762_v32 = vcombine.low %v1429_v35, %v1433_v13  ;;  %v15771_v59 = vcombine.high %v1437_v58, %v1441_v25  ;;  %v1477_v13 = vld [vmem:[#allocation4 + $0x1990] sm:$0xff] }
 0x5db   : > { %v15773_v31 = vcombine.high %v1438_v27, %v1442_v29  ;;  %v15772_v52 = vcombine.low %v1438_v27, %v1442_v29  ;;  %v1489_v27 = vld [vmem:[#allocation4 + $0x19f0] sm:$0xff]  ;;  %v1486_v29 = vld [vmem:[#allocation4 + $0x19d8] sm:$0xff] }
 0x5dd   : > { %11261 = vmatpush1.bf16.msra.mxu0 %v15722_v43  ;;  %11753 = vmatpush1.bf16.msra.mxu1 %v15724_v48  ;;  %v1449_v43 = vld [vmem:[#allocation4 + $0x18b0] sm:$0xff]  ;;  %v1446_v48 = vld [vmem:[#allocation4 + $0x1898] sm:$0xff] }
 0x5de   : > { %11262 = vmatprep.subr.bf16.mxu0 %v15731_v49  ;;  %11754 = vmatprep.subr.bf16.mxu1 %v15733_v50  ;;  %v1450_v49 = vld [vmem:[#allocation4 + $0x18b8] sm:$0xff]  ;;  %v15770_v50 = vcombine.low %v1437_v58, %v1441_v25  ;;  %v15779_v56 = vcombine.high %v1445_v41, %v1449_v43  ;;  %v1485_v25 = vld [vmem:[#allocation4 + $0x19d0] sm:$0xff] }
 0x5df   : > { %v15781_v9 = vcombine.high %v1446_v48, %v1450_v49 }
 0x5e1   : > { %11263 = vmatpush1.bf16.msra.mxu0 %v15730_v57  ;;  %11755 = vmatpush1.bf16.msra.mxu1 %v15732_v60  ;;  %v1457_v57 = vld [vmem:[#allocation4 + $0x18f0] sm:$0xff]  ;;  %v1454_v60 = vld [vmem:[#allocation4 + $0x18d8] sm:$0xff] }
 0x5e2   : > { %11264 = vmatprep.subr.bf16.mxu0 %v15739_v61  ;;  %11756 = vmatprep.subr.bf16.mxu1 %v15741_v4  ;;  %v1458_v61 = vld [vmem:[#allocation4 + $0x18f8] sm:$0xff]  ;;  %v15778_v4 = vcombine.low %v1445_v41, %v1449_v43  ;;  %v15787_v62 = vcombine.high %v1453_v24, %v1457_v57  ;;  %v1493_v43 = vld [vmem:[#allocation4 + $0x1a10] sm:$0xff] }
 0x5e3   : > { %v15789_v45 = vcombine.high %v1454_v60, %v1458_v61 }
 0x5e5   : > { %11265 = vmatpush1.bf16.msra.mxu0 %v15738_v53  ;;  %11757 = vmatpush1.bf16.msra.mxu1 %v15740_v19  ;;  %v1462_v53 = vld [vmem:[#allocation4 + $0x1918] sm:$0xff] }
 0x5e6   : > { %11266 = vmatprep.subr.bf16.mxu0 %v15747_v6  ;;  %11758 = vmatprep.subr.bf16.mxu1 %v15749_v1  ;;  %v1466_v19 = vld [vmem:[#allocation4 + $0x1938] sm:$0xff]  ;;  %v15786_v6 = vcombine.low %v1453_v24, %v1457_v57  ;;  %v15788_v1 = vcombine.low %v1454_v60, %v1458_v61  ;;  %v1501_v57 = vld [vmem:[#allocation4 + $0x1a50] sm:$0xff] }
 0x5e7   : > { %v1505_v60 = vld [vmem:[#allocation4 + $0x1a70] sm:$0xff]  ;;  %v1502_v61 = vld [vmem:[#allocation4 + $0x1a58] sm:$0xff] }
 0x5e9   : > { %11267 = vmatpush1.bf16.msra.mxu0 %v15746_v11  ;;  %11759 = vmatpush1.bf16.msra.mxu1 %v15748_v12  ;;  %v1474_v11 = vld [vmem:[#allocation4 + $0x1978] sm:$0xff]  ;;  %v15794_v12 = vcombine.low %v1461_v0, %v1465_v2  ;;  %v1509_v2 = vld [vmem:[#allocation4 + $0x1a90] sm:$0xff] }
 0x5ea   : > { %11268 = vmatprep.subr.bf16.mxu0 %v15755_v55  ;;  %11760 = vmatprep.subr.bf16.mxu1 %v15757_v17  ;;  %v15796_v55 = vcombine.low %v1462_v53, %v1466_v19  ;;  %v15803_v17 = vcombine.high %v1469_v28, %v1473_v8  ;;  %v15805_v35 = vcombine.high %v1470_v14, %v1474_v11 }
 0x5ed   : > { %11269 = vmatpush1.bf16.msra.mxu0 %v15754_v38  ;;  %11761 = vmatpush1.bf16.msra.mxu1 %v15756_v20  ;;  %v1482_v38 = vld [vmem:[#allocation4 + $0x19b8] sm:$0xff]  ;;  %v15802_v20 = vcombine.low %v1469_v28, %v1473_v8  ;;  %v1517_v8 = vld [vmem:[#allocation4 + $0x1ad0] sm:$0xff] }
 0x5ee   : > { %11279 = vmatprep.subr.bf16.mxu0 %v15763_v22  ;;  %11771 = vmatprep.subr.bf16.mxu1 %v15765_v23  ;;  %v15804_v22 = vcombine.low %v1470_v14, %v1474_v11  ;;  %v15811_v23 = vcombine.high %v1477_v13, %v1481_v15  ;;  %v15813_v58 = vcombine.high %v1478_v16, %v1482_v38  ;;  %v1521_v14 = vld [vmem:[#allocation4 + $0x1af0] sm:$0xff]  ;;  %v1518_v11 = vld [vmem:[#allocation4 + $0x1ad8] sm:$0xff] }
 0x5f0   : > { %11271 = vmatmul.mubr.bf16.vlgmr.msra.gmra.mrb[4].mxu0 %v18865_v42  ;;  %11763 = vmatmul.mubr.bf16.vlgmr.msra.gmra.mrb[4].mxu1 %v18865_v42  ;;  %v15780_v42 = vcombine.low %v1446_v48, %v1450_v49  ;;  %v1497_v48 = vld [vmem:[#allocation4 + $0x1a30] sm:$0xff]  ;;  %v1494_v49 = vld [vmem:[#allocation4 + $0x1a18] sm:$0xff] }
 0x5f1   : > { %11280 = vmatpush1.bf16.msra.mxu0 %v15762_v32  ;;  %11772 = vmatpush1.bf16.msra.mxu1 %v15764_v5  ;;  %v1490_v32 = vld [vmem:[#allocation4 + $0x19f8] sm:$0xff]  ;;  %v15810_v5 = vcombine.low %v1477_v13, %v1481_v15  ;;  %v1525_v15 = vld [vmem:[#allocation4 + $0x1b10] sm:$0xff] }
 0x5f2   : > { %11281 = vmatprep.subr.bf16.mxu0 %v15771_v59  ;;  %11773 = vmatprep.subr.bf16.mxu1 %v15773_v31  ;;  %v15812_v59 = vcombine.low %v1478_v16, %v1482_v38  ;;  %v15819_v31 = vcombine.high %v1485_v25, %v1489_v27  ;;  %v15821_v41 = vcombine.high %v1486_v29, %v1490_v32  ;;  %v1529_v16 = vld [vmem:[#allocation4 + $0x1b30] sm:$0xff]  ;;  %v1526_v38 = vld [vmem:[#allocation4 + $0x1b18] sm:$0xff] }
 0x5f3   : > { %11311 = vmatprep.mubr.bf16.mxu0 %v18868_v54  ;;  %11803 = vmatprep.mubr.bf16.mxu1 %v18868_v54  ;;  %v15797_v54 = vcombine.high %v1462_v53, %v1466_v19  ;;  %v1513_v53 = vld [vmem:[#allocation4 + $0x1ab0] sm:$0xff]  ;;  %v1510_v19 = vld [vmem:[#allocation4 + $0x1a98] sm:$0xff] }
 0x5f5   : > { %11282 = vmatpush1.bf16.msra.mxu0 %v15770_v50  ;;  %11774 = vmatpush1.bf16.msra.mxu1 %v15772_v52  ;;  %v1498_v50 = vld [vmem:[#allocation4 + $0x1a38] sm:$0xff]  ;;  %v15818_v52 = vcombine.low %v1485_v25, %v1489_v27  ;;  %v1533_v27 = vld [vmem:[#allocation4 + $0x1b50] sm:$0xff] }
 0x5f6   : > { %11283 = vmatprep.subr.bf16.mxu0 %v15779_v56  ;;  %11775 = vmatprep.subr.bf16.mxu1 %v15781_v9  ;;  %v15820_v56 = vcombine.low %v1486_v29, %v1490_v32  ;;  %v15827_v9 = vcombine.high %v1493_v43, %v1497_v48  ;;  %v15829_v24 = vcombine.high %v1494_v49, %v1498_v50  ;;  %v1537_v29 = vld [vmem:[#allocation4 + $0x1b70] sm:$0xff]  ;;  %v1534_v32 = vld [vmem:[#allocation4 + $0x1b58] sm:$0xff] }
 0x5f9   : > { %11284 = vmatpush1.bf16.msra.mxu0 %v15778_v4  ;;  %11776 = vmatpush1.bf16.msra.mxu1 %v15780_v42  ;;  %v1506_v4 = vld [vmem:[#allocation4 + $0x1a78] sm:$0xff]  ;;  %v15826_v42 = vcombine.low %v1493_v43, %v1497_v48  ;;  %v1541_v48 = vld [vmem:[#allocation4 + $0x1b90] sm:$0xff] }
 0x5fa   : > { %11285 = vmatprep.subr.bf16.mxu0 %v15787_v62  ;;  %11777 = vmatprep.subr.bf16.mxu1 %v15789_v45  ;;  %v15828_v62 = vcombine.low %v1494_v49, %v1498_v50  ;;  %v15835_v45 = vcombine.high %v1501_v57, %v1505_v60  ;;  %v15837_v0 = vcombine.high %v1502_v61, %v1506_v4  ;;  %v1545_v49 = vld [vmem:[#allocation4 + $0x1bb0] sm:$0xff]  ;;  %v1542_v50 = vld [vmem:[#allocation4 + $0x1b98] sm:$0xff] }
 0x5fd   : > { %11286 = vmatpush1.bf16.msra.mxu0 %v15786_v6  ;;  %11778 = vmatpush1.bf16.msra.mxu1 %v15788_v1  ;;  %v1514_v6 = vld [vmem:[#allocation4 + $0x1ab8] sm:$0xff]  ;;  %v15834_v1 = vcombine.low %v1501_v57, %v1505_v60  ;;  %v1549_v60 = vld [vmem:[#allocation4 + $0x1bd0] sm:$0xff] }
 0x5fe   : > { %11287 = vmatprep.subr.bf16.mxu0 %v15795_v36  ;;  %11779 = vmatprep.subr.bf16.mxu1 %v15797_v54  ;;  %v15836_v36 = vcombine.low %v1502_v61, %v1506_v4  ;;  %v15843_v54 = vcombine.high %v1509_v2, %v1513_v53  ;;  %v15845_v28 = vcombine.high %v1510_v19, %v1514_v6  ;;  %v1553_v61 = vld [vmem:[#allocation4 + $0x1bf0] sm:$0xff]  ;;  %v1550_v4 = vld [vmem:[#allocation4 + $0x1bd8] sm:$0xff] }
 0x601   : > { %11288 = vmatpush1.bf16.msra.mxu0 %v15794_v12  ;;  %11780 = vmatpush1.bf16.msra.mxu1 %v15796_v55  ;;  %v1522_v12 = vld [vmem:[#allocation4 + $0x1af8] sm:$0xff]  ;;  %v15842_v55 = vcombine.low %v1509_v2, %v1513_v53  ;;  %v1557_v53 = vld [vmem:[#allocation4 + $0x1c10] sm:$0xff] }
 0x602   : > { %11289 = vmatprep.subr.bf16.mxu0 %v15803_v17  ;;  %11781 = vmatprep.subr.bf16.mxu1 %v15805_v35  ;;  %v15844_v17 = vcombine.low %v1510_v19, %v1514_v6  ;;  %v15851_v35 = vcombine.high %v1517_v8, %v1521_v14  ;;  %v15853_v13 = vcombine.high %v1518_v11, %v1522_v12  ;;  %v1561_v19 = vld [vmem:[#allocation4 + $0x1c30] sm:$0xff]  ;;  %v1558_v6 = vld [vmem:[#allocation4 + $0x1c18] sm:$0xff] }
 0x605   : > { %11290 = vmatpush1.bf16.msra.mxu0 %v15802_v20  ;;  %11782 = vmatpush1.bf16.msra.mxu1 %v15804_v22  ;;  %v1530_v20 = vld [vmem:[#allocation4 + $0x1b38] sm:$0xff]  ;;  %v15850_v22 = vcombine.low %v1517_v8, %v1521_v14  ;;  %v1565_v14 = vld [vmem:[#allocation4 + $0x1c50] sm:$0xff] }
 0x606   : > { %11291 = vmatprep.subr.bf16.mxu0 %v15811_v23  ;;  %11783 = vmatprep.subr.bf16.mxu1 %v15813_v58  ;;  %v15852_v23 = vcombine.low %v1518_v11, %v1522_v12  ;;  %v15859_v58 = vcombine.high %v1525_v15, %v1529_v16  ;;  %v15861_v25 = vcombine.high %v1526_v38, %v1530_v20  ;;  %v1569_v11 = vld [vmem:[#allocation4 + $0x1c70] sm:$0xff]  ;;  %v1566_v12 = vld [vmem:[#allocation4 + $0x1c58] sm:$0xff] }
 0x609   : > { %11292 = vmatpush1.bf16.msra.mxu0 %v15810_v5  ;;  %11784 = vmatpush1.bf16.msra.mxu1 %v15812_v59  ;;  %v1538_v5 = vld [vmem:[#allocation4 + $0x1b78] sm:$0xff]  ;;  %v15858_v59 = vcombine.low %v1525_v15, %v1529_v16  ;;  %v1573_v16 = vld [vmem:[#allocation4 + $0x1c90] sm:$0xff] }
 0x60a   : > { %11293 = vmatprep.subr.bf16.mxu0 %v15819_v31  ;;  %11785 = vmatprep.subr.bf16.mxu1 %v15821_v41  ;;  %v15860_v31 = vcombine.low %v1526_v38, %v1530_v20  ;;  %v15867_v41 = vcombine.high %v1533_v27, %v1537_v29  ;;  %v15869_v43 = vcombine.high %v1534_v32, %v1538_v5  ;;  %v1577_v38 = vld [vmem:[#allocation4 + $0x1cb0] sm:$0xff]  ;;  %v1574_v20 = vld [vmem:[#allocation4 + $0x1c98] sm:$0xff] }
 0x60d   : > { %11294 = vmatpush1.bf16.msra.mxu0 %v15818_v52  ;;  %11786 = vmatpush1.bf16.msra.mxu1 %v15820_v56  ;;  %v1546_v52 = vld [vmem:[#allocation4 + $0x1bb8] sm:$0xff]  ;;  %v15866_v56 = vcombine.low %v1533_v27, %v1537_v29  ;;  %v1581_v29 = vld [vmem:[#allocation4 + $0x1cd0] sm:$0xff] }
 0x60e   : > { %11295 = vmatprep.subr.bf16.mxu0 %v15827_v9  ;;  %11787 = vmatprep.subr.bf16.mxu1 %v15829_v24  ;;  %v15868_v9 = vcombine.low %v1534_v32, %v1538_v5  ;;  %v15875_v24 = vcombine.high %v1541_v48, %v1545_v49  ;;  %v15877_v57 = vcombine.high %v1542_v50, %v1546_v52  ;;  %v1585_v32 = vld [vmem:[#allocation4 + $0x1cf0] sm:$0xff]  ;;  %v1582_v5 = vld [vmem:[#allocation4 + $0x1cd8] sm:$0xff] }
 0x611   : > { %11296 = vmatpush1.bf16.msra.mxu0 %v15826_v42  ;;  %11788 = vmatpush1.bf16.msra.mxu1 %v15828_v62  ;;  %v1554_v42 = vld [vmem:[#allocation4 + $0x1bf8] sm:$0xff]  ;;  %v15874_v62 = vcombine.low %v1541_v48, %v1545_v49  ;;  %v1589_v48 = vld [vmem:[#allocation4 + $0x1d10] sm:$0xff] }
 0x612   : > { %11297 = vmatprep.subr.bf16.mxu0 %v15835_v45  ;;  %11789 = vmatprep.subr.bf16.mxu1 %v15837_v0  ;;  %v15876_v45 = vcombine.low %v1542_v50, %v1546_v52  ;;  %v15883_v0 = vcombine.high %v1549_v60, %v1553_v61  ;;  %v15885_v2 = vcombine.high %v1550_v4, %v1554_v42  ;;  %v1593_v49 = vld [vmem:[#allocation4 + $0x1d30] sm:$0xff]  ;;  %v1590_v50 = vld [vmem:[#allocation4 + $0x1d18] sm:$0xff] }
 0x613   : > { %v1594_v52 = vld [vmem:[#allocation4 + $0x1d38] sm:$0xff] }
 0x615   : > { %11298 = vmatpush1.bf16.msra.mxu0 %v15834_v1  ;;  %11790 = vmatpush1.bf16.msra.mxu1 %v15836_v36  ;;  %v1562_v1 = vld [vmem:[#allocation4 + $0x1c38] sm:$0xff]  ;;  %v15882_v36 = vcombine.low %v1549_v60, %v1553_v61  ;;  %v1601_v60 = vld [vmem:[#allocation4 + $0x1d70] sm:$0xff] }
 0x616   : > { %11299 = vmatprep.subr.bf16.mxu0 %v15843_v54  ;;  %11791 = vmatprep.subr.bf16.mxu1 %v15845_v28  ;;  %v15884_v54 = vcombine.low %v1550_v4, %v1554_v42  ;;  %v15891_v28 = vcombine.high %v1557_v53, %v1561_v19  ;;  %v15893_v8 = vcombine.high %v1558_v6, %v1562_v1  ;;  %v1598_v61 = vld [vmem:[#allocation4 + $0x1d58] sm:$0xff] }
 0x617   : > { %v1602_v4 = vld [vmem:[#allocation4 + $0x1d78] sm:$0xff]  ;;  %v15922_v42 = vcombine.low %v1589_v48, %v1593_v49 }
 0x619   : > { %11300 = vmatpush1.bf16.msra.mxu0 %v15842_v55  ;;  %11792 = vmatpush1.bf16.msra.mxu1 %v15844_v17  ;;  %v1570_v55 = vld [vmem:[#allocation4 + $0x1c78] sm:$0xff]  ;;  %v15890_v17 = vcombine.low %v1557_v53, %v1561_v19  ;;  %v1609_v53 = vld [vmem:[#allocation4 + $0x1db0] sm:$0xff] }
 0x61a   : > { %11301 = vmatprep.subr.bf16.mxu0 %v15851_v35  ;;  %11793 = vmatprep.subr.bf16.mxu1 %v15853_v13  ;;  %v15892_v35 = vcombine.low %v1558_v6, %v1562_v1  ;;  %v15899_v13 = vcombine.high %v1565_v14, %v1569_v11  ;;  %v15901_v15 = vcombine.high %v1566_v12, %v1570_v55  ;;  %v1606_v19 = vld [vmem:[#allocation4 + $0x1d98] sm:$0xff] }
 0x61b   : > { %v1610_v6 = vld [vmem:[#allocation4 + $0x1db8] sm:$0xff] }
 0x61d   : > { %11302 = vmatpush1.bf16.msra.mxu0 %v15850_v22  ;;  %11794 = vmatpush1.bf16.msra.mxu1 %v15852_v23  ;;  %v1578_v22 = vld [vmem:[#allocation4 + $0x1cb8] sm:$0xff]  ;;  %v15898_v23 = vcombine.low %v1565_v14, %v1569_v11  ;;  %v1617_v14 = vld [vmem:[#allocation4 + $0x1df0] sm:$0xff] }
 0x61e   : > { %11303 = vmatprep.subr.bf16.mxu0 %v15859_v58  ;;  %11795 = vmatprep.subr.bf16.mxu1 %v15861_v25  ;;  %v15900_v58 = vcombine.low %v1566_v12, %v1570_v55  ;;  %v15907_v25 = vcombine.high %v1573_v16, %v1577_v38  ;;  %v15909_v27 = vcombine.high %v1574_v20, %v1578_v22  ;;  %v1614_v11 = vld [vmem:[#allocation4 + $0x1dd8] sm:$0xff] }
 0x61f   : > { %v1618_v12 = vld [vmem:[#allocation4 + $0x1df8] sm:$0xff] }
 0x621   : > { %11304 = vmatpush1.bf16.msra.mxu0 %v15858_v59  ;;  %11796 = vmatpush1.bf16.msra.mxu1 %v15860_v31  ;;  %v1586_v59 = vld [vmem:[#allocation4 + $0x1cf8] sm:$0xff]  ;;  %v15906_v31 = vcombine.low %v1573_v16, %v1577_v38  ;;  %v1625_v16 = vld [vmem:[#allocation4 + $0x1e30] sm:$0xff] }
 0x622   : > { %11305 = vmatprep.subr.bf16.mxu0 %v15867_v41  ;;  %11797 = vmatprep.subr.bf16.mxu1 %v15869_v43  ;;  %v15915_v41 = vcombine.high %v1581_v29, %v1585_v32  ;;  %v15917_v43 = vcombine.high %v1582_v5, %v1586_v59  ;;  %v1622_v38 = vld [vmem:[#allocation4 + $0x1e18] sm:$0xff] }
 0x625   : > { %11306 = vmatpush1.bf16.msra.mxu0 %v15866_v56  ;;  %11798 = vmatpush1.bf16.msra.mxu1 %v15868_v9  ;;  %v15914_v56 = vcombine.low %v1581_v29, %v1585_v32  ;;  %v15916_v9 = vcombine.low %v1582_v5, %v1586_v59  ;;  %v1633_v29 = vld [vmem:[#allocation4 + $0x1e70] sm:$0xff]  ;;  %v1630_v32 = vld [vmem:[#allocation4 + $0x1e58] sm:$0xff] }
 0x626   : > { %11307 = vmatprep.subr.bf16.mxu0 %v15875_v24  ;;  %11799 = vmatprep.subr.bf16.mxu1 %v15877_v57  ;;  %v15923_v24 = vcombine.high %v1589_v48, %v1593_v49  ;;  %v1597_v57 = vld [vmem:[#allocation4 + $0x1d50] sm:$0xff]  ;;  %v1634_v5 = vld [vmem:[#allocation4 + $0x1e78] sm:$0xff] }
 0x627   : > { %v15930_v1 = vcombine.low %v1597_v57, %v1601_v60  ;;  %v1641_v48 = vld [vmem:[#allocation4 + $0x1eb0] sm:$0xff]  ;;  %v1638_v49 = vld [vmem:[#allocation4 + $0x1e98] sm:$0xff] }
 0x629   : > { %11308 = vmatpush1.bf16.msra.mxu0 %v15874_v62  ;;  %11800 = vmatpush1.bf16.msra.mxu1 %v15876_v45  ;;  %v15924_v62 = vcombine.low %v1590_v50, %v1594_v52  ;;  %v15931_v45 = vcombine.high %v1597_v57, %v1601_v60  ;;  %v1649_v57 = vld [vmem:[#allocation4 + $0x1ef0] sm:$0xff]  ;;  %v1646_v60 = vld [vmem:[#allocation4 + $0x1ed8] sm:$0xff] }
 0x62a   : > { %11309 = vmatprep.subr.bf16.mxu0 %v15883_v0  ;;  %11801 = vmatprep.subr.bf16.mxu1 %v15885_v2  ;;  %v15933_v0 = vcombine.high %v1598_v61, %v1602_v4  ;;  %v1605_v2 = vld [vmem:[#allocation4 + $0x1d90] sm:$0xff] }
 0x62b   : > { %v15938_v55 = vcombine.low %v1605_v2, %v1609_v53 }
 0x62d   : > { %11310 = vmatpush1.bf16.msra.mxu0 %v15882_v36  ;;  %11802 = vmatpush1.bf16.msra.mxu1 %v15884_v54  ;;  %v15932_v36 = vcombine.low %v1598_v61, %v1602_v4  ;;  %v15939_v54 = vcombine.high %v1605_v2, %v1609_v53  ;;  %v1650_v61 = vld [vmem:[#allocation4 + $0x1ef8] sm:$0xff]  ;;  %v1657_v2 = vld [vmem:[#allocation4 + $0x1f30] sm:$0xff] }
 0x62e   : > { %11320 = vmatprep.subr.bf16.mxu0 %v15891_v28  ;;  %11812 = vmatprep.subr.bf16.mxu1 %v15893_v8  ;;  %v15941_v28 = vcombine.high %v1606_v19, %v1610_v6  ;;  %v1613_v8 = vld [vmem:[#allocation4 + $0x1dd0] sm:$0xff]  ;;  %v1654_v53 = vld [vmem:[#allocation4 + $0x1f18] sm:$0xff] }
 0x630   : > { %11312 = vmatmul.mubr.bf16.vlgmr.msra.gmra.mrb[4].mxu0 %v18876_v26  ;;  %11804 = vmatmul.mubr.bf16.vlgmr.msra.gmra.mrb[4].mxu1 %v18876_v26  ;;  %v15908_v26 = vcombine.low %v1574_v20, %v1578_v22  ;;  %v1626_v20 = vld [vmem:[#allocation4 + $0x1e38] sm:$0xff]  ;;  %v15946_v22 = vcombine.low %v1613_v8, %v1617_v14 }
 0x631   : > { %11321 = vmatpush1.bf16.msra.mxu0 %v15890_v17  ;;  %11813 = vmatpush1.bf16.msra.mxu1 %v15892_v35  ;;  %v15940_v17 = vcombine.low %v1606_v19, %v1610_v6  ;;  %v15947_v35 = vcombine.high %v1613_v8, %v1617_v14  ;;  %v1658_v19 = vld [vmem:[#allocation4 + $0x1f38] sm:$0xff]  ;;  %v1665_v8 = vld [vmem:[#allocation4 + $0x1f70] sm:$0xff] }
 0x632   : > { %11322 = vmatprep.subr.bf16.mxu0 %v15899_v13  ;;  %11814 = vmatprep.subr.bf16.mxu1 %v15901_v15  ;;  %v15949_v13 = vcombine.high %v1614_v11, %v1618_v12  ;;  %v1621_v15 = vld [vmem:[#allocation4 + $0x1e10] sm:$0xff]  ;;  %v1662_v14 = vld [vmem:[#allocation4 + $0x1f58] sm:$0xff] }
 0x633   : > { %11352 = vmatprep.mubr.bf16.mxu0 %v18880_v37  ;;  %11844 = vmatprep.mubr.bf16.mxu1 %v18880_v37  ;;  %v15925_v37 = vcombine.high %v1590_v50, %v1594_v52  ;;  %v15954_v59 = vcombine.low %v1621_v15, %v1625_v16  ;;  %v1642_v50 = vld [vmem:[#allocation4 + $0x1eb8] sm:$0xff] }
 0x635   : > { %11323 = vmatpush1.bf16.msra.mxu0 %v15898_v23  ;;  %11815 = vmatpush1.bf16.msra.mxu1 %v15900_v58  ;;  %v15948_v23 = vcombine.low %v1614_v11, %v1618_v12  ;;  %v15955_v58 = vcombine.high %v1621_v15, %v1625_v16  ;;  %v1666_v11 = vld [vmem:[#allocation4 + $0x1f78] sm:$0xff]  ;;  %v1673_v15 = vld [vmem:[#allocation4 + $0x1fb0] sm:$0xff] }
 0x636   : > { %11324 = vmatprep.subr.bf16.mxu0 %v15907_v25  ;;  %11816 = vmatprep.subr.bf16.mxu1 %v15909_v27  ;;  %v15957_v25 = vcombine.high %v1622_v38, %v1626_v20  ;;  %v1629_v27 = vld [vmem:[#allocation4 + $0x1e50] sm:$0xff]  ;;  %v1670_v16 = vld [vmem:[#allocation4 + $0x1f98] sm:$0xff] }
 0x637   : > { %v15962_v52 = vcombine.low %v1629_v27, %v1633_v29 }
 0x639   : > { %11325 = vmatpush1.bf16.msra.mxu0 %v15906_v31  ;;  %11817 = vmatpush1.bf16.msra.mxu1 %v15908_v26  ;;  %v15956_v31 = vcombine.low %v1622_v38, %v1626_v20  ;;  %v15963_v26 = vcombine.high %v1629_v27, %v1633_v29  ;;  %v1674_v38 = vld [vmem:[#allocation4 + $0x1fb8] sm:$0xff]  ;;  %v1681_v27 = vld [vmem:[#allocation4 + $0x1ff0] sm:$0xff] }
 0x63a   : > { %11326 = vmatprep.subr.bf16.mxu0 %v15915_v41  ;;  %11818 = vmatprep.subr.bf16.mxu1 %v15917_v43  ;;  %v15965_v41 = vcombine.high %v1630_v32, %v1634_v5  ;;  %v1637_v43 = vld [vmem:[#allocation4 + $0x1e90] sm:$0xff]  ;;  %v1678_v29 = vld [vmem:[#allocation4 + $0x1fd8] sm:$0xff] }
 0x63b   : > { %v15970_v4 = vcombine.low %v1637_v43, %v1641_v48 }
 0x63d   : > { %11327 = vmatpush1.bf16.msra.mxu0 %v15914_v56  ;;  %11819 = vmatpush1.bf16.msra.mxu1 %v15916_v9  ;;  %v15964_v56 = vcombine.low %v1630_v32, %v1634_v5  ;;  %v15971_v9 = vcombine.high %v1637_v43, %v1641_v48  ;;  %v1682_v32 = vld [vmem:[#allocation4 + $0x1ff8] sm:$0xff]  ;;  %v1689_v43 = vld [vmem:[#allocation4 + $0x2030] sm:$0xff] }
 0x63e   : > { %11328 = vmatprep.subr.bf16.mxu0 %v15923_v24  ;;  %11820 = vmatprep.subr.bf16.mxu1 %v15925_v37  ;;  %v15973_v24 = vcombine.high %v1638_v49, %v1642_v50  ;;  %v1645_v37 = vld [vmem:[#allocation4 + $0x1ed0] sm:$0xff]  ;;  %v1686_v48 = vld [vmem:[#allocation4 + $0x2018] sm:$0xff] }
 0x63f   : > { %v15978_v6 = vcombine.low %v1645_v37, %v1649_v57 }
 0x641   : > { %11329 = vmatpush1.bf16.msra.mxu0 %v15922_v42  ;;  %11821 = vmatpush1.bf16.msra.mxu1 %v15924_v62  ;;  %v15972_v42 = vcombine.low %v1638_v49, %v1642_v50  ;;  %v15979_v62 = vcombine.high %v1645_v37, %v1649_v57  ;;  %v1690_v49 = vld [vmem:[#allocation4 + $0x2038] sm:$0xff]  ;;  %v1697_v37 = vld [vmem:[#allocation4 + $0x2070] sm:$0xff] }
 0x642   : > { %11330 = vmatprep.subr.bf16.mxu0 %v15931_v45  ;;  %11822 = vmatprep.subr.bf16.mxu1 %v15933_v0  ;;  %v15981_v45 = vcombine.high %v1646_v60, %v1650_v61  ;;  %v1653_v0 = vld [vmem:[#allocation4 + $0x1f10] sm:$0xff]  ;;  %v1694_v57 = vld [vmem:[#allocation4 + $0x2058] sm:$0xff] }
 0x643   : > { %v15986_v12 = vcombine.low %v1653_v0, %v1657_v2 }
 0x645   : > { %11331 = vmatpush1.bf16.msra.mxu0 %v15930_v1  ;;  %11823 = vmatpush1.bf16.msra.mxu1 %v15932_v36  ;;  %v15980_v1 = vcombine.low %v1646_v60, %v1650_v61  ;;  %v15987_v36 = vcombine.high %v1653_v0, %v1657_v2  ;;  %v1698_v60 = vld [vmem:[#allocation4 + $0x2078] sm:$0xff]  ;;  %v1705_v0 = vld [vmem:[#allocation4 + $0x20b0] sm:$0xff] }
 0x646   : > { %11332 = vmatprep.subr.bf16.mxu0 %v15939_v54  ;;  %11824 = vmatprep.subr.bf16.mxu1 %v15941_v28  ;;  %v15989_v54 = vcombine.high %v1654_v53, %v1658_v19  ;;  %v1661_v28 = vld [vmem:[#allocation4 + $0x1f50] sm:$0xff]  ;;  %v1702_v2 = vld [vmem:[#allocation4 + $0x2098] sm:$0xff] }
 0x647   : > { %v15994_v20 = vcombine.low %v1661_v28, %v1665_v8 }
 0x649   : > { %11333 = vmatpush1.bf16.msra.mxu0 %v15938_v55  ;;  %11825 = vmatpush1.bf16.msra.mxu1 %v15940_v17  ;;  %v15988_v55 = vcombine.low %v1654_v53, %v1658_v19  ;;  %v15995_v17 = vcombine.high %v1661_v28, %v1665_v8  ;;  %v1706_v53 = vld [vmem:[#allocation4 + $0x20b8] sm:$0xff]  ;;  %v1713_v28 = vld [vmem:[#allocation4 + $0x20f0] sm:$0xff] }
 0x64a   : > { %11334 = vmatprep.subr.bf16.mxu0 %v15947_v35  ;;  %11826 = vmatprep.subr.bf16.mxu1 %v15949_v13  ;;  %v15997_v35 = vcombine.high %v1662_v14, %v1666_v11  ;;  %v1669_v13 = vld [vmem:[#allocation4 + $0x1f90] sm:$0xff]  ;;  %v1710_v8 = vld [vmem:[#allocation4 + $0x20d8] sm:$0xff] }
 0x64b   : > { %v16002_v5 = vcombine.low %v1669_v13, %v1673_v15 }
 0x64d   : > { %11335 = vmatpush1.bf16.msra.mxu0 %v15946_v22  ;;  %11827 = vmatpush1.bf16.msra.mxu1 %v15948_v23  ;;  %v15996_v22 = vcombine.low %v1662_v14, %v1666_v11  ;;  %v16003_v23 = vcombine.high %v1669_v13, %v1673_v15  ;;  %v1714_v14 = vld [vmem:[#allocation4 + $0x20f8] sm:$0xff] }
 0x64e   : > { %11336 = vmatprep.subr.bf16.mxu0 %v15955_v58  ;;  %11828 = vmatprep.subr.bf16.mxu1 %v15957_v25  ;;  %v16005_v58 = vcombine.high %v1670_v16, %v1674_v38  ;;  %v1677_v25 = vld [vmem:[#allocation4 + $0x1fd0] sm:$0xff]  ;;  %v1718_v13 = vld [vmem:[#allocation4 + $0x2118] sm:$0xff] }
 0x64f   : > { %v16010_v50 = vcombine.low %v1677_v25, %v1681_v27  ;;  %v1722_v15 = vld [vmem:[#allocation4 + $0x2138] sm:$0xff] }
 0x651   : > { %11337 = vmatpush1.bf16.msra.mxu0 %v15954_v59  ;;  %11829 = vmatpush1.bf16.msra.mxu1 %v15956_v31  ;;  %v16004_v59 = vcombine.low %v1670_v16, %v1674_v38  ;;  %v16011_v31 = vcombine.high %v1677_v25, %v1681_v27  ;;  %v16044_v38 = vcombine.low %v1710_v8, %v1714_v14  ;;  %v1730_v25 = vld [vmem:[#allocation4 + $0x2178] sm:$0xff] }
 0x652   : > { %11338 = vmatprep.subr.bf16.mxu0 %v15963_v26  ;;  %11830 = vmatprep.subr.bf16.mxu1 %v15965_v41  ;;  %v16013_v26 = vcombine.high %v1678_v29, %v1682_v32  ;;  %v1685_v41 = vld [vmem:[#allocation4 + $0x2010] sm:$0xff] }
 0x653   : > { %v16018_v61 = vcombine.low %v1685_v41, %v1689_v43 }
 0x655   : > { %11339 = vmatpush1.bf16.msra.mxu0 %v15962_v52  ;;  %11831 = vmatpush1.bf16.msra.mxu1 %v15964_v56  ;;  %v16012_v52 = vcombine.low %v1678_v29, %v1682_v32  ;;  %v16019_v56 = vcombine.high %v1685_v41, %v1689_v43  ;;  %v16052_v29 = vcombine.low %v1718_v13, %v1722_v15  ;;  %v1738_v41 = vld [vmem:[#allocation4 + $0x21b8] sm:$0xff] }
 0x656   : > { %11340 = vmatprep.subr.bf16.mxu0 %v15971_v9  ;;  %11832 = vmatprep.subr.bf16.mxu1 %v15973_v24  ;;  %v16021_v9 = vcombine.high %v1686_v48, %v1690_v49  ;;  %v1693_v24 = vld [vmem:[#allocation4 + $0x2050] sm:$0xff] }
 0x657   : > { %v16026_v19 = vcombine.low %v1693_v24, %v1697_v37 }
 0x659   : > { %11341 = vmatpush1.bf16.msra.mxu0 %v15970_v4  ;;  %11833 = vmatpush1.bf16.msra.mxu1 %v15972_v42  ;;  %v16020_v4 = vcombine.low %v1686_v48, %v1690_v49  ;;  %v16027_v42 = vcombine.high %v1693_v24, %v1697_v37  ;;  %v1746_v24 = vld [vmem:[#allocation4 + $0x21f8] sm:$0xff] }
 0x65a   : > { %11342 = vmatprep.subr.bf16.mxu0 %v15979_v62  ;;  %11834 = vmatprep.subr.bf16.mxu1 %v15981_v45  ;;  %v16029_v62 = vcombine.high %v1694_v57, %v1698_v60  ;;  %v1701_v45 = vld [vmem:[#allocation4 + $0x2090] sm:$0xff] }
 0x65b   : > { %v16034_v11 = vcombine.low %v1701_v45, %v1705_v0 }
 0x65d   : > { %11343 = vmatpush1.bf16.msra.mxu0 %v15978_v6  ;;  %11835 = vmatpush1.bf16.msra.mxu1 %v15980_v1  ;;  %v16028_v6 = vcombine.low %v1694_v57, %v1698_v60  ;;  %v16035_v1 = vcombine.high %v1701_v45, %v1705_v0  ;;  %v1754_v45 = vld [vmem:[#allocation4 + $0x2238] sm:$0xff] }
 0x65e   : > { %11344 = vmatprep.subr.bf16.mxu0 %v15987_v36  ;;  %11836 = vmatprep.subr.bf16.mxu1 %v15989_v54  ;;  %v16037_v36 = vcombine.high %v1702_v2, %v1706_v53  ;;  %v1709_v54 = vld [vmem:[#allocation4 + $0x20d0] sm:$0xff] }
 0x65f   : > { %v16042_v16 = vcombine.low %v1709_v54, %v1713_v28 }
 0x661   : > { %11345 = vmatpush1.bf16.msra.mxu0 %v15986_v12  ;;  %11837 = vmatpush1.bf16.msra.mxu1 %v15988_v55  ;;  %v16043_v12 = vcombine.high %v1709_v54, %v1713_v28  ;;  %v16045_v55 = vcombine.high %v1710_v8, %v1714_v14  ;;  %v1762_v54 = vld [vmem:[#allocation4 + $0x2278] sm:$0xff] }
 0x662   : > { %11346 = vmatprep.subr.bf16.mxu0 %v15995_v17  ;;  %11838 = vmatprep.subr.bf16.mxu1 %v15997_v35  ;;  %v1717_v17 = vld [vmem:[#allocation4 + $0x2110] sm:$0xff] }
 0x663   : > { %v1721_v35 = vld [vmem:[#allocation4 + $0x2130] sm:$0xff] }
 0x664   : > { %v16050_v27 = vcombine.low %v1717_v17, %v1721_v35 }
 0x665   : > { %11347 = vmatpush1.bf16.msra.mxu0 %v15994_v20  ;;  %11839 = vmatpush1.bf16.msra.mxu1 %v15996_v22  ;;  %v16051_v20 = vcombine.high %v1717_v17, %v1721_v35  ;;  %v1725_v22 = vld [vmem:[#allocation4 + $0x2150] sm:$0xff]  ;;  %v1770_v17 = vld [vmem:[#allocation4 + $0x22b8] sm:$0xff] }
 0x666   : > { %11348 = vmatprep.subr.bf16.mxu0 %v16003_v23  ;;  %11840 = vmatprep.subr.bf16.mxu1 %v16005_v58  ;;  %v1729_v23 = vld [vmem:[#allocation4 + $0x2170] sm:$0xff]  ;;  %v1726_v58 = vld [vmem:[#allocation4 + $0x2158] sm:$0xff] }
 0x667   : > { %v16059_v32 = vcombine.high %v1725_v22, %v1729_v23  ;;  %v16058_v43 = vcombine.low %v1725_v22, %v1729_v23  ;;  %v16060_v48 = vcombine.low %v1726_v58, %v1730_v25  ;;  %v1778_v22 = vld [vmem:[#allocation4 + $0x22f8] sm:$0xff] }
 0x669   : > { %11349 = vmatpush1.bf16.msra.mxu0 %v16002_v5  ;;  %11841 = vmatpush1.bf16.msra.mxu1 %v16004_v59  ;;  %v16061_v5 = vcombine.high %v1726_v58, %v1730_v25  ;;  %v1733_v59 = vld [vmem:[#allocation4 + $0x2190] sm:$0xff] }
 0x66a   : > { %11350 = vmatprep.subr.bf16.mxu0 %v16011_v31  ;;  %11842 = vmatprep.subr.bf16.mxu1 %v16013_v26  ;;  %v1737_v31 = vld [vmem:[#allocation4 + $0x21b0] sm:$0xff]  ;;  %v1734_v26 = vld [vmem:[#allocation4 + $0x2198] sm:$0xff] }
 0x66b   : > { %v16067_v49 = vcombine.high %v1733_v59, %v1737_v31  ;;  %v16066_v37 = vcombine.low %v1733_v59, %v1737_v31  ;;  %v16068_v57 = vcombine.low %v1734_v26, %v1738_v41  ;;  %v1786_v59 = vld [vmem:[#allocation4 + $0x2338] sm:$0xff] }
 0x66d   : > { %11351 = vmatpush1.bf16.msra.mxu0 %v16010_v50  ;;  %11843 = vmatpush1.bf16.msra.mxu1 %v16012_v52  ;;  %v16069_v50 = vcombine.high %v1734_v26, %v1738_v41  ;;  %v1741_v52 = vld [vmem:[#allocation4 + $0x21d0] sm:$0xff] }
 0x66e   : > { %11361 = vmatprep.subr.bf16.mxu0 %v16019_v56  ;;  %11853 = vmatprep.subr.bf16.mxu1 %v16021_v9  ;;  %v1745_v56 = vld [vmem:[#allocation4 + $0x21f0] sm:$0xff]  ;;  %v1742_v9 = vld [vmem:[#allocation4 + $0x21d8] sm:$0xff] }
 0x66f   : > { %v16075_v60 = vcombine.high %v1741_v52, %v1745_v56  ;;  %v16074_v0 = vcombine.low %v1741_v52, %v1745_v56  ;;  %v1794_v52 = vld [vmem:[#allocation4 + $0x2378] sm:$0xff] }
 0x670   : > { %11353 = vmatmul.mubr.bf16.vlgmr.msra.gmra.mrb[4].mxu0 %v18897_v18  ;;  %11845 = vmatmul.mubr.bf16.vlgmr.msra.gmra.mrb[4].mxu1 %v18897_v18  ;;  %v16036_v18 = vcombine.low %v1702_v2, %v1706_v53  ;;  %v16076_v2 = vcombine.low %v1742_v9, %v1746_v24 }
 0x671   : > { %11362 = vmatpush1.bf16.msra.mxu0 %v16018_v61  ;;  %11854 = vmatpush1.bf16.msra.mxu1 %v16020_v4  ;;  %v16077_v61 = vcombine.high %v1742_v9, %v1746_v24  ;;  %v1749_v4 = vld [vmem:[#allocation4 + $0x2210] sm:$0xff] }
 0x672   : > { %11363 = vmatprep.subr.bf16.mxu0 %v16027_v42  ;;  %11855 = vmatprep.subr.bf16.mxu1 %v16029_v62  ;;  %v1753_v42 = vld [vmem:[#allocation4 + $0x2230] sm:$0xff]  ;;  %v1750_v62 = vld [vmem:[#allocation4 + $0x2218] sm:$0xff] }
 0x673   : > { %11393 = vmatprep.mubr.bf16.mxu0 %v18900_v30  ;;  %11885 = vmatprep.mubr.bf16.mxu1 %v18900_v30  ;;  %v16053_v30 = vcombine.high %v1718_v13, %v1722_v15  ;;  %v16083_v53 = vcombine.high %v1749_v4, %v1753_v42  ;;  %v16082_v28 = vcombine.low %v1749_v4, %v1753_v42  ;;  %v1802_v4 = vld [vmem:[#allocation4 + $0x23b8] sm:$0xff] }
 0x674   : > { %v16084_v8 = vcombine.low %v1750_v62, %v1754_v45 }
 0x675   : > { %11364 = vmatpush1.bf16.msra.mxu0 %v16026_v19  ;;  %11856 = vmatpush1.bf16.msra.mxu1 %v16028_v6  ;;  %v16085_v19 = vcombine.high %v1750_v62, %v1754_v45  ;;  %v1757_v6 = vld [vmem:[#allocation4 + $0x2250] sm:$0xff] }
 0x676   : > { %11365 = vmatprep.subr.bf16.mxu0 %v16035_v1  ;;  %11857 = vmatprep.subr.bf16.mxu1 %v16037_v36  ;;  %v1761_v1 = vld [vmem:[#allocation4 + $0x2270] sm:$0xff]  ;;  %v1758_v36 = vld [vmem:[#allocation4 + $0x2258] sm:$0xff] }
 0x677   : > { %v16091_v14 = vcombine.high %v1757_v6, %v1761_v1  ;;  %v16090_v35 = vcombine.low %v1757_v6, %v1761_v1  ;;  %v16092_v13 = vcombine.low %v1758_v36, %v1762_v54  ;;  %v1810_v6 = vld [vmem:[#allocation4 + $0x23f8] sm:$0xff] }
 0x679   : > { %11366 = vmatpush1.bf16.msra.mxu0 %v16034_v11  ;;  %11858 = vmatpush1.bf16.msra.mxu1 %v16036_v18  ;;  %v16093_v11 = vcombine.high %v1758_v36, %v1762_v54  ;;  %v1765_v18 = vld [vmem:[#allocation4 + $0x2290] sm:$0xff] }
 0x67a   : > { %11367 = vmatprep.subr.bf16.mxu0 %v16043_v12  ;;  %11859 = vmatprep.subr.bf16.mxu1 %v16045_v55  ;;  %v1769_v12 = vld [vmem:[#allocation4 + $0x22b0] sm:$0xff]  ;;  %v1766_v55 = vld [vmem:[#allocation4 + $0x2298] sm:$0xff] }
 0x67b   : > { %v16099_v15 = vcombine.high %v1765_v18, %v1769_v12  ;;  %v16098_v23 = vcombine.low %v1765_v18, %v1769_v12  ;;  %v16100_v58 = vcombine.low %v1766_v55, %v1770_v17  ;;  %v1818_v18 = vld [vmem:[#allocation4 + $0x2438] sm:$0xff] }
 0x67d   : > { %11368 = vmatpush1.bf16.msra.mxu0 %v16042_v16  ;;  %11860 = vmatpush1.bf16.msra.mxu1 %v16044_v38  ;;  %v16101_v16 = vcombine.high %v1766_v55, %v1770_v17  ;;  %v1773_v38 = vld [vmem:[#allocation4 + $0x22d0] sm:$0xff] }
 0x67e   : > { %11369 = vmatprep.subr.bf16.mxu0 %v16051_v20  ;;  %11861 = vmatprep.subr.bf16.mxu1 %v16053_v30  ;;  %v1777_v20 = vld [vmem:[#allocation4 + $0x22f0] sm:$0xff]  ;;  %v1774_v30 = vld [vmem:[#allocation4 + $0x22d8] sm:$0xff] }
 0x67f   : > { %v16107_v25 = vcombine.high %v1773_v38, %v1777_v20  ;;  %v16106_v31 = vcombine.low %v1773_v38, %v1777_v20  ;;  %v16108_v26 = vcombine.low %v1774_v30, %v1778_v22  ;;  %v1826_v38 = vld [vmem:[#allocation4 + $0x2478] sm:$0xff] }
 0x681   : > { %11370 = vmatpush1.bf16.msra.mxu0 %v16050_v27  ;;  %11862 = vmatpush1.bf16.msra.mxu1 %v16052_v29  ;;  %v16109_v27 = vcombine.high %v1774_v30, %v1778_v22  ;;  %v1781_v29 = vld [vmem:[#allocation4 + $0x2310] sm:$0xff] }
 0x682   : > { %11371 = vmatprep.subr.bf16.mxu0 %v16059_v32  ;;  %11863 = vmatprep.subr.bf16.mxu1 %v16061_v5  ;;  %v1785_v32 = vld [vmem:[#allocation4 + $0x2330] sm:$0xff]  ;;  %v1782_v5 = vld [vmem:[#allocation4 + $0x2318] sm:$0xff] }
 0x683   : > { %v16115_v41 = vcombine.high %v1781_v29, %v1785_v32  ;;  %v16114_v56 = vcombine.low %v1781_v29, %v1785_v32  ;;  %v16116_v9 = vcombine.low %v1782_v5, %v1786_v59  ;;  %v1834_v29 = vld [vmem:[#allocation4 + $0x24b8] sm:$0xff] }
 0x685   : > { %11372 = vmatpush1.bf16.msra.mxu0 %v16058_v43  ;;  %11864 = vmatpush1.bf16.msra.mxu1 %v16060_v48  ;;  %v16117_v43 = vcombine.high %v1782_v5, %v1786_v59  ;;  %v1789_v48 = vld [vmem:[#allocation4 + $0x2350] sm:$0xff] }
 0x686   : > { %11373 = vmatprep.subr.bf16.mxu0 %v16067_v49  ;;  %11865 = vmatprep.subr.bf16.mxu1 %v16069_v50  ;;  %v1793_v49 = vld [vmem:[#allocation4 + $0x2370] sm:$0xff]  ;;  %v1790_v50 = vld [vmem:[#allocation4 + $0x2358] sm:$0xff] }
 0x687   : > { %v16123_v24 = vcombine.high %v1789_v48, %v1793_v49  ;;  %v16122_v42 = vcombine.low %v1789_v48, %v1793_v49  ;;  %v16124_v62 = vcombine.low %v1790_v50, %v1794_v52  ;;  %v1842_v48 = vld [vmem:[#allocation4 + $0x24f8] sm:$0xff] }
 0x689   : > { %11374 = vmatpush1.bf16.msra.mxu0 %v16066_v37  ;;  %11866 = vmatpush1.bf16.msra.mxu1 %v16068_v57  ;;  %v16125_v37 = vcombine.high %v1790_v50, %v1794_v52  ;;  %v1797_v57 = vld [vmem:[#allocation4 + $0x2390] sm:$0xff] }
 0x68a   : > { %11375 = vmatprep.subr.bf16.mxu0 %v16075_v60  ;;  %11867 = vmatprep.subr.bf16.mxu1 %v16077_v61  ;;  %v1801_v60 = vld [vmem:[#allocation4 + $0x23b0] sm:$0xff]  ;;  %v1798_v61 = vld [vmem:[#allocation4 + $0x2398] sm:$0xff] }
 0x68b   : > { %v16131_v45 = vcombine.high %v1797_v57, %v1801_v60  ;;  %v16130_v1 = vcombine.low %v1797_v57, %v1801_v60  ;;  %v16132_v36 = vcombine.low %v1798_v61, %v1802_v4 }
 0x68d   : > { %11376 = vmatpush1.bf16.msra.mxu0 %v16074_v0  ;;  %11868 = vmatpush1.bf16.msra.mxu1 %v16076_v2  ;;  %v16133_v0 = vcombine.high %v1798_v61, %v1802_v4  ;;  %v1805_v2 = vld [vmem:[#allocation4 + $0x23d0] sm:$0xff] }
 0x68e   : > { %11377 = vmatprep.subr.bf16.mxu0 %v16083_v53  ;;  %11869 = vmatprep.subr.bf16.mxu1 %v16085_v19  ;;  %v1809_v53 = vld [vmem:[#allocation4 + $0x23f0] sm:$0xff]  ;;  %v1806_v19 = vld [vmem:[#allocation4 + $0x23d8] sm:$0xff] }
 0x68f   : > { %v16139_v54 = vcombine.high %v1805_v2, %v1809_v53  ;;  %v16138_v12 = vcombine.low %v1805_v2, %v1809_v53  ;;  %v16140_v55 = vcombine.low %v1806_v19, %v1810_v6  ;;  %v1853_v4 = vld [vmem:[#allocation4 + $0x2550] sm:$0xff] }
 0x691   : > { %11378 = vmatpush1.bf16.msra.mxu0 %v16082_v28  ;;  %11870 = vmatpush1.bf16.msra.mxu1 %v16084_v8  ;;  %v16141_v28 = vcombine.high %v1806_v19, %v1810_v6  ;;  %v1813_v8 = vld [vmem:[#allocation4 + $0x2410] sm:$0xff] }
 0x692   : > { %11379 = vmatprep.subr.bf16.mxu0 %v16091_v14  ;;  %11871 = vmatprep.subr.bf16.mxu1 %v16093_v11  ;;  %v1817_v14 = vld [vmem:[#allocation4 + $0x2430] sm:$0xff]  ;;  %v1814_v11 = vld [vmem:[#allocation4 + $0x2418] sm:$0xff] }
 0x693   : > { %v16147_v17 = vcombine.high %v1813_v8, %v1817_v14  ;;  %v16146_v20 = vcombine.low %v1813_v8, %v1817_v14  ;;  %v16148_v30 = vcombine.low %v1814_v11, %v1818_v18  ;;  %v1861_v6 = vld [vmem:[#allocation4 + $0x2590] sm:$0xff] }
 0x695   : > { %11380 = vmatpush1.bf16.msra.mxu0 %v16090_v35  ;;  %11872 = vmatpush1.bf16.msra.mxu1 %v16092_v13  ;;  %v16149_v35 = vcombine.high %v1814_v11, %v1818_v18  ;;  %v1821_v13 = vld [vmem:[#allocation4 + $0x2450] sm:$0xff] }
 0x696   : > { %11381 = vmatprep.subr.bf16.mxu0 %v16099_v15  ;;  %11873 = vmatprep.subr.bf16.mxu1 %v16101_v16  ;;  %v1825_v15 = vld [vmem:[#allocation4 + $0x2470] sm:$0xff]  ;;  %v1822_v16 = vld [vmem:[#allocation4 + $0x2458] sm:$0xff] }
 0x697   : > { %v16155_v22 = vcombine.high %v1821_v13, %v1825_v15  ;;  %v16154_v32 = vcombine.low %v1821_v13, %v1825_v15  ;;  %v16156_v5 = vcombine.low %v1822_v16, %v1826_v38  ;;  %v1869_v18 = vld [vmem:[#allocation4 + $0x25d0] sm:$0xff] }
 0x699   : > { %11382 = vmatpush1.bf16.msra.mxu0 %v16098_v23  ;;  %11874 = vmatpush1.bf16.msra.mxu1 %v16100_v58  ;;  %v16157_v23 = vcombine.high %v1822_v16, %v1826_v38  ;;  %v1829_v58 = vld [vmem:[#allocation4 + $0x2490] sm:$0xff] }
 0x69a   : > { %11383 = vmatprep.subr.bf16.mxu0 %v16107_v25  ;;  %11875 = vmatprep.subr.bf16.mxu1 %v16109_v27  ;;  %v1833_v25 = vld [vmem:[#allocation4 + $0x24b0] sm:$0xff]  ;;  %v1830_v27 = vld [vmem:[#allocation4 + $0x2498] sm:$0xff] }
 0x69b   : > { %v16163_v59 = vcombine.high %v1829_v58, %v1833_v25  ;;  %v16162_v49 = vcombine.low %v1829_v58, %v1833_v25  ;;  %v1877_v38 = vld [vmem:[#allocation4 + $0x2610] sm:$0xff] }
 0x69d   : > { %11384 = vmatpush1.bf16.msra.mxu0 %v16106_v31  ;;  %11876 = vmatpush1.bf16.msra.mxu1 %v16108_v26  ;;  %v16165_v31 = vcombine.high %v1830_v27, %v1834_v29  ;;  %v1837_v26 = vld [vmem:[#allocation4 + $0x24d0] sm:$0xff] }
 0x69e   : > { %11385 = vmatprep.subr.bf16.mxu0 %v16115_v41  ;;  %11877 = vmatprep.subr.bf16.mxu1 %v16117_v43  ;;  %v1841_v41 = vld [vmem:[#allocation4 + $0x24f0] sm:$0xff]  ;;  %v1838_v43 = vld [vmem:[#allocation4 + $0x24d8] sm:$0xff] }
 0x69f   : > { %v16171_v50 = vcombine.high %v1837_v26, %v1841_v41  ;;  %v16173_v52 = vcombine.high %v1838_v43, %v1842_v48  ;;  %v16170_v57 = vcombine.low %v1837_v26, %v1841_v41  ;;  %v16172_v60 = vcombine.low %v1838_v43, %v1842_v48  ;;  %v1893_v48 = vld [vmem:[#allocation4 + $0x2690] sm:$0xff] }
 0x6a1   : > { %11386 = vmatpush1.bf16.msra.mxu0 %v16114_v56  ;;  %11878 = vmatpush1.bf16.msra.mxu1 %v16116_v9  ;;  %v1845_v56 = vld [vmem:[#allocation4 + $0x2510] sm:$0xff] }
 0x6a2   : > { %11387 = vmatprep.subr.bf16.mxu0 %v16123_v24  ;;  %11879 = vmatprep.subr.bf16.mxu1 %v16125_v37  ;;  %v1849_v9 = vld [vmem:[#allocation4 + $0x2530] sm:$0xff]  ;;  %v1846_v24 = vld [vmem:[#allocation4 + $0x2518] sm:$0xff] }
 0x6a3   : > { %v1850_v37 = vld [vmem:[#allocation4 + $0x2538] sm:$0xff]  ;;  %v16179_v61 = vcombine.high %v1845_v56, %v1849_v9 }
 0x6a4   : > { %v16180_v2 = vcombine.low %v1846_v24, %v1850_v37 }
 0x6a5   : > { %11388 = vmatpush1.bf16.msra.mxu0 %v16122_v42  ;;  %11880 = vmatpush1.bf16.msra.mxu1 %v16124_v62  ;;  %v1857_v42 = vld [vmem:[#allocation4 + $0x2570] sm:$0xff]  ;;  %v1854_v62 = vld [vmem:[#allocation4 + $0x2558] sm:$0xff] }
 0x6a6   : > { %11389 = vmatprep.subr.bf16.mxu0 %v16131_v45  ;;  %11881 = vmatprep.subr.bf16.mxu1 %v16133_v0  ;;  %v1858_v45 = vld [vmem:[#allocation4 + $0x2578] sm:$0xff]  ;;  %v16178_v0 = vcombine.low %v1845_v56, %v1849_v9  ;;  %v16187_v53 = vcombine.high %v1853_v4, %v1857_v42 }
 0x6a7   : > { %v16189_v19 = vcombine.high %v1854_v62, %v1858_v45  ;;  %v16188_v8 = vcombine.low %v1854_v62, %v1858_v45  ;;  %v1909_v45 = vld [vmem:[#allocation4 + $0x2710] sm:$0xff] }
 0x6a9   : > { %11390 = vmatpush1.bf16.msra.mxu0 %v16130_v1  ;;  %11882 = vmatpush1.bf16.msra.mxu1 %v16132_v36  ;;  %v1865_v1 = vld [vmem:[#allocation4 + $0x25b0] sm:$0xff]  ;;  %v1862_v36 = vld [vmem:[#allocation4 + $0x2598] sm:$0xff] }
 0x6aa   : > { %11391 = vmatprep.subr.bf16.mxu0 %v16139_v54  ;;  %11883 = vmatprep.subr.bf16.mxu1 %v16141_v28  ;;  %v1866_v54 = vld [vmem:[#allocation4 + $0x25b8] sm:$0xff]  ;;  %v16186_v28 = vcombine.low %v1853_v4, %v1857_v42  ;;  %v16195_v14 = vcombine.high %v1861_v6, %v1865_v1 }
 0x6ab   : > { %v16197_v11 = vcombine.high %v1862_v36, %v1866_v54  ;;  %v16196_v13 = vcombine.low %v1862_v36, %v1866_v54  ;;  %v1917_v54 = vld [vmem:[#allocation4 + $0x2750] sm:$0xff] }
 0x6ad   : > { %11392 = vmatpush1.bf16.msra.mxu0 %v16138_v12  ;;  %11884 = vmatpush1.bf16.msra.mxu1 %v16140_v55  ;;  %v1873_v12 = vld [vmem:[#allocation4 + $0x25f0] sm:$0xff]  ;;  %v1870_v55 = vld [vmem:[#allocation4 + $0x25d8] sm:$0xff] }
 0x6ae   : > { %11402 = vmatprep.subr.bf16.mxu0 %v16147_v17  ;;  %11894 = vmatprep.subr.bf16.mxu1 %v16149_v35  ;;  %v1874_v17 = vld [vmem:[#allocation4 + $0x25f8] sm:$0xff]  ;;  %v16194_v35 = vcombine.low %v1861_v6, %v1865_v1  ;;  %v16203_v15 = vcombine.high %v1869_v18, %v1873_v12 }
 0x6af   : > { %v16205_v16 = vcombine.high %v1870_v55, %v1874_v17  ;;  %v16204_v58 = vcombine.low %v1870_v55, %v1874_v17  ;;  %v1925_v17 = vld [vmem:[#allocation4 + $0x2790] sm:$0xff] }
 0x6b0   : > { %11394 = vmatmul.mubr.bf16.vlgmr.msra.gmra.mrb[4].mxu0 %v18908_v21  ;;  %11886 = vmatmul.mubr.bf16.vlgmr.msra.gmra.mrb[4].mxu1 %v18908_v21  ;;  %v16164_v21 = vcombine.low %v1830_v27, %v1834_v29  ;;  %v1885_v29 = vld [vmem:[#allocation4 + $0x2650] sm:$0xff] }
 0x6b1   : > { %11403 = vmatpush1.bf16.msra.mxu0 %v16146_v20  ;;  %11895 = vmatpush1.bf16.msra.mxu1 %v16148_v30  ;;  %v1881_v20 = vld [vmem:[#allocation4 + $0x2630] sm:$0xff]  ;;  %v1878_v30 = vld [vmem:[#allocation4 + $0x2618] sm:$0xff] }
 0x6b2   : > { %11404 = vmatprep.subr.bf16.mxu0 %v16155_v22  ;;  %11896 = vmatprep.subr.bf16.mxu1 %v16157_v23  ;;  %v1882_v22 = vld [vmem:[#allocation4 + $0x2638] sm:$0xff]  ;;  %v16202_v23 = vcombine.low %v1869_v18, %v1873_v12  ;;  %v16211_v25 = vcombine.high %v1877_v38, %v1881_v20 }
 0x6b3   : > { %11434 = vmatprep.mubr.bf16.mxu0 %v18912_v10  ;;  %11926 = vmatprep.mubr.bf16.mxu1 %v18912_v10  ;;  %v16181_v10 = vcombine.high %v1846_v24, %v1850_v37  ;;  %v16213_v27 = vcombine.high %v1878_v30, %v1882_v22  ;;  %v16212_v26 = vcombine.low %v1878_v30, %v1882_v22  ;;  %v1901_v37 = vld [vmem:[#allocation4 + $0x26d0] sm:$0xff] }
 0x6b4   : > { %v1933_v22 = vld [vmem:[#allocation4 + $0x27d0] sm:$0xff] }
 0x6b5   : > { %11405 = vmatpush1.bf16.msra.mxu0 %v16154_v32  ;;  %11897 = vmatpush1.bf16.msra.mxu1 %v16156_v5  ;;  %v1889_v32 = vld [vmem:[#allocation4 + $0x2670] sm:$0xff]  ;;  %v1886_v5 = vld [vmem:[#allocation4 + $0x2658] sm:$0xff] }
 0x6b6   : > { %11406 = vmatprep.subr.bf16.mxu0 %v16163_v59  ;;  %11898 = vmatprep.subr.bf16.mxu1 %v16165_v31  ;;  %v1890_v59 = vld [vmem:[#allocation4 + $0x2678] sm:$0xff]  ;;  %v16210_v31 = vcombine.low %v1877_v38, %v1881_v20  ;;  %v16219_v41 = vcombine.high %v1885_v29, %v1889_v32 }
 0x6b7   : > { %v16221_v43 = vcombine.high %v1886_v5, %v1890_v59  ;;  %v16220_v56 = vcombine.low %v1886_v5, %v1890_v59  ;;  %v1941_v59 = vld [vmem:[#allocation4 + $0x2810] sm:$0xff] }
 0x6b9   : > { %11407 = vmatpush1.bf16.msra.mxu0 %v16162_v49  ;;  %11899 = vmatpush1.bf16.msra.mxu1 %v16164_v21  ;;  %v1897_v49 = vld [vmem:[#allocation4 + $0x26b0] sm:$0xff]  ;;  %v1894_v21 = vld [vmem:[#allocation4 + $0x2698] sm:$0xff] }
 0x6ba   : > { %11408 = vmatprep.subr.bf16.mxu0 %v16171_v50  ;;  %11900 = vmatprep.subr.bf16.mxu1 %v16173_v52  ;;  %v1898_v50 = vld [vmem:[#allocation4 + $0x26b8] sm:$0xff]  ;;  %v16218_v52 = vcombine.low %v1885_v29, %v1889_v32  ;;  %v16227_v9 = vcombine.high %v1893_v48, %v1897_v49 }
 0x6bb   : > { %v16229_v24 = vcombine.high %v1894_v21, %v1898_v50  ;;  %v16228_v4 = vcombine.low %v1894_v21, %v1898_v50  ;;  %v1949_v50 = vld [vmem:[#allocation4 + $0x2850] sm:$0xff] }
 0x6bd   : > { %11409 = vmatpush1.bf16.msra.mxu0 %v16170_v57  ;;  %11901 = vmatpush1.bf16.msra.mxu1 %v16172_v60  ;;  %v1905_v57 = vld [vmem:[#allocation4 + $0x26f0] sm:$0xff]  ;;  %v1902_v60 = vld [vmem:[#allocation4 + $0x26d8] sm:$0xff] }
 0x6be   : > { %11410 = vmatprep.subr.bf16.mxu0 %v16179_v61  ;;  %11902 = vmatprep.subr.bf16.mxu1 %v16181_v10  ;;  %v1906_v61 = vld [vmem:[#allocation4 + $0x26f8] sm:$0xff]  ;;  %v16226_v10 = vcombine.low %v1893_v48, %v1897_v49  ;;  %v16235_v42 = vcombine.high %v1901_v37, %v1905_v57 }
 0x6bf   : > { %v16237_v62 = vcombine.high %v1902_v60, %v1906_v61  ;;  %v16236_v6 = vcombine.low %v1902_v60, %v1906_v61  ;;  %v1957_v61 = vld [vmem:[#allocation4 + $0x2890] sm:$0xff] }
 0x6c1   : > { %11411 = vmatpush1.bf16.msra.mxu0 %v16178_v0  ;;  %11903 = vmatpush1.bf16.msra.mxu1 %v16180_v2  ;;  %v1913_v0 = vld [vmem:[#allocation4 + $0x2730] sm:$0xff]  ;;  %v1910_v2 = vld [vmem:[#allocation4 + $0x2718] sm:$0xff] }
 0x6c2   : > { %11412 = vmatprep.subr.bf16.mxu0 %v16187_v53  ;;  %11904 = vmatprep.subr.bf16.mxu1 %v16189_v19  ;;  %v1914_v53 = vld [vmem:[#allocation4 + $0x2738] sm:$0xff]  ;;  %v16234_v19 = vcombine.low %v1901_v37, %v1905_v57  ;;  %v16243_v1 = vcombine.high %v1909_v45, %v1913_v0 }
 0x6c3   : > { %v16245_v36 = vcombine.high %v1910_v2, %v1914_v53  ;;  %v16244_v18 = vcombine.low %v1910_v2, %v1914_v53  ;;  %v1965_v53 = vld [vmem:[#allocation4 + $0x28d0] sm:$0xff] }
 0x6c5   : > { %11413 = vmatpush1.bf16.msra.mxu0 %v16186_v28  ;;  %11905 = vmatpush1.bf16.msra.mxu1 %v16188_v8  ;;  %v1921_v28 = vld [vmem:[#allocation4 + $0x2770] sm:$0xff]  ;;  %v1918_v8 = vld [vmem:[#allocation4 + $0x2758] sm:$0xff] }
 0x6c6   : > { %11414 = vmatprep.subr.bf16.mxu0 %v16195_v14  ;;  %11906 = vmatprep.subr.bf16.mxu1 %v16197_v11  ;;  %v1922_v14 = vld [vmem:[#allocation4 + $0x2778] sm:$0xff]  ;;  %v16242_v11 = vcombine.low %v1909_v45, %v1913_v0  ;;  %v16251_v12 = vcombine.high %v1917_v54, %v1921_v28 }
 0x6c7   : > { %v16253_v55 = vcombine.high %v1918_v8, %v1922_v14  ;;  %v16252_v38 = vcombine.low %v1918_v8, %v1922_v14  ;;  %v1973_v8 = vld [vmem:[#allocation4 + $0x2910] sm:$0xff] }
 0x6c8   : > { %v1977_v14 = vld [vmem:[#allocation4 + $0x2930] sm:$0xff] }
 0x6c9   : > { %11415 = vmatpush1.bf16.msra.mxu0 %v16194_v35  ;;  %11907 = vmatpush1.bf16.msra.mxu1 %v16196_v13  ;;  %v1929_v35 = vld [vmem:[#allocation4 + $0x27b0] sm:$0xff]  ;;  %v1926_v13 = vld [vmem:[#allocation4 + $0x2798] sm:$0xff] }
 0x6ca   : > { %11416 = vmatprep.subr.bf16.mxu0 %v16203_v15  ;;  %11908 = vmatprep.subr.bf16.mxu1 %v16205_v16  ;;  %v1930_v15 = vld [vmem:[#allocation4 + $0x27b8] sm:$0xff]  ;;  %v16250_v16 = vcombine.low %v1917_v54, %v1921_v28  ;;  %v16259_v20 = vcombine.high %v1925_v17, %v1929_v35 }
 0x6cb   : > { %v16261_v30 = vcombine.high %v1926_v13, %v1930_v15  ;;  %v16260_v29 = vcombine.low %v1926_v13, %v1930_v15  ;;  %v1985_v13 = vld [vmem:[#allocation4 + $0x2970] sm:$0xff]  ;;  %v1982_v15 = vld [vmem:[#allocation4 + $0x2958] sm:$0xff] }
 0x6cd   : > { %11417 = vmatpush1.bf16.msra.mxu0 %v16202_v23  ;;  %11909 = vmatpush1.bf16.msra.mxu1 %v16204_v58  ;;  %v1937_v23 = vld [vmem:[#allocation4 + $0x27f0] sm:$0xff]  ;;  %v1934_v58 = vld [vmem:[#allocation4 + $0x27d8] sm:$0xff] }
 0x6ce   : > { %11418 = vmatprep.subr.bf16.mxu0 %v16211_v25  ;;  %11910 = vmatprep.subr.bf16.mxu1 %v16213_v27  ;;  %v1938_v25 = vld [vmem:[#allocation4 + $0x27f8] sm:$0xff]  ;;  %v16258_v27 = vcombine.low %v1925_v17, %v1929_v35  ;;  %v16267_v32 = vcombine.high %v1933_v22, %v1937_v23  ;;  %v16307_v17 = vcombine.high %v1973_v8, %v1977_v14  ;;  %v1981_v35 = vld [vmem:[#allocation4 + $0x2950] sm:$0xff] }
 0x6cf   : > { %v16269_v5 = vcombine.high %v1934_v58, %v1938_v25  ;;  %v16268_v48 = vcombine.low %v1934_v58, %v1938_v25  ;;  %v1993_v58 = vld [vmem:[#allocation4 + $0x29b0] sm:$0xff]  ;;  %v1990_v25 = vld [vmem:[#allocation4 + $0x2998] sm:$0xff] }
 0x6d1   : > { %11419 = vmatpush1.bf16.msra.mxu0 %v16210_v31  ;;  %11911 = vmatpush1.bf16.msra.mxu1 %v16212_v26  ;;  %v1945_v31 = vld [vmem:[#allocation4 + $0x2830] sm:$0xff]  ;;  %v1942_v26 = vld [vmem:[#allocation4 + $0x2818] sm:$0xff] }
 0x6d2   : > { %11420 = vmatprep.subr.bf16.mxu0 %v16219_v41  ;;  %11912 = vmatprep.subr.bf16.mxu1 %v16221_v43  ;;  %v1946_v41 = vld [vmem:[#allocation4 + $0x2838] sm:$0xff]  ;;  %v16266_v43 = vcombine.low %v1933_v22, %v1937_v23  ;;  %v16275_v49 = vcombine.high %v1941_v59, %v1945_v31  ;;  %v1989_v23 = vld [vmem:[#allocation4 + $0x2990] sm:$0xff] }
 0x6d3   : > { %v16277_v21 = vcombine.high %v1942_v26, %v1946_v41  ;;  %v16276_v37 = vcombine.low %v1942_v26, %v1946_v41  ;;  %v2001_v26 = vld [vmem:[#allocation4 + $0x29f0] sm:$0xff]  ;;  %v1998_v41 = vld [vmem:[#allocation4 + $0x29d8] sm:$0xff] }
 0x6d5   : > { %11421 = vmatpush1.bf16.msra.mxu0 %v16218_v52  ;;  %11913 = vmatpush1.bf16.msra.mxu1 %v16220_v56  ;;  %v1953_v52 = vld [vmem:[#allocation4 + $0x2870] sm:$0xff]  ;;  %v1950_v56 = vld [vmem:[#allocation4 + $0x2858] sm:$0xff] }
 0x6d6   : > { %11422 = vmatprep.subr.bf16.mxu0 %v16227_v9  ;;  %11914 = vmatprep.subr.bf16.mxu1 %v16229_v24  ;;  %v1954_v9 = vld [vmem:[#allocation4 + $0x2878] sm:$0xff]  ;;  %v16274_v24 = vcombine.low %v1941_v59, %v1945_v31  ;;  %v16283_v57 = vcombine.high %v1949_v50, %v1953_v52  ;;  %v1997_v31 = vld [vmem:[#allocation4 + $0x29d0] sm:$0xff] }
 0x6d7   : > { %v16285_v60 = vcombine.high %v1950_v56, %v1954_v9  ;;  %v16284_v45 = vcombine.low %v1950_v56, %v1954_v9  ;;  %v2009_v56 = vld [vmem:[#allocation4 + $0x2a30] sm:$0xff]  ;;  %v2006_v9 = vld [vmem:[#allocation4 + $0x2a18] sm:$0xff] }
 0x6d9   : > { %11423 = vmatpush1.bf16.msra.mxu0 %v16226_v10  ;;  %11915 = vmatpush1.bf16.msra.mxu1 %v16228_v4  ;;  %v1961_v10 = vld [vmem:[#allocation4 + $0x28b0] sm:$0xff]  ;;  %v1958_v4 = vld [vmem:[#allocation4 + $0x2898] sm:$0xff] }
 0x6da   : > { %11424 = vmatprep.subr.bf16.mxu0 %v16235_v42  ;;  %11916 = vmatprep.subr.bf16.mxu1 %v16237_v62  ;;  %v1962_v42 = vld [vmem:[#allocation4 + $0x28b8] sm:$0xff]  ;;  %v16282_v62 = vcombine.low %v1949_v50, %v1953_v52  ;;  %v16291_v0 = vcombine.high %v1957_v61, %v1961_v10  ;;  %v2005_v52 = vld [vmem:[#allocation4 + $0x2a10] sm:$0xff] }
 0x6db   : > { %v16293_v2 = vcombine.high %v1958_v4, %v1962_v42 }
 0x6dd   : > { %11425 = vmatpush1.bf16.msra.mxu0 %v16234_v19  ;;  %11917 = vmatpush1.bf16.msra.mxu1 %v16236_v6  ;;  %v1969_v19 = vld [vmem:[#allocation4 + $0x28f0] sm:$0xff]  ;;  %v1966_v6 = vld [vmem:[#allocation4 + $0x28d8] sm:$0xff] }
 0x6de   : > { %11426 = vmatprep.subr.bf16.mxu0 %v16243_v1  ;;  %11918 = vmatprep.subr.bf16.mxu1 %v16245_v36  ;;  %v1970_v1 = vld [vmem:[#allocation4 + $0x28f8] sm:$0xff]  ;;  %v16290_v36 = vcombine.low %v1957_v61, %v1961_v10  ;;  %v16299_v54 = vcombine.high %v1965_v53, %v1969_v19  ;;  %v2013_v10 = vld [vmem:[#allocation4 + $0x2a50] sm:$0xff] }
 0x6df   : > { %v16301_v28 = vcombine.high %v1966_v6, %v1970_v1 }
 0x6e1   : > { %11427 = vmatpush1.bf16.msra.mxu0 %v16242_v11  ;;  %11919 = vmatpush1.bf16.msra.mxu1 %v16244_v18  ;;  %v1974_v11 = vld [vmem:[#allocation4 + $0x2918] sm:$0xff] }
 0x6e2   : > { %11428 = vmatprep.subr.bf16.mxu0 %v16251_v12  ;;  %11920 = vmatprep.subr.bf16.mxu1 %v16253_v55  ;;  %v1978_v18 = vld [vmem:[#allocation4 + $0x2938] sm:$0xff]  ;;  %v16298_v12 = vcombine.low %v1965_v53, %v1969_v19  ;;  %v16300_v55 = vcombine.low %v1966_v6, %v1970_v1  ;;  %v2021_v19 = vld [vmem:[#allocation4 + $0x2a90] sm:$0xff] }
 0x6e3   : > { %v2025_v6 = vld [vmem:[#allocation4 + $0x2ab0] sm:$0xff]  ;;  %v2022_v1 = vld [vmem:[#allocation4 + $0x2a98] sm:$0xff] }
 0x6e5   : > { %11429 = vmatpush1.bf16.msra.mxu0 %v16250_v16  ;;  %11921 = vmatpush1.bf16.msra.mxu1 %v16252_v38  ;;  %v1986_v16 = vld [vmem:[#allocation4 + $0x2978] sm:$0xff]  ;;  %v16306_v38 = vcombine.low %v1973_v8, %v1977_v14  ;;  %v2029_v14 = vld [vmem:[#allocation4 + $0x2ad0] sm:$0xff] }
 0x6e6   : > { %11430 = vmatprep.subr.bf16.mxu0 %v16259_v20  ;;  %11922 = vmatprep.subr.bf16.mxu1 %v16261_v30  ;;  %v16308_v20 = vcombine.low %v1974_v11, %v1978_v18  ;;  %v16315_v30 = vcombine.high %v1981_v35, %v1985_v13  ;;  %v16317_v22 = vcombine.high %v1982_v15, %v1986_v16 }
 0x6e9   : > { %11431 = vmatpush1.bf16.msra.mxu0 %v16258_v27  ;;  %11923 = vmatpush1.bf16.msra.mxu1 %v16260_v29  ;;  %v1994_v27 = vld [vmem:[#allocation4 + $0x29b8] sm:$0xff]  ;;  %v16314_v29 = vcombine.low %v1981_v35, %v1985_v13  ;;  %v2037_v13 = vld [vmem:[#allocation4 + $0x2b10] sm:$0xff] }
 0x6ea   : > { %11432 = vmatprep.subr.bf16.mxu0 %v16267_v32  ;;  %11924 = vmatprep.subr.bf16.mxu1 %v16269_v5  ;;  %v16316_v32 = vcombine.low %v1982_v15, %v1986_v16  ;;  %v16323_v5 = vcombine.high %v1989_v23, %v1993_v58  ;;  %v16325_v59 = vcombine.high %v1990_v25, %v1994_v27  ;;  %v2041_v15 = vld [vmem:[#allocation4 + $0x2b30] sm:$0xff]  ;;  %v2038_v16 = vld [vmem:[#allocation4 + $0x2b18] sm:$0xff] }
 0x6ed   : > { %11433 = vmatpush1.bf16.msra.mxu0 %v16266_v43  ;;  %11925 = vmatpush1.bf16.msra.mxu1 %v16268_v48  ;;  %v2002_v43 = vld [vmem:[#allocation4 + $0x29f8] sm:$0xff]  ;;  %v16322_v48 = vcombine.low %v1989_v23, %v1993_v58  ;;  %v2045_v58 = vld [vmem:[#allocation4 + $0x2b50] sm:$0xff] }
 0x6ee   : > { %11443 = vmatprep.subr.bf16.mxu0 %v16275_v49  ;;  %11935 = vmatprep.subr.bf16.mxu1 %v16277_v21  ;;  %v16324_v49 = vcombine.low %v1990_v25, %v1994_v27  ;;  %v16331_v21 = vcombine.high %v1997_v31, %v2001_v26  ;;  %v16333_v50 = vcombine.high %v1998_v41, %v2002_v43  ;;  %v2049_v25 = vld [vmem:[#allocation4 + $0x2b70] sm:$0xff]  ;;  %v2046_v27 = vld [vmem:[#allocation4 + $0x2b58] sm:$0xff] }
 0x6f0   : > { %11435 = vmatmul.mubr.bf16.vlgmr.msra.gmra.mrb[4].mxu0 %v18927_v63  ;;  %11927 = vmatmul.mubr.bf16.vlgmr.msra.gmra.mrb[4].mxu1 %v18927_v63  ;;  %v16292_v63 = vcombine.low %v1958_v4, %v1962_v42  ;;  %v2017_v4 = vld [vmem:[#allocation4 + $0x2a70] sm:$0xff]  ;;  %v2014_v42 = vld [vmem:[#allocation4 + $0x2a58] sm:$0xff] }
 0x6f1   : > { %11444 = vmatpush1.bf16.msra.mxu0 %v16274_v24  ;;  %11936 = vmatpush1.bf16.msra.mxu1 %v16276_v37  ;;  %v2010_v24 = vld [vmem:[#allocation4 + $0x2a38] sm:$0xff]  ;;  %v16330_v37 = vcombine.low %v1997_v31, %v2001_v26  ;;  %v2053_v26 = vld [vmem:[#allocation4 + $0x2b90] sm:$0xff] }
 0x6f2   : > { %11445 = vmatprep.subr.bf16.mxu0 %v16283_v57  ;;  %11937 = vmatprep.subr.bf16.mxu1 %v16285_v60  ;;  %v16332_v57 = vcombine.low %v1998_v41, %v2002_v43  ;;  %v16339_v60 = vcombine.high %v2005_v52, %v2009_v56  ;;  %v16341_v61 = vcombine.high %v2006_v9, %v2010_v24  ;;  %v2057_v41 = vld [vmem:[#allocation4 + $0x2bb0] sm:$0xff]  ;;  %v2054_v43 = vld [vmem:[#allocation4 + $0x2b98] sm:$0xff] }
 0x6f3   : > { %11475 = vmatprep.mubr.bf16.mxu0 %v18930_v47  ;;  %11967 = vmatprep.mubr.bf16.mxu1 %v18930_v47  ;;  %v16309_v47 = vcombine.high %v1974_v11, %v1978_v18  ;;  %v2033_v11 = vld [vmem:[#allocation4 + $0x2af0] sm:$0xff]  ;;  %v2030_v18 = vld [vmem:[#allocation4 + $0x2ad8] sm:$0xff] }
 0x6f5   : > { %11446 = vmatpush1.bf16.msra.mxu0 %v16282_v62  ;;  %11938 = vmatpush1.bf16.msra.mxu1 %v16284_v45  ;;  %v2018_v62 = vld [vmem:[#allocation4 + $0x2a78] sm:$0xff]  ;;  %v16338_v45 = vcombine.low %v2005_v52, %v2009_v56  ;;  %v2061_v56 = vld [vmem:[#allocation4 + $0x2bd0] sm:$0xff] }
 0x6f6   : > { %11447 = vmatprep.subr.bf16.mxu0 %v16291_v0  ;;  %11939 = vmatprep.subr.bf16.mxu1 %v16293_v2  ;;  %v16340_v0 = vcombine.low %v2006_v9, %v2010_v24  ;;  %v16347_v2 = vcombine.high %v2013_v10, %v2017_v4  ;;  %v16349_v53 = vcombine.high %v2014_v42, %v2018_v62  ;;  %v2065_v9 = vld [vmem:[#allocation4 + $0x2bf0] sm:$0xff]  ;;  %v2062_v24 = vld [vmem:[#allocation4 + $0x2bd8] sm:$0xff] }
 0x6f9   : > { %11448 = vmatpush1.bf16.msra.mxu0 %v16290_v36  ;;  %11940 = vmatpush1.bf16.msra.mxu1 %v16292_v63  ;;  %v2026_v36 = vld [vmem:[#allocation4 + $0x2ab8] sm:$0xff]  ;;  %v16346_v63 = vcombine.low %v2013_v10, %v2017_v4  ;;  %v2069_v4 = vld [vmem:[#allocation4 + $0x2c10] sm:$0xff] }
 0x6fa   : > { %11449 = vmatprep.subr.bf16.mxu0 %v16299_v54  ;;  %11941 = vmatprep.subr.bf16.mxu1 %v16301_v28  ;;  %v16348_v54 = vcombine.low %v2014_v42, %v2018_v62  ;;  %v16355_v28 = vcombine.high %v2021_v19, %v2025_v6  ;;  %v16357_v8 = vcombine.high %v2022_v1, %v2026_v36  ;;  %v2073_v42 = vld [vmem:[#allocation4 + $0x2c30] sm:$0xff]  ;;  %v2070_v62 = vld [vmem:[#allocation4 + $0x2c18] sm:$0xff] }
 0x6fd   : > { %11450 = vmatpush1.bf16.msra.mxu0 %v16298_v12  ;;  %11942 = vmatpush1.bf16.msra.mxu1 %v16300_v55  ;;  %v2034_v12 = vld [vmem:[#allocation4 + $0x2af8] sm:$0xff]  ;;  %v16354_v55 = vcombine.low %v2021_v19, %v2025_v6  ;;  %v2077_v6 = vld [vmem:[#allocation4 + $0x2c50] sm:$0xff] }
 0x6fe   : > { %11451 = vmatprep.subr.bf16.mxu0 %v16307_v17  ;;  %11943 = vmatprep.subr.bf16.mxu1 %v16309_v47  ;;  %v16356_v17 = vcombine.low %v2022_v1, %v2026_v36  ;;  %v16363_v47 = vcombine.high %v2029_v14, %v2033_v11  ;;  %v16365_v35 = vcombine.high %v2030_v18, %v2034_v12  ;;  %v2081_v1 = vld [vmem:[#allocation4 + $0x2c70] sm:$0xff]  ;;  %v2078_v36 = vld [vmem:[#allocation4 + $0x2c58] sm:$0xff] }
 0x701   : > { %11452 = vmatpush1.bf16.msra.mxu0 %v16306_v38  ;;  %11944 = vmatpush1.bf16.msra.mxu1 %v16308_v20  ;;  %v2042_v38 = vld [vmem:[#allocation4 + $0x2b38] sm:$0xff]  ;;  %v16362_v20 = vcombine.low %v2029_v14, %v2033_v11  ;;  %v2085_v11 = vld [vmem:[#allocation4 + $0x2c90] sm:$0xff] }
 0x702   : > { %11453 = vmatprep.subr.bf16.mxu0 %v16315_v30  ;;  %11945 = vmatprep.subr.bf16.mxu1 %v16317_v22  ;;  %v16364_v30 = vcombine.low %v2030_v18, %v2034_v12  ;;  %v16371_v22 = vcombine.high %v2037_v13, %v2041_v15  ;;  %v16373_v23 = vcombine.high %v2038_v16, %v2042_v38  ;;  %v2089_v18 = vld [vmem:[#allocation4 + $0x2cb0] sm:$0xff]  ;;  %v2086_v12 = vld [vmem:[#allocation4 + $0x2c98] sm:$0xff] }
 0x705   : > { %11454 = vmatpush1.bf16.msra.mxu0 %v16314_v29  ;;  %11946 = vmatpush1.bf16.msra.mxu1 %v16316_v32  ;;  %v2050_v29 = vld [vmem:[#allocation4 + $0x2b78] sm:$0xff]  ;;  %v16370_v32 = vcombine.low %v2037_v13, %v2041_v15  ;;  %v2093_v15 = vld [vmem:[#allocation4 + $0x2cd0] sm:$0xff] }
 0x706   : > { %11455 = vmatprep.subr.bf16.mxu0 %v16323_v5  ;;  %11947 = vmatprep.subr.bf16.mxu1 %v16325_v59  ;;  %v16372_v5 = vcombine.low %v2038_v16, %v2042_v38  ;;  %v16379_v59 = vcombine.high %v2045_v58, %v2049_v25  ;;  %v16381_v31 = vcombine.high %v2046_v27, %v2050_v29  ;;  %v2097_v16 = vld [vmem:[#allocation4 + $0x2cf0] sm:$0xff]  ;;  %v2094_v38 = vld [vmem:[#allocation4 + $0x2cd8] sm:$0xff] }
 0x709   : > { %11456 = vmatpush1.bf16.msra.mxu0 %v16322_v48  ;;  %11948 = vmatpush1.bf16.msra.mxu1 %v16324_v49  ;;  %v2058_v48 = vld [vmem:[#allocation4 + $0x2bb8] sm:$0xff]  ;;  %v16378_v49 = vcombine.low %v2045_v58, %v2049_v25  ;;  %v2101_v58 = vld [vmem:[#allocation4 + $0x2d10] sm:$0xff] }
 0x70a   : > { %11457 = vmatprep.subr.bf16.mxu0 %v16331_v21  ;;  %11949 = vmatprep.subr.bf16.mxu1 %v16333_v50  ;;  %v16380_v21 = vcombine.low %v2046_v27, %v2050_v29  ;;  %v16387_v50 = vcombine.high %v2053_v26, %v2057_v41  ;;  %v16389_v52 = vcombine.high %v2054_v43, %v2058_v48  ;;  %v2105_v25 = vld [vmem:[#allocation4 + $0x2d30] sm:$0xff]  ;;  %v2102_v27 = vld [vmem:[#allocation4 + $0x2d18] sm:$0xff] }
 0x70b   : > { %v2106_v29 = vld [vmem:[#allocation4 + $0x2d38] sm:$0xff] }
 0x70d   : > { %11458 = vmatpush1.bf16.msra.mxu0 %v16330_v37  ;;  %11950 = vmatpush1.bf16.msra.mxu1 %v16332_v57  ;;  %v2066_v37 = vld [vmem:[#allocation4 + $0x2bf8] sm:$0xff]  ;;  %v16386_v57 = vcombine.low %v2053_v26, %v2057_v41  ;;  %v2113_v26 = vld [vmem:[#allocation4 + $0x2d70] sm:$0xff] }
 0x70e   : > { %11459 = vmatprep.subr.bf16.mxu0 %v16339_v60  ;;  %11951 = vmatprep.subr.bf16.mxu1 %v16341_v61  ;;  %v16388_v60 = vcombine.low %v2054_v43, %v2058_v48  ;;  %v16395_v61 = vcombine.high %v2061_v56, %v2065_v9  ;;  %v16397_v10 = vcombine.high %v2062_v24, %v2066_v37  ;;  %v2110_v41 = vld [vmem:[#allocation4 + $0x2d58] sm:$0xff] }
 0x70f   : > { %v2114_v43 = vld [vmem:[#allocation4 + $0x2d78] sm:$0xff]  ;;  %v16434_v48 = vcombine.low %v2101_v58, %v2105_v25 }
 0x711   : > { %11460 = vmatpush1.bf16.msra.mxu0 %v16338_v45  ;;  %11952 = vmatpush1.bf16.msra.mxu1 %v16340_v0  ;;  %v2074_v45 = vld [vmem:[#allocation4 + $0x2c38] sm:$0xff]  ;;  %v16394_v0 = vcombine.low %v2061_v56, %v2065_v9  ;;  %v2121_v56 = vld [vmem:[#allocation4 + $0x2db0] sm:$0xff] }
 0x712   : > { %11461 = vmatprep.subr.bf16.mxu0 %v16347_v2  ;;  %11953 = vmatprep.subr.bf16.mxu1 %v16349_v53  ;;  %v16396_v2 = vcombine.low %v2062_v24, %v2066_v37  ;;  %v16403_v53 = vcombine.high %v2069_v4, %v2073_v42  ;;  %v16405_v19 = vcombine.high %v2070_v62, %v2074_v45  ;;  %v2118_v9 = vld [vmem:[#allocation4 + $0x2d98] sm:$0xff] }
 0x713   : > { %v2122_v24 = vld [vmem:[#allocation4 + $0x2db8] sm:$0xff] }
 0x715   : > { %11462 = vmatpush1.bf16.msra.mxu0 %v16346_v63  ;;  %11954 = vmatpush1.bf16.msra.mxu1 %v16348_v54  ;;  %v2082_v63 = vld [vmem:[#allocation4 + $0x2c78] sm:$0xff]  ;;  %v16402_v54 = vcombine.low %v2069_v4, %v2073_v42  ;;  %v2129_v4 = vld [vmem:[#allocation4 + $0x2df0] sm:$0xff] }
 0x716   : > { %11463 = vmatprep.subr.bf16.mxu0 %v16355_v28  ;;  %11955 = vmatprep.subr.bf16.mxu1 %v16357_v8  ;;  %v16404_v28 = vcombine.low %v2070_v62, %v2074_v45  ;;  %v16411_v8 = vcombine.high %v2077_v6, %v2081_v1  ;;  %v16413_v14 = vcombine.high %v2078_v36, %v2082_v63  ;;  %v2126_v42 = vld [vmem:[#allocation4 + $0x2dd8] sm:$0xff] }
 0x717   : > { %v2130_v62 = vld [vmem:[#allocation4 + $0x2df8] sm:$0xff] }
 0x719   : > { %11464 = vmatpush1.bf16.msra.mxu0 %v16354_v55  ;;  %11956 = vmatpush1.bf16.msra.mxu1 %v16356_v17  ;;  %v2090_v55 = vld [vmem:[#allocation4 + $0x2cb8] sm:$0xff]  ;;  %v16410_v17 = vcombine.low %v2077_v6, %v2081_v1  ;;  %v2137_v6 = vld [vmem:[#allocation4 + $0x2e30] sm:$0xff] }
 0x71a   : > { %11465 = vmatprep.subr.bf16.mxu0 %v16363_v47  ;;  %11957 = vmatprep.subr.bf16.mxu1 %v16365_v35  ;;  %v16412_v47 = vcombine.low %v2078_v36, %v2082_v63  ;;  %v16419_v35 = vcombine.high %v2085_v11, %v2089_v18  ;;  %v16421_v13 = vcombine.high %v2086_v12, %v2090_v55  ;;  %v2134_v1 = vld [vmem:[#allocation4 + $0x2e18] sm:$0xff] }
 0x71b   : > { %v2138_v36 = vld [vmem:[#allocation4 + $0x2e38] sm:$0xff] }
 0x71d   : > { %11466 = vmatpush1.bf16.msra.mxu0 %v16362_v20  ;;  %11958 = vmatpush1.bf16.msra.mxu1 %v16364_v30  ;;  %v2098_v20 = vld [vmem:[#allocation4 + $0x2cf8] sm:$0xff]  ;;  %v16418_v30 = vcombine.low %v2085_v11, %v2089_v18  ;;  %v2145_v11 = vld [vmem:[#allocation4 + $0x2e70] sm:$0xff] }
 0x71e   : > { %11467 = vmatprep.subr.bf16.mxu0 %v16371_v22  ;;  %11959 = vmatprep.subr.bf16.mxu1 %v16373_v23  ;;  %v16427_v22 = vcombine.high %v2093_v15, %v2097_v16  ;;  %v16429_v23 = vcombine.high %v2094_v38, %v2098_v20  ;;  %v2142_v18 = vld [vmem:[#allocation4 + $0x2e58] sm:$0xff] }
 0x721   : > { %11468 = vmatpush1.bf16.msra.mxu0 %v16370_v32  ;;  %11960 = vmatpush1.bf16.msra.mxu1 %v16372_v5  ;;  %v16426_v32 = vcombine.low %v2093_v15, %v2097_v16  ;;  %v16428_v5 = vcombine.low %v2094_v38, %v2098_v20  ;;  %v2153_v15 = vld [vmem:[#allocation4 + $0x2eb0] sm:$0xff]  ;;  %v2150_v16 = vld [vmem:[#allocation4 + $0x2e98] sm:$0xff] }
 0x722   : > { %11469 = vmatprep.subr.bf16.mxu0 %v16379_v59  ;;  %11961 = vmatprep.subr.bf16.mxu1 %v16381_v31  ;;  %v16435_v59 = vcombine.high %v2101_v58, %v2105_v25  ;;  %v2109_v31 = vld [vmem:[#allocation4 + $0x2d50] sm:$0xff]  ;;  %v2154_v38 = vld [vmem:[#allocation4 + $0x2eb8] sm:$0xff] }
 0x723   : > { %v16442_v37 = vcombine.low %v2109_v31, %v2113_v26  ;;  %v2161_v58 = vld [vmem:[#allocation4 + $0x2ef0] sm:$0xff]  ;;  %v2158_v25 = vld [vmem:[#allocation4 + $0x2ed8] sm:$0xff] }
 0x725   : > { %11470 = vmatpush1.bf16.msra.mxu0 %v16378_v49  ;;  %11962 = vmatpush1.bf16.msra.mxu1 %v16380_v21  ;;  %v16436_v49 = vcombine.low %v2102_v27, %v2106_v29  ;;  %v16443_v21 = vcombine.high %v2109_v31, %v2113_v26  ;;  %v2169_v31 = vld [vmem:[#allocation4 + $0x2f30] sm:$0xff]  ;;  %v2166_v26 = vld [vmem:[#allocation4 + $0x2f18] sm:$0xff] }
 0x726   : > { %11471 = vmatprep.subr.bf16.mxu0 %v16387_v50  ;;  %11963 = vmatprep.subr.bf16.mxu1 %v16389_v52  ;;  %v16445_v50 = vcombine.high %v2110_v41, %v2114_v43  ;;  %v2117_v52 = vld [vmem:[#allocation4 + $0x2d90] sm:$0xff] }
 0x727   : > { %v16450_v45 = vcombine.low %v2117_v52, %v2121_v56 }
 0x729   : > { %11472 = vmatpush1.bf16.msra.mxu0 %v16386_v57  ;;  %11964 = vmatpush1.bf16.msra.mxu1 %v16388_v60  ;;  %v16444_v57 = vcombine.low %v2110_v41, %v2114_v43  ;;  %v16451_v60 = vcombine.high %v2117_v52, %v2121_v56  ;;  %v2170_v41 = vld [vmem:[#allocation4 + $0x2f38] sm:$0xff]  ;;  %v2177_v52 = vld [vmem:[#allocation4 + $0x2f70] sm:$0xff] }
 0x72a   : > { %11473 = vmatprep.subr.bf16.mxu0 %v16395_v61  ;;  %11965 = vmatprep.subr.bf16.mxu1 %v16397_v10  ;;  %v16453_v61 = vcombine.high %v2118_v9, %v2122_v24  ;;  %v2125_v10 = vld [vmem:[#allocation4 + $0x2dd0] sm:$0xff]  ;;  %v2174_v56 = vld [vmem:[#allocation4 + $0x2f58] sm:$0xff] }
 0x72b   : > { %v16458_v63 = vcombine.low %v2125_v10, %v2129_v4 }
 0x72d   : > { %11474 = vmatpush1.bf16.msra.mxu0 %v16394_v0  ;;  %11966 = vmatpush1.bf16.msra.mxu1 %v16396_v2  ;;  %v16452_v0 = vcombine.low %v2118_v9, %v2122_v24  ;;  %v16459_v2 = vcombine.high %v2125_v10, %v2129_v4  ;;  %v2178_v9 = vld [vmem:[#allocation4 + $0x2f78] sm:$0xff]  ;;  %v2185_v10 = vld [vmem:[#allocation4 + $0x2fb0] sm:$0xff] }
 0x72e   : > { %11484 = vmatprep.subr.bf16.mxu0 %v16403_v53  ;;  %11976 = vmatprep.subr.bf16.mxu1 %v16405_v19  ;;  %v16461_v53 = vcombine.high %v2126_v42, %v2130_v62  ;;  %v2133_v19 = vld [vmem:[#allocation4 + $0x2e10] sm:$0xff]  ;;  %v2182_v4 = vld [vmem:[#allocation4 + $0x2f98] sm:$0xff] }
 0x730   : > { %11476 = vmatmul.mubr.bf16.vlgmr.msra.gmra.mrb[4].mxu0 %v18938_v51  ;;  %11968 = vmatmul.mubr.bf16.vlgmr.msra.gmra.mrb[4].mxu1 %v18938_v51  ;;  %v16420_v51 = vcombine.low %v2086_v12, %v2090_v55  ;;  %v2146_v12 = vld [vmem:[#allocation4 + $0x2e78] sm:$0xff]  ;;  %v16466_v55 = vcombine.low %v2133_v19, %v2137_v6 }
 0x731   : > { %11485 = vmatpush1.bf16.msra.mxu0 %v16402_v54  ;;  %11977 = vmatpush1.bf16.msra.mxu1 %v16404_v28  ;;  %v16460_v54 = vcombine.low %v2126_v42, %v2130_v62  ;;  %v16467_v28 = vcombine.high %v2133_v19, %v2137_v6  ;;  %v2186_v42 = vld [vmem:[#allocation4 + $0x2fb8] sm:$0xff]  ;;  %v2193_v19 = vld [vmem:[#allocation4 + $0x2ff0] sm:$0xff] }
 0x732   : > { %11486 = vmatprep.subr.bf16.mxu0 %v16411_v8  ;;  %11978 = vmatprep.subr.bf16.mxu1 %v16413_v14  ;;  %v16469_v8 = vcombine.high %v2134_v1, %v2138_v36  ;;  %v2141_v14 = vld [vmem:[#allocation4 + $0x2e50] sm:$0xff]  ;;  %v2190_v6 = vld [vmem:[#allocation4 + $0x2fd8] sm:$0xff] }
 0x733   : > { %11516 = vmatprep.mubr.bf16.mxu0 %v18942_v3  ;;  %12008 = vmatprep.mubr.bf16.mxu1 %v18942_v3  ;;  %v16437_v3 = vcombine.high %v2102_v27, %v2106_v29  ;;  %v16474_v20 = vcombine.low %v2141_v14, %v2145_v11  ;;  %v2162_v27 = vld [vmem:[#allocation4 + $0x2ef8] sm:$0xff] }
 0x735   : > { %11487 = vmatpush1.bf16.msra.mxu0 %v16410_v17  ;;  %11979 = vmatpush1.bf16.msra.mxu1 %v16412_v47  ;;  %v16468_v17 = vcombine.low %v2134_v1, %v2138_v36  ;;  %v16475_v47 = vcombine.high %v2141_v14, %v2145_v11  ;;  %v2194_v1 = vld [vmem:[#allocation4 + $0x2ff8] sm:$0xff] }
 0x736   : > { %11488 = vmatprep.subr.bf16.mxu0 %v16419_v35  ;;  %11980 = vmatprep.subr.bf16.mxu1 %v16421_v13  ;;  %v16477_v35 = vcombine.high %v2142_v18, %v2146_v12  ;;  %v2149_v13 = vld [vmem:[#allocation4 + $0x2e90] sm:$0xff]  ;;  %v16524_v11 = vcombine.low %v2190_v6, %v2194_v1 }
 0x737   : > { %v16482_v29 = vcombine.low %v2149_v13, %v2153_v15 }
 0x739   : > { %11489 = vmatpush1.bf16.msra.mxu0 %v16418_v30  ;;  %11981 = vmatpush1.bf16.msra.mxu1 %v16420_v51  ;;  %v16476_v30 = vcombine.low %v2142_v18, %v2146_v12  ;;  %v16483_v51 = vcombine.high %v2149_v13, %v2153_v15  ;;  %v17320_v18 = vld [vmem:[#allocation6 + $0x4] ss:$16 sps:$4 sm:$0xff]   ;;  %v17323_v12 = vld [vmem:[#allocation6 + $0xc] ss:$16 sps:$4 sm:$0xff]  }
 0x73a   : > { %11490 = vmatprep.subr.bf16.mxu0 %v16427_v22  ;;  %11982 = vmatprep.subr.bf16.mxu1 %v16429_v23  ;;  %v16485_v22 = vcombine.high %v2150_v16, %v2154_v38  ;;  %v2157_v23 = vld [vmem:[#allocation4 + $0x2ed0] sm:$0xff]  ;;  %v17329_v15 = vld [vmem:[#allocation6 + $0x2c] ss:$16 sps:$4 sm:$0xff]  }
 0x73b   : > { %v16490_v43 = vcombine.low %v2157_v23, %v2161_v58 }
 0x73d   : > { %11491 = vmatpush1.bf16.msra.mxu0 %v16426_v32  ;;  %11983 = vmatpush1.bf16.msra.mxu1 %v16428_v5  ;;  %v16484_v32 = vcombine.low %v2150_v16, %v2154_v38  ;;  %v16491_v5 = vcombine.high %v2157_v23, %v2161_v58  ;;  %v17324_v16 = vld [vmem:[#allocation6 + $0x20] ss:$16 sps:$4 sm:$0xff]   ;;  %v17327_v38 = vld [vmem:[#allocation6 + $0x28] ss:$16 sps:$4 sm:$0xff]   ;;  %v17341_v23 = vld [vmem:[#allocation6 + $0x6c] ss:$16 sps:$4 sm:$0xff]  }
 0x73e   : > { %11492 = vmatprep.subr.bf16.mxu0 %v16435_v59  ;;  %11984 = vmatprep.subr.bf16.mxu1 %v16437_v3  ;;  %v16493_v59 = vcombine.high %v2158_v25, %v2162_v27  ;;  %v2165_v3 = vld [vmem:[#allocation4 + $0x2f10] sm:$0xff]  ;;  %v17339_v58 = vld [vmem:[#allocation6 + $0x68] ss:$16 sps:$4 sm:$0xff]  }
 0x73f   : > { %v16498_v24 = vcombine.low %v2165_v3, %v2169_v31 }
 0x741   : > { %11493 = vmatpush1.bf16.msra.mxu0 %v16434_v48  ;;  %11985 = vmatpush1.bf16.msra.mxu1 %v16436_v49  ;;  %v16492_v48 = vcombine.low %v2158_v25, %v2162_v27  ;;  %v16499_v49 = vcombine.high %v2165_v3, %v2169_v31  ;;  %v17344_v25 = vld [vmem:[#allocation6 + $0x84] ss:$16 sps:$4 sm:$0xff]   ;;  %v17347_v27 = vld [vmem:[#allocation6 + $0x8c] ss:$16 sps:$4 sm:$0xff]   ;;  %v17348_v3 = vld [vmem:[#allocation6 + $0xa0] ss:$16 sps:$4 sm:$0xff]  }
 0x742   : > { %11494 = vmatprep.subr.bf16.mxu0 %v16443_v21  ;;  %11986 = vmatprep.subr.bf16.mxu1 %v16445_v50  ;;  %v16501_v21 = vcombine.high %v2166_v26, %v2170_v41  ;;  %v2173_v50 = vld [vmem:[#allocation4 + $0x2f50] sm:$0xff]  ;;  %v17351_v31 = vld [vmem:[#allocation6 + $0xa8] ss:$16 sps:$4 sm:$0xff]  }
 0x743   : > { %v16506_v62 = vcombine.low %v2173_v50, %v2177_v52 }
 0x745   : > { %11495 = vmatpush1.bf16.msra.mxu0 %v16442_v37  ;;  %11987 = vmatpush1.bf16.msra.mxu1 %v16444_v57  ;;  %v16500_v37 = vcombine.low %v2166_v26, %v2170_v41  ;;  %v16507_v57 = vcombine.high %v2173_v50, %v2177_v52  ;;  %v17356_v26 = vld [vmem:[#allocation6 + $0xc4] ss:$16 sps:$4 sm:$0xff]   ;;  %v17359_v41 = vld [vmem:[#allocation6 + $0xcc] ss:$16 sps:$4 sm:$0xff]   ;;  %v17360_v50 = vld [vmem:[#allocation6 + $0xe0] ss:$16 sps:$4 sm:$0xff]  }
 0x746   : > { %11496 = vmatprep.subr.bf16.mxu0 %v16451_v60  ;;  %11988 = vmatprep.subr.bf16.mxu1 %v16453_v61  ;;  %v16509_v60 = vcombine.high %v2174_v56, %v2178_v9  ;;  %v2181_v61 = vld [vmem:[#allocation4 + $0x2f90] sm:$0xff]  ;;  %v17363_v52 = vld [vmem:[#allocation6 + $0xe8] ss:$16 sps:$4 sm:$0xff]  }
 0x747   : > { %v16514_v36 = vcombine.low %v2181_v61, %v2185_v10 }
 0x749   : > { %11497 = vmatpush1.bf16.msra.mxu0 %v16450_v45  ;;  %11989 = vmatpush1.bf16.msra.mxu1 %v16452_v0  ;;  %v16508_v45 = vcombine.low %v2174_v56, %v2178_v9  ;;  %v16515_v0 = vcombine.high %v2181_v61, %v2185_v10  ;;  %v17368_v56 = vld [vmem:[#allocation6 + $0x104] ss:$16 sps:$4 sm:$0xff]   ;;  %v17371_v9 = vld [vmem:[#allocation6 + $0x10c] ss:$16 sps:$4 sm:$0xff]   ;;  %v17372_v61 = vld [vmem:[#allocation6 + $0x120] ss:$16 sps:$4 sm:$0xff]  }
 0x74a   : > { %11498 = vmatprep.subr.bf16.mxu0 %v16459_v2  ;;  %11990 = vmatprep.subr.bf16.mxu1 %v16461_v53  ;;  %v16517_v2 = vcombine.high %v2182_v4, %v2186_v42  ;;  %v2189_v53 = vld [vmem:[#allocation4 + $0x2fd0] sm:$0xff]  ;;  %v17375_v10 = vld [vmem:[#allocation6 + $0x128] ss:$16 sps:$4 sm:$0xff]  }
 0x74b   : > { %v16522_v14 = vcombine.low %v2189_v53, %v2193_v19 }
 0x74d   : > { %11499 = vmatpush1.bf16.msra.mxu0 %v16458_v63  ;;  %11991 = vmatpush1.bf16.msra.mxu1 %v16460_v54  ;;  %v16516_v63 = vcombine.low %v2182_v4, %v2186_v42  ;;  %v16523_v54 = vcombine.high %v2189_v53, %v2193_v19  ;;  %v17380_v4 = vld [vmem:[#allocation6 + $0x144] ss:$16 sps:$4 sm:$0xff]   ;;  %v17383_v42 = vld [vmem:[#allocation6 + $0x14c] ss:$16 sps:$4 sm:$0xff]   ;;  %v17384_v53 = vld [vmem:[#allocation6 + $0x160] ss:$16 sps:$4 sm:$0xff]  }
 0x74e   : > { %11500 = vmatprep.subr.bf16.mxu0 %v16467_v28  ;;  %11992 = vmatprep.subr.bf16.mxu1 %v16469_v8  ;;  %v16525_v28 = vcombine.high %v2190_v6, %v2194_v1  ;;  %v12018_v8 = vmul.f32 0.2, %v18972_v40  ;;  %v17387_v19 = vld [vmem:[#allocation6 + $0x168] ss:$16 sps:$4 sm:$0xff]   ;;  %v17392_v6 = vld [vmem:[#allocation6 + $0x184] ss:$16 sps:$4 sm:$0xff]  }
 0x74f   : > { %v17395_v1 = vld [vmem:[#allocation6 + $0x18c] ss:$16 sps:$4 sm:$0xff]  }
 0x751   : > { %11501 = vmatpush1.bf16.msra.mxu0 %v16466_v55  ;;  %11993 = vmatpush1.bf16.msra.mxu1 %v16468_v17  ;;  %v12026_v55 = vmax.f32 %v18972_v40, %v12018_v8  ;;  %v17318_v17 = vld [vmem:[#allocation6] ss:$16 sps:$4 sm:$0xff]   ;;  %v17335_v40 = vld [vmem:[#allocation6 + $0x4c] ss:$16 sps:$4 sm:$0xff]  }
 0x752   : > { %11502 = vmatprep.subr.bf16.mxu0 %v16475_v47  ;;  %11994 = vmatprep.subr.bf16.mxu1 %v16477_v35  ;;  %v17321_v47 = vld [vmem:[#allocation6 + $0x8] ss:$16 sps:$4 sm:$0xff]   ;;  %v17326_v35 = vld [vmem:[#allocation6 + $0x24] ss:$16 sps:$4 sm:$0xff]   ;;  %v17396_v8 = vld [vmem:[#allocation6 + $0x1a0] ss:$16 sps:$4 sm:$0xff]  }
 0x753   : > { %v12034_v13 = vpack.c.bf16 %v12026_v55, %v12026_v55  ;;  %v12017_v55 = vmul.f32 0.2, %v18968_v33 }
 0x755   : > { %11503 = vmatpush1.bf16.msra.mxu0 %v16474_v20  ;;  %11995 = vmatpush1.bf16.msra.mxu1 %v16476_v30  ;;  %v17332_v20 = vld [vmem:[#allocation6 + $0x44] ss:$16 sps:$4 sm:$0xff]   ;;  %v17330_v30 = vld [vmem:[#allocation6 + $0x40] ss:$16 sps:$4 sm:$0xff]  }
 0x756   : > { %11504 = vmatprep.subr.bf16.mxu0 %v16483_v51  ;;  %11996 = vmatprep.subr.bf16.mxu1 %v16485_v22  ;;  %v17333_v51 = vld [vmem:[#allocation6 + $0x48] ss:$16 sps:$4 sm:$0xff]   ;;  %v17338_v22 = vld [vmem:[#allocation6 + $0x64] ss:$16 sps:$4 sm:$0xff]  }
 0x759   : > { %11505 = vmatpush1.bf16.msra.mxu0 %v16482_v29  ;;  %11997 = vmatpush1.bf16.msra.mxu1 %v16484_v32  ;;  %v17342_v29 = vld [vmem:[#allocation6 + $0x80] ss:$16 sps:$4 sm:$0xff]   ;;  %v17345_v32 = vld [vmem:[#allocation6 + $0x88] ss:$16 sps:$4 sm:$0xff]  }
 0x75a   : > { %11506 = vmatprep.subr.bf16.mxu0 %v16491_v5  ;;  %11998 = vmatprep.subr.bf16.mxu1 %v16493_v59  ;;  %v17350_v5 = vld [vmem:[#allocation6 + $0xa4] ss:$16 sps:$4 sm:$0xff]   ;;  %v17353_v59 = vld [vmem:[#allocation6 + $0xac] ss:$16 sps:$4 sm:$0xff]  }
 0x75d   : > { %11507 = vmatpush1.bf16.msra.mxu0 %v16490_v43  ;;  %11999 = vmatpush1.bf16.msra.mxu1 %v16492_v48  ;;  %v17354_v43 = vld [vmem:[#allocation6 + $0xc0] ss:$16 sps:$4 sm:$0xff]   ;;  %v17357_v48 = vld [vmem:[#allocation6 + $0xc8] ss:$16 sps:$4 sm:$0xff]  }
 0x75e   : > { %11508 = vmatprep.subr.bf16.mxu0 %v16499_v49  ;;  %12000 = vmatprep.subr.bf16.mxu1 %v16501_v21  ;;  %v17362_v49 = vld [vmem:[#allocation6 + $0xe4] ss:$16 sps:$4 sm:$0xff]   ;;  %v17365_v21 = vld [vmem:[#allocation6 + $0xec] ss:$16 sps:$4 sm:$0xff]  }
 0x761   : > { %11509 = vmatpush1.bf16.msra.mxu0 %v16498_v24  ;;  %12001 = vmatpush1.bf16.msra.mxu1 %v16500_v37  ;;  %v17366_v24 = vld [vmem:[#allocation6 + $0x100] ss:$16 sps:$4 sm:$0xff]   ;;  %v17369_v37 = vld [vmem:[#allocation6 + $0x108] ss:$16 sps:$4 sm:$0xff]  }
 0x762   : > { %11510 = vmatprep.subr.bf16.mxu0 %v16507_v57  ;;  %12002 = vmatprep.subr.bf16.mxu1 %v16509_v60  ;;  %v17374_v57 = vld [vmem:[#allocation6 + $0x124] ss:$16 sps:$4 sm:$0xff]   ;;  %v17377_v60 = vld [vmem:[#allocation6 + $0x12c] ss:$16 sps:$4 sm:$0xff]  }
 0x765   : > { %11511 = vmatpush1.bf16.msra.mxu0 %v16506_v62  ;;  %12003 = vmatpush1.bf16.msra.mxu1 %v16508_v45  ;;  %v17378_v62 = vld [vmem:[#allocation6 + $0x140] ss:$16 sps:$4 sm:$0xff]   ;;  %v17381_v45 = vld [vmem:[#allocation6 + $0x148] ss:$16 sps:$4 sm:$0xff]  }
 0x766   : > { %11512 = vmatprep.subr.bf16.mxu0 %v16515_v0  ;;  %12004 = vmatprep.subr.bf16.mxu1 %v16517_v2  ;;  %v17386_v0 = vld [vmem:[#allocation6 + $0x164] ss:$16 sps:$4 sm:$0xff]   ;;  %v17389_v2 = vld [vmem:[#allocation6 + $0x16c] ss:$16 sps:$4 sm:$0xff]  }
 0x769   : > { %11513 = vmatpush1.bf16.msra.mxu0 %v16514_v36  ;;  %12005 = vmatpush1.bf16.msra.mxu1 %v16516_v63  ;;  %v17390_v36 = vld [vmem:[#allocation6 + $0x180] ss:$16 sps:$4 sm:$0xff]   ;;  %v17393_v63 = vld [vmem:[#allocation6 + $0x188] ss:$16 sps:$4 sm:$0xff]  }
 0x76a   : > { %11514 = vmatprep.subr.bf16.mxu0 %v16523_v54  ;;  %12006 = vmatprep.subr.bf16.mxu1 %v16525_v28  ;;  %v17398_v54 = vld [vmem:[#allocation6 + $0x1a4] ss:$16 sps:$4 sm:$0xff]   ;;  %v17401_v28 = vld [vmem:[#allocation6 + $0x1ac] ss:$16 sps:$4 sm:$0xff]  }
 0x76d   : > { %11515 = vmatpush1.bf16.msra.mxu0 %v16522_v14  ;;  %12007 = vmatpush1.bf16.msra.mxu1 %v16524_v11  ;;  %v17399_v14 = vld [vmem:[#allocation6 + $0x1a8] ss:$16 sps:$4 sm:$0xff]   ;;  %v17404_v11 = vld [vmem:[#allocation6 + $0x1c4] ss:$16 sps:$4 sm:$0xff]  }
 0x76e   : > { %13599 = vmatprep.subr.bf16.mxu0 %v17320_v18  ;;  %13763 = vmatprep.subr.bf16.mxu1 %v17323_v12  ;;  %v17407_v18 = vld [vmem:[#allocation6 + $0x1cc] ss:$16 sps:$4 sm:$0xff]   ;;  %v17402_v12 = vld [vmem:[#allocation6 + $0x1c0] ss:$16 sps:$4 sm:$0xff]  }
 0x770   : > { %11517 = vmatmul.mubr.bf16.vlgmr.msra.gmra.mrb[4].mxu0 %v18950_v7  ;;  %12009 = vmatmul.mubr.bf16.vlgmr.msra.gmra.mrb[4].mxu1 %v18950_v7  ;;  %v17336_v7 = vld [vmem:[#allocation6 + $0x60] ss:$16 sps:$4 sm:$0xff]  }
 0x771   : > { %13600 = vmatpush1.bf16.msra.mxu0 %v17318_v17  ;;  %13631 = vmatprep.mubr.bf16.mxu0 %v12034_v13  ;;  %v17405_v17 = vld [vmem:[#allocation6 + $0x1c8] ss:$16 sps:$4 sm:$0xff]  }
 0x772   : > { %13764 = vmatpush1.bf16.msra.mxu1 %v17321_v47  ;;  %13795 = vmatprep.mubr.bf16.mxu1 %v12034_v13  ;;  %v17410_v47 = vld [vmem:[#allocation6 + $0x1e4] ss:$16 sps:$4 sm:$0xff]   ;;  %v12020_v13 = vmul.f32 0.2, %v18974_v46 }
 0x773   : > { %13601 = vmatprep.subr.bf16.mxu0 %v17326_v35  ;;  %13765 = vmatprep.subr.bf16.mxu1 %v17329_v15  ;;  %v17413_v35 = vld [vmem:[#allocation6 + $0x1ec] ss:$16 sps:$4 sm:$0xff]   ;;  %v17408_v15 = vld [vmem:[#allocation6 + $0x1e0] ss:$16 sps:$4 sm:$0xff]  }
 0x775   : > { %13602 = vmatpush1.bf16.msra.mxu0 %v17324_v16  ;;  %v12025_v16 = vmax.f32 %v18968_v33, %v12017_v55  ;;  %v17420_v33 = vld [vmem:[#allocation6 + $0x220] ss:$16 sps:$4 sm:$0xff]  }
 0x776   : > { %13766 = vmatpush1.bf16.msra.mxu1 %v17327_v38  ;;  %13603 = vmatprep.subr.bf16.mxu0 %v17332_v20  ;;  %v17411_v38 = vld [vmem:[#allocation6 + $0x1e8] ss:$16 sps:$4 sm:$0xff]   ;;  %v17416_v20 = vld [vmem:[#allocation6 + $0x204] ss:$16 sps:$4 sm:$0xff]   ;;  %v17486_v55 = vld [vmem:[#allocation6 + $0x380] ss:$16 sps:$4 sm:$0xff]  }
 0x777   : > { %13767 = vmatprep.subr.bf16.mxu1 %v17335_v40  ;;  %v17419_v40 = vld [vmem:[#allocation6 + $0x20c] ss:$16 sps:$4 sm:$0xff]  }
 0x779   : > { %13604 = vmatpush1.bf16.msra.mxu0 %v17330_v30  ;;  %v12028_v30 = vmax.f32 %v18974_v46, %v12020_v13  ;;  %v17431_v46 = vld [vmem:[#allocation6 + $0x24c] ss:$16 sps:$4 sm:$0xff]   ;;  %v17492_v13 = vld [vmem:[#allocation6 + $0x3a0] ss:$16 sps:$4 sm:$0xff]  }
 0x77a   : > { %13768 = vmatpush1.bf16.msra.mxu1 %v17333_v51  ;;  %13605 = vmatprep.subr.bf16.mxu0 %v17338_v22  ;;  %v17414_v51 = vld [vmem:[#allocation6 + $0x200] ss:$16 sps:$4 sm:$0xff]   ;;  %v12033_v22 = vpack.c.bf16 %v12025_v16, %v12025_v16  ;;  %v17500_v16 = vld [vmem:[#allocation6 + $0x3c4] ss:$16 sps:$4 sm:$0xff]  }
 0x77b   : > { %13769 = vmatprep.subr.bf16.mxu1 %v17341_v23  ;;  %v17417_v23 = vld [vmem:[#allocation6 + $0x208] ss:$16 sps:$4 sm:$0xff]  }
 0x77d   : > { %13606 = vmatpush1.bf16.msra.mxu0 %v17336_v7  ;;  %v17422_v7 = vld [vmem:[#allocation6 + $0x224] ss:$16 sps:$4 sm:$0xff]  }
 0x77e   : > { %13770 = vmatpush1.bf16.msra.mxu1 %v17339_v58  ;;  %13607 = vmatprep.subr.bf16.mxu0 %v17344_v25  ;;  %v12036_v58 = vpack.c.bf16 %v12028_v30, %v12028_v30  ;;  %v17425_v25 = vld [vmem:[#allocation6 + $0x22c] ss:$16 sps:$4 sm:$0xff]   ;;  %v17501_v30 = vld [vmem:[#allocation6 + $0x3c8] ss:$16 sps:$4 sm:$0xff]  }
 0x77f   : > { %13771 = vmatprep.subr.bf16.mxu1 %v17347_v27  ;;  %v17423_v27 = vld [vmem:[#allocation6 + $0x228] ss:$16 sps:$4 sm:$0xff]  }
 0x781   : > { %13608 = vmatpush1.bf16.msra.mxu0 %v17342_v29  ;;  %v17428_v29 = vld [vmem:[#allocation6 + $0x244] ss:$16 sps:$4 sm:$0xff]  }
 0x782   : > { %13772 = vmatpush1.bf16.msra.mxu1 %v17345_v32  ;;  %13609 = vmatprep.subr.bf16.mxu0 %v17350_v5  ;;  %v17426_v32 = vld [vmem:[#allocation6 + $0x240] ss:$16 sps:$4 sm:$0xff]   ;;  %v17429_v5 = vld [vmem:[#allocation6 + $0x248] ss:$16 sps:$4 sm:$0xff]  }
 0x783   : > { %13773 = vmatprep.subr.bf16.mxu1 %v17353_v59  ;;  %v17434_v59 = vld [vmem:[#allocation6 + $0x264] ss:$16 sps:$4 sm:$0xff]  }
 0x785   : > { %13610 = vmatpush1.bf16.msra.mxu0 %v17348_v3  ;;  %v17437_v3 = vld [vmem:[#allocation6 + $0x26c] ss:$16 sps:$4 sm:$0xff]  }
 0x786   : > { %13774 = vmatpush1.bf16.msra.mxu1 %v17351_v31  ;;  %13611 = vmatprep.subr.bf16.mxu0 %v17356_v26  ;;  %v17432_v31 = vld [vmem:[#allocation6 + $0x260] ss:$16 sps:$4 sm:$0xff]   ;;  %v17435_v26 = vld [vmem:[#allocation6 + $0x268] ss:$16 sps:$4 sm:$0xff]  }
 0x787   : > { %13775 = vmatprep.subr.bf16.mxu1 %v17359_v41  ;;  %v17440_v41 = vld [vmem:[#allocation6 + $0x284] ss:$16 sps:$4 sm:$0xff]  }
 0x789   : > { %13612 = vmatpush1.bf16.msra.mxu0 %v17354_v43  ;;  %v17443_v43 = vld [vmem:[#allocation6 + $0x28c] ss:$16 sps:$4 sm:$0xff]  }
 0x78a   : > { %13776 = vmatpush1.bf16.msra.mxu1 %v17357_v48  ;;  %13613 = vmatprep.subr.bf16.mxu0 %v17362_v49  ;;  %v17438_v48 = vld [vmem:[#allocation6 + $0x280] ss:$16 sps:$4 sm:$0xff]   ;;  %v17441_v49 = vld [vmem:[#allocation6 + $0x288] ss:$16 sps:$4 sm:$0xff]  }
 0x78b   : > { %13777 = vmatprep.subr.bf16.mxu1 %v17365_v21  ;;  %v17446_v21 = vld [vmem:[#allocation6 + $0x2a4] ss:$16 sps:$4 sm:$0xff]  }
 0x78d   : > { %13614 = vmatpush1.bf16.msra.mxu0 %v17360_v50  ;;  %v17449_v50 = vld [vmem:[#allocation6 + $0x2ac] ss:$16 sps:$4 sm:$0xff]  }
 0x78e   : > { %13778 = vmatpush1.bf16.msra.mxu1 %v17363_v52  ;;  %13615 = vmatprep.subr.bf16.mxu0 %v17368_v56  ;;  %v17444_v52 = vld [vmem:[#allocation6 + $0x2a0] ss:$16 sps:$4 sm:$0xff]   ;;  %v17447_v56 = vld [vmem:[#allocation6 + $0x2a8] ss:$16 sps:$4 sm:$0xff]  }
 0x78f   : > { %13779 = vmatprep.subr.bf16.mxu1 %v17371_v9  ;;  %v17452_v9 = vld [vmem:[#allocation6 + $0x2c4] ss:$16 sps:$4 sm:$0xff]  }
 0x791   : > { %13616 = vmatpush1.bf16.msra.mxu0 %v17366_v24  ;;  %v17455_v24 = vld [vmem:[#allocation6 + $0x2cc] ss:$16 sps:$4 sm:$0xff]  }
 0x792   : > { %13780 = vmatpush1.bf16.msra.mxu1 %v17369_v37  ;;  %13617 = vmatprep.subr.bf16.mxu0 %v17374_v57  ;;  %v17450_v37 = vld [vmem:[#allocation6 + $0x2c0] ss:$16 sps:$4 sm:$0xff]   ;;  %v17453_v57 = vld [vmem:[#allocation6 + $0x2c8] ss:$16 sps:$4 sm:$0xff]  }
 0x793   : > { %13781 = vmatprep.subr.bf16.mxu1 %v17377_v60  ;;  %v17458_v60 = vld [vmem:[#allocation6 + $0x2e4] ss:$16 sps:$4 sm:$0xff]  }
 0x795   : > { %13618 = vmatpush1.bf16.msra.mxu0 %v17372_v61  ;;  %v17461_v61 = vld [vmem:[#allocation6 + $0x2ec] ss:$16 sps:$4 sm:$0xff]  }
 0x796   : > { %13782 = vmatpush1.bf16.msra.mxu1 %v17375_v10  ;;  %13619 = vmatprep.subr.bf16.mxu0 %v17380_v4  ;;  %v17456_v10 = vld [vmem:[#allocation6 + $0x2e0] ss:$16 sps:$4 sm:$0xff]   ;;  %v17459_v4 = vld [vmem:[#allocation6 + $0x2e8] ss:$16 sps:$4 sm:$0xff]  }
 0x797   : > { %13783 = vmatprep.subr.bf16.mxu1 %v17383_v42  ;;  %v17464_v42 = vld [vmem:[#allocation6 + $0x304] ss:$16 sps:$4 sm:$0xff]  }
 0x799   : > { %13620 = vmatpush1.bf16.msra.mxu0 %v17378_v62  ;;  %v17467_v62 = vld [vmem:[#allocation6 + $0x30c] ss:$16 sps:$4 sm:$0xff]  }
 0x79a   : > { %13784 = vmatpush1.bf16.msra.mxu1 %v17381_v45  ;;  %13621 = vmatprep.subr.bf16.mxu0 %v17386_v0  ;;  %v17462_v45 = vld [vmem:[#allocation6 + $0x300] ss:$16 sps:$4 sm:$0xff]   ;;  %v17465_v0 = vld [vmem:[#allocation6 + $0x308] ss:$16 sps:$4 sm:$0xff]  }
 0x79b   : > { %13785 = vmatprep.subr.bf16.mxu1 %v17389_v2  ;;  %v17470_v2 = vld [vmem:[#allocation6 + $0x324] ss:$16 sps:$4 sm:$0xff]  }
 0x79d   : > { %13622 = vmatpush1.bf16.msra.mxu0 %v17384_v53  ;;  %v17473_v53 = vld [vmem:[#allocation6 + $0x32c] ss:$16 sps:$4 sm:$0xff]  }
 0x79e   : > { %13786 = vmatpush1.bf16.msra.mxu1 %v17387_v19  ;;  %13623 = vmatprep.subr.bf16.mxu0 %v17392_v6  ;;  %v17468_v19 = vld [vmem:[#allocation6 + $0x320] ss:$16 sps:$4 sm:$0xff]   ;;  %v17471_v6 = vld [vmem:[#allocation6 + $0x328] ss:$16 sps:$4 sm:$0xff]  }
 0x79f   : > { %13787 = vmatprep.subr.bf16.mxu1 %v17395_v1  ;;  %v17476_v1 = vld [vmem:[#allocation6 + $0x344] ss:$16 sps:$4 sm:$0xff]  }
 0x7a1   : > { %13624 = vmatpush1.bf16.msra.mxu0 %v17390_v36  ;;  %v17479_v36 = vld [vmem:[#allocation6 + $0x34c] ss:$16 sps:$4 sm:$0xff]  }
 0x7a2   : > { %13788 = vmatpush1.bf16.msra.mxu1 %v17393_v63  ;;  %13625 = vmatprep.subr.bf16.mxu0 %v17398_v54  ;;  %v17474_v63 = vld [vmem:[#allocation6 + $0x340] ss:$16 sps:$4 sm:$0xff]   ;;  %v17477_v54 = vld [vmem:[#allocation6 + $0x348] ss:$16 sps:$4 sm:$0xff]  }
 0x7a3   : > { %13789 = vmatprep.subr.bf16.mxu1 %v17401_v28  ;;  %v17482_v28 = vld [vmem:[#allocation6 + $0x364] ss:$16 sps:$4 sm:$0xff]  }
 0x7a5   : > { %13626 = vmatpush1.bf16.msra.mxu0 %v17396_v8  ;;  %v17485_v8 = vld [vmem:[#allocation6 + $0x36c] ss:$16 sps:$4 sm:$0xff]  }
 0x7a6   : > { %13790 = vmatpush1.bf16.msra.mxu1 %v17399_v14  ;;  %13627 = vmatprep.subr.bf16.mxu0 %v17404_v11  ;;  %v17480_v14 = vld [vmem:[#allocation6 + $0x360] ss:$16 sps:$4 sm:$0xff]   ;;  %v17483_v11 = vld [vmem:[#allocation6 + $0x368] ss:$16 sps:$4 sm:$0xff]  }
 0x7a7   : > { %13791 = vmatprep.subr.bf16.mxu1 %v17407_v18  ;;  %v17488_v18 = vld [vmem:[#allocation6 + $0x384] ss:$16 sps:$4 sm:$0xff]  }
 0x7a9   : > { %13628 = vmatpush1.bf16.msra.mxu0 %v17402_v12  ;;  %v17491_v12 = vld [vmem:[#allocation6 + $0x38c] ss:$16 sps:$4 sm:$0xff]  }
 0x7aa   : > { %13792 = vmatpush1.bf16.msra.mxu1 %v17405_v17  ;;  %13629 = vmatprep.subr.bf16.mxu0 %v17410_v47  ;;  %v17489_v17 = vld [vmem:[#allocation6 + $0x388] ss:$16 sps:$4 sm:$0xff]   ;;  %v17494_v47 = vld [vmem:[#allocation6 + $0x3a4] ss:$16 sps:$4 sm:$0xff]  }
 0x7ab   : > { %13793 = vmatprep.subr.bf16.mxu1 %v17413_v35  ;;  %v17497_v35 = vld [vmem:[#allocation6 + $0x3ac] ss:$16 sps:$4 sm:$0xff]  }
 0x7ad   : > { %13630 = vmatpush1.bf16.msra.mxu0 %v17408_v15  ;;  %v17495_v15 = vld [vmem:[#allocation6 + $0x3a8] ss:$16 sps:$4 sm:$0xff]  }
 0x7ae   : > { %13794 = vmatpush1.bf16.msra.mxu1 %v17411_v38  ;;  %13640 = vmatprep.subr.bf16.mxu0 %v17416_v20  ;;  %v17503_v38 = vld [vmem:[#allocation6 + $0x3cc] ss:$16 sps:$4 sm:$0xff]   ;;  %v17498_v20 = vld [vmem:[#allocation6 + $0x3c0] ss:$16 sps:$4 sm:$0xff]  }
 0x7af   : > { %13804 = vmatprep.subr.bf16.mxu1 %v17419_v40  ;;  %v12019_v40 = vmul.f32 0.2, %v18970_v39 }
 0x7b0   : > { %13632 = vmatmul.mubr.bf16.vlgmr.msra.gmra.mrb[8].mxu0 %v12033_v22 }
 0x7b1   : > { %13796 = vmatmul.mubr.bf16.vlgmr.msra.gmra.mrb[8].mxu1 %v12033_v22  ;;  %13641 = vmatpush1.bf16.msra.mxu0 %v17414_v51  ;;  %v17506_v51 = vld [vmem:[#allocation6 + $0x3e4] ss:$16 sps:$4 sm:$0xff]   ;;  %v17509_v22 = vld [vmem:[#allocation6 + $0x3ec] ss:$16 sps:$4 sm:$0xff]  }
 0x7b2   : > { %13672 = vmatprep.mubr.bf16.mxu0 %v12036_v58  ;;  %13805 = vmatpush1.bf16.msra.mxu1 %v17417_v23  ;;  %v17504_v23 = vld [vmem:[#allocation6 + $0x3e0] ss:$16 sps:$4 sm:$0xff]  }
 0x7b3   : > { %13836 = vmatprep.mubr.bf16.mxu1 %v12036_v58  ;;  %13642 = vmatprep.subr.bf16.mxu0 %v17422_v7  ;;  %v12027_v7 = vmax.f32 %v18970_v39, %v12019_v40  ;;  %v17507_v58 = vld [vmem:[#allocation6 + $0x3e8] ss:$16 sps:$4 sm:$0xff]   ;;  %v17588_v40 = vld [vmem:[#allocation6 + $0x5a0] ss:$16 sps:$4 sm:$0xff]  }
 0x7b4   : > { %13806 = vmatprep.subr.bf16.mxu1 %v17425_v25  ;;  %v17512_v25 = vld [vmem:[#allocation6 + $0x404] ss:$16 sps:$4 sm:$0xff]   ;;  %v17519_v39 = vld [vmem:[#allocation6 + $0x428] ss:$16 sps:$4 sm:$0xff]  }
 0x7b5   : > { %13643 = vmatpush1.bf16.msra.mxu0 %v17420_v33  ;;  %v17515_v33 = vld [vmem:[#allocation6 + $0x40c] ss:$16 sps:$4 sm:$0xff]  }
 0x7b6   : > { %13807 = vmatpush1.bf16.msra.mxu1 %v17423_v27  ;;  %13644 = vmatprep.subr.bf16.mxu0 %v17428_v29  ;;  %v17510_v27 = vld [vmem:[#allocation6 + $0x400] ss:$16 sps:$4 sm:$0xff]   ;;  %v12035_v29 = vpack.c.bf16 %v12027_v7, %v12027_v7  ;;  %v17597_v7 = vld [vmem:[#allocation6 + $0x5c8] ss:$16 sps:$4 sm:$0xff]  }
 0x7b7   : > { %13808 = vmatprep.subr.bf16.mxu1 %v17431_v46  ;;  %v17513_v46 = vld [vmem:[#allocation6 + $0x408] ss:$16 sps:$4 sm:$0xff]  }
 0x7b9   : > { %13645 = vmatpush1.bf16.msra.mxu0 %v17426_v32  ;;  %v17518_v32 = vld [vmem:[#allocation6 + $0x424] ss:$16 sps:$4 sm:$0xff]  }
 0x7ba   : > { %13809 = vmatpush1.bf16.msra.mxu1 %v17429_v5  ;;  %13646 = vmatprep.subr.bf16.mxu0 %v17434_v59  ;;  %v17521_v5 = vld [vmem:[#allocation6 + $0x42c] ss:$16 sps:$4 sm:$0xff]   ;;  %v17516_v59 = vld [vmem:[#allocation6 + $0x420] ss:$16 sps:$4 sm:$0xff]  }
 0x7bb   : > { %13810 = vmatprep.subr.bf16.mxu1 %v17437_v3  ;;  %v17524_v3 = vld [vmem:[#allocation6 + $0x444] ss:$16 sps:$4 sm:$0xff]  }
 0x7bd   : > { %13647 = vmatpush1.bf16.msra.mxu0 %v17432_v31  ;;  %v17527_v31 = vld [vmem:[#allocation6 + $0x44c] ss:$16 sps:$4 sm:$0xff]  }
 0x7be   : > { %13811 = vmatpush1.bf16.msra.mxu1 %v17435_v26  ;;  %13648 = vmatprep.subr.bf16.mxu0 %v17440_v41  ;;  %v17522_v26 = vld [vmem:[#allocation6 + $0x440] ss:$16 sps:$4 sm:$0xff]   ;;  %v17525_v41 = vld [vmem:[#allocation6 + $0x448] ss:$16 sps:$4 sm:$0xff]  }
 0x7bf   : > { %13812 = vmatprep.subr.bf16.mxu1 %v17443_v43  ;;  %v17530_v43 = vld [vmem:[#allocation6 + $0x464] ss:$16 sps:$4 sm:$0xff]  }
 0x7c1   : > { %13649 = vmatpush1.bf16.msra.mxu0 %v17438_v48  ;;  %v17533_v48 = vld [vmem:[#allocation6 + $0x46c] ss:$16 sps:$4 sm:$0xff]  }
 0x7c2   : > { %13813 = vmatpush1.bf16.msra.mxu1 %v17441_v49  ;;  %13650 = vmatprep.subr.bf16.mxu0 %v17446_v21  ;;  %v17528_v49 = vld [vmem:[#allocation6 + $0x460] ss:$16 sps:$4 sm:$0xff]   ;;  %v17531_v21 = vld [vmem:[#allocation6 + $0x468] ss:$16 sps:$4 sm:$0xff]  }
 0x7c3   : > { %13814 = vmatprep.subr.bf16.mxu1 %v17449_v50  ;;  %v17536_v50 = vld [vmem:[#allocation6 + $0x484] ss:$16 sps:$4 sm:$0xff]  }
 0x7c5   : > { %13651 = vmatpush1.bf16.msra.mxu0 %v17444_v52  ;;  %v17539_v52 = vld [vmem:[#allocation6 + $0x48c] ss:$16 sps:$4 sm:$0xff]  }
 0x7c6   : > { %13815 = vmatpush1.bf16.msra.mxu1 %v17447_v56  ;;  %13652 = vmatprep.subr.bf16.mxu0 %v17452_v9  ;;  %v17534_v56 = vld [vmem:[#allocation6 + $0x480] ss:$16 sps:$4 sm:$0xff]   ;;  %v17537_v9 = vld [vmem:[#allocation6 + $0x488] ss:$16 sps:$4 sm:$0xff]  }
 0x7c7   : > { %13816 = vmatprep.subr.bf16.mxu1 %v17455_v24  ;;  %v17542_v24 = vld [vmem:[#allocation6 + $0x4a4] ss:$16 sps:$4 sm:$0xff]  }
 0x7c9   : > { %13653 = vmatpush1.bf16.msra.mxu0 %v17450_v37  ;;  %v17545_v37 = vld [vmem:[#allocation6 + $0x4ac] ss:$16 sps:$4 sm:$0xff]  }
 0x7ca   : > { %13817 = vmatpush1.bf16.msra.mxu1 %v17453_v57  ;;  %13654 = vmatprep.subr.bf16.mxu0 %v17458_v60  ;;  %v17540_v57 = vld [vmem:[#allocation6 + $0x4a0] ss:$16 sps:$4 sm:$0xff]   ;;  %v17543_v60 = vld [vmem:[#allocation6 + $0x4a8] ss:$16 sps:$4 sm:$0xff]  }
 0x7cb   : > { %13818 = vmatprep.subr.bf16.mxu1 %v17461_v61  ;;  %v17548_v61 = vld [vmem:[#allocation6 + $0x4c4] ss:$16 sps:$4 sm:$0xff]  }
 0x7cd   : > { %13655 = vmatpush1.bf16.msra.mxu0 %v17456_v10  ;;  %v17551_v10 = vld [vmem:[#allocation6 + $0x4cc] ss:$16 sps:$4 sm:$0xff]  }
 0x7ce   : > { %13819 = vmatpush1.bf16.msra.mxu1 %v17459_v4  ;;  %13656 = vmatprep.subr.bf16.mxu0 %v17464_v42  ;;  %v17546_v4 = vld [vmem:[#allocation6 + $0x4c0] ss:$16 sps:$4 sm:$0xff]   ;;  %v17549_v42 = vld [vmem:[#allocation6 + $0x4c8] ss:$16 sps:$4 sm:$0xff]  }
 0x7cf   : > { %13820 = vmatprep.subr.bf16.mxu1 %v17467_v62  ;;  %v17554_v62 = vld [vmem:[#allocation6 + $0x4e4] ss:$16 sps:$4 sm:$0xff]  }
 0x7d1   : > { %13657 = vmatpush1.bf16.msra.mxu0 %v17462_v45  ;;  %v17557_v45 = vld [vmem:[#allocation6 + $0x4ec] ss:$16 sps:$4 sm:$0xff]  }
 0x7d2   : > { %13821 = vmatpush1.bf16.msra.mxu1 %v17465_v0  ;;  %13658 = vmatprep.subr.bf16.mxu0 %v17470_v2  ;;  %v17552_v0 = vld [vmem:[#allocation6 + $0x4e0] ss:$16 sps:$4 sm:$0xff]   ;;  %v17555_v2 = vld [vmem:[#allocation6 + $0x4e8] ss:$16 sps:$4 sm:$0xff]  }
 0x7d3   : > { %13822 = vmatprep.subr.bf16.mxu1 %v17473_v53  ;;  %v17560_v53 = vld [vmem:[#allocation6 + $0x504] ss:$16 sps:$4 sm:$0xff]  }
 0x7d5   : > { %13659 = vmatpush1.bf16.msra.mxu0 %v17468_v19  ;;  %v17563_v19 = vld [vmem:[#allocation6 + $0x50c] ss:$16 sps:$4 sm:$0xff]  }
 0x7d6   : > { %13823 = vmatpush1.bf16.msra.mxu1 %v17471_v6  ;;  %13660 = vmatprep.subr.bf16.mxu0 %v17476_v1  ;;  %v17558_v6 = vld [vmem:[#allocation6 + $0x500] ss:$16 sps:$4 sm:$0xff]   ;;  %v17561_v1 = vld [vmem:[#allocation6 + $0x508] ss:$16 sps:$4 sm:$0xff]  }
 0x7d7   : > { %13824 = vmatprep.subr.bf16.mxu1 %v17479_v36  ;;  %v17566_v36 = vld [vmem:[#allocation6 + $0x524] ss:$16 sps:$4 sm:$0xff]  }
 0x7d9   : > { %13661 = vmatpush1.bf16.msra.mxu0 %v17474_v63  ;;  %v17569_v63 = vld [vmem:[#allocation6 + $0x52c] ss:$16 sps:$4 sm:$0xff]  }
 0x7da   : > { %13825 = vmatpush1.bf16.msra.mxu1 %v17477_v54  ;;  %13662 = vmatprep.subr.bf16.mxu0 %v17482_v28  ;;  %v17564_v54 = vld [vmem:[#allocation6 + $0x520] ss:$16 sps:$4 sm:$0xff]   ;;  %v17567_v28 = vld [vmem:[#allocation6 + $0x528] ss:$16 sps:$4 sm:$0xff]  }
 0x7db   : > { %13826 = vmatprep.subr.bf16.mxu1 %v17485_v8  ;;  %v17572_v8 = vld [vmem:[#allocation6 + $0x544] ss:$16 sps:$4 sm:$0xff]  }
 0x7dd   : > { %13663 = vmatpush1.bf16.msra.mxu0 %v17480_v14  ;;  %v17575_v14 = vld [vmem:[#allocation6 + $0x54c] ss:$16 sps:$4 sm:$0xff]  }
 0x7de   : > { %13827 = vmatpush1.bf16.msra.mxu1 %v17483_v11  ;;  %13664 = vmatprep.subr.bf16.mxu0 %v17488_v18  ;;  %v17570_v11 = vld [vmem:[#allocation6 + $0x540] ss:$16 sps:$4 sm:$0xff]   ;;  %v17573_v18 = vld [vmem:[#allocation6 + $0x548] ss:$16 sps:$4 sm:$0xff]  }
 0x7df   : > { %13828 = vmatprep.subr.bf16.mxu1 %v17491_v12  ;;  %v17578_v12 = vld [vmem:[#allocation6 + $0x564] ss:$16 sps:$4 sm:$0xff]  }
 0x7e1   : > { %13665 = vmatpush1.bf16.msra.mxu0 %v17486_v55  ;;  %v17581_v55 = vld [vmem:[#allocation6 + $0x56c] ss:$16 sps:$4 sm:$0xff]  }
 0x7e2   : > { %13829 = vmatpush1.bf16.msra.mxu1 %v17489_v17  ;;  %13666 = vmatprep.subr.bf16.mxu0 %v17494_v47  ;;  %v17576_v17 = vld [vmem:[#allocation6 + $0x560] ss:$16 sps:$4 sm:$0xff]   ;;  %v17579_v47 = vld [vmem:[#allocation6 + $0x568] ss:$16 sps:$4 sm:$0xff]  }
 0x7e3   : > { %13830 = vmatprep.subr.bf16.mxu1 %v17497_v35  ;;  %v17584_v35 = vld [vmem:[#allocation6 + $0x584] ss:$16 sps:$4 sm:$0xff]  }
 0x7e5   : > { %13667 = vmatpush1.bf16.msra.mxu0 %v17492_v13  ;;  %v17587_v13 = vld [vmem:[#allocation6 + $0x58c] ss:$16 sps:$4 sm:$0xff]  }
 0x7e6   : > { %13831 = vmatpush1.bf16.msra.mxu1 %v17495_v15  ;;  %13668 = vmatprep.subr.bf16.mxu0 %v17500_v16  ;;  %v17582_v15 = vld [vmem:[#allocation6 + $0x580] ss:$16 sps:$4 sm:$0xff]   ;;  %v17585_v16 = vld [vmem:[#allocation6 + $0x588] ss:$16 sps:$4 sm:$0xff]  }
 0x7e7   : > { %13832 = vmatprep.subr.bf16.mxu1 %v17503_v38  ;;  %v17590_v38 = vld [vmem:[#allocation6 + $0x5a4] ss:$16 sps:$4 sm:$0xff]  }
 0x7e9   : > { %13669 = vmatpush1.bf16.msra.mxu0 %v17498_v20  ;;  %v17593_v20 = vld [vmem:[#allocation6 + $0x5ac] ss:$16 sps:$4 sm:$0xff]  }
 0x7ea   : > { %13833 = vmatpush1.bf16.msra.mxu1 %v17501_v30  ;;  %13670 = vmatprep.subr.bf16.mxu0 %v17506_v51  ;;  %v17591_v30 = vld [vmem:[#allocation6 + $0x5a8] ss:$16 sps:$4 sm:$0xff]   ;;  %v17596_v51 = vld [vmem:[#allocation6 + $0x5c4] ss:$16 sps:$4 sm:$0xff]  }
 0x7eb   : > { %13834 = vmatprep.subr.bf16.mxu1 %v17509_v22  ;;  %v17599_v22 = vld [vmem:[#allocation6 + $0x5cc] ss:$16 sps:$4 sm:$0xff]  }
 0x7ed   : > { %13671 = vmatpush1.bf16.msra.mxu0 %v17504_v23  ;;  %v17594_v23 = vld [vmem:[#allocation6 + $0x5c0] ss:$16 sps:$4 sm:$0xff]  }
 0x7ee   : > { %13835 = vmatpush1.bf16.msra.mxu1 %v17507_v58  ;;  %13681 = vmatprep.subr.bf16.mxu0 %v17512_v25  ;;  %v17602_v58 = vld [vmem:[#allocation6 + $0x5e4] ss:$16 sps:$4 sm:$0xff]   ;;  %v17605_v25 = vld [vmem:[#allocation6 + $0x5ec] ss:$16 sps:$4 sm:$0xff]  }
 0x7ef   : > { %13845 = vmatprep.subr.bf16.mxu1 %v17515_v33  ;;  %v17600_v33 = vld [vmem:[#allocation6 + $0x5e0] ss:$16 sps:$4 sm:$0xff]  }
 0x7f0   : > { %13673 = vmatmul.mubr.bf16.vlgmr.msra.gmra.mrb[8].mxu0 %v12035_v29 }
 0x7f1   : > { %13837 = vmatmul.mubr.bf16.vlgmr.msra.gmra.mrb[8].mxu1 %v12035_v29  ;;  %13682 = vmatpush1.bf16.msra.mxu0 %v17510_v27  ;;  %v17603_v27 = vld [vmem:[#allocation6 + $0x5e8] ss:$16 sps:$4 sm:$0xff]   ;;  %v17608_v29 = vld [vmem:[#allocation6 + $0x604] ss:$16 sps:$4 sm:$0xff]  }
 0x7f2   : > { %13846 = vmatpush1.bf16.msra.mxu1 %v17513_v46  ;;  %13683 = vmatprep.subr.bf16.mxu0 %v17518_v32  ;;  %v17611_v46 = vld [vmem:[#allocation6 + $0x60c] ss:$16 sps:$4 sm:$0xff]  }
 0x7f3   : > { %13847 = vmatprep.subr.bf16.mxu1 %v17521_v5 }
 0x7f5   : > { %13684 = vmatpush1.bf16.msra.mxu0 %v17516_v59 }
 0x7f6   : > { %13848 = vmatpush1.bf16.msra.mxu1 %v17519_v39  ;;  %13685 = vmatprep.subr.bf16.mxu0 %v17524_v3 }
 0x7f7   : > { %13849 = vmatprep.subr.bf16.mxu1 %v17527_v31 }
 0x7f9   : > { %13686 = vmatpush1.bf16.msra.mxu0 %v17522_v26 }
 0x7fa   : > { %13850 = vmatpush1.bf16.msra.mxu1 %v17525_v41  ;;  %13687 = vmatprep.subr.bf16.mxu0 %v17530_v43 }
 0x7fb   : > { %13851 = vmatprep.subr.bf16.mxu1 %v17533_v48 }
 0x7fd   : > { %13688 = vmatpush1.bf16.msra.mxu0 %v17528_v49 }
 0x7fe   : > { %13852 = vmatpush1.bf16.msra.mxu1 %v17531_v21  ;;  %13689 = vmatprep.subr.bf16.mxu0 %v17536_v50 }
 0x7ff   : > { %13853 = vmatprep.subr.bf16.mxu1 %v17539_v52 }
 0x801   : > { %13690 = vmatpush1.bf16.msra.mxu0 %v17534_v56 }
 0x802   : > { %13854 = vmatpush1.bf16.msra.mxu1 %v17537_v9  ;;  %13691 = vmatprep.subr.bf16.mxu0 %v17542_v24  ;;  %v17606_v9 = vld [vmem:[#allocation6 + $0x600] ss:$16 sps:$4 sm:$0xff]   ;;  %v17609_v24 = vld [vmem:[#allocation6 + $0x608] ss:$16 sps:$4 sm:$0xff]  }
 0x803   : > { %13855 = vmatprep.subr.bf16.mxu1 %v17545_v37 }
 0x805   : > { %13692 = vmatpush1.bf16.msra.mxu0 %v17540_v57  ;;  %v17614_v57 = vld [vmem:[#allocation6 + $0x624] ss:$16 sps:$4 sm:$0xff]  }
 0x806   : > { %13856 = vmatpush1.bf16.msra.mxu1 %v17543_v60  ;;  %13693 = vmatprep.subr.bf16.mxu0 %v17548_v61  ;;  %v17617_v60 = vld [vmem:[#allocation6 + $0x62c] ss:$16 sps:$4 sm:$0xff]  }
 0x807   : > { %13857 = vmatprep.subr.bf16.mxu1 %v17551_v10  ;;  %v17612_v10 = vld [vmem:[#allocation6 + $0x620] ss:$16 sps:$4 sm:$0xff]  }
 0x809   : > { %13694 = vmatpush1.bf16.msra.mxu0 %v17546_v4  ;;  %v17615_v4 = vld [vmem:[#allocation6 + $0x628] ss:$16 sps:$4 sm:$0xff]  }
 0x80a   : > { %13858 = vmatpush1.bf16.msra.mxu1 %v17549_v42  ;;  %13695 = vmatprep.subr.bf16.mxu0 %v17554_v62  ;;  %v17620_v42 = vld [vmem:[#allocation6 + $0x644] ss:$16 sps:$4 sm:$0xff]   ;;  %v17623_v62 = vld [vmem:[#allocation6 + $0x64c] ss:$16 sps:$4 sm:$0xff]  }
 0x80b   : > { %13859 = vmatprep.subr.bf16.mxu1 %v17557_v45  ;;  %v17618_v45 = vld [vmem:[#allocation6 + $0x640] ss:$16 sps:$4 sm:$0xff]  }
 0x80d   : > { %13696 = vmatpush1.bf16.msra.mxu0 %v17552_v0  ;;  %v17621_v0 = vld [vmem:[#allocation6 + $0x648] ss:$16 sps:$4 sm:$0xff]  }
 0x80e   : > { %13860 = vmatpush1.bf16.msra.mxu1 %v17555_v2  ;;  %13697 = vmatprep.subr.bf16.mxu0 %v17560_v53  ;;  %v17626_v2 = vld [vmem:[#allocation6 + $0x664] ss:$16 sps:$4 sm:$0xff]   ;;  %v17629_v53 = vld [vmem:[#allocation6 + $0x66c] ss:$16 sps:$4 sm:$0xff]  }
 0x80f   : > { %13861 = vmatprep.subr.bf16.mxu1 %v17563_v19  ;;  %v17624_v19 = vld [vmem:[#allocation6 + $0x660] ss:$16 sps:$4 sm:$0xff]  }
 0x811   : > { %13698 = vmatpush1.bf16.msra.mxu0 %v17558_v6  ;;  %v17627_v6 = vld [vmem:[#allocation6 + $0x668] ss:$16 sps:$4 sm:$0xff]  }
 0x812   : > { %13862 = vmatpush1.bf16.msra.mxu1 %v17561_v1  ;;  %13699 = vmatprep.subr.bf16.mxu0 %v17566_v36  ;;  %v17632_v1 = vld [vmem:[#allocation6 + $0x684] ss:$16 sps:$4 sm:$0xff]   ;;  %v17635_v36 = vld [vmem:[#allocation6 + $0x68c] ss:$16 sps:$4 sm:$0xff]  }
 0x813   : > { %13863 = vmatprep.subr.bf16.mxu1 %v17569_v63  ;;  %v17630_v63 = vld [vmem:[#allocation6 + $0x680] ss:$16 sps:$4 sm:$0xff]  }
 0x815   : > { %13700 = vmatpush1.bf16.msra.mxu0 %v17564_v54  ;;  %v17633_v54 = vld [vmem:[#allocation6 + $0x688] ss:$16 sps:$4 sm:$0xff]  }
 0x816   : > { %13864 = vmatpush1.bf16.msra.mxu1 %v17567_v28  ;;  %13701 = vmatprep.subr.bf16.mxu0 %v17572_v8  ;;  %v17638_v28 = vld [vmem:[#allocation6 + $0x6a4] ss:$16 sps:$4 sm:$0xff]   ;;  %v17641_v8 = vld [vmem:[#allocation6 + $0x6ac] ss:$16 sps:$4 sm:$0xff]  }
 0x817   : > { %13865 = vmatprep.subr.bf16.mxu1 %v17575_v14  ;;  %v17636_v14 = vld [vmem:[#allocation6 + $0x6a0] ss:$16 sps:$4 sm:$0xff]  }
 0x819   : > { %13702 = vmatpush1.bf16.msra.mxu0 %v17570_v11  ;;  %v17639_v11 = vld [vmem:[#allocation6 + $0x6a8] ss:$16 sps:$4 sm:$0xff]  }
 0x81a   : > { %13866 = vmatpush1.bf16.msra.mxu1 %v17573_v18  ;;  %13703 = vmatprep.subr.bf16.mxu0 %v17578_v12  ;;  %v17644_v18 = vld [vmem:[#allocation6 + $0x6c4] ss:$16 sps:$4 sm:$0xff]   ;;  %v17647_v12 = vld [vmem:[#allocation6 + $0x6cc] ss:$16 sps:$4 sm:$0xff]  }
 0x81b   : > { %13867 = vmatprep.subr.bf16.mxu1 %v17581_v55  ;;  %v17642_v55 = vld [vmem:[#allocation6 + $0x6c0] ss:$16 sps:$4 sm:$0xff]  }
 0x81d   : > { %13704 = vmatpush1.bf16.msra.mxu0 %v17576_v17  ;;  %v17645_v17 = vld [vmem:[#allocation6 + $0x6c8] ss:$16 sps:$4 sm:$0xff]  }
 0x81e   : > { %13868 = vmatpush1.bf16.msra.mxu1 %v17579_v47  ;;  %13705 = vmatprep.subr.bf16.mxu0 %v17584_v35  ;;  %v17650_v47 = vld [vmem:[#allocation6 + $0x6e4] ss:$16 sps:$4 sm:$0xff]   ;;  %v17653_v35 = vld [vmem:[#allocation6 + $0x6ec] ss:$16 sps:$4 sm:$0xff]  }
 0x81f   : > { %13869 = vmatprep.subr.bf16.mxu1 %v17587_v13  ;;  %v17648_v13 = vld [vmem:[#allocation6 + $0x6e0] ss:$16 sps:$4 sm:$0xff]  }
 0x821   : > { %13706 = vmatpush1.bf16.msra.mxu0 %v17582_v15  ;;  %v17651_v15 = vld [vmem:[#allocation6 + $0x6e8] ss:$16 sps:$4 sm:$0xff]  }
 0x822   : > { %13870 = vmatpush1.bf16.msra.mxu1 %v17585_v16  ;;  %13707 = vmatprep.subr.bf16.mxu0 %v17590_v38  ;;  %v17656_v16 = vld [vmem:[#allocation6 + $0x704] ss:$16 sps:$4 sm:$0xff]   ;;  %v17659_v38 = vld [vmem:[#allocation6 + $0x70c] ss:$16 sps:$4 sm:$0xff]  }
 0x823   : > { %13871 = vmatprep.subr.bf16.mxu1 %v17593_v20  ;;  %v17654_v20 = vld [vmem:[#allocation6 + $0x700] ss:$16 sps:$4 sm:$0xff]  }
 0x825   : > { %13708 = vmatpush1.bf16.msra.mxu0 %v17588_v40  ;;  %v17657_v40 = vld [vmem:[#allocation6 + $0x708] ss:$16 sps:$4 sm:$0xff]  }
 0x826   : > { %13872 = vmatpush1.bf16.msra.mxu1 %v17591_v30  ;;  %13709 = vmatprep.subr.bf16.mxu0 %v17596_v51  ;;  %v17662_v30 = vld [vmem:[#allocation6 + $0x724] ss:$16 sps:$4 sm:$0xff]   ;;  %v17665_v51 = vld [vmem:[#allocation6 + $0x72c] ss:$16 sps:$4 sm:$0xff]  }
 0x827   : > { %13873 = vmatprep.subr.bf16.mxu1 %v17599_v22  ;;  %v17660_v22 = vld [vmem:[#allocation6 + $0x720] ss:$16 sps:$4 sm:$0xff]  }
 0x829   : > { %13710 = vmatpush1.bf16.msra.mxu0 %v17594_v23  ;;  %v17663_v23 = vld [vmem:[#allocation6 + $0x728] ss:$16 sps:$4 sm:$0xff]  }
 0x82a   : > { %13874 = vmatpush1.bf16.msra.mxu1 %v17597_v7  ;;  %13711 = vmatprep.subr.bf16.mxu0 %v17602_v58  ;;  %v17668_v7 = vld [vmem:[#allocation6 + $0x744] ss:$16 sps:$4 sm:$0xff]   ;;  %v17671_v58 = vld [vmem:[#allocation6 + $0x74c] ss:$16 sps:$4 sm:$0xff]  }
 0x82b   : > { %13875 = vmatprep.subr.bf16.mxu1 %v17605_v25  ;;  %v17666_v25 = vld [vmem:[#allocation6 + $0x740] ss:$16 sps:$4 sm:$0xff]  }
 0x82d   : > { %13712 = vmatpush1.bf16.msra.mxu0 %v17600_v33  ;;  %v17669_v33 = vld [vmem:[#allocation6 + $0x748] ss:$16 sps:$4 sm:$0xff]  }
 0x82e   : > { %13876 = vmatpush1.bf16.msra.mxu1 %v17603_v27  ;;  %13722 = vmatprep.subr.bf16.mxu0 %v17608_v29  ;;  %v17674_v27 = vld [vmem:[#allocation6 + $0x764] ss:$16 sps:$4 sm:$0xff]   ;;  %v17677_v29 = vld [vmem:[#allocation6 + $0x76c] ss:$16 sps:$4 sm:$0xff]  }
 0x82f   : > { %13886 = vmatprep.subr.bf16.mxu1 %v17611_v46  ;;  %v17672_v46 = vld [vmem:[#allocation6 + $0x760] ss:$16 sps:$4 sm:$0xff]  }
 0x843   : > { %v11518_v32 = vpop.f32.mrb[4].mxu0  ;;  %v19018_v59 = vpop.f32.mrb[4].mxu1 }
 0x844   : > { %v12021_v5 = vmul.f32 0.2, %v11518_v32  ;;  %v11520_v39 = vpop.f32.mrb[5].mxu0  ;;  %v12012_v31 = vpop.f32.mrb[5].mxu1 }
 0x845   : > { %v12022_v3 = vmul.f32 0.2, %v11520_v39  ;;  %v11522_v26 = vpop.f32.mrb[6].mxu0  ;;  %v12024_v43 = vmul.f32 0.2, %v12012_v31  ;;  %v12014_v48 = vpop.f32.mrb[6].mxu1 }
 0x846   : > { %v12029_v41 = vmax.f32 %v11518_v32, %v12021_v5  ;;  %v11523_v49 = vpop.f32.mrb[7].mxu0  ;;  %v12015_v50 = vpop.f32.mrb[7].mxu1  ;;  %v17675_v32 = vld [vmem:[#allocation6 + $0x768] ss:$16 sps:$4 sm:$0xff]   ;;  %v17680_v5 = vld [vmem:[#allocation6 + $0x784] ss:$16 sps:$4 sm:$0xff]  }
 0x847   : > { %v12030_v21 = vmax.f32 %v11520_v39, %v12022_v3  ;;  %v12032_v52 = vmax.f32 %v12012_v31, %v12024_v43  ;;  %v17683_v39 = vld [vmem:[#allocation6 + $0x78c] ss:$16 sps:$4 sm:$0xff]   ;;  %v17678_v3 = vld [vmem:[#allocation6 + $0x780] ss:$16 sps:$4 sm:$0xff]   ;;  %v17681_v31 = vld [vmem:[#allocation6 + $0x788] ss:$16 sps:$4 sm:$0xff]  }
 0x848   : > { %v12037_v37 = vpack.c.bf16 %v12029_v41, %v12029_v41  ;;  %v17686_v26 = vld [vmem:[#allocation6 + $0x7a4] ss:$16 sps:$4 sm:$0xff]   ;;  %v17689_v41 = vld [vmem:[#allocation6 + $0x7ac] ss:$16 sps:$4 sm:$0xff]   ;;  %v17684_v43 = vld [vmem:[#allocation6 + $0x7a0] ss:$16 sps:$4 sm:$0xff]  }
 0x849   : > { %v12038_v56 = vpack.c.bf16 %v12030_v21, %v12030_v21  ;;  %v12040_v61 = vpack.c.bf16 %v12032_v52, %v12032_v52  ;;  %v17687_v48 = vld [vmem:[#allocation6 + $0x7a8] ss:$16 sps:$4 sm:$0xff]   ;;  %v17692_v49 = vld [vmem:[#allocation6 + $0x7c4] ss:$16 sps:$4 sm:$0xff]   ;;  %v17695_v21 = vld [vmem:[#allocation6 + $0x7cc] ss:$16 sps:$4 sm:$0xff]  }
 0x84a   : > { %v17690_v50 = vld [vmem:[#allocation6 + $0x7c0] ss:$16 sps:$4 sm:$0xff]   ;;  %v17693_v52 = vld [vmem:[#allocation6 + $0x7c8] ss:$16 sps:$4 sm:$0xff]  }
 0x84b   : > { %13713 = vmatprep.mubr.bf16.mxu0 %v12038_v56  ;;  %13877 = vmatprep.mubr.bf16.mxu1 %v12038_v56  ;;  %v12023_v56 = vmul.f32 0.2, %v19018_v59 }
 0x84c   : > { %13714 = vmatmul.mubr.bf16.vlgmr.msra.gmra.mrb[8].mxu0 %v12037_v37  ;;  %13878 = vmatmul.mubr.bf16.vlgmr.msra.gmra.mrb[8].mxu1 %v12037_v37  ;;  %v17696_v37 = vld [vmem:[#allocation6 + $0x7e0] ss:$16 sps:$4 sm:$0xff]  }
 0x84d   : > { %13723 = vmatpush1.bf16.msra.mxu0 %v17606_v9  ;;  %13887 = vmatpush1.bf16.msra.mxu1 %v17609_v24  ;;  %v17698_v9 = vld [vmem:[#allocation6 + $0x7e4] ss:$16 sps:$4 sm:$0xff]   ;;  %v17701_v24 = vld [vmem:[#allocation6 + $0x7ec] ss:$16 sps:$4 sm:$0xff]  }
 0x84e   : > { %13754 = vmatprep.mubr.bf16.mxu0 %v12040_v61  ;;  %13918 = vmatprep.mubr.bf16.mxu1 %v12040_v61  ;;  %v17704_v61 = vld [vmem:[#allocation9 + $0x4] ss:$8 sps:$4 sm:$0xff]  }
 0x84f   : > { %13724 = vmatprep.subr.bf16.mxu0 %v17614_v57  ;;  %13888 = vmatprep.subr.bf16.mxu1 %v17617_v60  ;;  %v17699_v57 = vld [vmem:[#allocation6 + $0x7e8] ss:$16 sps:$4 sm:$0xff]   ;;  %v12031_v60 = vmax.f32 %v19018_v59, %v12023_v56  ;;  %v17711_v59 = vld [vmem:[#allocation9 + $0x30] ss:$8 sps:$4 sm:$0xff]  }
 0x851   : > { %13725 = vmatpush1.bf16.msra.mxu0 %v17612_v10  ;;  %13889 = vmatpush1.bf16.msra.mxu1 %v17615_v4  ;;  %v17702_v10 = vld [vmem:[#allocation9] ss:$8 sps:$4 sm:$0xff]   ;;  %v12039_v4 = vpack.c.bf16 %v12031_v60, %v12031_v60 }
 0x852   : > { %13726 = vmatprep.subr.bf16.mxu0 %v17620_v42  ;;  %13890 = vmatprep.subr.bf16.mxu1 %v17623_v62  ;;  %v17707_v42 = vld [vmem:[#allocation9 + $0x14] ss:$8 sps:$4 sm:$0xff]   ;;  %v17705_v62 = vld [vmem:[#allocation9 + $0x10] ss:$8 sps:$4 sm:$0xff]  }
 0x855   : > { %13727 = vmatpush1.bf16.msra.mxu0 %v17618_v45  ;;  %13891 = vmatpush1.bf16.msra.mxu1 %v17621_v0  ;;  %v17710_v45 = vld [vmem:[#allocation9 + $0x24] ss:$8 sps:$4 sm:$0xff]   ;;  %v17708_v0 = vld [vmem:[#allocation9 + $0x20] ss:$8 sps:$4 sm:$0xff]  }
 0x856   : > { %13728 = vmatprep.subr.bf16.mxu0 %v17626_v2  ;;  %13892 = vmatprep.subr.bf16.mxu1 %v17629_v53  ;;  %v17713_v2 = vld [vmem:[#allocation9 + $0x34] ss:$8 sps:$4 sm:$0xff]   ;;  %v17716_v53 = vld [vmem:[#allocation9 + $0x44] ss:$8 sps:$4 sm:$0xff]  }
 0x859   : > { %13729 = vmatpush1.bf16.msra.mxu0 %v17624_v19  ;;  %13893 = vmatpush1.bf16.msra.mxu1 %v17627_v6  ;;  %v17714_v19 = vld [vmem:[#allocation9 + $0x40] ss:$8 sps:$4 sm:$0xff]   ;;  %v17719_v6 = vld [vmem:[#allocation9 + $0x54] ss:$8 sps:$4 sm:$0xff]  }
 0x85a   : > { %13730 = vmatprep.subr.bf16.mxu0 %v17632_v1  ;;  %13894 = vmatprep.subr.bf16.mxu1 %v17635_v36  ;;  %v17717_v1 = vld [vmem:[#allocation9 + $0x50] ss:$8 sps:$4 sm:$0xff]   ;;  %v17722_v36 = vld [vmem:[#allocation9 + $0x64] ss:$8 sps:$4 sm:$0xff]  }
 0x85d   : > { %13731 = vmatpush1.bf16.msra.mxu0 %v17630_v63  ;;  %13895 = vmatpush1.bf16.msra.mxu1 %v17633_v54  ;;  %v17720_v63 = vld [vmem:[#allocation9 + $0x60] ss:$8 sps:$4 sm:$0xff]   ;;  %v17725_v54 = vld [vmem:[#allocation9 + $0x74] ss:$8 sps:$4 sm:$0xff]  }
 0x85e   : > { %13732 = vmatprep.subr.bf16.mxu0 %v17638_v28  ;;  %13896 = vmatprep.subr.bf16.mxu1 %v17641_v8  ;;  %v17723_v28 = vld [vmem:[#allocation9 + $0x70] ss:$8 sps:$4 sm:$0xff]   ;;  %v17728_v8 = vld [vmem:[#allocation9 + $0x84] ss:$8 sps:$4 sm:$0xff]  }
 0x861   : > { %13733 = vmatpush1.bf16.msra.mxu0 %v17636_v14  ;;  %13897 = vmatpush1.bf16.msra.mxu1 %v17639_v11  ;;  %v17726_v14 = vld [vmem:[#allocation9 + $0x80] ss:$8 sps:$4 sm:$0xff]   ;;  %v17731_v11 = vld [vmem:[#allocation9 + $0x94] ss:$8 sps:$4 sm:$0xff]  }
 0x862   : > { %13734 = vmatprep.subr.bf16.mxu0 %v17644_v18  ;;  %13898 = vmatprep.subr.bf16.mxu1 %v17647_v12  ;;  %v17729_v18 = vld [vmem:[#allocation9 + $0x90] ss:$8 sps:$4 sm:$0xff]   ;;  %v17734_v12 = vld [vmem:[#allocation9 + $0xa4] ss:$8 sps:$4 sm:$0xff]  }
 0x865   : > { %13735 = vmatpush1.bf16.msra.mxu0 %v17642_v55  ;;  %13899 = vmatpush1.bf16.msra.mxu1 %v17645_v17  ;;  %v17732_v55 = vld [vmem:[#allocation9 + $0xa0] ss:$8 sps:$4 sm:$0xff]   ;;  %v17737_v17 = vld [vmem:[#allocation9 + $0xb4] ss:$8 sps:$4 sm:$0xff]  }
 0x866   : > { %13736 = vmatprep.subr.bf16.mxu0 %v17650_v47  ;;  %13900 = vmatprep.subr.bf16.mxu1 %v17653_v35  ;;  %v17735_v47 = vld [vmem:[#allocation9 + $0xb0] ss:$8 sps:$4 sm:$0xff]   ;;  %v17740_v35 = vld [vmem:[#allocation9 + $0xc4] ss:$8 sps:$4 sm:$0xff]  }
 0x869   : > { %13737 = vmatpush1.bf16.msra.mxu0 %v17648_v13  ;;  %13901 = vmatpush1.bf16.msra.mxu1 %v17651_v15  ;;  %v17738_v13 = vld [vmem:[#allocation9 + $0xc0] ss:$8 sps:$4 sm:$0xff]   ;;  %v17743_v15 = vld [vmem:[#allocation9 + $0xd4] ss:$8 sps:$4 sm:$0xff]  }
 0x86a   : > { %13738 = vmatprep.subr.bf16.mxu0 %v17656_v16  ;;  %13902 = vmatprep.subr.bf16.mxu1 %v17659_v38  ;;  %v17741_v16 = vld [vmem:[#allocation9 + $0xd0] ss:$8 sps:$4 sm:$0xff]   ;;  %v17746_v38 = vld [vmem:[#allocation9 + $0xe4] ss:$8 sps:$4 sm:$0xff]  }
 0x86d   : > { %13739 = vmatpush1.bf16.msra.mxu0 %v17654_v20  ;;  %13903 = vmatpush1.bf16.msra.mxu1 %v17657_v40  ;;  %v17744_v20 = vld [vmem:[#allocation9 + $0xe0] ss:$8 sps:$4 sm:$0xff]   ;;  %v17749_v40 = vld [vmem:[#allocation9 + $0xf4] ss:$8 sps:$4 sm:$0xff]  }
 0x86e   : > { %13740 = vmatprep.subr.bf16.mxu0 %v17662_v30  ;;  %13904 = vmatprep.subr.bf16.mxu1 %v17665_v51  ;;  %v17747_v30 = vld [vmem:[#allocation9 + $0xf0] ss:$8 sps:$4 sm:$0xff]   ;;  %v17752_v51 = vld [vmem:[#allocation9 + $0x104] ss:$8 sps:$4 sm:$0xff]  }
 0x871   : > { %13741 = vmatpush1.bf16.msra.mxu0 %v17660_v22  ;;  %13905 = vmatpush1.bf16.msra.mxu1 %v17663_v23  ;;  %v17798_v22 = vld [vmem:[#allocation12 + $0x40] sm:$0xff]  }
 0x872   : > { %13742 = vmatprep.subr.bf16.mxu0 %v17668_v7  ;;  %13906 = vmatprep.subr.bf16.mxu1 %v17671_v58  ;;  %v17799_v23 = vld [vmem:[#allocation12] sm:$0xff]   ;;  %v17800_v7 = vld [vmem:[#allocation12 + $0x48] sm:$0xff]  }
 0x873   : > { %v17801_v58 = vld [vmem:[#allocation12 + $0x8] sm:$0xff]  }
 0x875   : > { %13743 = vmatpush1.bf16.msra.mxu0 %v17666_v25  ;;  %13907 = vmatpush1.bf16.msra.mxu1 %v17669_v33  ;;  %v17802_v25 = vld [vmem:[#allocation12 + $0x50] sm:$0xff]  }
 0x876   : > { %13744 = vmatprep.subr.bf16.mxu0 %v17674_v27  ;;  %13908 = vmatprep.subr.bf16.mxu1 %v17677_v29  ;;  %v17803_v33 = vld [vmem:[#allocation12 + $0x10] sm:$0xff]   ;;  %v17804_v27 = vld [vmem:[#allocation12 + $0x58] sm:$0xff]  }
 0x877   : > { %v17805_v29 = vld [vmem:[#allocation12 + $0x18] sm:$0xff]  }
 0x879   : > { %13745 = vmatpush1.bf16.msra.mxu0 %v17672_v46  ;;  %13909 = vmatpush1.bf16.msra.mxu1 %v17675_v32  ;;  %v17806_v46 = vld [vmem:[#allocation12 + $0x60] sm:$0xff]  }
 0x87a   : > { %13746 = vmatprep.subr.bf16.mxu0 %v17680_v5  ;;  %13910 = vmatprep.subr.bf16.mxu1 %v17683_v39  ;;  %v17807_v32 = vld [vmem:[#allocation12 + $0x20] sm:$0xff]   ;;  %v17808_v5 = vld [vmem:[#allocation12 + $0x68] sm:$0xff]   ;;  %v13581_v39 = vsub.s32 0, %v18758_v44 }
 0x87d   : > { %13747 = vmatpush1.bf16.msra.mxu0 %v17678_v3  ;;  %13911 = vmatpush1.bf16.msra.mxu1 %v17681_v31  ;;  %v19023_v3 = vld [vmem:[#allocation7] sm:$0xf]  ;;  %v13585_v31 = vsub.s32 1, %v18758_v44 }
 0x87e   : > { %13748 = vmatprep.subr.bf16.mxu0 %v17686_v26  ;;  %13912 = vmatprep.subr.bf16.mxu1 %v17689_v41  ;;  %v13593_v26 = vsub.s32 3, %v18758_v44  ;;  %v13582_v41 = vrot.slane %v19023_v3, %v13581_v39 }
 0x881   : > { %13749 = vmatpush1.bf16.msra.mxu0 %v17684_v43  ;;  %13913 = vmatpush1.bf16.msra.mxu1 %v17687_v48  ;;  %v13586_v43 = vrot.slane %v19023_v3, %v13585_v31  ;;  %v13594_v48 = vrot.slane %v19023_v3, %v13593_v26 }
 0x882   : > { %13750 = vmatprep.subr.bf16.mxu0 %v17692_v49  ;;  %13914 = vmatprep.subr.bf16.mxu1 %v17695_v21 }
 0x885   : > { %13751 = vmatpush1.bf16.msra.mxu0 %v17690_v50  ;;  %13915 = vmatpush1.bf16.msra.mxu1 %v17693_v52 }
 0x886   : > { %13752 = vmatprep.subr.bf16.mxu0 %v17698_v9  ;;  %13916 = vmatprep.subr.bf16.mxu1 %v17701_v24 }
 0x889   : > { %13753 = vmatpush1.bf16.msra.mxu0 %v17696_v37  ;;  %13917 = vmatpush1.bf16.msra.mxu1 %v17699_v57 }
 0x88a   : > { %14335 = vmatprep.subr.bf16.mxu0 %v17704_v61  ;;  %16874 = vmatprep.subr.bf16.mxu1 %v17798_v22  ;;  %v17788_v22 = vld [vmem:[#allocation9 + $0x1c4] ss:$8 sps:$4 sm:$0xff]  }
 0x88c   : > { %13755 = vmatmul.mubr.bf16.vlgmr.msra.gmra.mrb[8].mxu0 %v12039_v4  ;;  %13919 = vmatmul.mubr.bf16.vlgmr.msra.gmra.mrb[8].mxu1 %v12039_v4 }
 0x88d   : > { %14336 = vmatpush1.bf16.msra.mxu0 %v17702_v10  ;;  %16875 = vmatpush3.bf16.msra.mxu1 %v17799_v23  ;;  %v17786_v23 = vld [vmem:[#allocation9 + $0x1c0] ss:$8 sps:$4 sm:$0xff]  }
 0x88e   : > { %14337 = vmatprep.subr.bf16.mxu0 %v17707_v42  ;;  %16876 = vmatprep.subr.bf16.mxu1 %v17800_v7 }
 0x891   : > { %14338 = vmatpush1.bf16.msra.mxu0 %v17705_v62  ;;  %16877 = vmatpush3.bf16.msra.mxu1 %v17801_v58  ;;  %v17791_v58 = vld [vmem:[#allocation9 + $0x1d4] ss:$8 sps:$4 sm:$0xff]  }
 0x892   : > { %14339 = vmatprep.subr.bf16.mxu0 %v17710_v45  ;;  %16878 = vmatprep.subr.bf16.mxu1 %v17802_v25  ;;  %v17789_v25 = vld [vmem:[#allocation9 + $0x1d0] ss:$8 sps:$4 sm:$0xff]  }
 0x895   : > { %14340 = vmatpush1.bf16.msra.mxu0 %v17708_v0  ;;  %16879 = vmatpush3.bf16.msra.mxu1 %v17803_v33 }
 0x896   : > { %14341 = vmatprep.subr.bf16.mxu0 %v17713_v2  ;;  %16880 = vmatprep.subr.bf16.mxu1 %v17804_v27  ;;  %v17794_v27 = vld [vmem:[#allocation9 + $0x1e4] ss:$8 sps:$4 sm:$0xff]  }
 0x899   : > { %14342 = vmatpush1.bf16.msra.mxu0 %v17711_v59  ;;  %16881 = vmatpush3.bf16.msra.mxu1 %v17805_v29  ;;  %v17750_v59 = vld [vmem:[#allocation9 + $0x100] ss:$8 sps:$4 sm:$0xff]  }
 0x89a   : > { %14343 = vmatprep.subr.bf16.mxu0 %v17716_v53  ;;  %16882 = vmatprep.subr.bf16.mxu1 %v17806_v46  ;;  %v17792_v29 = vld [vmem:[#allocation9 + $0x1e0] ss:$8 sps:$4 sm:$0xff]  }
 0x89d   : > { %14344 = vmatpush1.bf16.msra.mxu0 %v17714_v19  ;;  %16883 = vmatpush3.bf16.msra.mxu1 %v17807_v32  ;;  %v17755_v19 = vld [vmem:[#allocation9 + $0x114] ss:$8 sps:$4 sm:$0xff]  }
 0x89e   : > { %14345 = vmatprep.subr.bf16.mxu0 %v17719_v6  ;;  %16884 = vmatprep.subr.bf16.mxu1 %v17808_v5  ;;  %v17797_v32 = vld [vmem:[#allocation9 + $0x1f4] ss:$8 sps:$4 sm:$0xff]   ;;  %v17795_v5 = vld [vmem:[#allocation9 + $0x1f0] ss:$8 sps:$4 sm:$0xff]  }
 0x8a1   : > { %14346 = vmatpush1.bf16.msra.mxu0 %v17717_v1  ;;  %v17753_v1 = vld [vmem:[#allocation9 + $0x110] ss:$8 sps:$4 sm:$0xff]  }
 0x8a2   : > { %14347 = vmatprep.subr.bf16.mxu0 %v17722_v36  ;;  %v17758_v36 = vld [vmem:[#allocation9 + $0x124] ss:$8 sps:$4 sm:$0xff]  }
 0x8a5   : > { %14348 = vmatpush1.bf16.msra.mxu0 %v17720_v63  ;;  %v17756_v63 = vld [vmem:[#allocation9 + $0x120] ss:$8 sps:$4 sm:$0xff]  }
 0x8a6   : > { %14349 = vmatprep.subr.bf16.mxu0 %v17725_v54  ;;  %v17761_v54 = vld [vmem:[#allocation9 + $0x134] ss:$8 sps:$4 sm:$0xff]  }
 0x8a9   : > { %14350 = vmatpush1.bf16.msra.mxu0 %v17723_v28  ;;  %v17759_v28 = vld [vmem:[#allocation9 + $0x130] ss:$8 sps:$4 sm:$0xff]  }
 0x8aa   : > { %14351 = vmatprep.subr.bf16.mxu0 %v17728_v8  ;;  %v17764_v8 = vld [vmem:[#allocation9 + $0x144] ss:$8 sps:$4 sm:$0xff]  }
 0x8ad   : > { %14352 = vmatpush1.bf16.msra.mxu0 %v17726_v14  ;;  %v17762_v14 = vld [vmem:[#allocation9 + $0x140] ss:$8 sps:$4 sm:$0xff]  }
 0x8ae   : > { %14353 = vmatprep.subr.bf16.mxu0 %v17731_v11  ;;  %v17767_v11 = vld [vmem:[#allocation9 + $0x154] ss:$8 sps:$4 sm:$0xff]  }
 0x8b1   : > { %14354 = vmatpush1.bf16.msra.mxu0 %v17729_v18  ;;  %v17765_v18 = vld [vmem:[#allocation9 + $0x150] ss:$8 sps:$4 sm:$0xff]  }
 0x8b2   : > { %14355 = vmatprep.subr.bf16.mxu0 %v17734_v12  ;;  %v17770_v12 = vld [vmem:[#allocation9 + $0x164] ss:$8 sps:$4 sm:$0xff]  }
 0x8b5   : > { %14356 = vmatpush1.bf16.msra.mxu0 %v17732_v55  ;;  %v17768_v55 = vld [vmem:[#allocation9 + $0x160] ss:$8 sps:$4 sm:$0xff]  }
 0x8b6   : > { %14357 = vmatprep.subr.bf16.mxu0 %v17737_v17  ;;  %v17773_v17 = vld [vmem:[#allocation9 + $0x174] ss:$8 sps:$4 sm:$0xff]  }
 0x8b9   : > { %14358 = vmatpush1.bf16.msra.mxu0 %v17735_v47  ;;  %v17771_v47 = vld [vmem:[#allocation9 + $0x170] ss:$8 sps:$4 sm:$0xff]  }
 0x8ba   : > { %14359 = vmatprep.subr.bf16.mxu0 %v17740_v35  ;;  %v17776_v35 = vld [vmem:[#allocation9 + $0x184] ss:$8 sps:$4 sm:$0xff]  }
 0x8bd   : > { %14360 = vmatpush1.bf16.msra.mxu0 %v17738_v13  ;;  %v17774_v13 = vld [vmem:[#allocation9 + $0x180] ss:$8 sps:$4 sm:$0xff]  }
 0x8be   : > { %14361 = vmatprep.subr.bf16.mxu0 %v17743_v15  ;;  %v17779_v15 = vld [vmem:[#allocation9 + $0x194] ss:$8 sps:$4 sm:$0xff]  }
 0x8c1   : > { %14362 = vmatpush1.bf16.msra.mxu0 %v17741_v16  ;;  %v17777_v16 = vld [vmem:[#allocation9 + $0x190] ss:$8 sps:$4 sm:$0xff]  }
 0x8c2   : > { %14363 = vmatprep.subr.bf16.mxu0 %v17746_v38  ;;  %v17782_v38 = vld [vmem:[#allocation9 + $0x1a4] ss:$8 sps:$4 sm:$0xff]  }
 0x8c5   : > { %14364 = vmatpush1.bf16.msra.mxu0 %v17744_v20  ;;  %v17780_v20 = vld [vmem:[#allocation9 + $0x1a0] ss:$8 sps:$4 sm:$0xff]  }
 0x8c6   : > { %14365 = vmatprep.subr.bf16.mxu0 %v17749_v40  ;;  %v17785_v40 = vld [vmem:[#allocation9 + $0x1b4] ss:$8 sps:$4 sm:$0xff]  }
 0x8c9   : > { %14366 = vmatpush1.bf16.msra.mxu0 %v17747_v30  ;;  %v17783_v30 = vld [vmem:[#allocation9 + $0x1b0] ss:$8 sps:$4 sm:$0xff]  }
 0x8ca   : > { %14376 = vmatprep.subr.bf16.mxu0 %v17752_v51  ;;  %v13589_v51 = vsub.s32 2, %v18758_v44  ;;  %v17816_v44 = vld [vmem:[#allocation16 + $0x10] sm:$0xff]  }
 0x8cc   : > { %v13590_v7 = vrot.slane %v19023_v3, %v13589_v51  ;;  %v17809_v3 = vld [vmem:[#allocation12 + $0x28] sm:$0xff]  }
 0x8cd   : > { %16885 = vmatpush3.bf16.msra.mxu1 %v17809_v3 }
 0x95f   : > { %v13756_v49 = vpop.f32.mrb[8].mxu0  ;;  %v19034_v21 = vpop.f32.mrb[8].mxu1 }
 0x960   : > { %v16933_v50 = vadd.f32 %v13756_v49, %v13582_v41  ;;  %v13758_v52 = vpop.f32.mrb[9].mxu0  ;;  %v13922_v56 = vpop.f32.mrb[9].mxu1  ;;  %v16935_v33 = vadd.f32 %v19034_v21, %v13590_v7  ;;  %v17812_v49 = vld [vmem:[#allocation12 + $0x78] sm:$0xff]  }
 0x961   : > { %v16934_v9 = vadd.f32 %v13758_v52, %v13586_v43  ;;  %v16936_v24 = vadd.f32 %v13922_v56, %v13594_v48  ;;  %v13760_v37 = vpop.f32.mrb[10].mxu0  ;;  %v13924_v57 = vpop.f32.mrb[10].mxu1  ;;  %v17810_v43 = vld [vmem:[#allocation12 + $0x70] sm:$0xff]   ;;  %v17813_v21 = vld [vmem:[#allocation12 + $0x38] sm:$0xff]  }
 0x962   : > { %v13927_v60 = vmul.f32 0.2, %v16933_v50  ;;  %v13761_v61 = vpop.f32.mrb[11].mxu0  ;;  %v13925_v10 = vpop.f32.mrb[11].mxu1  ;;  %v13929_v46 = vmul.f32 0.2, %v16935_v33  ;;  %16886 = vmatprep.subr.bf16.mxu1 %v17810_v43 }
 0x963   : > { %v13928_v4 = vmul.f32 0.2, %v16934_v9  ;;  %v13930_v42 = vmul.f32 0.2, %v16936_v24  ;;  %v17811_v48 = vld [vmem:[#allocation12 + $0x30] sm:$0xff]  }
 0x964   : > { %v13931_v62 = vmax.f32 %v16933_v50, %v13927_v60  ;;  %v13933_v26 = vmax.f32 %v16935_v33, %v13929_v46  ;;  %16887 = vmatpush3.bf16.msra.mxu1 %v17811_v48  ;;  %v18274_v50 = vmov 0.0   ;;  %v14003_v52 = vld [vmem:[#allocation10] sm:$0x3]  ;;  %v14754_v33 = vld [vmem:[#allocation19] sm:$0x1] }
 0x965   : > { %v13932_v45 = vmax.f32 %v16934_v9, %v13928_v4  ;;  %v13934_v0 = vmax.f32 %v16936_v24, %v13930_v42  ;;  %16888 = vmatprep.subr.bf16.mxu1 %v17812_v49  ;;  %v14328_v56 = vrot.slane %v14003_v52, %v13581_v39  ;;  %v14332_v9 = vrot.slane %v14003_v52, %v13585_v31  ;;  %v17815_v39 = vld [vmem:[#allocation16 + $0x8] sm:$0xff]   ;;  %v17817_v31 = vld [vmem:[#allocation16 + $0x18] sm:$0xff]   ;;  %v14769_v43 = vld [vmem:[#allocation21] sm:$0x1] }
 0x966   : > { %v13935_v53 = vpack.c.bf16 %v13931_v62, %v13931_v62  ;;  %v13937_v41 = vpack.c.bf16 %v13933_v26, %v13933_v26 }
 0x967   : > { %v13936_v2 = vpack.c.bf16 %v13932_v45, %v13932_v45  ;;  %v13938_v6 = vpack.c.bf16 %v13934_v0, %v13934_v0 }
 0x968   : > { %16889 = vmatpush3.bf16.msra.mxu1 %v17813_v21 }
 0x969   : > { %14367 = vmatprep.mubr.bf16.mxu0 %v13936_v2  ;;  %16907 = vmatprep.subr.bf16.mxu1 %v18274_v50  ;;  %v17814_v2 = vld [vmem:[#allocation16] sm:$0xff]  }
 0x96a   : > { %14368 = vmatmul.mubr.bf16.vlgmr.msra.gmra.mrb[12].mxu0 %v13935_v53  ;;  %v17818_v53 = vld [vmem:[#allocation16 + $0x20] sm:$0xff]  }
 0x96b   : > { %14377 = vmatpush1.bf16.msra.mxu0 %v17750_v59  ;;  %14408 = vmatprep.mubr.bf16.mxu0 %v13938_v6  ;;  %v17820_v6 = vld [vmem:[#allocation16 + $0x30] sm:$0xff]  }
 0x96c   : > { %14378 = vmatprep.subr.bf16.mxu0 %v17755_v19  ;;  %v17819_v19 = vld [vmem:[#allocation16 + $0x28] sm:$0xff]  }
 0x96f   : > { %14379 = vmatpush1.bf16.msra.mxu0 %v17753_v1  ;;  %v17821_v1 = vld [vmem:[#allocation16 + $0x38] sm:$0xff]  }
 0x970   : > { %14380 = vmatprep.subr.bf16.mxu0 %v17758_v36 }
 0x973   : > { %14381 = vmatpush1.bf16.msra.mxu0 %v17756_v63  ;;  %v14455_v63 = vld [vmem:[#allocation13] sm:$0x1] }
 0x974   : > { %14382 = vmatprep.subr.bf16.mxu0 %v17761_v54 }
 0x977   : > { %14383 = vmatpush1.bf16.msra.mxu0 %v17759_v28 }
 0x978   : > { %14384 = vmatprep.subr.bf16.mxu0 %v17764_v8 }
 0x97b   : > { %14385 = vmatpush1.bf16.msra.mxu0 %v17762_v14 }
 0x97c   : > { %14386 = vmatprep.subr.bf16.mxu0 %v17767_v11 }
 0x97f   : > { %14387 = vmatpush1.bf16.msra.mxu0 %v17765_v18 }
 0x980   : > { %14388 = vmatprep.subr.bf16.mxu0 %v17770_v12  ;;  %v14596_v12 = vld [vmem:[#allocation15] sm:$0xf] }
 0x983   : > { %14389 = vmatpush1.bf16.msra.mxu0 %v17768_v55 }
 0x984   : > { %14390 = vmatprep.subr.bf16.mxu0 %v17773_v17 }
 0x987   : > { %14391 = vmatpush1.bf16.msra.mxu0 %v17771_v47  ;;  %v14708_v47 = vsel %vm14706_vm1, %v14596_v12, 0 }
 0x988   : > { %14392 = vmatprep.subr.bf16.mxu0 %v17776_v35  ;;  %v14594_v35 = vld [vmem:[%s18722_s25] sm:$0x1] }
 0x98b   : > { %14393 = vmatpush1.bf16.msra.mxu0 %v17774_v13  ;;  %v14595_v13 = vpack.c.bf16 %v14594_v35, %v14594_v35 }
 0x98c   : > { %14394 = vmatprep.subr.bf16.mxu0 %v17779_v15 }
 0x98f   : > { %14395 = vmatpush1.bf16.msra.mxu0 %v17777_v16 }
 0x990   : > { %14396 = vmatprep.subr.bf16.mxu0 %v17782_v38 }
 0x993   : > { %14397 = vmatpush1.bf16.msra.mxu0 %v17780_v20 }
 0x994   : > { %14398 = vmatprep.subr.bf16.mxu0 %v17785_v40 }
 0x997   : > { %14399 = vmatpush1.bf16.msra.mxu0 %v17783_v30  ;;  %v14750_v30 = vld [vmem:[#allocation18] sm:$0x1] }
 0x998   : > { %14400 = vmatprep.subr.bf16.mxu0 %v17788_v22 }
 0x99b   : > { %14401 = vmatpush1.bf16.msra.mxu0 %v17786_v23 }
 0x99c   : > { %14402 = vmatprep.subr.bf16.mxu0 %v17791_v58 }
 0x99f   : > { %14403 = vmatpush1.bf16.msra.mxu0 %v17789_v25 }
 0x9a0   : > { %14404 = vmatprep.subr.bf16.mxu0 %v17794_v27 }
 0x9a3   : > { %14405 = vmatpush1.bf16.msra.mxu0 %v17792_v29  ;;  %v14760_v29 = vld [vmem:[#allocation19 + $0x1] sm:$0x1] }
 0x9a4   : > { %14406 = vmatprep.subr.bf16.mxu0 %v17797_v32 }
 0x9a7   : > { %14407 = vmatpush1.bf16.msra.mxu0 %v17795_v5 }
 0x9aa   : > { %14409 = vmatmul.mubr.bf16.vlgmr.msra.gmra.mrb[12].mxu0 %v13937_v41  ;;  %v14766_v41 = vand.u32 127, %v2202_v34 }
 0x9ac   : > { %vm14767_vm4 = vcmp.eq.s32.totalorder %v14766_v41, 0 }
 0xa7d   : > { %v14410_v24 = vpop.f32.mrb[12].mxu0 }
 0xa7e   : > { %v16937_v37 = vadd.f32 %v14410_v24, %v14328_v56  ;;  %v14412_v57 = vpop.f32.mrb[13].mxu0 }
 0xa7f   : > { %v16938_v60 = vadd.f32 %v14412_v57, %v14332_v9  ;;  %v14414_v61 = vpop.f32.mrb[14].mxu0 }
 0xa80   : > { %v14417_v10 = vmul.f32 0.2, %v16937_v37  ;;  %v14415_v4 = vpop.f32.mrb[15].mxu0 }
 0xa81   : > { %v14418_v42 = vmul.f32 0.2, %v16938_v60 }
 0xa82   : > { %v14419_v62 = vmax.f32 %v16937_v37, %v14417_v10 }
 0xa83   : > { %v14420_v45 = vmax.f32 %v16938_v60, %v14418_v42 }
 0xa84   : > { %v14421_v59 = vpack.c.bf16 %v14419_v62, %v14419_v62 }
 0xa85   : > { %v14422_v0 = vpack.c.bf16 %v14420_v45, %v14420_v45 }
 0xa87   : > { %14584 = vmatprep.mubr.bf16.mxu1 %v14422_v0 }
 0xa88   : > { %14585 = vmatmul.mubr.bf16.vlgmr.msra.gmra.mrb[12].mxu1 %v14421_v59 }
 0xa89   : > { %16908 = vmatpush3.bf16.msra.mxu1 %v17814_v2  ;;  %16923 = vmatprep.mubr.msk.bf16.mxu1 %vm18275_vm0, %v18274_v50 }
 0xa8a   : > { %16909 = vmatprep.subr.bf16.mxu1 %v18274_v50 }
 0xa8d   : > { %16910 = vmatpush3.bf16.msra.mxu1 %v17815_v39 }
 0xa8e   : > { %16911 = vmatprep.subr.bf16.mxu1 %v18274_v50 }
 0xa91   : > { %16912 = vmatpush3.bf16.msra.mxu1 %v17816_v44 }
 0xa92   : > { %16913 = vmatprep.subr.bf16.mxu1 %v18274_v50 }
 0xa95   : > { %16914 = vmatpush3.bf16.msra.mxu1 %v17817_v31 }
 0xa96   : > { %16915 = vmatprep.subr.bf16.mxu1 %v18274_v50 }
 0xa99   : > { %16916 = vmatpush3.bf16.msra.mxu1 %v17818_v53 }
 0xa9a   : > { %16917 = vmatprep.subr.bf16.mxu1 %v18274_v50 }
 0xa9d   : > { %16918 = vmatpush3.bf16.msra.mxu1 %v17819_v19 }
 0xa9e   : > { %16919 = vmatprep.subr.bf16.mxu1 %v18274_v50 }
 0xaa1   : > { %16920 = vmatpush3.bf16.msra.mxu1 %v17820_v6 }
 0xaa2   : > { %16921 = vmatprep.subr.bf16.mxu1 %v18274_v50 }
 0xaa5   : > { %16922 = vmatpush3.bf16.msra.mxu1 %v17821_v1 }
 0xaa6   : > { %16927 = vmatprep.subr.bf16.mxu1 %v18274_v50 }
 0xb5b   : > { %v16890_v36 = vpop.f32.mrb[12].mxu1 }
 0xb5c   : > { %v16891_v54 = vpop.f32.mrb[13].mxu1 }
 0xb5d   : > { %v16892_v28 = vadd.f32 %v16891_v54, %v16890_v36  ;;  %v16893_v8 = vpop.f32.mrb[14].mxu1 }
 0xb5e   : > { %v16894_v14 = vpop.f32.mrb[15].mxu1 }
 0xb5f   : > { %v14587_v11 = vadd.f32 %v16892_v28, %v14455_v63 }
 0xb61   : > { %v14592_v18 = vmul.f32 0.2, %v14587_v11 }
 0xb63   : > { %v14593_v55 = vmax.f32 %v14587_v11, %v14592_v18 }
 0xb65   : > { %v14597_v17 = vpack.c.bf16 %v14593_v55, %v14593_v55  ;;  %v14761_v5 = vmul.f32 %v14760_v29, %v14593_v55 }
 0xb67   : > { %16924 = vmatmul.mubr.bf16.vlgmr.msra.gmra.mrb[16].mxu1 %v14597_v17  ;;  %v14762_v26 = vsel %vm14756_vm3, %v14761_v5, 0.0 }
 0xb68   : > { %16928 = vmatpush3.bf16.msra.mxu1 %v14708_v47  ;;  %16929 = vmatprep.mubr.msk.bf16.mxu1 %vm18275_vm0, %v18274_v50 }
 0xb6f   : > { %16930 = vmatmul.mubr.msk.bf16.vlgmr.msra.gmra.mrb[20].mxu1 %vm14702_vm2, %v14595_v13 }
 0xc3a   : > { %v14696_v15 = vpop.f32.mrb[16].mxu1 }
 0xc3b   : > { %v16925_v16 = vpop.f32.mrb[17].mxu1 }
 0xc3c   : > { %v14699_v38 = vpop.f32.mrb[18].mxu1 }
 0xc3d   : > { %v16926_v20 = vpop.f32.mrb[19].mxu1 }
 0xc42   : > { %v14744_v40 = vpop.f32.mrb[20].mxu1 }
 0xc43   : > { %v14745_v51 = vadd.f32 %v14744_v40, %v14696_v15  ;;  %v16931_v22 = vpop.f32.mrb[21].mxu1 }
 0xc44   : > { %v14747_v23 = vpop.f32.mrb[22].mxu1 }
 0xc45   : > { %v14751_v7 = vadd.f32 %v14750_v30, %v14745_v51  ;;  %v16932_v58 = vpop.f32.mrb[23].mxu1 }
 0xc47   : > { %v14752_v25 = vmul.f32 0.2, %v14751_v7 }
 0xc49   : > { %v14753_v27 = vmax.f32 %v14751_v7, %v14752_v25 }
 0xc4b   : > { %v14755_v46 = vmul.f32 %v14754_v33, %v14753_v27 }
 0xc4d   : > { %v14757_v32 = vsel %vm14756_vm3, %v14755_v46, 0.0 }
 0xc4e   : > { %14758 = vadd.xlane.f32.xlu0 %v14757_v32 }
 0xc52   : > { %14763 = vadd.xlane.f32.xlu0 %v14762_v26 }
 0xcdb   : > { %v14759_v3 = vpop.xlane.xlu0 %14758 }
 0xcdf   : > { %v14764_v48 = vpop.xlane.xlu0 %14763 }
 0xce0   : > { %v14768_v49 = vsel %vm14767_vm4, %v14759_v3, %v14764_v48 }
 0xce1   : > { %v14770_v21 = vadd.f32 %v14769_v43, %v14768_v49 }
 0xce3   : > { %v16871_v50 = vmul.f32 -1.442695, %v14770_v21 }
 0xce5   : > { %17822 = vpow2.f32 %v16871_v50 }
 0xcef   : > { %v17823_v52 = vpop.eup %17822 }
 0xcf0   : > { %v14774_v56 = vadd.f32 1.0, %v17823_v52 }
 0xcf2   : > { %17824 = vrcp.f32 %v14774_v56 }
 0xcfc   : > { %v17825_v9 = vpop.eup %17824 }
 0xcfd   : > { %14778 = vst.msk [vmem:[%s654_s14] sm:$0x1] %vm14777_vm5, %v17825_v9 }
 0xcfe PF: > { %p30_p11 = scmp.ge.s32.totalorder %s18661_s24, 4   ;;  %s19121_s29 = smov %s18242_s30 }
 0xcff   : > { %s19122_s30 = smov %s18246_s15  ;;  %s19123_s15 = smov %s18673_s1 }
 0xd00   : > { %s19124_s16 = smov %s18661_s24  ;;  %32 = sbr.rel (!%p30_p11) target bundleno = 13 (0xd), region = 167 }
 0xd07   :  { %14796 = vsyncpa [#allocation3], 1 }
 0xd08   :  { %14798 = vsyncpa [#allocation3 + $0x1], 1 }
 0xd09   :  { %14799 = vsyncpa [#allocation5], 1 }
 0xd0a   :  { %14800 = vsyncpa [#allocation8], 1 }
 0xd0b   :  { %14801 = vsyncpa [#allocation11], 1 }
 0xd0c   :  { %14802 = vsyncpa [#allocation14], 1 }
 0xd0d   :  { %14803 = vsyncpa [#allocation17], 1 }
 0xd0e   :  { %14804 = vsyncpa [#allocation20], 1 }

</bundles_post_ra>
